<compile_context>
chip_gen: v7x
topology: tpu7x:2x2x1
jax: 0.10.0
libtpu: 0.0.40
codegen_flags: <defaults>
</compile_context>

<pallas_src>
import functools

import jax
import jax.numpy as jnp
from jax import lax
from jax.experimental import pallas as pl
from jax.experimental.pallas import tpu as pltpu


# ---------------------------------------------------------------------------
# In-kernel helpers
# ---------------------------------------------------------------------------
def _zero_halo(xb_ref, Hi, Wi, Ci):
    """Re-initialise only the 1-pixel halo of a flat padded image buffer.

    The buffer is a (Hi+2, Wi+2, Ci) zero-padded image flattened to
    ((Hi+2)*(Wi+2), Ci).  The interior rows are (re)written every grid step by
    the previous layer's pooling stage, so only the border cells are touched.
    """
    Wp = Wi + 2
    # top padding row + left pad cell of image row 0
    xb_ref[0:Wp + 1, :] = jnp.zeros((Wp + 1, Ci), jnp.float32)
    # right pad of image row h and left pad of image row h+1 are adjacent
    for h in range(Hi - 1):
        a = (h + 1) * Wp + 1 + Wi
        xb_ref[a:a + 2, :] = jnp.zeros((2, Ci), jnp.float32)
    # right pad of the last image row + bottom padding row
    a = Hi * Wp + 1 + Wi
    xb_ref[a:(Hi + 2) * Wp, :] = jnp.zeros(((Hi + 2) * Wp - a, Ci), jnp.float32)


def _conv3x3_maxpool(load_src, write_row, w_ref, b_ref, p_ref, c_ref,
                     Hi, Wi, Ci, Co, apply_relu, mxu_dtype):
    """Conv2d(3x3, pad=1) -> [ReLU] -> MaxPool2d(3, stride=2, pad=1).

    `load_src(a, b)` returns rows [a, b) of the flat zero-padded input image
    (pixel (h, w) at flat row h*(Wi+2)+w).  ReLU is applied before the pool
    (max is monotonic, so pool->relu == relu->pool), letting the pool pad with
    0.0 for the ReLU layers and -inf for the final (no-ReLU) layer.
    """
    Wp = Wi + 2
    M = Hi * Wp - 2                 # conv rows, padded-width row-major order
    Ho, Wo = Hi // 2, Wi // 2
    pad_val = 0.0 if apply_relu else -jnp.inf

    # -- im2col: each of the 9 taps is a contiguous slice of the padded input --
    k = 0
    for dh in range(3):
        for dw in range(3):
            off = dh * Wp + dw
            p_ref[:, k * Ci:(k + 1) * Ci] = load_src(off, off + M)
            k += 1

    # -- one MXU matmul per layer; bias broadcast hoisted (added once) --------
    conv = jnp.dot(p_ref[...].astype(mxu_dtype), w_ref[...],
                   preferred_element_type=jnp.float32) + b_ref[...]
    if apply_relu:
        conv = jnp.maximum(conv, 0.0)

    # -- maxpool column stage, vectorised over every pixel at once ------------
    c_ref[0:1, :] = jnp.full((1, Co), pad_val, jnp.float32)
    c_ref[M + 1:M + 2, :] = jnp.full((1, Co), pad_val, jnp.float32)
    c_ref[1:M + 1, :] = conv
    # The two "junk" cells between consecutive image rows become pool padding,
    # so no masking is ever needed for the w=0 / w=Wi-1 column boundaries.
    for h in range(Hi - 1):
        a = 1 + h * Wp + Wi
        c_ref[a:a + 2, :] = jnp.full((2, Co), pad_val, jnp.float32)
    left = c_ref[0:M, :]
    center = c_ref[1:M + 1, :]
    right = c_ref[2:M + 2, :]
    cm = jnp.maximum(jnp.maximum(left, right), center)
    c_ref[1:M + 1, :] = cm

    # -- maxpool row stage + stride-2 subsample: one lane-dense store per row --
    for i in range(Ho):
        parts = []
        for h in (2 * i - 1, 2 * i, 2 * i + 1):
            if h < 0:
                continue                        # top pool-padding row
            start = 1 + h * Wp
            if Wo > 1:
                parts.append(c_ref[pl.ds(start, Wo, stride=2), :])
            else:
                parts.append(c_ref[pl.ds(start, 1), :])
        orow = parts[0]
        for part in parts[1:]:
            orow = jnp.maximum(orow, part)
        write_row(i, orow)                      # single (Wo, Co) store


def _make_encoder_kernel(H, W, channels, fused_norm_type, mxu_dtype):
    n_layers = len(channels) - 1

    def kernel(*refs):
        x_ref = refs[0]
        w_refs = [refs[1 + 2 * i] for i in range(n_layers)]
        b_refs = [refs[2 + 2 * i] for i in range(n_layers)]
        out_ref = refs[1 + 2 * n_layers]
        scratch = refs[2 + 2 * n_layers:]

        # scratch layout: [p0, c0] + [xb_i, p_i, c_i for i in 1..n_layers-1]
        xb_refs, p_refs, c_refs = [None], [], []
        idx = 0
        for li in range(n_layers):
            if li > 0:
                xb_refs.append(scratch[idx]); idx += 1
            p_refs.append(scratch[idx]); idx += 1
            c_refs.append(scratch[idx]); idx += 1

        for li in range(n_layers):
            Hi, Wi = H >> li, W >> li
            Wo = Wi // 2
            Ci, Co = channels[li], channels[li + 1]

            if li == 0:
                def load_src(a, b, _r=x_ref):          # input pre-padded in wrapper
                    return _r[0, a:b, :]
            else:
                _zero_halo(xb_refs[li], Hi, Wi, Ci)
                def load_src(a, b, _r=xb_refs[li]):
                    return _r[a:b, :]

            if li == n_layers - 1:
                def write_row(i, orow, _out=out_ref, _Wo=Wo):
                    _out[0, i * _Wo:(i + 1) * _Wo, :] = orow
            else:
                def write_row(i, orow, _nxt=xb_refs[li + 1], _Wp=Wo + 2, _Wo=Wo):
                    a = (i + 1) * _Wp + 1
                    _nxt[a:a + _Wo, :] = orow          # interior of next halo buffer

            _conv3x3_maxpool(load_src, write_row, w_refs[li], b_refs[li],
                             p_refs[li], c_refs[li], Hi, Wi, Ci, Co,
                             apply_relu=(li < n_layers - 1),
                             mxu_dtype=mxu_dtype)

        # Fused Lp-normalisation epilogue (p = 1 or 2).  No epsilon, matching
        # `x / torch.linalg.norm(x, ...)` exactly.  Permutation-invariant, so
        # applying it before the wrapper's NCHW reorder is identical.
        if fused_norm_type == 2.0:
            feat = out_ref[...]
            ss = jnp.sum(feat * feat, axis=2, keepdims=True)
            ss = jnp.sum(ss, axis=1, keepdims=True)
            out_ref[...] = feat * lax.rsqrt(ss)        # rsqrt -> EUP slot
        elif fused_norm_type == 1.0:
            feat = out_ref[...]
            s1 = jnp.sum(jnp.abs(feat), axis=2, keepdims=True)
            s1 = jnp.sum(s1, axis=1, keepdims=True)
            out_ref[...] = feat / s1

    return kernel


def _scratch_shapes(H, W, channels):
    shapes = []
    n_layers = len(channels) - 1
    for li in range(n_layers):
        Hi, Wi = H >> li, W >> li
        Ci, Co = channels[li], channels[li + 1]
        Wp = Wi + 2
        M = Hi * Wp - 2
        if li > 0:
            shapes.append(pltpu.VMEM(((Hi + 2) * Wp, Ci), jnp.float32))  # halo img
        shapes.append(pltpu.VMEM((M, 9 * Ci), jnp.float32))              # im2col
        shapes.append(pltpu.VMEM((M + 2, Co), jnp.float32))              # pool buf
    return shapes


# ---------------------------------------------------------------------------
# Encoder (parameters + forward)
# ---------------------------------------------------------------------------
def init_encoder_params(key, input_channels):
    # layer_init in the original script is orthogonal init (std=sqrt(2)), bias 0.
    # TODO(synk): orthogonal init itself not reproduced (scaled normals with the
    # same shapes); it does not affect the forward-pass semantics.
    channels = [input_channels, 32, 64, 128, 256]
    params = []
    for i in range(4):
        cin, cout = channels[i], channels[i + 1]
        key, wk = jax.random.split(key)
        std = jnp.sqrt(2.0 / (cin * 9))
        w = jax.random.normal(wk, (3, 3, cin, cout), jnp.float32) * std  # HWIO
        b = jnp.zeros((cout,), jnp.float32)
        params.append((w, b))
    return params


@functools.partial(jax.jit, static_argnames=("norm_type", "mxu_dtype"))
def encoder_forward(params, x, *, norm_type=0.0, mxu_dtype=jnp.bfloat16):
    """x: (B, H, W, Cin) NHWC (the tensor torch's forward receives pre-permute)."""
    B, H, W, Cin = x.shape
    n_layers = len(params)
    assert H % (1 << n_layers) == 0 and W % (1 << n_layers) == 0, \
        "spatial dims must be divisible by 16 so every pool stage halves evenly"
    channels = tuple([Cin] + [w.shape[-1] for (w, _) in params])
    Hf, Wf = H >> n_layers, W >> n_layers
    S, Cl = Hf * Wf, channels[-1]

    # Zero-pad spatially and flatten to the padded-width layout once, in plain
    # JAX, so the kernel never re-initialises the layer-0 halo nor copies input.
    xp = jnp.pad(x.astype(jnp.float32), ((0, 0), (1, 1), (1, 1), (0, 0)))
    xp = xp.reshape(B, (H + 2) * (W + 2), Cin)

    # HWIO (3,3,Ci,Co) conv weights -> (9*Ci, Co) im2col weights, cast for MXU.
    w_flat = [w.reshape(9 * w.shape[2], w.shape[3]).astype(mxu_dtype)
              for (w, _) in params]
    biases = [b.reshape(1, -1).astype(jnp.float32) for (_, b) in params]

    fuse_norm = float(norm_type) in (1.0, 2.0)
    kernel = _make_encoder_kernel(H, W, channels,
                                  float(norm_type) if fuse_norm else 0.0,
                                  mxu_dtype)

    in_specs = [pl.BlockSpec((1, (H + 2) * (W + 2), Cin), lambda n: (n, 0, 0))]
    args = [xp]
    for wf, bf in zip(w_flat, biases):
        in_specs.append(pl.BlockSpec(wf.shape, lambda n: (0, 0)))
        in_specs.append(pl.BlockSpec(bf.shape, lambda n: (0, 0)))
        args += [wf, bf]

    out = pl.pallas_call(
        kernel,
        out_shape=jax.ShapeDtypeStruct((B, S, Cl), jnp.float32),
        grid_spec=pltpu.PrefetchScalarGridSpec(
            num_scalar_prefetch=0,
            grid=(B,),
            in_specs=in_specs,
            out_specs=pl.BlockSpec((1, S, Cl), lambda n: (n, 0, 0)),
            scratch_shapes=_scratch_shapes(H, W, channels),
        ),
        compiler_params=pltpu.CompilerParams(
            dimension_semantics=("parallel",)),   # batch elems are independent
    )(*args)

    # torch flattens in NCHW order; the kernel produced NHWC-flat (B, Hf*Wf, C).
    # Reorder in the wrapper (free; for 16x16 inputs Hf == Wf == 1 so this is a
    # pure reshape).  The fused norm is permutation-invariant, already applied.
    out = jnp.transpose(out, (0, 2, 1)).reshape(B, Cl * S)
    if norm_type > 0 and not fuse_norm:
        # TODO(synk): general-p Lp norm kept in plain JAX (p=1, 2 are fused
        # into the kernel epilogue above).
        nrm = jnp.sum(jnp.abs(out) ** norm_type, axis=-1,
                      keepdims=True) ** (1.0 / norm_type)
        out = out / nrm
    return out


# ---------------------------------------------------------------------------
# Pure-JAX reference (for correctness checks)
# ---------------------------------------------------------------------------
def encoder_reference(params, x, norm_type=0.0, mxu_dtype=jnp.float32):
    h = x.astype(jnp.float32)
    n = len(params)
    for i, (w, b) in enumerate(params):
        if mxu_dtype == jnp.float32:
            conv = lax.conv_general_dilated(
                h, w, window_strides=(1, 1), padding=((1, 1), (1, 1)),
                dimension_numbers=("NHWC", "HWIO", "NHWC"),
                precision=lax.Precision.HIGHEST)
        else:  # mirror the kernel's low-precision MXU operands (f32 accum)
            conv = lax.conv_general_dilated(
                h.astype(mxu_dtype), w.astype(mxu_dtype),
                window_strides=(1, 1), padding=((1, 1), (1, 1)),
                dimension_numbers=("NHWC", "HWIO", "NHWC"),
                preferred_element_type=jnp.float32)
        h = conv + b.reshape(1, 1, 1, -1)
        h = lax.reduce_window(h, -jnp.inf, lax.max, (1, 3, 3, 1), (1, 2, 2, 1),
                              [(0, 0), (1, 1), (1, 1), (0, 0)])
        if i < n - 1:
            h = jnp.maximum(h, 0.0)
    B, Ho, Wo, C = h.shape
    out = jnp.transpose(h, (0, 3, 1, 2)).reshape(B, C * Ho * Wo)
    if norm_type > 0:
        out = out / jnp.linalg.norm(out, ord=norm_type, axis=-1, keepdims=True)
    return out


if __name__ == "__main__":
    key = jax.random.PRNGKey(0)
    pkey, xkey = jax.random.split(key)

    input_channels = 4
    B, H, W = 2, 16, 16
    params = init_encoder_params(pkey, input_channels)
    x = jax.random.normal(xkey, (B, H, W, input_channels), jnp.float32)

    # 1) f32 MXU path vs exact f32 reference (PyTorch-module numerics).
    out32 = jax.block_until_ready(
        encoder_forward(params, x, norm_type=0.0, mxu_dtype=jnp.float32))
    assert out32.shape == (B, 256), out32.shape
    ref32 = encoder_reference(params, x, norm_type=0.0, mxu_dtype=jnp.float32)
    assert jnp.allclose(out32, ref32, rtol=1e-2, atol=1e-2), \
        float(jnp.max(jnp.abs(out32 - ref32)))

    # 2) Default bf16-MXU fast path vs a precision-matched reference.
    outbf = jax.block_until_ready(encoder_forward(params, x, norm_type=0.0))
    refbf = encoder_reference(params, x, norm_type=0.0, mxu_dtype=jnp.bfloat16)
    assert jnp.allclose(outbf, refbf, rtol=1e-2, atol=1e-2), \
        float(jnp.max(jnp.abs(outbf - refbf)))

    # 3) Fused L2-normalisation epilogue.
    outn = jax.block_until_ready(
        encoder_forward(params, x, norm_type=2.0, mxu_dtype=jnp.float32))
    refn = encoder_reference(params, x, norm_type=2.0, mxu_dtype=jnp.float32)
    assert jnp.allclose(outn, refn, rtol=1e-2, atol=1e-2)

    print("KERNEL_OK")
</pallas_src>

<mosaic_0001>
module attributes {stable_mosaic.version = 11 : i64} {
  func.func @kernel(%arg0: i32, %arg1: memref<1x324x4xf32, #tpu.memory_space<vmem>>, %arg2: memref<36x32xf32, #tpu.memory_space<vmem>>, %arg3: memref<1x32xf32, #tpu.memory_space<vmem>>, %arg4: memref<288x64xf32, #tpu.memory_space<vmem>>, %arg5: memref<1x64xf32, #tpu.memory_space<vmem>>, %arg6: memref<576x128xf32, #tpu.memory_space<vmem>>, %arg7: memref<1x128xf32, #tpu.memory_space<vmem>>, %arg8: memref<1152x256xf32, #tpu.memory_space<vmem>>, %arg9: memref<1x256xf32, #tpu.memory_space<vmem>>, %arg10: memref<1x1x256xf32, #tpu.memory_space<vmem>>, %arg11: memref<286x36xf32, #tpu.memory_space<vmem>>, %arg12: memref<288x32xf32, #tpu.memory_space<vmem>>, %arg13: memref<100x32xf32, #tpu.memory_space<vmem>>, %arg14: memref<78x288xf32, #tpu.memory_space<vmem>>, %arg15: memref<80x64xf32, #tpu.memory_space<vmem>>, %arg16: memref<36x64xf32, #tpu.memory_space<vmem>>, %arg17: memref<22x576xf32, #tpu.memory_space<vmem>>, %arg18: memref<24x128xf32, #tpu.memory_space<vmem>>, %arg19: memref<16x128xf32, #tpu.memory_space<vmem>>, %arg20: memref<6x1152xf32, #tpu.memory_space<vmem>>, %arg21: memref<8x256xf32, #tpu.memory_space<vmem>>) attributes {dimension_semantics = [#tpu.dimension_semantics<parallel>], iteration_bounds = array<i64: 2>, scalar_prefetch = 0 : i64, scratch_operands = 11 : i64, tpu.core_type = #tpu.core_type<tc>, window_params = [{transform_indices = @transform_0, window_bounds = array<i64: 1, 324, 4>}, {pipeline_mode = #tpu.pipeline_mode<synchronous>, transform_indices = @transform_1, window_bounds = array<i64: 36, 32>}, {pipeline_mode = #tpu.pipeline_mode<synchronous>, transform_indices = @transform_2, window_bounds = array<i64: 1, 32>}, {pipeline_mode = #tpu.pipeline_mode<synchronous>, transform_indices = @transform_3, window_bounds = array<i64: 288, 64>}, {pipeline_mode = #tpu.pipeline_mode<synchronous>, transform_indices = @transform_4, window_bounds = array<i64: 1, 64>}, {pipeline_mode = #tpu.pipeline_mode<synchronous>, transform_indices = @transform_5, window_bounds = array<i64: 576, 128>}, {pipeline_mode = #tpu.pipeline_mode<synchronous>, transform_indices = @transform_6, window_bounds = array<i64: 1, 128>}, {pipeline_mode = #tpu.pipeline_mode<synchronous>, transform_indices = @transform_7, window_bounds = array<i64: 1152, 256>}, {pipeline_mode = #tpu.pipeline_mode<synchronous>, transform_indices = @transform_8, window_bounds = array<i64: 1, 256>}, {transform_indices = @transform_9, window_bounds = array<i64: 1, 1, 256>}]} {
    %c0 = arith.constant 0 : index
    %c0_0 = arith.constant 0 : index
    %c0_1 = arith.constant 0 : index
    %0 = vector.load %arg1[%c0, %c0_0, %c0_1] : memref<1x324x4xf32, #tpu.memory_space<vmem>>, vector<1x286x4xf32>
    %1 = vector.shape_cast %0 : vector<1x286x4xf32> to vector<286x4xf32>
    %c0_2 = arith.constant 0 : index
    %c0_3 = arith.constant 0 : index
    %2 = vector.load %arg11[%c0_2, %c0_3] : memref<286x36xf32, #tpu.memory_space<vmem>>, vector<286x4xf32>
    tpu.vector_store %arg11[%c0_2, %c0_3], %1 {strides = array<i32>} : memref<286x36xf32, #tpu.memory_space<vmem>>, vector<286x4xf32>,
    %c0_4 = arith.constant 0 : index
    %c1 = arith.constant 1 : index
    %c0_5 = arith.constant 0 : index
    %3 = vector.load %arg1[%c0_4, %c1, %c0_5] : memref<1x324x4xf32, #tpu.memory_space<vmem>>, vector<1x286x4xf32>
    %4 = vector.shape_cast %3 : vector<1x286x4xf32> to vector<286x4xf32>
    %c0_6 = arith.constant 0 : index
    %c4 = arith.constant 4 : index
    %5 = vector.load %arg11[%c0_6, %c4] : memref<286x36xf32, #tpu.memory_space<vmem>>, vector<286x4xf32>
    tpu.vector_store %arg11[%c0_6, %c4], %4 {strides = array<i32>} : memref<286x36xf32, #tpu.memory_space<vmem>>, vector<286x4xf32>,
    %c0_7 = arith.constant 0 : index
    %c2 = arith.constant 2 : index
    %c0_8 = arith.constant 0 : index
    %6 = vector.load %arg1[%c0_7, %c2, %c0_8] : memref<1x324x4xf32, #tpu.memory_space<vmem>>, vector<1x286x4xf32>
    %7 = vector.shape_cast %6 : vector<1x286x4xf32> to vector<286x4xf32>
    %c0_9 = arith.constant 0 : index
    %c8 = arith.constant 8 : index
    %8 = vector.load %arg11[%c0_9, %c8] : memref<286x36xf32, #tpu.memory_space<vmem>>, vector<286x4xf32>
    tpu.vector_store %arg11[%c0_9, %c8], %7 {strides = array<i32>} : memref<286x36xf32, #tpu.memory_space<vmem>>, vector<286x4xf32>,
    %c0_10 = arith.constant 0 : index
    %c18 = arith.constant 18 : index
    %c0_11 = arith.constant 0 : index
    %9 = vector.load %arg1[%c0_10, %c18, %c0_11] : memref<1x324x4xf32, #tpu.memory_space<vmem>>, vector<1x286x4xf32>
    %10 = vector.shape_cast %9 : vector<1x286x4xf32> to vector<286x4xf32>
    %c0_12 = arith.constant 0 : index
    %c12 = arith.constant 12 : index
    %11 = vector.load %arg11[%c0_12, %c12] : memref<286x36xf32, #tpu.memory_space<vmem>>, vector<286x4xf32>
    tpu.vector_store %arg11[%c0_12, %c12], %10 {strides = array<i32>} : memref<286x36xf32, #tpu.memory_space<vmem>>, vector<286x4xf32>,
    %c0_13 = arith.constant 0 : index
    %c19 = arith.constant 19 : index
    %c0_14 = arith.constant 0 : index
    %12 = vector.load %arg1[%c0_13, %c19, %c0_14] : memref<1x324x4xf32, #tpu.memory_space<vmem>>, vector<1x286x4xf32>
    %13 = vector.shape_cast %12 : vector<1x286x4xf32> to vector<286x4xf32>
    %c0_15 = arith.constant 0 : index
    %c16 = arith.constant 16 : index
    %14 = vector.load %arg11[%c0_15, %c16] : memref<286x36xf32, #tpu.memory_space<vmem>>, vector<286x4xf32>
    tpu.vector_store %arg11[%c0_15, %c16], %13 {strides = array<i32>} : memref<286x36xf32, #tpu.memory_space<vmem>>, vector<286x4xf32>,
    %c0_16 = arith.constant 0 : index
    %c20 = arith.constant 20 : index
    %c0_17 = arith.constant 0 : index
    %15 = vector.load %arg1[%c0_16, %c20, %c0_17] : memref<1x324x4xf32, #tpu.memory_space<vmem>>, vector<1x286x4xf32>
    %16 = vector.shape_cast %15 : vector<1x286x4xf32> to vector<286x4xf32>
    %c0_18 = arith.constant 0 : index
    %c20_19 = arith.constant 20 : index
    %17 = vector.load %arg11[%c0_18, %c20_19] : memref<286x36xf32, #tpu.memory_space<vmem>>, vector<286x4xf32>
    tpu.vector_store %arg11[%c0_18, %c20_19], %16 {strides = array<i32>} : memref<286x36xf32, #tpu.memory_space<vmem>>, vector<286x4xf32>,
    %c0_20 = arith.constant 0 : index
    %c36 = arith.constant 36 : index
    %c0_21 = arith.constant 0 : index
    %18 = vector.load %arg1[%c0_20, %c36, %c0_21] : memref<1x324x4xf32, #tpu.memory_space<vmem>>, vector<1x286x4xf32>
    %19 = vector.shape_cast %18 : vector<1x286x4xf32> to vector<286x4xf32>
    %c0_22 = arith.constant 0 : index
    %c24 = arith.constant 24 : index
    %20 = vector.load %arg11[%c0_22, %c24] : memref<286x36xf32, #tpu.memory_space<vmem>>, vector<286x4xf32>
    tpu.vector_store %arg11[%c0_22, %c24], %19 {strides = array<i32>} : memref<286x36xf32, #tpu.memory_space<vmem>>, vector<286x4xf32>,
    %c0_23 = arith.constant 0 : index
    %c37 = arith.constant 37 : index
    %c0_24 = arith.constant 0 : index
    %21 = vector.load %arg1[%c0_23, %c37, %c0_24] : memref<1x324x4xf32, #tpu.memory_space<vmem>>, vector<1x286x4xf32>
    %22 = vector.shape_cast %21 : vector<1x286x4xf32> to vector<286x4xf32>
    %c0_25 = arith.constant 0 : index
    %c28 = arith.constant 28 : index
    %23 = vector.load %arg11[%c0_25, %c28] : memref<286x36xf32, #tpu.memory_space<vmem>>, vector<286x4xf32>
    tpu.vector_store %arg11[%c0_25, %c28], %22 {strides = array<i32>} : memref<286x36xf32, #tpu.memory_space<vmem>>, vector<286x4xf32>,
    %c0_26 = arith.constant 0 : index
    %c38 = arith.constant 38 : index
    %c0_27 = arith.constant 0 : index
    %24 = vector.load %arg1[%c0_26, %c38, %c0_27] : memref<1x324x4xf32, #tpu.memory_space<vmem>>, vector<1x286x4xf32>
    %25 = vector.shape_cast %24 : vector<1x286x4xf32> to vector<286x4xf32>
    %c0_28 = arith.constant 0 : index
    %c32 = arith.constant 32 : index
    %26 = vector.load %arg11[%c0_28, %c32] : memref<286x36xf32, #tpu.memory_space<vmem>>, vector<286x4xf32>
    tpu.vector_store %arg11[%c0_28, %c32], %25 {strides = array<i32>} : memref<286x36xf32, #tpu.memory_space<vmem>>, vector<286x4xf32>,
    %c0_29 = arith.constant 0 : index
    %c0_30 = arith.constant 0 : index
    %27 = vector.load %arg11[%c0_29, %c0_30] : memref<286x36xf32, #tpu.memory_space<vmem>>, vector<286x36xf32>
    %c0_31 = arith.constant 0 : index
    %c0_32 = arith.constant 0 : index
    %28 = vector.load %arg2[%c0_31, %c0_32] : memref<36x32xf32, #tpu.memory_space<vmem>>, vector<36x32xf32>
    %cst = arith.constant dense<0.000000e+00> : vector<286x32xf32>
    %29 = tpu.matmul %27, %28, %cst {dimension_numbers = #tpu.dot_dimension_numbers<[1], [0], [0], [1], [0, 0, 1, 1], [], []>} : vector<286x36xf32>, vector<36x32xf32>, vector<286x32xf32> -> vector<286x32xf32>
    %c0_33 = arith.constant 0 : index
    %c0_34 = arith.constant 0 : index
    %30 = vector.load %arg3[%c0_33, %c0_34] : memref<1x32xf32, #tpu.memory_space<vmem>>, vector<1x32xf32>
    %31 = vector.broadcast %30 : vector<1x32xf32> to vector<286x32xf32>
    %32 = arith.addf %29, %31 : vector<286x32xf32>
    %cst_35 = arith.constant 0.000000e+00 : f32
    %33 = vector.broadcast %cst_35 : f32 to vector<286x32xf32>
    %34 = arith.maximumf %32, %33 : vector<286x32xf32>
    %cst_36 = arith.constant 0.000000e+00 : f32
    %35 = vector.broadcast %cst_36 : f32 to vector<1x32xf32>
    %c0_37 = arith.constant 0 : index
    %c0_38 = arith.constant 0 : index
    %36 = vector.load %arg12[%c0_37, %c0_38] : memref<288x32xf32, #tpu.memory_space<vmem>>, vector<1x32xf32>
    tpu.vector_store %arg12[%c0_37, %c0_38], %35 {strides = array<i32>} : memref<288x32xf32, #tpu.memory_space<vmem>>, vector<1x32xf32>,
    %cst_39 = arith.constant 0.000000e+00 : f32
    %37 = vector.broadcast %cst_39 : f32 to vector<1x32xf32>
    %c287 = arith.constant 287 : index
    %c0_40 = arith.constant 0 : index
    %38 = vector.load %arg12[%c287, %c0_40] : memref<288x32xf32, #tpu.memory_space<vmem>>, vector<1x32xf32>
    tpu.vector_store %arg12[%c287, %c0_40], %37 {strides = array<i32>} : memref<288x32xf32, #tpu.memory_space<vmem>>, vector<1x32xf32>,
    %c1_41 = arith.constant 1 : index
    %c0_42 = arith.constant 0 : index
    %39 = vector.load %arg12[%c1_41, %c0_42] : memref<288x32xf32, #tpu.memory_space<vmem>>, vector<286x32xf32>
    tpu.vector_store %arg12[%c1_41, %c0_42], %34 {strides = array<i32>} : memref<288x32xf32, #tpu.memory_space<vmem>>, vector<286x32xf32>,
    %cst_43 = arith.constant 0.000000e+00 : f32
    %40 = vector.broadcast %cst_43 : f32 to vector<2x32xf32>
    %c17 = arith.constant 17 : index
    %c0_44 = arith.constant 0 : index
    %41 = vector.load %arg12[%c17, %c0_44] : memref<288x32xf32, #tpu.memory_space<vmem>>, vector<2x32xf32>
    tpu.vector_store %arg12[%c17, %c0_44], %40 {strides = array<i32>} : memref<288x32xf32, #tpu.memory_space<vmem>>, vector<2x32xf32>,
    %cst_45 = arith.constant 0.000000e+00 : f32
    %42 = vector.broadcast %cst_45 : f32 to vector<2x32xf32>
    %c35 = arith.constant 35 : index
    %c0_46 = arith.constant 0 : index
    %43 = vector.load %arg12[%c35, %c0_46] : memref<288x32xf32, #tpu.memory_space<vmem>>, vector<2x32xf32>
    tpu.vector_store %arg12[%c35, %c0_46], %42 {strides = array<i32>} : memref<288x32xf32, #tpu.memory_space<vmem>>, vector<2x32xf32>,
    %cst_47 = arith.constant 0.000000e+00 : f32
    %44 = vector.broadcast %cst_47 : f32 to vector<2x32xf32>
    %c53 = arith.constant 53 : index
    %c0_48 = arith.constant 0 : index
    %45 = vector.load %arg12[%c53, %c0_48] : memref<288x32xf32, #tpu.memory_space<vmem>>, vector<2x32xf32>
    tpu.vector_store %arg12[%c53, %c0_48], %44 {strides = array<i32>} : memref<288x32xf32, #tpu.memory_space<vmem>>, vector<2x32xf32>,
    %cst_49 = arith.constant 0.000000e+00 : f32
    %46 = vector.broadcast %cst_49 : f32 to vector<2x32xf32>
    %c71 = arith.constant 71 : index
    %c0_50 = arith.constant 0 : index
    %47 = vector.load %arg12[%c71, %c0_50] : memref<288x32xf32, #tpu.memory_space<vmem>>, vector<2x32xf32>
    tpu.vector_store %arg12[%c71, %c0_50], %46 {strides = array<i32>} : memref<288x32xf32, #tpu.memory_space<vmem>>, vector<2x32xf32>,
    %cst_51 = arith.constant 0.000000e+00 : f32
    %48 = vector.broadcast %cst_51 : f32 to vector<2x32xf32>
    %c89 = arith.constant 89 : index
    %c0_52 = arith.constant 0 : index
    %49 = vector.load %arg12[%c89, %c0_52] : memref<288x32xf32, #tpu.memory_space<vmem>>, vector<2x32xf32>
    tpu.vector_store %arg12[%c89, %c0_52], %48 {strides = array<i32>} : memref<288x32xf32, #tpu.memory_space<vmem>>, vector<2x32xf32>,
    %cst_53 = arith.constant 0.000000e+00 : f32
    %50 = vector.broadcast %cst_53 : f32 to vector<2x32xf32>
    %c107 = arith.constant 107 : index
    %c0_54 = arith.constant 0 : index
    %51 = vector.load %arg12[%c107, %c0_54] : memref<288x32xf32, #tpu.memory_space<vmem>>, vector<2x32xf32>
    tpu.vector_store %arg12[%c107, %c0_54], %50 {strides = array<i32>} : memref<288x32xf32, #tpu.memory_space<vmem>>, vector<2x32xf32>,
    %cst_55 = arith.constant 0.000000e+00 : f32
    %52 = vector.broadcast %cst_55 : f32 to vector<2x32xf32>
    %c125 = arith.constant 125 : index
    %c0_56 = arith.constant 0 : index
    %53 = vector.load %arg12[%c125, %c0_56] : memref<288x32xf32, #tpu.memory_space<vmem>>, vector<2x32xf32>
    tpu.vector_store %arg12[%c125, %c0_56], %52 {strides = array<i32>} : memref<288x32xf32, #tpu.memory_space<vmem>>, vector<2x32xf32>,
    %cst_57 = arith.constant 0.000000e+00 : f32
    %54 = vector.broadcast %cst_57 : f32 to vector<2x32xf32>
    %c143 = arith.constant 143 : index
    %c0_58 = arith.constant 0 : index
    %55 = vector.load %arg12[%c143, %c0_58] : memref<288x32xf32, #tpu.memory_space<vmem>>, vector<2x32xf32>
    tpu.vector_store %arg12[%c143, %c0_58], %54 {strides = array<i32>} : memref<288x32xf32, #tpu.memory_space<vmem>>, vector<2x32xf32>,
    %cst_59 = arith.constant 0.000000e+00 : f32
    %56 = vector.broadcast %cst_59 : f32 to vector<2x32xf32>
    %c161 = arith.constant 161 : index
    %c0_60 = arith.constant 0 : index
    %57 = vector.load %arg12[%c161, %c0_60] : memref<288x32xf32, #tpu.memory_space<vmem>>, vector<2x32xf32>
    tpu.vector_store %arg12[%c161, %c0_60], %56 {strides = array<i32>} : memref<288x32xf32, #tpu.memory_space<vmem>>, vector<2x32xf32>,
    %cst_61 = arith.constant 0.000000e+00 : f32
    %58 = vector.broadcast %cst_61 : f32 to vector<2x32xf32>
    %c179 = arith.constant 179 : index
    %c0_62 = arith.constant 0 : index
    %59 = vector.load %arg12[%c179, %c0_62] : memref<288x32xf32, #tpu.memory_space<vmem>>, vector<2x32xf32>
    tpu.vector_store %arg12[%c179, %c0_62], %58 {strides = array<i32>} : memref<288x32xf32, #tpu.memory_space<vmem>>, vector<2x32xf32>,
    %cst_63 = arith.constant 0.000000e+00 : f32
    %60 = vector.broadcast %cst_63 : f32 to vector<2x32xf32>
    %c197 = arith.constant 197 : index
    %c0_64 = arith.constant 0 : index
    %61 = vector.load %arg12[%c197, %c0_64] : memref<288x32xf32, #tpu.memory_space<vmem>>, vector<2x32xf32>
    tpu.vector_store %arg12[%c197, %c0_64], %60 {strides = array<i32>} : memref<288x32xf32, #tpu.memory_space<vmem>>, vector<2x32xf32>,
    %cst_65 = arith.constant 0.000000e+00 : f32
    %62 = vector.broadcast %cst_65 : f32 to vector<2x32xf32>
    %c215 = arith.constant 215 : index
    %c0_66 = arith.constant 0 : index
    %63 = vector.load %arg12[%c215, %c0_66] : memref<288x32xf32, #tpu.memory_space<vmem>>, vector<2x32xf32>
    tpu.vector_store %arg12[%c215, %c0_66], %62 {strides = array<i32>} : memref<288x32xf32, #tpu.memory_space<vmem>>, vector<2x32xf32>,
    %cst_67 = arith.constant 0.000000e+00 : f32
    %64 = vector.broadcast %cst_67 : f32 to vector<2x32xf32>
    %c233 = arith.constant 233 : index
    %c0_68 = arith.constant 0 : index
    %65 = vector.load %arg12[%c233, %c0_68] : memref<288x32xf32, #tpu.memory_space<vmem>>, vector<2x32xf32>
    tpu.vector_store %arg12[%c233, %c0_68], %64 {strides = array<i32>} : memref<288x32xf32, #tpu.memory_space<vmem>>, vector<2x32xf32>,
    %cst_69 = arith.constant 0.000000e+00 : f32
    %66 = vector.broadcast %cst_69 : f32 to vector<2x32xf32>
    %c251 = arith.constant 251 : index
    %c0_70 = arith.constant 0 : index
    %67 = vector.load %arg12[%c251, %c0_70] : memref<288x32xf32, #tpu.memory_space<vmem>>, vector<2x32xf32>
    tpu.vector_store %arg12[%c251, %c0_70], %66 {strides = array<i32>} : memref<288x32xf32, #tpu.memory_space<vmem>>, vector<2x32xf32>,
    %cst_71 = arith.constant 0.000000e+00 : f32
    %68 = vector.broadcast %cst_71 : f32 to vector<2x32xf32>
    %c269 = arith.constant 269 : index
    %c0_72 = arith.constant 0 : index
    %69 = vector.load %arg12[%c269, %c0_72] : memref<288x32xf32, #tpu.memory_space<vmem>>, vector<2x32xf32>
    tpu.vector_store %arg12[%c269, %c0_72], %68 {strides = array<i32>} : memref<288x32xf32, #tpu.memory_space<vmem>>, vector<2x32xf32>,
    %c0_73 = arith.constant 0 : index
    %c0_74 = arith.constant 0 : index
    %70 = vector.load %arg12[%c0_73, %c0_74] : memref<288x32xf32, #tpu.memory_space<vmem>>, vector<286x32xf32>
    %c1_75 = arith.constant 1 : index
    %c0_76 = arith.constant 0 : index
    %71 = vector.load %arg12[%c1_75, %c0_76] : memref<288x32xf32, #tpu.memory_space<vmem>>, vector<286x32xf32>
    %c2_77 = arith.constant 2 : index
    %c0_78 = arith.constant 0 : index
    %72 = vector.load %arg12[%c2_77, %c0_78] : memref<288x32xf32, #tpu.memory_space<vmem>>, vector<286x32xf32>
    %73 = arith.maximumf %70, %72 : vector<286x32xf32>
    %74 = arith.maximumf %73, %71 : vector<286x32xf32>
    %c1_79 = arith.constant 1 : index
    %c0_80 = arith.constant 0 : index
    %75 = vector.load %arg12[%c1_79, %c0_80] : memref<288x32xf32, #tpu.memory_space<vmem>>, vector<286x32xf32>
    tpu.vector_store %arg12[%c1_79, %c0_80], %74 {strides = array<i32>} : memref<288x32xf32, #tpu.memory_space<vmem>>, vector<286x32xf32>,
    %c1_81 = arith.constant 1 : index
    %c0_82 = arith.constant 0 : index
    %76 = tpu.strided_load %arg12[%c1_81, %c0_82] {strides = array<i32: 2, 1>} : memref<288x32xf32, #tpu.memory_space<vmem>>, vector<8x32xf32>
    %c19_83 = arith.constant 19 : index
    %c0_84 = arith.constant 0 : index
    %77 = tpu.strided_load %arg12[%c19_83, %c0_84] {strides = array<i32: 2, 1>} : memref<288x32xf32, #tpu.memory_space<vmem>>, vector<8x32xf32>
    %78 = arith.maximumf %76, %77 : vector<8x32xf32>
    %c11 = arith.constant 11 : index
    %c0_85 = arith.constant 0 : index
    %79 = vector.load %arg13[%c11, %c0_85] : memref<100x32xf32, #tpu.memory_space<vmem>>, vector<8x32xf32>
    tpu.vector_store %arg13[%c11, %c0_85], %78 {strides = array<i32>} : memref<100x32xf32, #tpu.memory_space<vmem>>, vector<8x32xf32>,
    %c19_86 = arith.constant 19 : index
    %c0_87 = arith.constant 0 : index
    %80 = tpu.strided_load %arg12[%c19_86, %c0_87] {strides = array<i32: 2, 1>} : memref<288x32xf32, #tpu.memory_space<vmem>>, vector<8x32xf32>
    %c37_88 = arith.constant 37 : index
    %c0_89 = arith.constant 0 : index
    %81 = tpu.strided_load %arg12[%c37_88, %c0_89] {strides = array<i32: 2, 1>} : memref<288x32xf32, #tpu.memory_space<vmem>>, vector<8x32xf32>
    %c55 = arith.constant 55 : index
    %c0_90 = arith.constant 0 : index
    %82 = tpu.strided_load %arg12[%c55, %c0_90] {strides = array<i32: 2, 1>} : memref<288x32xf32, #tpu.memory_space<vmem>>, vector<8x32xf32>
    %83 = arith.maximumf %80, %81 : vector<8x32xf32>
    %84 = arith.maximumf %83, %82 : vector<8x32xf32>
    %c21 = arith.constant 21 : index
    %c0_91 = arith.constant 0 : index
    %85 = vector.load %arg13[%c21, %c0_91] : memref<100x32xf32, #tpu.memory_space<vmem>>, vector<8x32xf32>
    tpu.vector_store %arg13[%c21, %c0_91], %84 {strides = array<i32>} : memref<100x32xf32, #tpu.memory_space<vmem>>, vector<8x32xf32>,
    %c55_92 = arith.constant 55 : index
    %c0_93 = arith.constant 0 : index
    %86 = tpu.strided_load %arg12[%c55_92, %c0_93] {strides = array<i32: 2, 1>} : memref<288x32xf32, #tpu.memory_space<vmem>>, vector<8x32xf32>
    %c73 = arith.constant 73 : index
    %c0_94 = arith.constant 0 : index
    %87 = tpu.strided_load %arg12[%c73, %c0_94] {strides = array<i32: 2, 1>} : memref<288x32xf32, #tpu.memory_space<vmem>>, vector<8x32xf32>
    %c91 = arith.constant 91 : index
    %c0_95 = arith.constant 0 : index
    %88 = tpu.strided_load %arg12[%c91, %c0_95] {strides = array<i32: 2, 1>} : memref<288x32xf32, #tpu.memory_space<vmem>>, vector<8x32xf32>
    %89 = arith.maximumf %86, %87 : vector<8x32xf32>
    %90 = arith.maximumf %89, %88 : vector<8x32xf32>
    %c31 = arith.constant 31 : index
    %c0_96 = arith.constant 0 : index
    %91 = vector.load %arg13[%c31, %c0_96] : memref<100x32xf32, #tpu.memory_space<vmem>>, vector<8x32xf32>
    tpu.vector_store %arg13[%c31, %c0_96], %90 {strides = array<i32>} : memref<100x32xf32, #tpu.memory_space<vmem>>, vector<8x32xf32>,
    %c91_97 = arith.constant 91 : index
    %c0_98 = arith.constant 0 : index
    %92 = tpu.strided_load %arg12[%c91_97, %c0_98] {strides = array<i32: 2, 1>} : memref<288x32xf32, #tpu.memory_space<vmem>>, vector<8x32xf32>
    %c109 = arith.constant 109 : index
    %c0_99 = arith.constant 0 : index
    %93 = tpu.strided_load %arg12[%c109, %c0_99] {strides = array<i32: 2, 1>} : memref<288x32xf32, #tpu.memory_space<vmem>>, vector<8x32xf32>
    %c127 = arith.constant 127 : index
    %c0_100 = arith.constant 0 : index
    %94 = tpu.strided_load %arg12[%c127, %c0_100] {strides = array<i32: 2, 1>} : memref<288x32xf32, #tpu.memory_space<vmem>>, vector<8x32xf32>
    %95 = arith.maximumf %92, %93 : vector<8x32xf32>
    %96 = arith.maximumf %95, %94 : vector<8x32xf32>
    %c41 = arith.constant 41 : index
    %c0_101 = arith.constant 0 : index
    %97 = vector.load %arg13[%c41, %c0_101] : memref<100x32xf32, #tpu.memory_space<vmem>>, vector<8x32xf32>
    tpu.vector_store %arg13[%c41, %c0_101], %96 {strides = array<i32>} : memref<100x32xf32, #tpu.memory_space<vmem>>, vector<8x32xf32>,
    %c127_102 = arith.constant 127 : index
    %c0_103 = arith.constant 0 : index
    %98 = tpu.strided_load %arg12[%c127_102, %c0_103] {strides = array<i32: 2, 1>} : memref<288x32xf32, #tpu.memory_space<vmem>>, vector<8x32xf32>
    %c145 = arith.constant 145 : index
    %c0_104 = arith.constant 0 : index
    %99 = tpu.strided_load %arg12[%c145, %c0_104] {strides = array<i32: 2, 1>} : memref<288x32xf32, #tpu.memory_space<vmem>>, vector<8x32xf32>
    %c163 = arith.constant 163 : index
    %c0_105 = arith.constant 0 : index
    %100 = tpu.strided_load %arg12[%c163, %c0_105] {strides = array<i32: 2, 1>} : memref<288x32xf32, #tpu.memory_space<vmem>>, vector<8x32xf32>
    %101 = arith.maximumf %98, %99 : vector<8x32xf32>
    %102 = arith.maximumf %101, %100 : vector<8x32xf32>
    %c51 = arith.constant 51 : index
    %c0_106 = arith.constant 0 : index
    %103 = vector.load %arg13[%c51, %c0_106] : memref<100x32xf32, #tpu.memory_space<vmem>>, vector<8x32xf32>
    tpu.vector_store %arg13[%c51, %c0_106], %102 {strides = array<i32>} : memref<100x32xf32, #tpu.memory_space<vmem>>, vector<8x32xf32>,
    %c163_107 = arith.constant 163 : index
    %c0_108 = arith.constant 0 : index
    %104 = tpu.strided_load %arg12[%c163_107, %c0_108] {strides = array<i32: 2, 1>} : memref<288x32xf32, #tpu.memory_space<vmem>>, vector<8x32xf32>
    %c181 = arith.constant 181 : index
    %c0_109 = arith.constant 0 : index
    %105 = tpu.strided_load %arg12[%c181, %c0_109] {strides = array<i32: 2, 1>} : memref<288x32xf32, #tpu.memory_space<vmem>>, vector<8x32xf32>
    %c199 = arith.constant 199 : index
    %c0_110 = arith.constant 0 : index
    %106 = tpu.strided_load %arg12[%c199, %c0_110] {strides = array<i32: 2, 1>} : memref<288x32xf32, #tpu.memory_space<vmem>>, vector<8x32xf32>
    %107 = arith.maximumf %104, %105 : vector<8x32xf32>
    %108 = arith.maximumf %107, %106 : vector<8x32xf32>
    %c61 = arith.constant 61 : index
    %c0_111 = arith.constant 0 : index
    %109 = vector.load %arg13[%c61, %c0_111] : memref<100x32xf32, #tpu.memory_space<vmem>>, vector<8x32xf32>
    tpu.vector_store %arg13[%c61, %c0_111], %108 {strides = array<i32>} : memref<100x32xf32, #tpu.memory_space<vmem>>, vector<8x32xf32>,
    %c199_112 = arith.constant 199 : index
    %c0_113 = arith.constant 0 : index
    %110 = tpu.strided_load %arg12[%c199_112, %c0_113] {strides = array<i32: 2, 1>} : memref<288x32xf32, #tpu.memory_space<vmem>>, vector<8x32xf32>
    %c217 = arith.constant 217 : index
    %c0_114 = arith.constant 0 : index
    %111 = tpu.strided_load %arg12[%c217, %c0_114] {strides = array<i32: 2, 1>} : memref<288x32xf32, #tpu.memory_space<vmem>>, vector<8x32xf32>
    %c235 = arith.constant 235 : index
    %c0_115 = arith.constant 0 : index
    %112 = tpu.strided_load %arg12[%c235, %c0_115] {strides = array<i32: 2, 1>} : memref<288x32xf32, #tpu.memory_space<vmem>>, vector<8x32xf32>
    %113 = arith.maximumf %110, %111 : vector<8x32xf32>
    %114 = arith.maximumf %113, %112 : vector<8x32xf32>
    %c71_116 = arith.constant 71 : index
    %c0_117 = arith.constant 0 : index
    %115 = vector.load %arg13[%c71_116, %c0_117] : memref<100x32xf32, #tpu.memory_space<vmem>>, vector<8x32xf32>
    tpu.vector_store %arg13[%c71_116, %c0_117], %114 {strides = array<i32>} : memref<100x32xf32, #tpu.memory_space<vmem>>, vector<8x32xf32>,
    %c235_118 = arith.constant 235 : index
    %c0_119 = arith.constant 0 : index
    %116 = tpu.strided_load %arg12[%c235_118, %c0_119] {strides = array<i32: 2, 1>} : memref<288x32xf32, #tpu.memory_space<vmem>>, vector<8x32xf32>
    %c253 = arith.constant 253 : index
    %c0_120 = arith.constant 0 : index
    %117 = tpu.strided_load %arg12[%c253, %c0_120] {strides = array<i32: 2, 1>} : memref<288x32xf32, #tpu.memory_space<vmem>>, vector<8x32xf32>
    %c271 = arith.constant 271 : index
    %c0_121 = arith.constant 0 : index
    %118 = tpu.strided_load %arg12[%c271, %c0_121] {strides = array<i32: 2, 1>} : memref<288x32xf32, #tpu.memory_space<vmem>>, vector<8x32xf32>
    %119 = arith.maximumf %116, %117 : vector<8x32xf32>
    %120 = arith.maximumf %119, %118 : vector<8x32xf32>
    %c81 = arith.constant 81 : index
    %c0_122 = arith.constant 0 : index
    %121 = vector.load %arg13[%c81, %c0_122] : memref<100x32xf32, #tpu.memory_space<vmem>>, vector<8x32xf32>
    tpu.vector_store %arg13[%c81, %c0_122], %120 {strides = array<i32>} : memref<100x32xf32, #tpu.memory_space<vmem>>, vector<8x32xf32>,
    %cst_123 = arith.constant 0.000000e+00 : f32
    %122 = vector.broadcast %cst_123 : f32 to vector<11x32xf32>
    %c0_124 = arith.constant 0 : index
    %c0_125 = arith.constant 0 : index
    %123 = vector.load %arg13[%c0_124, %c0_125] : memref<100x32xf32, #tpu.memory_space<vmem>>, vector<11x32xf32>
    tpu.vector_store %arg13[%c0_124, %c0_125], %122 {strides = array<i32>} : memref<100x32xf32, #tpu.memory_space<vmem>>, vector<11x32xf32>,
    %cst_126 = arith.constant 0.000000e+00 : f32
    %124 = vector.broadcast %cst_126 : f32 to vector<2x32xf32>
    %c19_127 = arith.constant 19 : index
    %c0_128 = arith.constant 0 : index
    %125 = vector.load %arg13[%c19_127, %c0_128] : memref<100x32xf32, #tpu.memory_space<vmem>>, vector<2x32xf32>
    tpu.vector_store %arg13[%c19_127, %c0_128], %124 {strides = array<i32>} : memref<100x32xf32, #tpu.memory_space<vmem>>, vector<2x32xf32>,
    %cst_129 = arith.constant 0.000000e+00 : f32
    %126 = vector.broadcast %cst_129 : f32 to vector<2x32xf32>
    %c29 = arith.constant 29 : index
    %c0_130 = arith.constant 0 : index
    %127 = vector.load %arg13[%c29, %c0_130] : memref<100x32xf32, #tpu.memory_space<vmem>>, vector<2x32xf32>
    tpu.vector_store %arg13[%c29, %c0_130], %126 {strides = array<i32>} : memref<100x32xf32, #tpu.memory_space<vmem>>, vector<2x32xf32>,
    %cst_131 = arith.constant 0.000000e+00 : f32
    %128 = vector.broadcast %cst_131 : f32 to vector<2x32xf32>
    %c39 = arith.constant 39 : index
    %c0_132 = arith.constant 0 : index
    %129 = vector.load %arg13[%c39, %c0_132] : memref<100x32xf32, #tpu.memory_space<vmem>>, vector<2x32xf32>
    tpu.vector_store %arg13[%c39, %c0_132], %128 {strides = array<i32>} : memref<100x32xf32, #tpu.memory_space<vmem>>, vector<2x32xf32>,
    %cst_133 = arith.constant 0.000000e+00 : f32
    %130 = vector.broadcast %cst_133 : f32 to vector<2x32xf32>
    %c49 = arith.constant 49 : index
    %c0_134 = arith.constant 0 : index
    %131 = vector.load %arg13[%c49, %c0_134] : memref<100x32xf32, #tpu.memory_space<vmem>>, vector<2x32xf32>
    tpu.vector_store %arg13[%c49, %c0_134], %130 {strides = array<i32>} : memref<100x32xf32, #tpu.memory_space<vmem>>, vector<2x32xf32>,
    %cst_135 = arith.constant 0.000000e+00 : f32
    %132 = vector.broadcast %cst_135 : f32 to vector<2x32xf32>
    %c59 = arith.constant 59 : index
    %c0_136 = arith.constant 0 : index
    %133 = vector.load %arg13[%c59, %c0_136] : memref<100x32xf32, #tpu.memory_space<vmem>>, vector<2x32xf32>
    tpu.vector_store %arg13[%c59, %c0_136], %132 {strides = array<i32>} : memref<100x32xf32, #tpu.memory_space<vmem>>, vector<2x32xf32>,
    %cst_137 = arith.constant 0.000000e+00 : f32
    %134 = vector.broadcast %cst_137 : f32 to vector<2x32xf32>
    %c69 = arith.constant 69 : index
    %c0_138 = arith.constant 0 : index
    %135 = vector.load %arg13[%c69, %c0_138] : memref<100x32xf32, #tpu.memory_space<vmem>>, vector<2x32xf32>
    tpu.vector_store %arg13[%c69, %c0_138], %134 {strides = array<i32>} : memref<100x32xf32, #tpu.memory_space<vmem>>, vector<2x32xf32>,
    %cst_139 = arith.constant 0.000000e+00 : f32
    %136 = vector.broadcast %cst_139 : f32 to vector<2x32xf32>
    %c79 = arith.constant 79 : index
    %c0_140 = arith.constant 0 : index
    %137 = vector.load %arg13[%c79, %c0_140] : memref<100x32xf32, #tpu.memory_space<vmem>>, vector<2x32xf32>
    tpu.vector_store %arg13[%c79, %c0_140], %136 {strides = array<i32>} : memref<100x32xf32, #tpu.memory_space<vmem>>, vector<2x32xf32>,
    %cst_141 = arith.constant 0.000000e+00 : f32
    %138 = vector.broadcast %cst_141 : f32 to vector<11x32xf32>
    %c89_142 = arith.constant 89 : index
    %c0_143 = arith.constant 0 : index
    %139 = vector.load %arg13[%c89_142, %c0_143] : memref<100x32xf32, #tpu.memory_space<vmem>>, vector<11x32xf32>
    tpu.vector_store %arg13[%c89_142, %c0_143], %138 {strides = array<i32>} : memref<100x32xf32, #tpu.memory_space<vmem>>, vector<11x32xf32>,
    %c0_144 = arith.constant 0 : index
    %c0_145 = arith.constant 0 : index
    %140 = vector.load %arg13[%c0_144, %c0_145] : memref<100x32xf32, #tpu.memory_space<vmem>>, vector<78x32xf32>
    %c0_146 = arith.constant 0 : index
    %c0_147 = arith.constant 0 : index
    %141 = vector.load %arg14[%c0_146, %c0_147] : memref<78x288xf32, #tpu.memory_space<vmem>>, vector<78x32xf32>
    tpu.vector_store %arg14[%c0_146, %c0_147], %140 {strides = array<i32>} : memref<78x288xf32, #tpu.memory_space<vmem>>, vector<78x32xf32>,
    %c1_148 = arith.constant 1 : index
    %c0_149 = arith.constant 0 : index
    %142 = vector.load %arg13[%c1_148, %c0_149] : memref<100x32xf32, #tpu.memory_space<vmem>>, vector<78x32xf32>
    %c0_150 = arith.constant 0 : index
    %c32_151 = arith.constant 32 : index
    %143 = vector.load %arg14[%c0_150, %c32_151] : memref<78x288xf32, #tpu.memory_space<vmem>>, vector<78x32xf32>
    tpu.vector_store %arg14[%c0_150, %c32_151], %142 {strides = array<i32>} : memref<78x288xf32, #tpu.memory_space<vmem>>, vector<78x32xf32>,
    %c2_152 = arith.constant 2 : index
    %c0_153 = arith.constant 0 : index
    %144 = vector.load %arg13[%c2_152, %c0_153] : memref<100x32xf32, #tpu.memory_space<vmem>>, vector<78x32xf32>
    %c0_154 = arith.constant 0 : index
    %c64 = arith.constant 64 : index
    %145 = vector.load %arg14[%c0_154, %c64] : memref<78x288xf32, #tpu.memory_space<vmem>>, vector<78x32xf32>
    tpu.vector_store %arg14[%c0_154, %c64], %144 {strides = array<i32>} : memref<78x288xf32, #tpu.memory_space<vmem>>, vector<78x32xf32>,
    %c10 = arith.constant 10 : index
    %c0_155 = arith.constant 0 : index
    %146 = vector.load %arg13[%c10, %c0_155] : memref<100x32xf32, #tpu.memory_space<vmem>>, vector<78x32xf32>
    %c0_156 = arith.constant 0 : index
    %c96 = arith.constant 96 : index
    %147 = vector.load %arg14[%c0_156, %c96] : memref<78x288xf32, #tpu.memory_space<vmem>>, vector<78x32xf32>
    tpu.vector_store %arg14[%c0_156, %c96], %146 {strides = array<i32>} : memref<78x288xf32, #tpu.memory_space<vmem>>, vector<78x32xf32>,
    %c11_157 = arith.constant 11 : index
    %c0_158 = arith.constant 0 : index
    %148 = vector.load %arg13[%c11_157, %c0_158] : memref<100x32xf32, #tpu.memory_space<vmem>>, vector<78x32xf32>
    %c0_159 = arith.constant 0 : index
    %c128 = arith.constant 128 : index
    %149 = vector.load %arg14[%c0_159, %c128] : memref<78x288xf32, #tpu.memory_space<vmem>>, vector<78x32xf32>
    tpu.vector_store %arg14[%c0_159, %c128], %148 {strides = array<i32>} : memref<78x288xf32, #tpu.memory_space<vmem>>, vector<78x32xf32>,
    %c12_160 = arith.constant 12 : index
    %c0_161 = arith.constant 0 : index
    %150 = vector.load %arg13[%c12_160, %c0_161] : memref<100x32xf32, #tpu.memory_space<vmem>>, vector<78x32xf32>
    %c0_162 = arith.constant 0 : index
    %c160 = arith.constant 160 : index
    %151 = vector.load %arg14[%c0_162, %c160] : memref<78x288xf32, #tpu.memory_space<vmem>>, vector<78x32xf32>
    tpu.vector_store %arg14[%c0_162, %c160], %150 {strides = array<i32>} : memref<78x288xf32, #tpu.memory_space<vmem>>, vector<78x32xf32>,
    %c20_163 = arith.constant 20 : index
    %c0_164 = arith.constant 0 : index
    %152 = vector.load %arg13[%c20_163, %c0_164] : memref<100x32xf32, #tpu.memory_space<vmem>>, vector<78x32xf32>
    %c0_165 = arith.constant 0 : index
    %c192 = arith.constant 192 : index
    %153 = vector.load %arg14[%c0_165, %c192] : memref<78x288xf32, #tpu.memory_space<vmem>>, vector<78x32xf32>
    tpu.vector_store %arg14[%c0_165, %c192], %152 {strides = array<i32>} : memref<78x288xf32, #tpu.memory_space<vmem>>, vector<78x32xf32>,
    %c21_166 = arith.constant 21 : index
    %c0_167 = arith.constant 0 : index
    %154 = vector.load %arg13[%c21_166, %c0_167] : memref<100x32xf32, #tpu.memory_space<vmem>>, vector<78x32xf32>
    %c0_168 = arith.constant 0 : index
    %c224 = arith.constant 224 : index
    %155 = vector.load %arg14[%c0_168, %c224] : memref<78x288xf32, #tpu.memory_space<vmem>>, vector<78x32xf32>
    tpu.vector_store %arg14[%c0_168, %c224], %154 {strides = array<i32>} : memref<78x288xf32, #tpu.memory_space<vmem>>, vector<78x32xf32>,
    %c22 = arith.constant 22 : index
    %c0_169 = arith.constant 0 : index
    %156 = vector.load %arg13[%c22, %c0_169] : memref<100x32xf32, #tpu.memory_space<vmem>>, vector<78x32xf32>
    %c0_170 = arith.constant 0 : index
    %c256 = arith.constant 256 : index
    %157 = vector.load %arg14[%c0_170, %c256] : memref<78x288xf32, #tpu.memory_space<vmem>>, vector<78x32xf32>
    tpu.vector_store %arg14[%c0_170, %c256], %156 {strides = array<i32>} : memref<78x288xf32, #tpu.memory_space<vmem>>, vector<78x32xf32>,
    %c0_171 = arith.constant 0 : index
    %c0_172 = arith.constant 0 : index
    %158 = vector.load %arg14[%c0_171, %c0_172] : memref<78x288xf32, #tpu.memory_space<vmem>>, vector<78x288xf32>
    %c0_173 = arith.constant 0 : index
    %c0_174 = arith.constant 0 : index
    %159 = vector.load %arg4[%c0_173, %c0_174] : memref<288x64xf32, #tpu.memory_space<vmem>>, vector<288x64xf32>
    %cst_175 = arith.constant dense<0.000000e+00> : vector<78x64xf32>
    %160 = tpu.matmul %158, %159, %cst_175 {dimension_numbers = #tpu.dot_dimension_numbers<[1], [0], [0], [1], [0, 0, 1, 1], [], []>} : vector<78x288xf32>, vector<288x64xf32>, vector<78x64xf32> -> vector<78x64xf32>
    %c0_176 = arith.constant 0 : index
    %c0_177 = arith.constant 0 : index
    %161 = vector.load %arg5[%c0_176, %c0_177] : memref<1x64xf32, #tpu.memory_space<vmem>>, vector<1x64xf32>
    %162 = vector.broadcast %161 : vector<1x64xf32> to vector<78x64xf32>
    %163 = arith.addf %160, %162 : vector<78x64xf32>
    %cst_178 = arith.constant 0.000000e+00 : f32
    %164 = vector.broadcast %cst_178 : f32 to vector<78x64xf32>
    %165 = arith.maximumf %163, %164 : vector<78x64xf32>
    %cst_179 = arith.constant 0.000000e+00 : f32
    %166 = vector.broadcast %cst_179 : f32 to vector<1x64xf32>
    %c0_180 = arith.constant 0 : index
    %c0_181 = arith.constant 0 : index
    %167 = vector.load %arg15[%c0_180, %c0_181] : memref<80x64xf32, #tpu.memory_space<vmem>>, vector<1x64xf32>
    tpu.vector_store %arg15[%c0_180, %c0_181], %166 {strides = array<i32>} : memref<80x64xf32, #tpu.memory_space<vmem>>, vector<1x64xf32>,
    %cst_182 = arith.constant 0.000000e+00 : f32
    %168 = vector.broadcast %cst_182 : f32 to vector<1x64xf32>
    %c79_183 = arith.constant 79 : index
    %c0_184 = arith.constant 0 : index
    %169 = vector.load %arg15[%c79_183, %c0_184] : memref<80x64xf32, #tpu.memory_space<vmem>>, vector<1x64xf32>
    tpu.vector_store %arg15[%c79_183, %c0_184], %168 {strides = array<i32>} : memref<80x64xf32, #tpu.memory_space<vmem>>, vector<1x64xf32>,
    %c1_185 = arith.constant 1 : index
    %c0_186 = arith.constant 0 : index
    %170 = vector.load %arg15[%c1_185, %c0_186] : memref<80x64xf32, #tpu.memory_space<vmem>>, vector<78x64xf32>
    tpu.vector_store %arg15[%c1_185, %c0_186], %165 {strides = array<i32>} : memref<80x64xf32, #tpu.memory_space<vmem>>, vector<78x64xf32>,
    %cst_187 = arith.constant 0.000000e+00 : f32
    %171 = vector.broadcast %cst_187 : f32 to vector<2x64xf32>
    %c9 = arith.constant 9 : index
    %c0_188 = arith.constant 0 : index
    %172 = vector.load %arg15[%c9, %c0_188] : memref<80x64xf32, #tpu.memory_space<vmem>>, vector<2x64xf32>
    tpu.vector_store %arg15[%c9, %c0_188], %171 {strides = array<i32>} : memref<80x64xf32, #tpu.memory_space<vmem>>, vector<2x64xf32>,
    %cst_189 = arith.constant 0.000000e+00 : f32
    %173 = vector.broadcast %cst_189 : f32 to vector<2x64xf32>
    %c19_190 = arith.constant 19 : index
    %c0_191 = arith.constant 0 : index
    %174 = vector.load %arg15[%c19_190, %c0_191] : memref<80x64xf32, #tpu.memory_space<vmem>>, vector<2x64xf32>
    tpu.vector_store %arg15[%c19_190, %c0_191], %173 {strides = array<i32>} : memref<80x64xf32, #tpu.memory_space<vmem>>, vector<2x64xf32>,
    %cst_192 = arith.constant 0.000000e+00 : f32
    %175 = vector.broadcast %cst_192 : f32 to vector<2x64xf32>
    %c29_193 = arith.constant 29 : index
    %c0_194 = arith.constant 0 : index
    %176 = vector.load %arg15[%c29_193, %c0_194] : memref<80x64xf32, #tpu.memory_space<vmem>>, vector<2x64xf32>
    tpu.vector_store %arg15[%c29_193, %c0_194], %175 {strides = array<i32>} : memref<80x64xf32, #tpu.memory_space<vmem>>, vector<2x64xf32>,
    %cst_195 = arith.constant 0.000000e+00 : f32
    %177 = vector.broadcast %cst_195 : f32 to vector<2x64xf32>
    %c39_196 = arith.constant 39 : index
    %c0_197 = arith.constant 0 : index
    %178 = vector.load %arg15[%c39_196, %c0_197] : memref<80x64xf32, #tpu.memory_space<vmem>>, vector<2x64xf32>
    tpu.vector_store %arg15[%c39_196, %c0_197], %177 {strides = array<i32>} : memref<80x64xf32, #tpu.memory_space<vmem>>, vector<2x64xf32>,
    %cst_198 = arith.constant 0.000000e+00 : f32
    %179 = vector.broadcast %cst_198 : f32 to vector<2x64xf32>
    %c49_199 = arith.constant 49 : index
    %c0_200 = arith.constant 0 : index
    %180 = vector.load %arg15[%c49_199, %c0_200] : memref<80x64xf32, #tpu.memory_space<vmem>>, vector<2x64xf32>
    tpu.vector_store %arg15[%c49_199, %c0_200], %179 {strides = array<i32>} : memref<80x64xf32, #tpu.memory_space<vmem>>, vector<2x64xf32>,
    %cst_201 = arith.constant 0.000000e+00 : f32
    %181 = vector.broadcast %cst_201 : f32 to vector<2x64xf32>
    %c59_202 = arith.constant 59 : index
    %c0_203 = arith.constant 0 : index
    %182 = vector.load %arg15[%c59_202, %c0_203] : memref<80x64xf32, #tpu.memory_space<vmem>>, vector<2x64xf32>
    tpu.vector_store %arg15[%c59_202, %c0_203], %181 {strides = array<i32>} : memref<80x64xf32, #tpu.memory_space<vmem>>, vector<2x64xf32>,
    %cst_204 = arith.constant 0.000000e+00 : f32
    %183 = vector.broadcast %cst_204 : f32 to vector<2x64xf32>
    %c69_205 = arith.constant 69 : index
    %c0_206 = arith.constant 0 : index
    %184 = vector.load %arg15[%c69_205, %c0_206] : memref<80x64xf32, #tpu.memory_space<vmem>>, vector<2x64xf32>
    tpu.vector_store %arg15[%c69_205, %c0_206], %183 {strides = array<i32>} : memref<80x64xf32, #tpu.memory_space<vmem>>, vector<2x64xf32>,
    %c0_207 = arith.constant 0 : index
    %c0_208 = arith.constant 0 : index
    %185 = vector.load %arg15[%c0_207, %c0_208] : memref<80x64xf32, #tpu.memory_space<vmem>>, vector<78x64xf32>
    %c1_209 = arith.constant 1 : index
    %c0_210 = arith.constant 0 : index
    %186 = vector.load %arg15[%c1_209, %c0_210] : memref<80x64xf32, #tpu.memory_space<vmem>>, vector<78x64xf32>
    %c2_211 = arith.constant 2 : index
    %c0_212 = arith.constant 0 : index
    %187 = vector.load %arg15[%c2_211, %c0_212] : memref<80x64xf32, #tpu.memory_space<vmem>>, vector<78x64xf32>
    %188 = arith.maximumf %185, %187 : vector<78x64xf32>
    %189 = arith.maximumf %188, %186 : vector<78x64xf32>
    %c1_213 = arith.constant 1 : index
    %c0_214 = arith.constant 0 : index
    %190 = vector.load %arg15[%c1_213, %c0_214] : memref<80x64xf32, #tpu.memory_space<vmem>>, vector<78x64xf32>
    tpu.vector_store %arg15[%c1_213, %c0_214], %189 {strides = array<i32>} : memref<80x64xf32, #tpu.memory_space<vmem>>, vector<78x64xf32>,
    %c1_215 = arith.constant 1 : index
    %c0_216 = arith.constant 0 : index
    %191 = tpu.strided_load %arg15[%c1_215, %c0_216] {strides = array<i32: 2, 1>} : memref<80x64xf32, #tpu.memory_space<vmem>>, vector<4x64xf32>
    %c11_217 = arith.constant 11 : index
    %c0_218 = arith.constant 0 : index
    %192 = tpu.strided_load %arg15[%c11_217, %c0_218] {strides = array<i32: 2, 1>} : memref<80x64xf32, #tpu.memory_space<vmem>>, vector<4x64xf32>
    %193 = arith.maximumf %191, %192 : vector<4x64xf32>
    %c7 = arith.constant 7 : index
    %c0_219 = arith.constant 0 : index
    %194 = vector.load %arg16[%c7, %c0_219] : memref<36x64xf32, #tpu.memory_space<vmem>>, vector<4x64xf32>
    tpu.vector_store %arg16[%c7, %c0_219], %193 {strides = array<i32>} : memref<36x64xf32, #tpu.memory_space<vmem>>, vector<4x64xf32>,
    %c11_220 = arith.constant 11 : index
    %c0_221 = arith.constant 0 : index
    %195 = tpu.strided_load %arg15[%c11_220, %c0_221] {strides = array<i32: 2, 1>} : memref<80x64xf32, #tpu.memory_space<vmem>>, vector<4x64xf32>
    %c21_222 = arith.constant 21 : index
    %c0_223 = arith.constant 0 : index
    %196 = tpu.strided_load %arg15[%c21_222, %c0_223] {strides = array<i32: 2, 1>} : memref<80x64xf32, #tpu.memory_space<vmem>>, vector<4x64xf32>
    %c31_224 = arith.constant 31 : index
    %c0_225 = arith.constant 0 : index
    %197 = tpu.strided_load %arg15[%c31_224, %c0_225] {strides = array<i32: 2, 1>} : memref<80x64xf32, #tpu.memory_space<vmem>>, vector<4x64xf32>
    %198 = arith.maximumf %195, %196 : vector<4x64xf32>
    %199 = arith.maximumf %198, %197 : vector<4x64xf32>
    %c13 = arith.constant 13 : index
    %c0_226 = arith.constant 0 : index
    %200 = vector.load %arg16[%c13, %c0_226] : memref<36x64xf32, #tpu.memory_space<vmem>>, vector<4x64xf32>
    tpu.vector_store %arg16[%c13, %c0_226], %199 {strides = array<i32>} : memref<36x64xf32, #tpu.memory_space<vmem>>, vector<4x64xf32>,
    %c31_227 = arith.constant 31 : index
    %c0_228 = arith.constant 0 : index
    %201 = tpu.strided_load %arg15[%c31_227, %c0_228] {strides = array<i32: 2, 1>} : memref<80x64xf32, #tpu.memory_space<vmem>>, vector<4x64xf32>
    %c41_229 = arith.constant 41 : index
    %c0_230 = arith.constant 0 : index
    %202 = tpu.strided_load %arg15[%c41_229, %c0_230] {strides = array<i32: 2, 1>} : memref<80x64xf32, #tpu.memory_space<vmem>>, vector<4x64xf32>
    %c51_231 = arith.constant 51 : index
    %c0_232 = arith.constant 0 : index
    %203 = tpu.strided_load %arg15[%c51_231, %c0_232] {strides = array<i32: 2, 1>} : memref<80x64xf32, #tpu.memory_space<vmem>>, vector<4x64xf32>
    %204 = arith.maximumf %201, %202 : vector<4x64xf32>
    %205 = arith.maximumf %204, %203 : vector<4x64xf32>
    %c19_233 = arith.constant 19 : index
    %c0_234 = arith.constant 0 : index
    %206 = vector.load %arg16[%c19_233, %c0_234] : memref<36x64xf32, #tpu.memory_space<vmem>>, vector<4x64xf32>
    tpu.vector_store %arg16[%c19_233, %c0_234], %205 {strides = array<i32>} : memref<36x64xf32, #tpu.memory_space<vmem>>, vector<4x64xf32>,
    %c51_235 = arith.constant 51 : index
    %c0_236 = arith.constant 0 : index
    %207 = tpu.strided_load %arg15[%c51_235, %c0_236] {strides = array<i32: 2, 1>} : memref<80x64xf32, #tpu.memory_space<vmem>>, vector<4x64xf32>
    %c61_237 = arith.constant 61 : index
    %c0_238 = arith.constant 0 : index
    %208 = tpu.strided_load %arg15[%c61_237, %c0_238] {strides = array<i32: 2, 1>} : memref<80x64xf32, #tpu.memory_space<vmem>>, vector<4x64xf32>
    %c71_239 = arith.constant 71 : index
    %c0_240 = arith.constant 0 : index
    %209 = tpu.strided_load %arg15[%c71_239, %c0_240] {strides = array<i32: 2, 1>} : memref<80x64xf32, #tpu.memory_space<vmem>>, vector<4x64xf32>
    %210 = arith.maximumf %207, %208 : vector<4x64xf32>
    %211 = arith.maximumf %210, %209 : vector<4x64xf32>
    %c25 = arith.constant 25 : index
    %c0_241 = arith.constant 0 : index
    %212 = vector.load %arg16[%c25, %c0_241] : memref<36x64xf32, #tpu.memory_space<vmem>>, vector<4x64xf32>
    tpu.vector_store %arg16[%c25, %c0_241], %211 {strides = array<i32>} : memref<36x64xf32, #tpu.memory_space<vmem>>, vector<4x64xf32>,
    %cst_242 = arith.constant 0.000000e+00 : f32
    %213 = vector.broadcast %cst_242 : f32 to vector<7x64xf32>
    %c0_243 = arith.constant 0 : index
    %c0_244 = arith.constant 0 : index
    %214 = vector.load %arg16[%c0_243, %c0_244] : memref<36x64xf32, #tpu.memory_space<vmem>>, vector<7x64xf32>
    tpu.vector_store %arg16[%c0_243, %c0_244], %213 {strides = array<i32>} : memref<36x64xf32, #tpu.memory_space<vmem>>, vector<7x64xf32>,
    %cst_245 = arith.constant 0.000000e+00 : f32
    %215 = vector.broadcast %cst_245 : f32 to vector<2x64xf32>
    %c11_246 = arith.constant 11 : index
    %c0_247 = arith.constant 0 : index
    %216 = vector.load %arg16[%c11_246, %c0_247] : memref<36x64xf32, #tpu.memory_space<vmem>>, vector<2x64xf32>
    tpu.vector_store %arg16[%c11_246, %c0_247], %215 {strides = array<i32>} : memref<36x64xf32, #tpu.memory_space<vmem>>, vector<2x64xf32>,
    %cst_248 = arith.constant 0.000000e+00 : f32
    %217 = vector.broadcast %cst_248 : f32 to vector<2x64xf32>
    %c17_249 = arith.constant 17 : index
    %c0_250 = arith.constant 0 : index
    %218 = vector.load %arg16[%c17_249, %c0_250] : memref<36x64xf32, #tpu.memory_space<vmem>>, vector<2x64xf32>
    tpu.vector_store %arg16[%c17_249, %c0_250], %217 {strides = array<i32>} : memref<36x64xf32, #tpu.memory_space<vmem>>, vector<2x64xf32>,
    %cst_251 = arith.constant 0.000000e+00 : f32
    %219 = vector.broadcast %cst_251 : f32 to vector<2x64xf32>
    %c23 = arith.constant 23 : index
    %c0_252 = arith.constant 0 : index
    %220 = vector.load %arg16[%c23, %c0_252] : memref<36x64xf32, #tpu.memory_space<vmem>>, vector<2x64xf32>
    tpu.vector_store %arg16[%c23, %c0_252], %219 {strides = array<i32>} : memref<36x64xf32, #tpu.memory_space<vmem>>, vector<2x64xf32>,
    %cst_253 = arith.constant 0.000000e+00 : f32
    %221 = vector.broadcast %cst_253 : f32 to vector<7x64xf32>
    %c29_254 = arith.constant 29 : index
    %c0_255 = arith.constant 0 : index
    %222 = vector.load %arg16[%c29_254, %c0_255] : memref<36x64xf32, #tpu.memory_space<vmem>>, vector<7x64xf32>
    tpu.vector_store %arg16[%c29_254, %c0_255], %221 {strides = array<i32>} : memref<36x64xf32, #tpu.memory_space<vmem>>, vector<7x64xf32>,
    %c0_256 = arith.constant 0 : index
    %c0_257 = arith.constant 0 : index
    %223 = vector.load %arg16[%c0_256, %c0_257] : memref<36x64xf32, #tpu.memory_space<vmem>>, vector<22x64xf32>
    %c0_258 = arith.constant 0 : index
    %c0_259 = arith.constant 0 : index
    %224 = vector.load %arg17[%c0_258, %c0_259] : memref<22x576xf32, #tpu.memory_space<vmem>>, vector<22x64xf32>
    tpu.vector_store %arg17[%c0_258, %c0_259], %223 {strides = array<i32>} : memref<22x576xf32, #tpu.memory_space<vmem>>, vector<22x64xf32>,
    %c1_260 = arith.constant 1 : index
    %c0_261 = arith.constant 0 : index
    %225 = vector.load %arg16[%c1_260, %c0_261] : memref<36x64xf32, #tpu.memory_space<vmem>>, vector<22x64xf32>
    %c0_262 = arith.constant 0 : index
    %c64_263 = arith.constant 64 : index
    %226 = vector.load %arg17[%c0_262, %c64_263] : memref<22x576xf32, #tpu.memory_space<vmem>>, vector<22x64xf32>
    tpu.vector_store %arg17[%c0_262, %c64_263], %225 {strides = array<i32>} : memref<22x576xf32, #tpu.memory_space<vmem>>, vector<22x64xf32>,
    %c2_264 = arith.constant 2 : index
    %c0_265 = arith.constant 0 : index
    %227 = vector.load %arg16[%c2_264, %c0_265] : memref<36x64xf32, #tpu.memory_space<vmem>>, vector<22x64xf32>
    %c0_266 = arith.constant 0 : index
    %c128_267 = arith.constant 128 : index
    %228 = vector.load %arg17[%c0_266, %c128_267] : memref<22x576xf32, #tpu.memory_space<vmem>>, vector<22x64xf32>
    tpu.vector_store %arg17[%c0_266, %c128_267], %227 {strides = array<i32>} : memref<22x576xf32, #tpu.memory_space<vmem>>, vector<22x64xf32>,
    %c6 = arith.constant 6 : index
    %c0_268 = arith.constant 0 : index
    %229 = vector.load %arg16[%c6, %c0_268] : memref<36x64xf32, #tpu.memory_space<vmem>>, vector<22x64xf32>
    %c0_269 = arith.constant 0 : index
    %c192_270 = arith.constant 192 : index
    %230 = vector.load %arg17[%c0_269, %c192_270] : memref<22x576xf32, #tpu.memory_space<vmem>>, vector<22x64xf32>
    tpu.vector_store %arg17[%c0_269, %c192_270], %229 {strides = array<i32>} : memref<22x576xf32, #tpu.memory_space<vmem>>, vector<22x64xf32>,
    %c7_271 = arith.constant 7 : index
    %c0_272 = arith.constant 0 : index
    %231 = vector.load %arg16[%c7_271, %c0_272] : memref<36x64xf32, #tpu.memory_space<vmem>>, vector<22x64xf32>
    %c0_273 = arith.constant 0 : index
    %c256_274 = arith.constant 256 : index
    %232 = vector.load %arg17[%c0_273, %c256_274] : memref<22x576xf32, #tpu.memory_space<vmem>>, vector<22x64xf32>
    tpu.vector_store %arg17[%c0_273, %c256_274], %231 {strides = array<i32>} : memref<22x576xf32, #tpu.memory_space<vmem>>, vector<22x64xf32>,
    %c8_275 = arith.constant 8 : index
    %c0_276 = arith.constant 0 : index
    %233 = vector.load %arg16[%c8_275, %c0_276] : memref<36x64xf32, #tpu.memory_space<vmem>>, vector<22x64xf32>
    %c0_277 = arith.constant 0 : index
    %c320 = arith.constant 320 : index
    %234 = vector.load %arg17[%c0_277, %c320] : memref<22x576xf32, #tpu.memory_space<vmem>>, vector<22x64xf32>
    tpu.vector_store %arg17[%c0_277, %c320], %233 {strides = array<i32>} : memref<22x576xf32, #tpu.memory_space<vmem>>, vector<22x64xf32>,
    %c12_278 = arith.constant 12 : index
    %c0_279 = arith.constant 0 : index
    %235 = vector.load %arg16[%c12_278, %c0_279] : memref<36x64xf32, #tpu.memory_space<vmem>>, vector<22x64xf32>
    %c0_280 = arith.constant 0 : index
    %c384 = arith.constant 384 : index
    %236 = vector.load %arg17[%c0_280, %c384] : memref<22x576xf32, #tpu.memory_space<vmem>>, vector<22x64xf32>
    tpu.vector_store %arg17[%c0_280, %c384], %235 {strides = array<i32>} : memref<22x576xf32, #tpu.memory_space<vmem>>, vector<22x64xf32>,
    %c13_281 = arith.constant 13 : index
    %c0_282 = arith.constant 0 : index
    %237 = vector.load %arg16[%c13_281, %c0_282] : memref<36x64xf32, #tpu.memory_space<vmem>>, vector<22x64xf32>
    %c0_283 = arith.constant 0 : index
    %c448 = arith.constant 448 : index
    %238 = vector.load %arg17[%c0_283, %c448] : memref<22x576xf32, #tpu.memory_space<vmem>>, vector<22x64xf32>
    tpu.vector_store %arg17[%c0_283, %c448], %237 {strides = array<i32>} : memref<22x576xf32, #tpu.memory_space<vmem>>, vector<22x64xf32>,
    %c14 = arith.constant 14 : index
    %c0_284 = arith.constant 0 : index
    %239 = vector.load %arg16[%c14, %c0_284] : memref<36x64xf32, #tpu.memory_space<vmem>>, vector<22x64xf32>
    %c0_285 = arith.constant 0 : index
    %c512 = arith.constant 512 : index
    %240 = vector.load %arg17[%c0_285, %c512] : memref<22x576xf32, #tpu.memory_space<vmem>>, vector<22x64xf32>
    tpu.vector_store %arg17[%c0_285, %c512], %239 {strides = array<i32>} : memref<22x576xf32, #tpu.memory_space<vmem>>, vector<22x64xf32>,
    %c0_286 = arith.constant 0 : index
    %c0_287 = arith.constant 0 : index
    %241 = vector.load %arg17[%c0_286, %c0_287] : memref<22x576xf32, #tpu.memory_space<vmem>>, vector<22x576xf32>
    %c0_288 = arith.constant 0 : index
    %c0_289 = arith.constant 0 : index
    %242 = vector.load %arg6[%c0_288, %c0_289] : memref<576x128xf32, #tpu.memory_space<vmem>>, vector<576x128xf32>
    %cst_290 = arith.constant dense<0.000000e+00> : vector<22x128xf32>
    %243 = tpu.matmul %241, %242, %cst_290 {dimension_numbers = #tpu.dot_dimension_numbers<[1], [0], [0], [1], [0, 0, 1, 1], [], []>} : vector<22x576xf32>, vector<576x128xf32>, vector<22x128xf32> -> vector<22x128xf32>
    %c0_291 = arith.constant 0 : index
    %c0_292 = arith.constant 0 : index
    %244 = vector.load %arg7[%c0_291, %c0_292] : memref<1x128xf32, #tpu.memory_space<vmem>>, vector<1x128xf32>
    %245 = vector.broadcast %244 : vector<1x128xf32> to vector<22x128xf32>
    %246 = arith.addf %243, %245 : vector<22x128xf32>
    %cst_293 = arith.constant 0.000000e+00 : f32
    %247 = vector.broadcast %cst_293 : f32 to vector<22x128xf32>
    %248 = arith.maximumf %246, %247 : vector<22x128xf32>
    %cst_294 = arith.constant 0.000000e+00 : f32
    %249 = vector.broadcast %cst_294 : f32 to vector<1x128xf32>
    %c0_295 = arith.constant 0 : index
    %c0_296 = arith.constant 0 : index
    %250 = vector.load %arg18[%c0_295, %c0_296] : memref<24x128xf32, #tpu.memory_space<vmem>>, vector<1x128xf32>
    tpu.vector_store %arg18[%c0_295, %c0_296], %249 {strides = array<i32>} : memref<24x128xf32, #tpu.memory_space<vmem>>, vector<1x128xf32>,
    %cst_297 = arith.constant 0.000000e+00 : f32
    %251 = vector.broadcast %cst_297 : f32 to vector<1x128xf32>
    %c23_298 = arith.constant 23 : index
    %c0_299 = arith.constant 0 : index
    %252 = vector.load %arg18[%c23_298, %c0_299] : memref<24x128xf32, #tpu.memory_space<vmem>>, vector<1x128xf32>
    tpu.vector_store %arg18[%c23_298, %c0_299], %251 {strides = array<i32>} : memref<24x128xf32, #tpu.memory_space<vmem>>, vector<1x128xf32>,
    %c1_300 = arith.constant 1 : index
    %c0_301 = arith.constant 0 : index
    %253 = vector.load %arg18[%c1_300, %c0_301] : memref<24x128xf32, #tpu.memory_space<vmem>>, vector<22x128xf32>
    tpu.vector_store %arg18[%c1_300, %c0_301], %248 {strides = array<i32>} : memref<24x128xf32, #tpu.memory_space<vmem>>, vector<22x128xf32>,
    %cst_302 = arith.constant 0.000000e+00 : f32
    %254 = vector.broadcast %cst_302 : f32 to vector<2x128xf32>
    %c5 = arith.constant 5 : index
    %c0_303 = arith.constant 0 : index
    %255 = vector.load %arg18[%c5, %c0_303] : memref<24x128xf32, #tpu.memory_space<vmem>>, vector<2x128xf32>
    tpu.vector_store %arg18[%c5, %c0_303], %254 {strides = array<i32>} : memref<24x128xf32, #tpu.memory_space<vmem>>, vector<2x128xf32>,
    %cst_304 = arith.constant 0.000000e+00 : f32
    %256 = vector.broadcast %cst_304 : f32 to vector<2x128xf32>
    %c11_305 = arith.constant 11 : index
    %c0_306 = arith.constant 0 : index
    %257 = vector.load %arg18[%c11_305, %c0_306] : memref<24x128xf32, #tpu.memory_space<vmem>>, vector<2x128xf32>
    tpu.vector_store %arg18[%c11_305, %c0_306], %256 {strides = array<i32>} : memref<24x128xf32, #tpu.memory_space<vmem>>, vector<2x128xf32>,
    %cst_307 = arith.constant 0.000000e+00 : f32
    %258 = vector.broadcast %cst_307 : f32 to vector<2x128xf32>
    %c17_308 = arith.constant 17 : index
    %c0_309 = arith.constant 0 : index
    %259 = vector.load %arg18[%c17_308, %c0_309] : memref<24x128xf32, #tpu.memory_space<vmem>>, vector<2x128xf32>
    tpu.vector_store %arg18[%c17_308, %c0_309], %258 {strides = array<i32>} : memref<24x128xf32, #tpu.memory_space<vmem>>, vector<2x128xf32>,
    %c0_310 = arith.constant 0 : index
    %c0_311 = arith.constant 0 : index
    %260 = vector.load %arg18[%c0_310, %c0_311] : memref<24x128xf32, #tpu.memory_space<vmem>>, vector<22x128xf32>
    %c1_312 = arith.constant 1 : index
    %c0_313 = arith.constant 0 : index
    %261 = vector.load %arg18[%c1_312, %c0_313] : memref<24x128xf32, #tpu.memory_space<vmem>>, vector<22x128xf32>
    %c2_314 = arith.constant 2 : index
    %c0_315 = arith.constant 0 : index
    %262 = vector.load %arg18[%c2_314, %c0_315] : memref<24x128xf32, #tpu.memory_space<vmem>>, vector<22x128xf32>
    %263 = arith.maximumf %260, %262 : vector<22x128xf32>
    %264 = arith.maximumf %263, %261 : vector<22x128xf32>
    %c1_316 = arith.constant 1 : index
    %c0_317 = arith.constant 0 : index
    %265 = vector.load %arg18[%c1_316, %c0_317] : memref<24x128xf32, #tpu.memory_space<vmem>>, vector<22x128xf32>
    tpu.vector_store %arg18[%c1_316, %c0_317], %264 {strides = array<i32>} : memref<24x128xf32, #tpu.memory_space<vmem>>, vector<22x128xf32>,
    %c1_318 = arith.constant 1 : index
    %c0_319 = arith.constant 0 : index
    %266 = tpu.strided_load %arg18[%c1_318, %c0_319] {strides = array<i32: 2, 1>} : memref<24x128xf32, #tpu.memory_space<vmem>>, vector<2x128xf32>
    %c7_320 = arith.constant 7 : index
    %c0_321 = arith.constant 0 : index
    %267 = tpu.strided_load %arg18[%c7_320, %c0_321] {strides = array<i32: 2, 1>} : memref<24x128xf32, #tpu.memory_space<vmem>>, vector<2x128xf32>
    %268 = arith.maximumf %266, %267 : vector<2x128xf32>
    %c5_322 = arith.constant 5 : index
    %c0_323 = arith.constant 0 : index
    %269 = vector.load %arg19[%c5_322, %c0_323] : memref<16x128xf32, #tpu.memory_space<vmem>>, vector<2x128xf32>
    tpu.vector_store %arg19[%c5_322, %c0_323], %268 {strides = array<i32>} : memref<16x128xf32, #tpu.memory_space<vmem>>, vector<2x128xf32>,
    %c7_324 = arith.constant 7 : index
    %c0_325 = arith.constant 0 : index
    %270 = tpu.strided_load %arg18[%c7_324, %c0_325] {strides = array<i32: 2, 1>} : memref<24x128xf32, #tpu.memory_space<vmem>>, vector<2x128xf32>
    %c13_326 = arith.constant 13 : index
    %c0_327 = arith.constant 0 : index
    %271 = tpu.strided_load %arg18[%c13_326, %c0_327] {strides = array<i32: 2, 1>} : memref<24x128xf32, #tpu.memory_space<vmem>>, vector<2x128xf32>
    %c19_328 = arith.constant 19 : index
    %c0_329 = arith.constant 0 : index
    %272 = tpu.strided_load %arg18[%c19_328, %c0_329] {strides = array<i32: 2, 1>} : memref<24x128xf32, #tpu.memory_space<vmem>>, vector<2x128xf32>
    %273 = arith.maximumf %270, %271 : vector<2x128xf32>
    %274 = arith.maximumf %273, %272 : vector<2x128xf32>
    %c9_330 = arith.constant 9 : index
    %c0_331 = arith.constant 0 : index
    %275 = vector.load %arg19[%c9_330, %c0_331] : memref<16x128xf32, #tpu.memory_space<vmem>>, vector<2x128xf32>
    tpu.vector_store %arg19[%c9_330, %c0_331], %274 {strides = array<i32>} : memref<16x128xf32, #tpu.memory_space<vmem>>, vector<2x128xf32>,
    %cst_332 = arith.constant 0.000000e+00 : f32
    %276 = vector.broadcast %cst_332 : f32 to vector<5x128xf32>
    %c0_333 = arith.constant 0 : index
    %c0_334 = arith.constant 0 : index
    %277 = vector.load %arg19[%c0_333, %c0_334] : memref<16x128xf32, #tpu.memory_space<vmem>>, vector<5x128xf32>
    tpu.vector_store %arg19[%c0_333, %c0_334], %276 {strides = array<i32>} : memref<16x128xf32, #tpu.memory_space<vmem>>, vector<5x128xf32>,
    %cst_335 = arith.constant 0.000000e+00 : f32
    %278 = vector.broadcast %cst_335 : f32 to vector<2x128xf32>
    %c7_336 = arith.constant 7 : index
    %c0_337 = arith.constant 0 : index
    %279 = vector.load %arg19[%c7_336, %c0_337] : memref<16x128xf32, #tpu.memory_space<vmem>>, vector<2x128xf32>
    tpu.vector_store %arg19[%c7_336, %c0_337], %278 {strides = array<i32>} : memref<16x128xf32, #tpu.memory_space<vmem>>, vector<2x128xf32>,
    %cst_338 = arith.constant 0.000000e+00 : f32
    %280 = vector.broadcast %cst_338 : f32 to vector<5x128xf32>
    %c11_339 = arith.constant 11 : index
    %c0_340 = arith.constant 0 : index
    %281 = vector.load %arg19[%c11_339, %c0_340] : memref<16x128xf32, #tpu.memory_space<vmem>>, vector<5x128xf32>
    tpu.vector_store %arg19[%c11_339, %c0_340], %280 {strides = array<i32>} : memref<16x128xf32, #tpu.memory_space<vmem>>, vector<5x128xf32>,
    %c0_341 = arith.constant 0 : index
    %c0_342 = arith.constant 0 : index
    %282 = vector.load %arg19[%c0_341, %c0_342] : memref<16x128xf32, #tpu.memory_space<vmem>>, vector<6x128xf32>
    %c0_343 = arith.constant 0 : index
    %c0_344 = arith.constant 0 : index
    %283 = vector.load %arg20[%c0_343, %c0_344] : memref<6x1152xf32, #tpu.memory_space<vmem>>, vector<6x128xf32>
    tpu.vector_store %arg20[%c0_343, %c0_344], %282 {strides = array<i32>} : memref<6x1152xf32, #tpu.memory_space<vmem>>, vector<6x128xf32>,
    %c1_345 = arith.constant 1 : index
    %c0_346 = arith.constant 0 : index
    %284 = vector.load %arg19[%c1_345, %c0_346] : memref<16x128xf32, #tpu.memory_space<vmem>>, vector<6x128xf32>
    %c0_347 = arith.constant 0 : index
    %c128_348 = arith.constant 128 : index
    %285 = vector.load %arg20[%c0_347, %c128_348] : memref<6x1152xf32, #tpu.memory_space<vmem>>, vector<6x128xf32>
    tpu.vector_store %arg20[%c0_347, %c128_348], %284 {strides = array<i32>} : memref<6x1152xf32, #tpu.memory_space<vmem>>, vector<6x128xf32>,
    %c2_349 = arith.constant 2 : index
    %c0_350 = arith.constant 0 : index
    %286 = vector.load %arg19[%c2_349, %c0_350] : memref<16x128xf32, #tpu.memory_space<vmem>>, vector<6x128xf32>
    %c0_351 = arith.constant 0 : index
    %c256_352 = arith.constant 256 : index
    %287 = vector.load %arg20[%c0_351, %c256_352] : memref<6x1152xf32, #tpu.memory_space<vmem>>, vector<6x128xf32>
    tpu.vector_store %arg20[%c0_351, %c256_352], %286 {strides = array<i32>} : memref<6x1152xf32, #tpu.memory_space<vmem>>, vector<6x128xf32>,
    %c4_353 = arith.constant 4 : index
    %c0_354 = arith.constant 0 : index
    %288 = vector.load %arg19[%c4_353, %c0_354] : memref<16x128xf32, #tpu.memory_space<vmem>>, vector<6x128xf32>
    %c0_355 = arith.constant 0 : index
    %c384_356 = arith.constant 384 : index
    %289 = vector.load %arg20[%c0_355, %c384_356] : memref<6x1152xf32, #tpu.memory_space<vmem>>, vector<6x128xf32>
    tpu.vector_store %arg20[%c0_355, %c384_356], %288 {strides = array<i32>} : memref<6x1152xf32, #tpu.memory_space<vmem>>, vector<6x128xf32>,
    %c5_357 = arith.constant 5 : index
    %c0_358 = arith.constant 0 : index
    %290 = vector.load %arg19[%c5_357, %c0_358] : memref<16x128xf32, #tpu.memory_space<vmem>>, vector<6x128xf32>
    %c0_359 = arith.constant 0 : index
    %c512_360 = arith.constant 512 : index
    %291 = vector.load %arg20[%c0_359, %c512_360] : memref<6x1152xf32, #tpu.memory_space<vmem>>, vector<6x128xf32>
    tpu.vector_store %arg20[%c0_359, %c512_360], %290 {strides = array<i32>} : memref<6x1152xf32, #tpu.memory_space<vmem>>, vector<6x128xf32>,
    %c6_361 = arith.constant 6 : index
    %c0_362 = arith.constant 0 : index
    %292 = vector.load %arg19[%c6_361, %c0_362] : memref<16x128xf32, #tpu.memory_space<vmem>>, vector<6x128xf32>
    %c0_363 = arith.constant 0 : index
    %c640 = arith.constant 640 : index
    %293 = vector.load %arg20[%c0_363, %c640] : memref<6x1152xf32, #tpu.memory_space<vmem>>, vector<6x128xf32>
    tpu.vector_store %arg20[%c0_363, %c640], %292 {strides = array<i32>} : memref<6x1152xf32, #tpu.memory_space<vmem>>, vector<6x128xf32>,
    %c8_364 = arith.constant 8 : index
    %c0_365 = arith.constant 0 : index
    %294 = vector.load %arg19[%c8_364, %c0_365] : memref<16x128xf32, #tpu.memory_space<vmem>>, vector<6x128xf32>
    %c0_366 = arith.constant 0 : index
    %c768 = arith.constant 768 : index
    %295 = vector.load %arg20[%c0_366, %c768] : memref<6x1152xf32, #tpu.memory_space<vmem>>, vector<6x128xf32>
    tpu.vector_store %arg20[%c0_366, %c768], %294 {strides = array<i32>} : memref<6x1152xf32, #tpu.memory_space<vmem>>, vector<6x128xf32>,
    %c9_367 = arith.constant 9 : index
    %c0_368 = arith.constant 0 : index
    %296 = vector.load %arg19[%c9_367, %c0_368] : memref<16x128xf32, #tpu.memory_space<vmem>>, vector<6x128xf32>
    %c0_369 = arith.constant 0 : index
    %c896 = arith.constant 896 : index
    %297 = vector.load %arg20[%c0_369, %c896] : memref<6x1152xf32, #tpu.memory_space<vmem>>, vector<6x128xf32>
    tpu.vector_store %arg20[%c0_369, %c896], %296 {strides = array<i32>} : memref<6x1152xf32, #tpu.memory_space<vmem>>, vector<6x128xf32>,
    %c10_370 = arith.constant 10 : index
    %c0_371 = arith.constant 0 : index
    %298 = vector.load %arg19[%c10_370, %c0_371] : memref<16x128xf32, #tpu.memory_space<vmem>>, vector<6x128xf32>
    %c0_372 = arith.constant 0 : index
    %c1024 = arith.constant 1024 : index
    %299 = vector.load %arg20[%c0_372, %c1024] : memref<6x1152xf32, #tpu.memory_space<vmem>>, vector<6x128xf32>
    tpu.vector_store %arg20[%c0_372, %c1024], %298 {strides = array<i32>} : memref<6x1152xf32, #tpu.memory_space<vmem>>, vector<6x128xf32>,
    %c0_373 = arith.constant 0 : index
    %c0_374 = arith.constant 0 : index
    %300 = vector.load %arg20[%c0_373, %c0_374] : memref<6x1152xf32, #tpu.memory_space<vmem>>, vector<6x1152xf32>
    %c0_375 = arith.constant 0 : index
    %c0_376 = arith.constant 0 : index
    %301 = vector.load %arg8[%c0_375, %c0_376] : memref<1152x256xf32, #tpu.memory_space<vmem>>, vector<1152x256xf32>
    %cst_377 = arith.constant dense<0.000000e+00> : vector<6x256xf32>
    %302 = tpu.matmul %300, %301, %cst_377 {dimension_numbers = #tpu.dot_dimension_numbers<[1], [0], [0], [1], [0, 0, 1, 1], [], []>} : vector<6x1152xf32>, vector<1152x256xf32>, vector<6x256xf32> -> vector<6x256xf32>
    %c0_378 = arith.constant 0 : index
    %c0_379 = arith.constant 0 : index
    %303 = vector.load %arg9[%c0_378, %c0_379] : memref<1x256xf32, #tpu.memory_space<vmem>>, vector<1x256xf32>
    %304 = vector.broadcast %303 : vector<1x256xf32> to vector<6x256xf32>
    %305 = arith.addf %302, %304 : vector<6x256xf32>
    %cst_380 = arith.constant 0xFF800000 : f32
    %306 = vector.broadcast %cst_380 : f32 to vector<1x256xf32>
    %c0_381 = arith.constant 0 : index
    %c0_382 = arith.constant 0 : index
    %307 = vector.load %arg21[%c0_381, %c0_382] : memref<8x256xf32, #tpu.memory_space<vmem>>, vector<1x256xf32>
    tpu.vector_store %arg21[%c0_381, %c0_382], %306 {strides = array<i32>} : memref<8x256xf32, #tpu.memory_space<vmem>>, vector<1x256xf32>,
    %cst_383 = arith.constant 0xFF800000 : f32
    %308 = vector.broadcast %cst_383 : f32 to vector<1x256xf32>
    %c7_384 = arith.constant 7 : index
    %c0_385 = arith.constant 0 : index
    %309 = vector.load %arg21[%c7_384, %c0_385] : memref<8x256xf32, #tpu.memory_space<vmem>>, vector<1x256xf32>
    tpu.vector_store %arg21[%c7_384, %c0_385], %308 {strides = array<i32>} : memref<8x256xf32, #tpu.memory_space<vmem>>, vector<1x256xf32>,
    %c1_386 = arith.constant 1 : index
    %c0_387 = arith.constant 0 : index
    %310 = vector.load %arg21[%c1_386, %c0_387] : memref<8x256xf32, #tpu.memory_space<vmem>>, vector<6x256xf32>
    tpu.vector_store %arg21[%c1_386, %c0_387], %305 {strides = array<i32>} : memref<8x256xf32, #tpu.memory_space<vmem>>, vector<6x256xf32>,
    %cst_388 = arith.constant 0xFF800000 : f32
    %311 = vector.broadcast %cst_388 : f32 to vector<2x256xf32>
    %c3 = arith.constant 3 : index
    %c0_389 = arith.constant 0 : index
    %312 = vector.load %arg21[%c3, %c0_389] : memref<8x256xf32, #tpu.memory_space<vmem>>, vector<2x256xf32>
    tpu.vector_store %arg21[%c3, %c0_389], %311 {strides = array<i32>} : memref<8x256xf32, #tpu.memory_space<vmem>>, vector<2x256xf32>,
    %c0_390 = arith.constant 0 : index
    %c0_391 = arith.constant 0 : index
    %313 = vector.load %arg21[%c0_390, %c0_391] : memref<8x256xf32, #tpu.memory_space<vmem>>, vector<6x256xf32>
    %c1_392 = arith.constant 1 : index
    %c0_393 = arith.constant 0 : index
    %314 = vector.load %arg21[%c1_392, %c0_393] : memref<8x256xf32, #tpu.memory_space<vmem>>, vector<6x256xf32>
    %c2_394 = arith.constant 2 : index
    %c0_395 = arith.constant 0 : index
    %315 = vector.load %arg21[%c2_394, %c0_395] : memref<8x256xf32, #tpu.memory_space<vmem>>, vector<6x256xf32>
    %316 = arith.maximumf %313, %315 : vector<6x256xf32>
    %317 = arith.maximumf %316, %314 : vector<6x256xf32>
    %c1_396 = arith.constant 1 : index
    %c0_397 = arith.constant 0 : index
    %318 = vector.load %arg21[%c1_396, %c0_397] : memref<8x256xf32, #tpu.memory_space<vmem>>, vector<6x256xf32>
    tpu.vector_store %arg21[%c1_396, %c0_397], %317 {strides = array<i32>} : memref<8x256xf32, #tpu.memory_space<vmem>>, vector<6x256xf32>,
    %c1_398 = arith.constant 1 : index
    %c0_399 = arith.constant 0 : index
    %319 = vector.load %arg21[%c1_398, %c0_399] : memref<8x256xf32, #tpu.memory_space<vmem>>, vector<1x256xf32>
    %c5_400 = arith.constant 5 : index
    %c0_401 = arith.constant 0 : index
    %320 = vector.load %arg21[%c5_400, %c0_401] : memref<8x256xf32, #tpu.memory_space<vmem>>, vector<1x256xf32>
    %321 = arith.maximumf %319, %320 : vector<1x256xf32>
    %c0_402 = arith.constant 0 : index
    %c0_403 = arith.constant 0 : index
    %c0_404 = arith.constant 0 : index
    %322 = vector.load %arg10[%c0_402, %c0_403, %c0_404] : memref<1x1x256xf32, #tpu.memory_space<vmem>>, vector<1x1x256xf32>
    %323 = vector.shape_cast %322 : vector<1x1x256xf32> to vector<1x256xf32>
    %324 = vector.shape_cast %321 : vector<1x256xf32> to vector<1x1x256xf32>
    tpu.vector_store %arg10[%c0_402, %c0_403, %c0_404], %324 {strides = array<i32>} : memref<1x1x256xf32, #tpu.memory_space<vmem>>, vector<1x1x256xf32>,
    return
  }
  func.func @transform_0(%arg0: i32) -> (i32, i32, i32) {
    %c0_i32 = arith.constant 0 : i32
    %c0_i32_0 = arith.constant 0 : i32
    %c0_i32_1 = arith.constant 0 : i32
    return %arg0, %c0_i32, %c0_i32_0 : i32, i32, i32
  }
  func.func @transform_1(%arg0: i32) -> (i32, i32) {
    %c0_i32 = arith.constant 0 : i32
    %c0_i32_0 = arith.constant 0 : i32
    %c0_i32_1 = arith.constant 0 : i32
    return %c0_i32, %c0_i32_0 : i32, i32
  }
  func.func @transform_2(%arg0: i32) -> (i32, i32) {
    %c0_i32 = arith.constant 0 : i32
    %c0_i32_0 = arith.constant 0 : i32
    %c0_i32_1 = arith.constant 0 : i32
    return %c0_i32, %c0_i32_0 : i32, i32
  }
  func.func @transform_3(%arg0: i32) -> (i32, i32) {
    %c0_i32 = arith.constant 0 : i32
    %c0_i32_0 = arith.constant 0 : i32
    %c0_i32_1 = arith.constant 0 : i32
    return %c0_i32, %c0_i32_0 : i32, i32
  }
  func.func @transform_4(%arg0: i32) -> (i32, i32) {
    %c0_i32 = arith.constant 0 : i32
    %c0_i32_0 = arith.constant 0 : i32
    %c0_i32_1 = arith.constant 0 : i32
    return %c0_i32, %c0_i32_0 : i32, i32
  }
  func.func @transform_5(%arg0: i32) -> (i32, i32) {
    %c0_i32 = arith.constant 0 : i32
    %c0_i32_0 = arith.constant 0 : i32
    %c0_i32_1 = arith.constant 0 : i32
    return %c0_i32, %c0_i32_0 : i32, i32
  }
  func.func @transform_6(%arg0: i32) -> (i32, i32) {
    %c0_i32 = arith.constant 0 : i32
    %c0_i32_0 = arith.constant 0 : i32
    %c0_i32_1 = arith.constant 0 : i32
    return %c0_i32, %c0_i32_0 : i32, i32
  }
  func.func @transform_7(%arg0: i32) -> (i32, i32) {
    %c0_i32 = arith.constant 0 : i32
    %c0_i32_0 = arith.constant 0 : i32
    %c0_i32_1 = arith.constant 0 : i32
    return %c0_i32, %c0_i32_0 : i32, i32
  }
  func.func @transform_8(%arg0: i32) -> (i32, i32) {
    %c0_i32 = arith.constant 0 : i32
    %c0_i32_0 = arith.constant 0 : i32
    %c0_i32_1 = arith.constant 0 : i32
    return %c0_i32, %c0_i32_0 : i32, i32
  }
  func.func @transform_9(%arg0: i32) -> (i32, i32, i32) {
    %c0_i32 = arith.constant 0 : i32
    %c0_i32_0 = arith.constant 0 : i32
    %c0_i32_1 = arith.constant 0 : i32
    return %arg0, %c0_i32, %c0_i32_0 : i32, i32, i32
  }
}

</mosaic_0001>

<bundles_post_ra>
// kernel: encoder_forward.1
= control target key start
LH: loop header
LB: loop body
LE: loop exit
PB: predicated region body
PF: predicated region fallthrough
CT: control target
= control target key end

     0   :  { %14 = vsyncpa [#allocation14], 0  ;;  %s8225_s0 = inlined_call_operand.vmem [shape: f32[2,324,4], index: 0, kind: input, shape index: {}]   ;;  %s8226_s1 = inlined_call_operand.vmem [shape: f32[36,32], index: 1, kind: input, shape index: {}]   ;;  %s8227_s2 = inlined_call_operand.hbm [shape: f32[1,32], index: 2, kind: input, shape index: {}]   ;;  %s8228_s3 = inlined_call_operand.hbm [shape: f32[288,64], index: 3, kind: input, shape index: {}]   ;;  %s8229_s4 = inlined_call_operand.hbm [shape: f32[1,64], index: 4, kind: input, shape index: {}]   ;;  %s8230_s5 = inlined_call_operand.hbm [shape: f32[576,128], index: 5, kind: input, shape index: {}]   ;;  %s8231_s6 = inlined_call_operand.hbm [shape: f32[1,128], index: 6, kind: input, shape index: {}]   ;;  %s8232_s7 = inlined_call_operand.hbm [shape: f32[1152,256], index: 7, kind: input, shape index: {}]   ;;  %s8233_s8 = inlined_call_operand.hbm [shape: f32[1,256], index: 8, kind: input, shape index: {}]   ;;  %s8234_s9 = inlined_call_operand.vmem [shape: f32[2,1,256], index: 9, kind: output, shape index: {}]  }
   0x1   :  { %15 = vsyncpa [#allocation16], 0 }
   0x2   :  { %16 = vsyncpa [#allocation19], 0 }
   0x3   :  { %17 = vsyncpa [#allocation22], 0  ;;  %s6488_s30 = smov 0  }
   0x4 LB: > { %s6413_s10 = smov [#allocation15]   ;;  %s6494_s12 = sadd.s32 4294967295, %s6411_s30   ;;  %s6411_s30 = sphi %s6488_s30, %s23_s30  }
   0x5   : > { %s274_s11 = sshll.u32 %s6413_s10, 4  ;;  %p5275_p0 = scmp.ge.s32.totalorder %s6411_s30, 1  ;;  %s6499_s11 = int_to_ptr.vmem [resolvable:$true] %s274_s11 }
   0x6   : > { %p248_p1 = scmp.lt.s32.totalorder %s6411_s30, 3  ;;  %p8235_p2 = scmp.eq.s32.totalorder %s6494_s12, 0 }
   0x7   : > { %s6414_s14 = smov [#allocation18]   ;;  %s6415_s17 = smov [#allocation21]  }
   0x8   : > { %p6501_p3 = pnand %p5275_p0, %p248_p1  ;;  %s298_s15 = sshll.u32 %s6414_s14, 4  ;;  %s6507_s15 = int_to_ptr.vmem [resolvable:$true] %s298_s15 }
   0x9   : > { %s322_s18 = sshll.u32 %s6415_s17, 4  ;;  %s6193_s21 = scalar_lea.hbm %s8228_s3, 4608  ;;  %s6515_s18 = int_to_ptr.vmem [resolvable:$true] %s322_s18 }
   0xa   : > { %s8237_s13 = scalar_select %p6501_p3, 1, 0 }
   0xb   : > { %p6122_p4 = pneg %p6501_p3  ;;  %p6194_p6 = scmp.ne.s32.totalorder %s8228_s3, %s6193_s21 }
   0xc   : > { %p6200_p10 = scmp.lt.u32.totalorder %s6193_s21, %s8228_s3 }
   0xd   : > { %p6511_p5 = pnand %p8235_p2, %p6122_p4 }
   0xf   : > { %p6525_p7 = pneg %p6511_p5 }
  0x11   : > { %p6196_p8 = pnand %p6525_p7, %p6194_p6 }
  0x13   : > { %p6197_p9 = pneg %p6196_p8 }
  0x15   : > { %p6202_p11 = pnand %p6200_p10, %p6197_p9 }
  0x17   : > { %6205 = shalt.err (!%p6202_p11)
}
  0x18   : > { %s6206_s27 = scalar_lea.vmem %s6499_s11, 4608  ;;  %p6214_p1 = scmp.lt.s32.totalorder %s6499_s11, %s6499_s11 }
  0x19   : > { %p6207_p12 = scmp.ne.s32.totalorder %s6499_s11, %s6206_s27  ;;  %p6215_p4 = scmp.lt.s32.totalorder %s6206_s27, %s6206_s27 }
  0x1b   : > { %p6209_p13 = pnand %p6207_p12, %p6525_p7  ;;  %p6216_p6 = por %p6215_p4, %p6214_p1 }
  0x1d   : > { %p6210_p0 = pneg %p6209_p13 }
  0x1f   : > { %p6217_p8 = pnand %p6216_p6, %p6210_p0 }
  0x21   : > { %6220 = shalt.err (!%p6217_p8)
}
  0x22   : > { %s6416_s28 = smov 128   ;;  %s6417_s29 = smov 8  }
  0x23   : > { %6128 = dma.hbm_to_vmem [thread:$0]  (!%p6511_p5), %s8228_s3, 4608, %s6499_s11, [#allocation16], %s6416_s28, %s6416_s28, %s6417_s29  }
  0x24   : > { %s6221_s20 = scalar_lea.hbm %s8230_s5, 9216 }
  0x25   : > { %p6222_p9 = scmp.ne.s32.totalorder %s8230_s5, %s6221_s20  ;;  %p6228_p12 = scmp.lt.u32.totalorder %s6221_s20, %s8230_s5 }
  0x27   : > { %p6224_p10 = pnand %p6222_p9, %p6525_p7 }
  0x29   : > { %p6225_p11 = pneg %p6224_p10 }
  0x2b   : > { %p6230_p13 = pnand %p6228_p12, %p6225_p11 }
  0x2d   : > { %6233 = shalt.err (!%p6230_p13)
}
  0x2e   : > { %s6234_s11 = scalar_lea.vmem %s6507_s15, 9216  ;;  %p6242_p6 = scmp.lt.s32.totalorder %s6507_s15, %s6507_s15 }
  0x2f   : > { %p6235_p0 = scmp.ne.s32.totalorder %s6507_s15, %s6234_s11  ;;  %p6243_p8 = scmp.lt.s32.totalorder %s6234_s11, %s6234_s11 }
  0x31   : > { %p6237_p1 = pnand %p6235_p0, %p6525_p7  ;;  %p6244_p9 = por %p6243_p8, %p6242_p6 }
  0x33   : > { %p6238_p4 = pneg %p6237_p1 }
  0x35   : > { %p6245_p10 = pnand %p6244_p9, %p6238_p4 }
  0x37   : > { %6248 = shalt.err (!%p6245_p10)
}
  0x38   : > { %6134 = dma.hbm_to_vmem [thread:$0]  (!%p6511_p5), %s8230_s5, 9216, %s6507_s15, [#allocation19], %s6416_s28, %s6416_s28, %s6417_s29  }
  0x39   : > { %s6249_s17 = scalar_lea.hbm %s8232_s7, 36864 }
  0x3a   : > { %p6250_p11 = scmp.ne.s32.totalorder %s8232_s7, %s6249_s17  ;;  %p6256_p0 = scmp.lt.u32.totalorder %s6249_s17, %s8232_s7 }
  0x3c   : > { %p6252_p12 = pnand %p6250_p11, %p6525_p7 }
  0x3e   : > { %p6253_p13 = pneg %p6252_p12 }
  0x40   : > { %p6258_p1 = pnand %p6256_p0, %p6253_p13 }
  0x42   : > { %6261 = shalt.err (!%p6258_p1)
}
  0x43   : > { %s6262_s15 = scalar_lea.vmem %s6515_s18, 36864  ;;  %p6270_p9 = scmp.lt.s32.totalorder %s6515_s18, %s6515_s18 }
  0x44   : > { %p6263_p4 = scmp.ne.s32.totalorder %s6515_s18, %s6262_s15  ;;  %p6271_p10 = scmp.lt.s32.totalorder %s6262_s15, %s6262_s15 }
  0x46   : > { %p6265_p6 = pnand %p6263_p4, %p6525_p7  ;;  %p6272_p11 = por %p6271_p10, %p6270_p9 }
  0x48   : > { %p6266_p8 = pneg %p6265_p6 }
  0x4a   : > { %p6273_p12 = pnand %p6272_p11, %p6266_p8 }
  0x4c   : > { %6276 = shalt.err (!%p6273_p12)
}
  0x4d   : > { %s6418_s28 = smov 256   ;;  %s6419_s29 = smov 16  }
  0x4e   : > { %6140 = dma.hbm_to_vmem [thread:$0]  (!%p6511_p5), %s8232_s7, 36864, %s6515_s18, [#allocation22], %s6418_s28, %s6418_s28, %s6419_s29  }
  0x4f   : > { %s6420_s11 = smov [#allocation13]   ;;  %s6421_s27 = smov [#allocation17]  }
  0x50   : > { %s264_s26 = sshll.u32 %s6420_s11, 4  ;;  %s288_s10 = sshll.u32 %s6421_s27, 4  ;;  %s265_s26 = int_to_ptr.vmem [resolvable:$true] %s264_s26  ;;  %s6592_s10 = int_to_ptr.vmem [resolvable:$true] %s288_s10 }
  0x51   : > { %s6277_s19 = scalar_lea.hbm %s8227_s2, 16 }
  0x52   : > { %p6278_p13 = scmp.ne.s32.totalorder %s8227_s2, %s6277_s19  ;;  %p6284_p4 = scmp.lt.u32.totalorder %s6277_s19, %s8227_s2 }
  0x54   : > { %p6280_p0 = pnand %p6278_p13, %p6525_p7 }
  0x56   : > { %p6281_p1 = pneg %p6280_p0 }
  0x58   : > { %p6286_p6 = pnand %p6284_p4, %p6281_p1 }
  0x5a   : > { %6289 = shalt.err (!%p6286_p6)
}
  0x5b   : > { %s6290_s15 = scalar_lea.vmem %s265_s26, 16  ;;  %s6297_s28 = scalar_lea.vmem %s265_s26, 32 }
  0x5c   : > { %p6291_p8 = scmp.ne.s32.totalorder %s265_s26, %s6290_s15  ;;  %p6298_p11 = scmp.lt.s32.totalorder %s265_s26, %s265_s26 }
  0x5d   : > { %p6299_p12 = scmp.lt.s32.totalorder %s6297_s28, %s6290_s15 }
  0x5e   : > { %p6293_p9 = pnand %p6291_p8, %p6525_p7 }
  0x5f   : > { %p6300_p2 = por %p6299_p12, %p6298_p11 }
  0x60   : > { %p6294_p10 = pneg %p6293_p9 }
  0x62   : > { %p6301_p3 = pnand %p6300_p2, %p6294_p10 }
  0x64   : > { %6304 = shalt.err (!%p6301_p3)
}
  0x65   : > { %6125 = dma.hbm_to_vmem [thread:$0]  (!%p6511_p5), %s8227_s2, 16, %s265_s26, [#allocation14]  }
  0x66   : > { %s6305_s27 = scalar_lea.hbm %s8229_s4, 16 }
  0x67   : > { %p6306_p13 = scmp.ne.s32.totalorder %s8229_s4, %s6305_s27  ;;  %p6312_p2 = scmp.lt.u32.totalorder %s6305_s27, %s8229_s4 }
  0x69   : > { %p6308_p0 = pnand %p6306_p13, %p6525_p7 }
  0x6b   : > { %p6309_p1 = pneg %p6308_p0 }
  0x6d   : > { %p6314_p3 = pnand %p6312_p2, %p6309_p1 }
  0x6f   : > { %6317 = shalt.err (!%p6314_p3)
}
  0x70   : > { %s6318_s26 = scalar_lea.vmem %s6592_s10, 16  ;;  %s6325_s21 = scalar_lea.vmem %s6592_s10, 32 }
  0x71   : > { %p6319_p4 = scmp.ne.s32.totalorder %s6592_s10, %s6318_s26  ;;  %p6326_p9 = scmp.lt.s32.totalorder %s6592_s10, %s6592_s10 }
  0x72   : > { %p6327_p10 = scmp.lt.s32.totalorder %s6325_s21, %s6318_s26 }
  0x73   : > { %p6321_p6 = pnand %p6319_p4, %p6525_p7 }
  0x74   : > { %p6328_p11 = por %p6327_p10, %p6326_p9 }
  0x75   : > { %p6322_p8 = pneg %p6321_p6 }
  0x77   : > { %p6329_p12 = pnand %p6328_p11, %p6322_p8 }
  0x79   : > { %6332 = shalt.err (!%p6329_p12)
}
  0x7a   : > { %6131 = dma.hbm_to_vmem [thread:$0]  (!%p6511_p5), %s8229_s4, 16, %s6592_s10, [#allocation16]  }
  0x7b   : > { %s6422_s15 = smov [#allocation20]   ;;  %s6423_s29 = smov [#allocation23]  }
  0x7c   : > { %s312_s28 = sshll.u32 %s6422_s15, 4  ;;  %s336_s23 = sshll.u32 %s6423_s29, 4  ;;  %s313_s28 = int_to_ptr.vmem [resolvable:$true] %s312_s28  ;;  %s6636_s23 = int_to_ptr.vmem [resolvable:$true] %s336_s23 }
  0x7d   : > { %s6333_s27 = scalar_lea.hbm %s8231_s6, 16 }
  0x7e   : > { %p6334_p13 = scmp.ne.s32.totalorder %s8231_s6, %s6333_s27  ;;  %p6340_p2 = scmp.lt.u32.totalorder %s6333_s27, %s8231_s6 }
  0x80   : > { %p6336_p0 = pnand %p6334_p13, %p6525_p7 }
  0x82   : > { %p6337_p1 = pneg %p6336_p0 }
  0x84   : > { %p6342_p3 = pnand %p6340_p2, %p6337_p1 }
  0x86   : > { %6345 = shalt.err (!%p6342_p3)
}
  0x87   : > { %s6346_s20 = scalar_lea.vmem %s313_s28, 16  ;;  %s6353_s26 = scalar_lea.vmem %s313_s28, 32 }
  0x88   : > { %p6347_p4 = scmp.ne.s32.totalorder %s313_s28, %s6346_s20  ;;  %p6354_p9 = scmp.lt.s32.totalorder %s313_s28, %s313_s28 }
  0x89   : > { %p6355_p10 = scmp.lt.s32.totalorder %s6353_s26, %s6346_s20 }
  0x8a   : > { %p6349_p6 = pnand %p6347_p4, %p6525_p7 }
  0x8b   : > { %p6356_p11 = por %p6355_p10, %p6354_p9 }
  0x8c   : > { %p6350_p8 = pneg %p6349_p6 }
  0x8e   : > { %p6357_p12 = pnand %p6356_p11, %p6350_p8 }
  0x90   : > { %6360 = shalt.err (!%p6357_p12)
}
  0x91   : > { %6137 = dma.hbm_to_vmem [thread:$0]  (!%p6511_p5), %s8231_s6, 16, %s313_s28, [#allocation19]  }
  0x92   : > { %s6361_s29 = scalar_lea.hbm %s8233_s8, 32 }
  0x93   : > { %p6362_p13 = scmp.ne.s32.totalorder %s8233_s8, %s6361_s29  ;;  %p6368_p2 = scmp.lt.u32.totalorder %s6361_s29, %s8233_s8 }
  0x95   : > { %p6364_p0 = pnand %p6362_p13, %p6525_p7 }
  0x97   : > { %p6365_p1 = pneg %p6364_p0 }
  0x99   : > { %p6370_p3 = pnand %p6368_p2, %p6365_p1 }
  0x9b   : > { %6373 = shalt.err (!%p6370_p3)
}
  0x9c   : > { %s6374_s28 = scalar_lea.vmem %s6636_s23, 32  ;;  %p6382_p9 = scmp.lt.s32.totalorder %s6636_s23, %s6636_s23 }
  0x9d   : > { %p6375_p4 = scmp.ne.s32.totalorder %s6636_s23, %s6374_s28  ;;  %p6383_p10 = scmp.lt.s32.totalorder %s6374_s28, %s6374_s28 }
  0x9f   : > { %p6377_p6 = pnand %p6375_p4, %p6525_p7  ;;  %p6384_p11 = por %p6383_p10, %p6382_p9 }
  0xa1   : > { %p6378_p8 = pneg %p6377_p6 }
  0xa3   : > { %p6385_p12 = pnand %p6384_p11, %p6378_p8 }
  0xa5   : > { %6388 = shalt.err (!%p6385_p12)
}
  0xa6   : > { %6143 = dma.hbm_to_vmem [thread:$0]  (!%p6511_p5), %s8233_s8, 32, %s6636_s23, [#allocation22]  }
  0xa7   : > { %p8240_p13 = scmp.ne.s32.totalorder %s8237_s13, 0 }
  0xa8   : > { %p8241_p0 = scmp.eq.s32.totalorder (!%p8240_p13), %s6494_s12, 0 }
  0xa9   : > { %357 = sbr.rel (%p8240_p13) target bundleno = 2319 (0x90f), region = 56 }
  0xb0   : > { %6394 = dma.done.wait (%p8241_p0), [#allocation14], 16   ;;  %p8242_p7 = pmov %p8241_p0 }
  0xb1   : > { %p8243_p1 = pmov %p8241_p0 }
  0xb2   : > { %6396 = vsyncadd (%p8242_p7), [#allocation14], 4294967280 }
  0xb3   : > { %6398 = dma.done.wait (%p8243_p1), [#allocation16], 4624   ;;  %p8244_p2 = pmov %p8241_p0 }
  0xb4   : > { %p8245_p3 = pmov %p8241_p0 }
  0xb5   : > { %6400 = vsyncadd (%p8244_p2), [#allocation16], 4294962672 }
  0xb6   : > { %6402 = dma.done.wait (%p8245_p3), [#allocation19], 9232   ;;  %p8246_p5 = pmov %p8241_p0 }
  0xb7   : > { %p8247_p4 = pmov %p8241_p0 }
  0xb8   : > { %6404 = vsyncadd (%p8246_p5), [#allocation19], 4294958064 }
  0xb9   : > { %6406 = dma.done.wait (%p8247_p4), [#allocation22], 36896   ;;  %p8248_p6 = pmov %p8241_p0 }
  0xba   : > { %p416_p8 = scmp.lt.s32.totalorder %s6494_s12, 1  ;;  %s6424_s10 = smov 8   ;;  %vm461_vm0 = vcmask 31744   ;;  %v2279_v21 = vld [vmem:[%s8226_s1] sm:$0xff]  ;;  %v2280_v22 = vld [vmem:[%s8226_s1 + $0x8] sm:$0xff]  ;;  %v2281_v26 = vld [vmem:[%s8226_s1 + $0x10] sm:$0xff] }
  0xbb   : > { %6408 = vsyncadd (%p8248_p6), [#allocation22], 4294930400  ;;  %s6425_s20 = smov 4   ;;  %s6426_s26 = smov 12   ;;  %v5671_v23 = vpack.c.bf16 %v2280_v22, %v2279_v21  ;;  %v2282_v27 = vld [vmem:[%s8226_s1 + $0x18] sm:$0xff]  ;;  %vm2400_vm1 = vcmask 1043456  }
  0xbc   : > { %s8252_s12 = smov (!%p416_p8, %s6494_s12), 1  ;;  %s6427_s21 = smov 16   ;;  %v5675_v28 = vpack.c.bf16 %v2282_v27, %v2281_v26  ;;  %v2283_v32 = vld [vmem:[%s8226_s1 + $0x20] sm:$0xf]  ;;  %vm679_vm2 = vcmask 64544   ;;  %vm897_vm3 = vcmask 97344  }
  0xbd   : > { %s6093_s13 = smul.u32 328, %s8252_s12  ;;  %s6428_s22 = smov 20   ;;  %5672 = vmatprep.subr.bf16.mxu0 %v5671_v23  ;;  %vm1115_vm4 = vcmask 130144   ;;  %vm1333_vm5 = vcmask 162944   ;;  %vm1551_vm6 = vcmask 195744   ;;  %vm1769_vm7 = vcmask 228544  }
  0xbe   : > { %s6429_s18 = smov 24   ;;  %s6430_s27 = smov 28   ;;  %5674 = vmatpush3.bf16.msra.mxu0 %v5671_v23  ;;  %vm1987_vm8 = vcmask 261344   ;;  %vm2205_vm9 = vcmask 294144   ;;  %vm2291_vm10 = vcmask 293888   ;;  %vm2688_vm11 = vcmask 261120  }
  0xbf   : > { %s6705_s23 = scalar_lea.vmem %s8225_s0, %s6093_s13  ;;  %5676 = vmatprep.subr.bf16.mxu0 %v5675_v28  ;;  %s6431_s13 = smov 32   ;;  %vm2685_vm12 = vcmask 253952   ;;  %vm2726_vm13 = vcmask 254976   ;;  %vm3021_vm14 = vcmask 256000   ;;  %vm497_vm15 = vcmask 29696  }
  0xc0   : > { %v717_v0 = vld [vmem:[%s6705_s23 + $0x2] sm:$0xff]  ;;  %v718_v2 = vld [vmem:[%s6705_s23 + $0xa] sm:$0xff]  ;;  %v936_v4 = vld [vmem:[%s6705_s23 + $0x1a] sm:$0xff] }
  0xc1   : > { %v499_v1 = vld [vmem:[%s6705_s23 + $0x1] sm:$0xff]  ;;  %789 = vrot.lane.b32.xlu1 %v717_v0, %s6424_s10  ;;  %v500_v3 = vld [vmem:[%s6705_s23 + $0x9] sm:$0xff]  ;;  %v935_v5 = vld [vmem:[%s6705_s23 + $0x12] sm:$0xff] }
  0xc2   : > { %571 = vrot.lane.b32.xlu0 %v499_v1, %s6425_s20  ;;  %v501_v6 = vld [vmem:[%s6705_s23 + $0x11] sm:$0xff]  ;;  %v1154_v9 = vld [vmem:[%s6705_s23 + $0x1b] sm:$0xff]  ;;  %v426_v12 = vld [vmem:[%s6705_s23 + $0x8] sm:$0xff]  ;;  %5678 = vmatpush3.bf16.msra.mxu0 %v5675_v28 }
  0xc3   : > { %v1153_v7 = vld [vmem:[%s6705_s23 + $0x13] sm:$0xff]  ;;  %v425_v10 = vld [vmem:[%s6705_s23] sm:$0xff]  ;;  %463 = vst.msk [vmem:[#allocation2 + $0x8] sm:$0xff] %vm461_vm0, %v426_v12  ;;  %v938_v25 = vld [vmem:[%s6705_s23 + $0x2a] sm:$0xff]  ;;  %5567 = vmatprep.subr.msk.mxu0 %vm2400_vm1, %v2283_v32 }
  0xc4   : > { %v1371_v8 = vld [vmem:[%s6705_s23 + $0x14] sm:$0xff]  ;;  %462 = vst.msk [vmem:[#allocation2] sm:$0xff] %vm461_vm0, %v425_v10  ;;  %v1589_v15 = vld [vmem:[%s6705_s23 + $0x24] sm:$0xff]  ;;  %v1372_v16 = vld [vmem:[%s6705_s23 + $0x1c] sm:$0xff] }
  0xc5   : > { %791 = vrot.lane.b32.xlu1 %v718_v2, %s6424_s10  ;;  %v502_v11 = vld [vmem:[%s6705_s23 + $0x19] sm:$0xff]  ;;  %v427_v13 = vld [vmem:[%s6705_s23 + $0x10] sm:$0xff]  ;;  %v937_v17 = vld [vmem:[%s6705_s23 + $0x22] sm:$0xff] }
  0xc6   : > { %573 = vrot.lane.b32.xlu0 %v500_v3, %s6425_s20  ;;  %464 = vst.msk [vmem:[#allocation2 + $0x10] sm:$0xff] %vm461_vm0, %v427_v13  ;;  %v428_v14 = vld [vmem:[%s6705_s23 + $0x18] sm:$0xff]  ;;  %v1807_v18 = vld [vmem:[%s6705_s23 + $0x25] sm:$0xff]  ;;  %v1808_v30 = vld [vmem:[%s6705_s23 + $0x2d] sm:$0xff]  ;;  %5568 = vmatpush3.msk.msra.mxu0 %vm2400_vm1, %v2283_v32  ;;  %vm933_vm1 = vcmask 95296  }
  0xc7   : > { %465 = vst.msk [vmem:[#allocation2 + $0x18] sm:$0xff] %vm461_vm0, %v428_v14  ;;  %v1590_v19 = vld [vmem:[%s6705_s23 + $0x2c] sm:$0xff]  ;;  %v429_v20 = vld [vmem:[%s6705_s23 + $0x20] sm:$0xff]  ;;  %v1591_v37 = vld [vmem:[%s6705_s23 + $0x34] sm:$0xff] }
  0xc8   : > { %466 = vst.msk [vmem:[#allocation2 + $0x20] sm:$0xff] %vm461_vm0, %v429_v20  ;;  %v1155_v24 = vld [vmem:[%s6705_s23 + $0x23] sm:$0xff]  ;;  %v1156_v33 = vld [vmem:[%s6705_s23 + $0x2b] sm:$0xff]  ;;  %v1809_v39 = vld [vmem:[%s6705_s23 + $0x35] sm:$0xff] }
  0xc9   : > { %1009 = vrot.lane.b32.xlu1 %v936_v4, %s6426_s26  ;;  %v2025_v29 = vld [vmem:[%s6705_s23 + $0x26] sm:$0xff]  ;;  %v2026_v35 = vld [vmem:[%s6705_s23 + $0x2e] sm:$0xff]  ;;  %v1592_v40 = vld [vmem:[%s6705_s23 + $0x3c] sm:$0xff] }
  0xca   : > { %1007 = vrot.lane.b32.xlu0 %v935_v5, %s6426_s26  ;;  %v430_v31 = vld [vmem:[%s6705_s23 + $0x28] sm:$0xff]  ;;  %v939_v38 = vld [vmem:[%s6705_s23 + $0x32] sm:$0xff]  ;;  %v940_v43 = vld [vmem:[%s6705_s23 + $0x3a] sm:$0xff] }
  0xcb   : > { %467 = vst.msk [vmem:[#allocation2 + $0x28] sm:$0xff] %vm461_vm0, %v430_v31  ;;  %v503_v34 = vld [vmem:[%s6705_s23 + $0x21] sm:$0xff]  ;;  %v504_v36 = vld [vmem:[%s6705_s23 + $0x29] sm:$0xff]  ;;  %v1157_v42 = vld [vmem:[%s6705_s23 + $0x33] sm:$0xff] }
  0xcc   : > { %v431_v41 = vld [vmem:[%s6705_s23 + $0x30] sm:$0xff]  ;;  %v1810_v45 = vld [vmem:[%s6705_s23 + $0x3d] sm:$0xff]  ;;  %v1811_v53 = vld [vmem:[%s6705_s23 + $0x45] sm:$0xff] }
  0xcd   : > { %575 = vrot.lane.b32.xlu1 %v501_v6, %s6425_s20  ;;  %468 = vst.msk [vmem:[#allocation2 + $0x30] sm:$0xff] %vm461_vm0, %v431_v41  ;;  %v2027_v44 = vld [vmem:[%s6705_s23 + $0x36] sm:$0xff]  ;;  %v2028_v49 = vld [vmem:[%s6705_s23 + $0x3e] sm:$0xff]  ;;  %v1594_v54 = vld [vmem:[%s6705_s23 + $0x4c] sm:$0xff] }
  0xce   : > { %1225 = vrot.lane.b32.xlu0 %v1153_v7, %s6427_s21  ;;  %v432_v46 = vld [vmem:[%s6705_s23 + $0x38] sm:$0xff]  ;;  %v1593_v51 = vld [vmem:[%s6705_s23 + $0x44] sm:$0xff]  ;;  %v1812_v59 = vld [vmem:[%s6705_s23 + $0x4d] sm:$0xff] }
  0xcf   : > { %469 = vst.msk [vmem:[#allocation2 + $0x38] sm:$0xff] %vm461_vm0, %v432_v46  ;;  %v1158_v47 = vld [vmem:[%s6705_s23 + $0x3b] sm:$0xff]  ;;  %v505_v48 = vld [vmem:[%s6705_s23 + $0x31] sm:$0xff]  ;;  %v1159_v56 = vld [vmem:[%s6705_s23 + $0x43] sm:$0xff] }
  0xd0   : > { %v506_v50 = vld [vmem:[%s6705_s23 + $0x39] sm:$0xff]  ;;  %v941_v52 = vld [vmem:[%s6705_s23 + $0x42] sm:$0xff]  ;;  %v942_v57 = vld [vmem:[%s6705_s23 + $0x4a] sm:$0xff] }
  0xd1   : > { %1443 = vrot.lane.b32.xlu1 %v1371_v8, %s6428_s22  ;;  %v433_v55 = vld [vmem:[%s6705_s23 + $0x40] sm:$0xff]  ;;  %v434_v60 = vld [vmem:[%s6705_s23 + $0x48] sm:$0xff]  ;;  %v1595_v3 = vld [vmem:[%s6705_s23 + $0x54] sm:$0xff] }
  0xd2   : > { %1227 = vrot.lane.b32.xlu0 %v1154_v9, %s6427_s21  ;;  %470 = vst.msk [vmem:[#allocation2 + $0x40] sm:$0xff] %vm461_vm0, %v433_v55  ;;  %v2029_v58 = vld [vmem:[%s6705_s23 + $0x46] sm:$0xff]  ;;  %471 = vst.msk [vmem:[#allocation2 + $0x48] sm:$0xff] %vm461_vm0, %v434_v60  ;;  %v2030_v63 = vld [vmem:[%s6705_s23 + $0x4e] sm:$0xff] }
  0xd3   : > { %v1160_v61 = vld [vmem:[%s6705_s23 + $0x4b] sm:$0xff]  ;;  %v507_v62 = vld [vmem:[%s6705_s23 + $0x41] sm:$0xff]  ;;  %v1813_v9 = vld [vmem:[%s6705_s23 + $0x55] sm:$0xff] }
  0xd4   : > { %v508_v0 = vld [vmem:[%s6705_s23 + $0x49] sm:$0xff]  ;;  %v943_v6 = vld [vmem:[%s6705_s23 + $0x52] sm:$0xff]  ;;  %v1596_v10 = vld [vmem:[%s6705_s23 + $0x5c] sm:$0xff] }
  0xd5   : > { %793 = vrot.lane.b32.xlu1 %v935_v5, %s6424_s10  ;;  %v1161_v14 = vld [vmem:[%s6705_s23 + $0x53] sm:$0xff]  ;;  %v1162_v23 = vld [vmem:[%s6705_s23 + $0x5b] sm:$0xff] }
  0xd6   : > { %577 = vrot.lane.b32.xlu0 %v502_v11, %s6425_s20  ;;  %v435_v11 = vld [vmem:[%s6705_s23 + $0x50] sm:$0xff]  ;;  %v436_v20 = vld [vmem:[%s6705_s23 + $0x58] sm:$0xff]  ;;  %v437_v41 = vld [vmem:[%s6705_s23 + $0x60] sm:$0xff] }
  0xd7   : > { %472 = vst.msk [vmem:[#allocation2 + $0x50] sm:$0xff] %vm461_vm0, %v435_v11  ;;  %473 = vst.msk [vmem:[#allocation2 + $0x58] sm:$0xff] %vm461_vm0, %v436_v20  ;;  %v2032_v27 = vld [vmem:[%s6705_s23 + $0x5e] sm:$0xff] }
  0xd8   : > { %474 = vst.msk [vmem:[#allocation2 + $0x60] sm:$0xff] %vm461_vm0, %v437_v41  ;;  %v511_v55 = vld [vmem:[%s6705_s23 + $0x61] sm:$0xff] }
  0xd9   : > { %1661 = vrot.lane.b32.xlu1 %v1589_v15, %s6429_s18  ;;  %v441_v41 = vld [vmem:[%s6705_s23 + $0x80] sm:$0xff] }
  0xda   : > { %1445 = vrot.lane.b32.xlu0 %v1372_v16, %s6428_s22  ;;  %478 = vst.msk [vmem:[#allocation2 + $0x80] sm:$0xff] %vm461_vm0, %v441_v41  ;;  %v7145_v41 = vld [vmem:[%s6705_s23 + $0xac] sm:$0xff] }
  0xdd   : > { %1011 = vrot.lane.b32.xlu1 %v937_v17, %s6426_s26 }
  0xde   : > { %795 = vrot.lane.b32.xlu0 %v936_v4, %s6424_s10 }
  0xe1   : > { %1879 = vrot.lane.b32.xlu1 %v1807_v18, %s6430_s27  ;;  %v2031_v18 = vld [vmem:[%s6705_s23 + $0x56] sm:$0xff] }
  0xe2   : > { %1663 = vrot.lane.b32.xlu0 %v1590_v19, %s6429_s18 }
  0xe5   : > { %1229 = vrot.lane.b32.xlu1 %v1155_v24, %s6427_s21  ;;  %v509_v24 = vld [vmem:[%s6705_s23 + $0x51] sm:$0xff] }
  0xe6   : > { %1013 = vrot.lane.b32.xlu0 %v938_v25, %s6426_s26 }
  0xe9   : > { %2097 = vrot.lane.b32.xlu1 %v2025_v29, %s6431_s13 }
  0xea   : > { %1881 = vrot.lane.b32.xlu0 %v1808_v30, %s6430_s27  ;;  %v510_v30 = vld [vmem:[%s6705_s23 + $0x59] sm:$0xff] }
  0xed   : > { %1231 = vrot.lane.b32.xlu1 %v1156_v33, %s6427_s21  ;;  %v1597_v33 = vld [vmem:[%s6705_s23 + $0x64] sm:$0xff] }
  0xee   : > { %579 = vrot.lane.b32.xlu0 %v503_v34, %s6425_s20 }
  0xf1   : > { %2099 = vrot.lane.b32.xlu1 %v2026_v35, %s6431_s13 }
  0xf2   : > { %1447 = vrot.lane.b32.xlu0 %v1589_v15, %s6428_s22  ;;  %v944_v15 = vld [vmem:[%s6705_s23 + $0x5a] sm:$0xff] }
  0xf5   : > { %797 = vrot.lane.b32.xlu1 %v937_v17, %s6424_s10 }
  0xf6   : > { %581 = vrot.lane.b32.xlu0 %v504_v36, %s6425_s20  ;;  %v945_v36 = vld [vmem:[%s6705_s23 + $0x62] sm:$0xff] }
  0xf9   : > { %1665 = vrot.lane.b32.xlu1 %v1591_v37, %s6429_s18 }
  0xfa   : > { %1449 = vrot.lane.b32.xlu0 %v1590_v19, %s6428_s22  ;;  %v1814_v19 = vld [vmem:[%s6705_s23 + $0x5d] sm:$0xff] }
  0xfd   : > { %1015 = vrot.lane.b32.xlu1 %v939_v38, %s6426_s26 }
  0xfe   : > { %799 = vrot.lane.b32.xlu0 %v938_v25, %s6424_s10 }
 0x101   : > { %1883 = vrot.lane.b32.xlu1 %v1809_v39, %s6430_s27  ;;  %v1815_v39 = vld [vmem:[%s6705_s23 + $0x65] sm:$0xff] }
 0x102   : > { %1667 = vrot.lane.b32.xlu0 %v1592_v40, %s6429_s18 }
 0x105   : > { %1233 = vrot.lane.b32.xlu1 %v1157_v42, %s6427_s21 }
 0x106   : > { %1017 = vrot.lane.b32.xlu0 %v940_v43, %s6426_s26 }
 0x109   : > { %2101 = vrot.lane.b32.xlu1 %v2027_v44, %s6431_s13  ;;  %v1163_v44 = vld [vmem:[%s6705_s23 + $0x63] sm:$0xff] }
 0x10a   : > { %1885 = vrot.lane.b32.xlu0 %v1810_v45, %s6430_s27  ;;  %v946_v45 = vld [vmem:[%s6705_s23 + $0x6a] sm:$0xff] }
 0x10d   : > { %1235 = vrot.lane.b32.xlu1 %v1158_v47, %s6427_s21 }
 0x10e   : > { %583 = vrot.lane.b32.xlu0 %v505_v48, %s6425_s20 }
 0x111   : > { %2103 = vrot.lane.b32.xlu1 %v2028_v49, %s6431_s13  ;;  %v2033_v49 = vld [vmem:[%s6705_s23 + $0x66] sm:$0xff] }
 0x112   : > { %1451 = vrot.lane.b32.xlu0 %v1591_v37, %s6428_s22 }
 0x115   : > { %801 = vrot.lane.b32.xlu1 %v939_v38, %s6424_s10 }
 0x116   : > { %585 = vrot.lane.b32.xlu0 %v506_v50, %s6425_s20  ;;  %v1816_v50 = vld [vmem:[%s6705_s23 + $0x6d] sm:$0xff] }
 0x119   : > { %1669 = vrot.lane.b32.xlu1 %v1593_v51, %s6429_s18 }
 0x11a   : > { %1453 = vrot.lane.b32.xlu0 %v1592_v40, %s6428_s22  ;;  %v1598_v40 = vld [vmem:[%s6705_s23 + $0x6c] sm:$0xff] }
 0x11d   : > { %1019 = vrot.lane.b32.xlu1 %v941_v52, %s6426_s26 }
 0x11e   : > { %803 = vrot.lane.b32.xlu0 %v940_v43, %s6424_s10 }
 0x121   : > { %1887 = vrot.lane.b32.xlu1 %v1811_v53, %s6430_s27 }
 0x122   : > { %1671 = vrot.lane.b32.xlu0 %v1594_v54, %s6429_s18 }
 0x125   : > { %1237 = vrot.lane.b32.xlu1 %v1159_v56, %s6427_s21 }
 0x126   : > { %1021 = vrot.lane.b32.xlu0 %v942_v57, %s6426_s26 }
 0x129   : > { %2105 = vrot.lane.b32.xlu1 %v2029_v58, %s6431_s13 }
 0x12a   : > { %1889 = vrot.lane.b32.xlu0 %v1812_v59, %s6430_s27  ;;  %v2034_v59 = vld [vmem:[%s6705_s23 + $0x6e] sm:$0xff] }
 0x12d   : > { %1239 = vrot.lane.b32.xlu1 %v1160_v61, %s6427_s21 }
 0x12e   : > { %587 = vrot.lane.b32.xlu0 %v507_v62, %s6425_s20  ;;  %v512_v62 = vld [vmem:[%s6705_s23 + $0x69] sm:$0xff] }
 0x131   : > { %2107 = vrot.lane.b32.xlu1 %v2030_v63, %s6431_s13 }
 0x132   : > { %1455 = vrot.lane.b32.xlu0 %v1593_v51, %s6428_s22  ;;  %v438_v51 = vld [vmem:[%s6705_s23 + $0x68] sm:$0xff] }
 0x133   : > { %v790_v1 = vpop.permute.xlu1 %789  ;;  %475 = vst.msk [vmem:[#allocation2 + $0x68] sm:$0xff] %vm461_vm0, %v438_v51  ;;  %v442_v51 = vld [vmem:[%s6705_s23 + $0x88] sm:$0xff] }
 0x134   : > { %v572_v2 = vpop.permute.xlu0 %571  ;;  %479 = vst.msk [vmem:[#allocation2 + $0x88] sm:$0xff] %vm461_vm0, %v442_v51  ;;  %v1824_v51 = vld [vmem:[%s6705_s23 + $0xad] sm:$0xff] }
 0x135   : > { %680 = vst.msk [vmem:[#allocation2] sm:$0xff] %vm679_vm2, %v572_v2  ;;  %805 = vrot.lane.b32.xlu1 %v941_v52, %s6424_s10 }
 0x136   : > { %589 = vrot.lane.b32.xlu0 %v508_v0, %s6425_s20  ;;  %898 = vst.msk [vmem:[#allocation2] sm:$0xff] %vm897_vm3, %v790_v1  ;;  %v1599_v1 = vld [vmem:[%s6705_s23 + $0x74] sm:$0xff] }
 0x137   : > { %v792_v4 = vpop.permute.xlu1 %791 }
 0x138   : > { %v574_v5 = vpop.permute.xlu0 %573 }
 0x139   : > { %681 = vst.msk [vmem:[#allocation2 + $0x8] sm:$0xff] %vm679_vm2, %v574_v5  ;;  %1673 = vrot.lane.b32.xlu1 %v1595_v3, %s6429_s18 }
 0x13a   : > { %1457 = vrot.lane.b32.xlu0 %v1594_v54, %s6428_s22  ;;  %899 = vst.msk [vmem:[#allocation2 + $0x8] sm:$0xff] %vm897_vm3, %v792_v4  ;;  %v1164_v54 = vld [vmem:[%s6705_s23 + $0x6b] sm:$0xff] }
 0x13b   : > { %v1010_v7 = vpop.permute.xlu1 %1009  ;;  %v947_v4 = vld [vmem:[%s6705_s23 + $0x72] sm:$0xff] }
 0x13c   : > { %v1008_v8 = vpop.permute.xlu0 %1007  ;;  %1117 = vst.msk [vmem:[#allocation2 + $0x8] sm:$0xff] %vm1115_vm4, %v1010_v7  ;;  %v1817_v7 = vld [vmem:[%s6705_s23 + $0x75] sm:$0xff] }
 0x13d   : > { %1116 = vst.msk [vmem:[#allocation2] sm:$0xff] %vm1115_vm4, %v1008_v8  ;;  %1023 = vrot.lane.b32.xlu1 %v943_v6, %s6426_s26  ;;  %v1600_v8 = vld [vmem:[%s6705_s23 + $0x7c] sm:$0xff] }
 0x13e   : > { %807 = vrot.lane.b32.xlu0 %v942_v57, %s6424_s10 }
 0x13f   : > { %v576_v12 = vpop.permute.xlu1 %575 }
 0x140   : > { %v1226_v13 = vpop.permute.xlu0 %1225  ;;  %682 = vst.msk [vmem:[#allocation2 + $0x10] sm:$0xff] %vm679_vm2, %v576_v12  ;;  %v1165_v12 = vld [vmem:[%s6705_s23 + $0x73] sm:$0xff] }
 0x141   : > { %1334 = vst.msk [vmem:[#allocation2] sm:$0xff] %vm1333_vm5, %v1226_v13  ;;  %1891 = vrot.lane.b32.xlu1 %v1813_v9, %s6430_s27  ;;  %v439_v9 = vld [vmem:[%s6705_s23 + $0x70] sm:$0xff]  ;;  %v948_v13 = vld [vmem:[%s6705_s23 + $0x7a] sm:$0xff] }
 0x142   : > { %1675 = vrot.lane.b32.xlu0 %v1596_v10, %s6429_s18  ;;  %476 = vst.msk [vmem:[#allocation2 + $0x70] sm:$0xff] %vm461_vm0, %v439_v9  ;;  %v443_v9 = vld [vmem:[%s6705_s23 + $0x90] sm:$0xff] }
 0x143   : > { %v1444_v16 = vpop.permute.xlu1 %1443  ;;  %480 = vst.msk [vmem:[#allocation2 + $0x90] sm:$0xff] %vm461_vm0, %v443_v9  ;;  %v1608_v9 = vld [vmem:[%s6705_s23 + $0xbc] sm:$0xff] }
 0x144   : > { %v1228_v17 = vpop.permute.xlu0 %1227  ;;  %1552 = vst.msk [vmem:[#allocation2] sm:$0xff] %vm1551_vm6, %v1444_v16 }
 0x145   : > { %1335 = vst.msk [vmem:[#allocation2 + $0x8] sm:$0xff] %vm1333_vm5, %v1228_v17  ;;  %1241 = vrot.lane.b32.xlu1 %v1161_v14, %s6427_s21  ;;  %v2035_v17 = vld [vmem:[%s6705_s23 + $0x76] sm:$0xff] }
 0x146   : > { %1025 = vrot.lane.b32.xlu0 %v944_v15, %s6426_s26 }
 0x147   : > { %v794_v21 = vpop.permute.xlu1 %793 }
 0x148   : > { %v578_v22 = vpop.permute.xlu0 %577  ;;  %900 = vst.msk [vmem:[#allocation2 + $0x10] sm:$0xff] %vm897_vm3, %v794_v21 }
 0x149   : > { %683 = vst.msk [vmem:[#allocation2 + $0x18] sm:$0xff] %vm679_vm2, %v578_v22  ;;  %2109 = vrot.lane.b32.xlu1 %v2031_v18, %s6431_s13  ;;  %v1818_v18 = vld [vmem:[%s6705_s23 + $0x7d] sm:$0xff] }
 0x14a   : > { %1893 = vrot.lane.b32.xlu0 %v1814_v19, %s6430_s27  ;;  %v440_v19 = vld [vmem:[%s6705_s23 + $0x78] sm:$0xff] }
 0x14b   : > { %v1662_v25 = vpop.permute.xlu1 %1661  ;;  %477 = vst.msk [vmem:[#allocation2 + $0x78] sm:$0xff] %vm461_vm0, %v440_v19  ;;  %v1166_v22 = vld [vmem:[%s6705_s23 + $0x7b] sm:$0xff]  ;;  %v6432_v19 = vmov 0.0  }
 0x14c   : > { %v1446_v26 = vpop.permute.xlu0 %1445  ;;  %1770 = vst.msk [vmem:[#allocation2] sm:$0xff] %vm1769_vm7, %v1662_v25  ;;  %4371 = vst [vmem:[#allocation9] sm:$0x1] %v6432_v19 }
 0x14d   : > { %1553 = vst.msk [vmem:[#allocation2 + $0x8] sm:$0xff] %vm1551_vm6, %v1446_v26  ;;  %1243 = vrot.lane.b32.xlu1 %v1162_v23, %s6427_s21  ;;  %v513_v23 = vld [vmem:[%s6705_s23 + $0x71] sm:$0xff]  ;;  %4372 = vst [vmem:[#allocation9 + $0x17] sm:$0x1] %v6432_v19 }
 0x14e   : > { %591 = vrot.lane.b32.xlu0 %v509_v24, %s6425_s20  ;;  %2686 = vst.msk [vmem:[#allocation3] sm:$0x1] %vm2685_vm12, %v6432_v19  ;;  %2687 = vst.msk [vmem:[#allocation3 + $0x11f] sm:$0x1] %vm2685_vm12, %v6432_v19  ;;  %vm2241_vm12 = vcmask 292096  }
 0x14f   : > { %v1012_v28 = vpop.permute.xlu1 %1011  ;;  %3020 = vst.msk [vmem:[#allocation4] sm:$0xff] %vm2688_vm11, %v6432_v19  ;;  %3030 = vst.msk [vmem:[#allocation4 + $0x59] sm:$0xff] %vm2688_vm11, %v6432_v19 }
 0x150   : > { %v796_v29 = vpop.permute.xlu0 %795  ;;  %1118 = vst.msk [vmem:[#allocation2 + $0x10] sm:$0xff] %vm1115_vm4, %v1012_v28  ;;  %4411 = vst [vmem:[#allocation10] sm:$0x1f] %v6432_v19 }
 0x151   : > { %901 = vst.msk [vmem:[#allocation2 + $0x18] sm:$0xff] %vm897_vm3, %v796_v29  ;;  %2111 = vrot.lane.b32.xlu1 %v2032_v27, %s6431_s13  ;;  %v2036_v27 = vld [vmem:[%s6705_s23 + $0x7e] sm:$0xff]  ;;  %4412 = vst [vmem:[#allocation10 + $0x7] sm:$0x3] %v6432_v19 }
 0x152   : > { %1459 = vrot.lane.b32.xlu0 %v1595_v3, %s6428_s22  ;;  %4413 = vst [vmem:[#allocation10 + $0xb] sm:$0x1f] %v6432_v19  ;;  %3023 = vst.msk [vmem:[#allocation4 + $0x13] sm:$0x3] %vm2726_vm13, %v6432_v19 }
 0x153   : > { %v1880_v31 = vpop.permute.xlu1 %1879  ;;  %3024 = vst.msk [vmem:[#allocation4 + $0x1d] sm:$0x3] %vm2726_vm13, %v6432_v19  ;;  %3025 = vst.msk [vmem:[#allocation4 + $0x27] sm:$0x3] %vm2726_vm13, %v6432_v19 }
 0x154   : > { %v1664_v32 = vpop.permute.xlu0 %1663  ;;  %1988 = vst.msk [vmem:[#allocation2] sm:$0xff] %vm1987_vm8, %v1880_v31 }
 0x155   : > { %1771 = vst.msk [vmem:[#allocation2 + $0x8] sm:$0xff] %vm1769_vm7, %v1664_v32  ;;  %809 = vrot.lane.b32.xlu1 %v943_v6, %s6424_s10 }
 0x156   : > { %593 = vrot.lane.b32.xlu0 %v510_v30, %s6425_s20  ;;  %v514_v30 = vld [vmem:[%s6705_s23 + $0x79] sm:$0xff]  ;;  %3026 = vst.msk [vmem:[#allocation4 + $0x31] sm:$0x3] %vm2726_vm13, %v6432_v19  ;;  %3027 = vst.msk [vmem:[#allocation4 + $0x3b] sm:$0x3] %vm2726_vm13, %v6432_v19 }
 0x157   : > { %v1230_v34 = vpop.permute.xlu1 %1229  ;;  %3028 = vst.msk [vmem:[#allocation4 + $0x45] sm:$0x3] %vm2726_vm13, %v6432_v19  ;;  %3029 = vst.msk [vmem:[#allocation4 + $0x4f] sm:$0x3] %vm2726_vm13, %v6432_v19 }
 0x158   : > { %v1014_v35 = vpop.permute.xlu0 %1013  ;;  %1336 = vst.msk [vmem:[#allocation2 + $0x10] sm:$0xff] %vm1333_vm5, %v1230_v34 }
 0x159   : > { %1119 = vst.msk [vmem:[#allocation2 + $0x18] sm:$0xff] %vm1115_vm4, %v1014_v35  ;;  %1677 = vrot.lane.b32.xlu1 %v1597_v33, %s6429_s18 }
 0x15a   : > { %1461 = vrot.lane.b32.xlu0 %v1596_v10, %s6428_s22  ;;  %3022 = vst.msk [vmem:[#allocation4 + $0x8] sm:$0x7] %vm3021_vm14, %v6432_v19  ;;  %3031 = vst.msk [vmem:[#allocation4 + $0x61] sm:$0x7] %vm3021_vm14, %v6432_v19  ;;  %vm3174_vm14 = vcmask 783872  }
 0x15b   : > { %v2098_v37 = vpop.permute.xlu1 %2097 }
 0x15c   : > { %v1882_v38 = vpop.permute.xlu0 %1881  ;;  %2206 = vst.msk [vmem:[#allocation2] sm:$0xff] %vm2205_vm9, %v2098_v37 }
 0x15d   : > { %1989 = vst.msk [vmem:[#allocation2 + $0x8] sm:$0xff] %vm1987_vm8, %v1882_v38  ;;  %1027 = vrot.lane.b32.xlu1 %v945_v36, %s6426_s26 }
 0x15e   : > { %811 = vrot.lane.b32.xlu0 %v944_v15, %s6424_s10 }
 0x15f   : > { %v1232_v42 = vpop.permute.xlu1 %1231 }
 0x160   : > { %v580_v43 = vpop.permute.xlu0 %579  ;;  %1337 = vst.msk [vmem:[#allocation2 + $0x18] sm:$0xff] %vm1333_vm5, %v1232_v42 }
 0x161   : > { %684 = vst.msk [vmem:[#allocation2 + $0x20] sm:$0xff] %vm679_vm2, %v580_v43  ;;  %1895 = vrot.lane.b32.xlu1 %v1815_v39, %s6430_s27  ;;  %v1819_v39 = vld [vmem:[%s6705_s23 + $0x85] sm:$0xff] }
 0x162   : > { %1679 = vrot.lane.b32.xlu0 %v1598_v40, %s6429_s18 }
 0x163   : > { %v2100_v46 = vpop.permute.xlu1 %2099  ;;  %v2243_v48 = vld [vmem:[#allocation2] sm:$0xff] }
 0x164   : > { %v1448_v47 = vpop.permute.xlu0 %1447  ;;  %2207 = vst.msk [vmem:[#allocation2 + $0x8] sm:$0xff] %vm2205_vm9, %v2100_v46  ;;  %5569 = vmatprep.mubr.msk.f32.mxu0 %vm2291_vm10, %v2243_v48 }
 0x165   : > { %1554 = vst.msk [vmem:[#allocation2 + $0x10] sm:$0xff] %vm1551_vm6, %v1448_v47  ;;  %1245 = vrot.lane.b32.xlu1 %v1163_v44, %s6427_s21  ;;  %v1167_v44 = vld [vmem:[%s6705_s23 + $0x83] sm:$0xff] }
 0x166   : > { %1029 = vrot.lane.b32.xlu0 %v946_v45, %s6426_s26 }
 0x167   : > { %v798_v52 = vpop.permute.xlu1 %797 }
 0x168   : > { %v582_v53 = vpop.permute.xlu0 %581  ;;  %902 = vst.msk [vmem:[#allocation2 + $0x20] sm:$0xff] %vm897_vm3, %v798_v52 }
 0x169   : > { %685 = vst.msk [vmem:[#allocation2 + $0x28] sm:$0xff] %vm679_vm2, %v582_v53  ;;  %2113 = vrot.lane.b32.xlu1 %v2033_v49, %s6431_s13  ;;  %v2037_v49 = vld [vmem:[%s6705_s23 + $0x86] sm:$0xff] }
 0x16a   : > { %1897 = vrot.lane.b32.xlu0 %v1816_v50, %s6430_s27  ;;  %v1820_v50 = vld [vmem:[%s6705_s23 + $0x8d] sm:$0xff] }
 0x16b   : > { %v1666_v56 = vpop.permute.xlu1 %1665  ;;  %v2244_v58 = vld [vmem:[#allocation2 + $0x8] sm:$0xff] }
 0x16c   : > { %v1450_v57 = vpop.permute.xlu0 %1449  ;;  %1772 = vst.msk [vmem:[#allocation2 + $0x10] sm:$0xff] %vm1769_vm7, %v1666_v56  ;;  %5570 = vmatmul.mubr.msk.f32.vlgmr.msra.gmra.mrb[0].mxu0 %vm2291_vm10, %v2244_v58 }
 0x16d   : > { %1555 = vst.msk [vmem:[#allocation2 + $0x18] sm:$0xff] %vm1551_vm6, %v1450_v57  ;;  %1247 = vrot.lane.b32.xlu1 %v1164_v54, %s6427_s21  ;;  %v1168_v54 = vld [vmem:[%s6705_s23 + $0x8b] sm:$0xff] }
 0x16e   : > { %595 = vrot.lane.b32.xlu0 %v511_v55, %s6425_s20  ;;  %v515_v55 = vld [vmem:[%s6705_s23 + $0x81] sm:$0xff] }
 0x16f   : > { %v1016_v60 = vpop.permute.xlu1 %1015 }
 0x170   : > { %v800_v61 = vpop.permute.xlu0 %799  ;;  %1120 = vst.msk [vmem:[#allocation2 + $0x20] sm:$0xff] %vm1115_vm4, %v1016_v60 }
 0x171   : > { %903 = vst.msk [vmem:[#allocation2 + $0x28] sm:$0xff] %vm897_vm3, %v800_v61  ;;  %2115 = vrot.lane.b32.xlu1 %v2034_v59, %s6431_s13  ;;  %v2038_v59 = vld [vmem:[%s6705_s23 + $0x8e] sm:$0xff] }
 0x172   : > { %1463 = vrot.lane.b32.xlu0 %v1597_v33, %s6428_s22  ;;  %v1601_v33 = vld [vmem:[%s6705_s23 + $0x84] sm:$0xff] }
 0x173   : > { %v1884_v63 = vpop.permute.xlu1 %1883 }
 0x174   : > { %v1668_v0 = vpop.permute.xlu0 %1667  ;;  %1990 = vst.msk [vmem:[#allocation2 + $0x10] sm:$0xff] %vm1987_vm8, %v1884_v63 }
 0x175   : > { %1773 = vst.msk [vmem:[#allocation2 + $0x18] sm:$0xff] %vm1769_vm7, %v1668_v0  ;;  %813 = vrot.lane.b32.xlu1 %v945_v36, %s6424_s10  ;;  %v949_v36 = vld [vmem:[%s6705_s23 + $0x82] sm:$0xff] }
 0x176   : > { %597 = vrot.lane.b32.xlu0 %v512_v62, %s6425_s20  ;;  %v516_v62 = vld [vmem:[%s6705_s23 + $0x89] sm:$0xff] }
 0x177   : > { %v1234_v2 = vpop.permute.xlu1 %1233 }
 0x178   : > { %v1018_v3 = vpop.permute.xlu0 %1017  ;;  %1338 = vst.msk [vmem:[#allocation2 + $0x20] sm:$0xff] %vm1333_vm5, %v1234_v2 }
 0x179   : > { %1121 = vst.msk [vmem:[#allocation2 + $0x28] sm:$0xff] %vm1115_vm4, %v1018_v3  ;;  %1681 = vrot.lane.b32.xlu1 %v1599_v1, %s6429_s18 }
 0x17a   : > { %1465 = vrot.lane.b32.xlu0 %v1598_v40, %s6428_s22  ;;  %v1602_v40 = vld [vmem:[%s6705_s23 + $0x8c] sm:$0xff] }
 0x17b   : > { %v2102_v5 = vpop.permute.xlu1 %2101 }
 0x17c   : > { %v1886_v6 = vpop.permute.xlu0 %1885  ;;  %2208 = vst.msk [vmem:[#allocation2 + $0x10] sm:$0xff] %vm2205_vm9, %v2102_v5 }
 0x17d   : > { %1991 = vst.msk [vmem:[#allocation2 + $0x18] sm:$0xff] %vm1987_vm8, %v1886_v6  ;;  %1031 = vrot.lane.b32.xlu1 %v947_v4, %s6426_s26 }
 0x17e   : > { %815 = vrot.lane.b32.xlu0 %v946_v45, %s6424_s10  ;;  %v950_v45 = vld [vmem:[%s6705_s23 + $0x8a] sm:$0xff] }
 0x17f   : > { %v1236_v10 = vpop.permute.xlu1 %1235 }
 0x180   : > { %v584_v11 = vpop.permute.xlu0 %583  ;;  %1339 = vst.msk [vmem:[#allocation2 + $0x28] sm:$0xff] %vm1333_vm5, %v1236_v10 }
 0x181   : > { %686 = vst.msk [vmem:[#allocation2 + $0x30] sm:$0xff] %vm679_vm2, %v584_v11  ;;  %1899 = vrot.lane.b32.xlu1 %v1817_v7, %s6430_s27  ;;  %v1821_v7 = vld [vmem:[%s6705_s23 + $0x95] sm:$0xff] }
 0x182   : > { %1683 = vrot.lane.b32.xlu0 %v1600_v8, %s6429_s18 }
 0x183   : > { %v2104_v14 = vpop.permute.xlu1 %2103  ;;  %v2245_v16 = vld [vmem:[#allocation2 + $0x10] sm:$0xff] }
 0x184   : > { %v1452_v15 = vpop.permute.xlu0 %1451  ;;  %2209 = vst.msk [vmem:[#allocation2 + $0x18] sm:$0xff] %vm2205_vm9, %v2104_v14  ;;  %5572 = vmatprep.mubr.msk.f32.mxu0 %vm2291_vm10, %v2245_v16 }
 0x185   : > { %1556 = vst.msk [vmem:[#allocation2 + $0x20] sm:$0xff] %vm1551_vm6, %v1452_v15  ;;  %1249 = vrot.lane.b32.xlu1 %v1165_v12, %s6427_s21  ;;  %v1169_v12 = vld [vmem:[%s6705_s23 + $0x93] sm:$0xff] }
 0x186   : > { %1033 = vrot.lane.b32.xlu0 %v948_v13, %s6426_s26 }
 0x187   : > { %v802_v20 = vpop.permute.xlu1 %801 }
 0x188   : > { %v586_v21 = vpop.permute.xlu0 %585  ;;  %904 = vst.msk [vmem:[#allocation2 + $0x30] sm:$0xff] %vm897_vm3, %v802_v20 }
 0x189   : > { %687 = vst.msk [vmem:[#allocation2 + $0x38] sm:$0xff] %vm679_vm2, %v586_v21  ;;  %2117 = vrot.lane.b32.xlu1 %v2035_v17, %s6431_s13  ;;  %v2039_v17 = vld [vmem:[%s6705_s23 + $0x96] sm:$0xff] }
 0x18a   : > { %1901 = vrot.lane.b32.xlu0 %v1818_v18, %s6430_s27  ;;  %v1822_v18 = vld [vmem:[%s6705_s23 + $0x9d] sm:$0xff] }
 0x18b   : > { %v1670_v24 = vpop.permute.xlu1 %1669  ;;  %v2246_v26 = vld [vmem:[#allocation2 + $0x18] sm:$0xff] }
 0x18c   : > { %v1454_v25 = vpop.permute.xlu0 %1453  ;;  %1774 = vst.msk [vmem:[#allocation2 + $0x20] sm:$0xff] %vm1769_vm7, %v1670_v24  ;;  %5573 = vmatmul.mubr.msk.f32.gmra.mrb[2].mxu0 %vm2291_vm10, %v2246_v26  ;;  %v517_v24 = vld [vmem:[%s6705_s23 + $0x91] sm:$0xff] }
 0x18d   : > { %1557 = vst.msk [vmem:[#allocation2 + $0x28] sm:$0xff] %vm1551_vm6, %v1454_v25  ;;  %1251 = vrot.lane.b32.xlu1 %v1166_v22, %s6427_s21  ;;  %v444_v22 = vld [vmem:[%s6705_s23 + $0x98] sm:$0xff] }
 0x18e   : > { %599 = vrot.lane.b32.xlu0 %v513_v23, %s6425_s20  ;;  %481 = vst.msk [vmem:[#allocation2 + $0x98] sm:$0xff] %vm461_vm0, %v444_v22  ;;  %v1170_v23 = vld [vmem:[%s6705_s23 + $0x9b] sm:$0xff] }
 0x18f   : > { %v1020_v28 = vpop.permute.xlu1 %1019 }
 0x190   : > { %v804_v29 = vpop.permute.xlu0 %803  ;;  %1122 = vst.msk [vmem:[#allocation2 + $0x30] sm:$0xff] %vm1115_vm4, %v1020_v28  ;;  %v2040_v28 = vld [vmem:[%s6705_s23 + $0x9e] sm:$0xff] }
 0x191   : > { %905 = vst.msk [vmem:[#allocation2 + $0x38] sm:$0xff] %vm897_vm3, %v804_v29  ;;  %2119 = vrot.lane.b32.xlu1 %v2036_v27, %s6431_s13 }
 0x192   : > { %1467 = vrot.lane.b32.xlu0 %v1599_v1, %s6428_s22  ;;  %v7051_v1 = vld [vmem:[%s6705_s23 + $0x94] sm:$0xff] }
 0x193   : > { %v1888_v31 = vpop.permute.xlu1 %1887 }
 0x194   : > { %v1672_v32 = vpop.permute.xlu0 %1671  ;;  %1992 = vst.msk [vmem:[#allocation2 + $0x20] sm:$0xff] %vm1987_vm8, %v1888_v31  ;;  %v518_v31 = vld [vmem:[%s6705_s23 + $0x99] sm:$0xff] }
 0x195   : > { %1775 = vst.msk [vmem:[#allocation2 + $0x28] sm:$0xff] %vm1769_vm7, %v1672_v32  ;;  %817 = vrot.lane.b32.xlu1 %v947_v4, %s6424_s10  ;;  %v7059_v4 = vld [vmem:[%s6705_s23 + $0x92] sm:$0xff] }
 0x196   : > { %601 = vrot.lane.b32.xlu0 %v514_v30, %s6425_s20 }
 0x197   : > { %v1238_v34 = vpop.permute.xlu1 %1237 }
 0x198   : > { %v1022_v35 = vpop.permute.xlu0 %1021  ;;  %1340 = vst.msk [vmem:[#allocation2 + $0x30] sm:$0xff] %vm1333_vm5, %v1238_v34  ;;  %v7126_v34 = vld [vmem:[%s6705_s23 + $0xa4] sm:$0xff] }
 0x199   : > { %1123 = vst.msk [vmem:[#allocation2 + $0x38] sm:$0xff] %vm1115_vm4, %v1022_v35  ;;  %1685 = vrot.lane.b32.xlu1 %v1601_v33, %s6429_s18 }
 0x19a   : > { %1469 = vrot.lane.b32.xlu0 %v1600_v8, %s6428_s22  ;;  %v7068_v8 = vld [vmem:[%s6705_s23 + $0x9c] sm:$0xff] }
 0x19b   : > { %v2106_v37 = vpop.permute.xlu1 %2105 }
 0x19c   : > { %v1890_v38 = vpop.permute.xlu0 %1889  ;;  %2210 = vst.msk [vmem:[#allocation2 + $0x20] sm:$0xff] %vm2205_vm9, %v2106_v37  ;;  %v7135_v37 = vld [vmem:[%s6705_s23 + $0xa2] sm:$0xff] }
 0x19d   : > { %1993 = vst.msk [vmem:[#allocation2 + $0x28] sm:$0xff] %vm1987_vm8, %v1890_v38  ;;  %1035 = vrot.lane.b32.xlu1 %v949_v36, %s6426_s26 }
 0x19e   : > { %819 = vrot.lane.b32.xlu0 %v948_v13, %s6424_s10  ;;  %v7079_v13 = vld [vmem:[%s6705_s23 + $0x9a] sm:$0xff] }
 0x19f   : > { %v1240_v42 = vpop.permute.xlu1 %1239 }
 0x1a0   : > { %v588_v43 = vpop.permute.xlu0 %587  ;;  %1341 = vst.msk [vmem:[#allocation2 + $0x38] sm:$0xff] %vm1333_vm5, %v1240_v42 }
 0x1a1   : > { %688 = vst.msk [vmem:[#allocation2 + $0x40] sm:$0xff] %vm679_vm2, %v588_v43  ;;  %1903 = vrot.lane.b32.xlu1 %v1819_v39, %s6430_s27 }
 0x1a2   : > { %1687 = vrot.lane.b32.xlu0 %v1602_v40, %s6429_s18 }
 0x1a3   : > { %v2108_v46 = vpop.permute.xlu1 %2107  ;;  %v2247_v48 = vld [vmem:[#allocation2 + $0x20] sm:$0xff] }
 0x1a4   : > { %v1456_v47 = vpop.permute.xlu0 %1455  ;;  %2211 = vst.msk [vmem:[#allocation2 + $0x28] sm:$0xff] %vm2205_vm9, %v2108_v46  ;;  %5575 = vmatprep.mubr.msk.f32.mxu0 %vm2291_vm10, %v2247_v48  ;;  %v7156_v46 = vld [vmem:[%s6705_s23 + $0xaa] sm:$0xff] }
 0x1a5   : > { %1558 = vst.msk [vmem:[#allocation2 + $0x30] sm:$0xff] %vm1551_vm6, %v1456_v47  ;;  %1253 = vrot.lane.b32.xlu1 %v1167_v44, %s6427_s21  ;;  %v445_v44 = vld [vmem:[%s6705_s23 + $0xa0] sm:$0xff] }
 0x1a6   : > { %1037 = vrot.lane.b32.xlu0 %v950_v45, %s6426_s26  ;;  %482 = vst.msk [vmem:[#allocation2 + $0xa0] sm:$0xff] %vm461_vm0, %v445_v44 }
 0x1a7   : > { %v806_v52 = vpop.permute.xlu1 %805 }
 0x1a8   : > { %v590_v53 = vpop.permute.xlu0 %589  ;;  %906 = vst.msk [vmem:[#allocation2 + $0x40] sm:$0xff] %vm897_vm3, %v806_v52 }
 0x1a9   : > { %689 = vst.msk [vmem:[#allocation2 + $0x48] sm:$0xff] %vm679_vm2, %v590_v53  ;;  %2121 = vrot.lane.b32.xlu1 %v2037_v49, %s6431_s13 }
 0x1aa   : > { %1905 = vrot.lane.b32.xlu0 %v1820_v50, %s6430_s27  ;;  %v2041_v50 = vld [vmem:[%s6705_s23 + $0xa6] sm:$0xff] }
 0x1ab   : > { %v1674_v56 = vpop.permute.xlu1 %1673  ;;  %v2248_v58 = vld [vmem:[#allocation2 + $0x28] sm:$0xff] }
 0x1ac   : > { %v1458_v57 = vpop.permute.xlu0 %1457  ;;  %1776 = vst.msk [vmem:[#allocation2 + $0x30] sm:$0xff] %vm1769_vm7, %v1674_v56  ;;  %5576 = vmatmul.mubr.msk.f32.gmra.mrb[4].mxu0 %vm2291_vm10, %v2248_v58  ;;  %v519_v56 = vld [vmem:[%s6705_s23 + $0xa1] sm:$0xff] }
 0x1ad   : > { %1559 = vst.msk [vmem:[#allocation2 + $0x38] sm:$0xff] %vm1551_vm6, %v1458_v57  ;;  %1255 = vrot.lane.b32.xlu1 %v1168_v54, %s6427_s21  ;;  %v446_v54 = vld [vmem:[%s6705_s23 + $0xa8] sm:$0xff] }
 0x1ae   : > { %603 = vrot.lane.b32.xlu0 %v515_v55, %s6425_s20  ;;  %483 = vst.msk [vmem:[#allocation2 + $0xa8] sm:$0xff] %vm461_vm0, %v446_v54  ;;  %v1172_v55 = vld [vmem:[%s6705_s23 + $0xab] sm:$0xff] }
 0x1af   : > { %v1024_v60 = vpop.permute.xlu1 %1023 }
 0x1b0   : > { %v808_v61 = vpop.permute.xlu0 %807  ;;  %1124 = vst.msk [vmem:[#allocation2 + $0x40] sm:$0xff] %vm1115_vm4, %v1024_v60  ;;  %v2042_v60 = vld [vmem:[%s6705_s23 + $0xae] sm:$0xff] }
 0x1b1   : > { %907 = vst.msk [vmem:[#allocation2 + $0x48] sm:$0xff] %vm897_vm3, %v808_v61  ;;  %2123 = vrot.lane.b32.xlu1 %v2038_v59, %s6431_s13 }
 0x1b2   : > { %1471 = vrot.lane.b32.xlu0 %v1601_v33, %s6428_s22 }
 0x1b3   : > { %v1892_v63 = vpop.permute.xlu1 %1891 }
 0x1b4   : > { %v1676_v0 = vpop.permute.xlu0 %1675  ;;  %1994 = vst.msk [vmem:[#allocation2 + $0x30] sm:$0xff] %vm1987_vm8, %v1892_v63  ;;  %v520_v63 = vld [vmem:[%s6705_s23 + $0xa9] sm:$0xff] }
 0x1b5   : > { %1777 = vst.msk [vmem:[#allocation2 + $0x38] sm:$0xff] %vm1769_vm7, %v1676_v0  ;;  %821 = vrot.lane.b32.xlu1 %v949_v36, %s6424_s10 }
 0x1b6   : > { %605 = vrot.lane.b32.xlu0 %v516_v62, %s6425_s20 }
 0x1b7   : > { %v1242_v2 = vpop.permute.xlu1 %1241 }
 0x1b8   : > { %v1026_v3 = vpop.permute.xlu0 %1025  ;;  %1342 = vst.msk [vmem:[#allocation2 + $0x40] sm:$0xff] %vm1333_vm5, %v1242_v2  ;;  %v1607_v2 = vld [vmem:[%s6705_s23 + $0xb4] sm:$0xff] }
 0x1b9   : > { %1125 = vst.msk [vmem:[#allocation2 + $0x48] sm:$0xff] %vm1115_vm4, %v1026_v3  ;;  %1689 = vrot.lane.b32.xlu1 %v7051_v1, %s6429_s18 }
 0x1ba   : > { %1473 = vrot.lane.b32.xlu0 %v1602_v40, %s6428_s22  ;;  %v1823_v40 = vld [vmem:[%s6705_s23 + $0xa5] sm:$0xff] }
 0x1bb   : > { %v2110_v5 = vpop.permute.xlu1 %2109 }
 0x1bc   : > { %v1894_v6 = vpop.permute.xlu0 %1893  ;;  %2212 = vst.msk [vmem:[#allocation2 + $0x30] sm:$0xff] %vm2205_vm9, %v2110_v5  ;;  %v955_v5 = vld [vmem:[%s6705_s23 + $0xb2] sm:$0xff] }
 0x1bd   : > { %1995 = vst.msk [vmem:[#allocation2 + $0x38] sm:$0xff] %vm1987_vm8, %v1894_v6  ;;  %1039 = vrot.lane.b32.xlu1 %v7059_v4, %s6426_s26 }
 0x1be   : > { %823 = vrot.lane.b32.xlu0 %v950_v45, %s6424_s10  ;;  %v1171_v45 = vld [vmem:[%s6705_s23 + $0xa3] sm:$0xff] }
 0x1bf   : > { %v1244_v10 = vpop.permute.xlu1 %1243 }
 0x1c0   : > { %v592_v11 = vpop.permute.xlu0 %591  ;;  %1343 = vst.msk [vmem:[#allocation2 + $0x48] sm:$0xff] %vm1333_vm5, %v1244_v10 }
 0x1c1   : > { %690 = vst.msk [vmem:[#allocation2 + $0x50] sm:$0xff] %vm679_vm2, %v592_v11  ;;  %1907 = vrot.lane.b32.xlu1 %v1821_v7, %s6430_s27 }
 0x1c2   : > { %1691 = vrot.lane.b32.xlu0 %v7068_v8, %s6429_s18 }
 0x1c3   : > { %v2112_v14 = vpop.permute.xlu1 %2111  ;;  %v2249_v16 = vld [vmem:[#allocation2 + $0x30] sm:$0xff] }
 0x1c4   : > { %v1460_v15 = vpop.permute.xlu0 %1459  ;;  %2213 = vst.msk [vmem:[#allocation2 + $0x38] sm:$0xff] %vm2205_vm9, %v2112_v14  ;;  %5578 = vmatprep.mubr.msk.f32.mxu0 %vm2291_vm10, %v2249_v16  ;;  %v956_v14 = vld [vmem:[%s6705_s23 + $0xba] sm:$0xff] }
 0x1c5   : > { %1560 = vst.msk [vmem:[#allocation2 + $0x40] sm:$0xff] %vm1551_vm6, %v1460_v15  ;;  %1257 = vrot.lane.b32.xlu1 %v1169_v12, %s6427_s21  ;;  %v447_v12 = vld [vmem:[%s6705_s23 + $0xb0] sm:$0xff] }
 0x1c6   : > { %1041 = vrot.lane.b32.xlu0 %v7079_v13, %s6426_s26  ;;  %484 = vst.msk [vmem:[#allocation2 + $0xb0] sm:$0xff] %vm461_vm0, %v447_v12 }
 0x1c7   : > { %v810_v20 = vpop.permute.xlu1 %809 }
 0x1c8   : > { %v594_v21 = vpop.permute.xlu0 %593  ;;  %908 = vst.msk [vmem:[#allocation2 + $0x50] sm:$0xff] %vm897_vm3, %v810_v20  ;;  %v1826_v20 = vld [vmem:[%s6705_s23 + $0xbd] sm:$0xff] }
 0x1c9   : > { %691 = vst.msk [vmem:[#allocation2 + $0x58] sm:$0xff] %vm679_vm2, %v594_v21  ;;  %2125 = vrot.lane.b32.xlu1 %v2039_v17, %s6431_s13 }
 0x1ca   : > { %1909 = vrot.lane.b32.xlu0 %v1822_v18, %s6430_s27  ;;  %v2043_v18 = vld [vmem:[%s6705_s23 + $0xb6] sm:$0xff] }
 0x1cb   : > { %v1678_v25 = vpop.permute.xlu1 %1677  ;;  %v2250_v27 = vld [vmem:[#allocation2 + $0x38] sm:$0xff] }
 0x1cc   : > { %v1462_v26 = vpop.permute.xlu0 %1461  ;;  %1778 = vst.msk [vmem:[#allocation2 + $0x40] sm:$0xff] %vm1769_vm7, %v1678_v25  ;;  %5579 = vmatmul.mubr.msk.f32.gmra.mrb[6].mxu0 %vm2291_vm10, %v2250_v27  ;;  %v521_v25 = vld [vmem:[%s6705_s23 + $0xb1] sm:$0xff] }
 0x1cd   : > { %1561 = vst.msk [vmem:[#allocation2 + $0x48] sm:$0xff] %vm1551_vm6, %v1462_v26  ;;  %1259 = vrot.lane.b32.xlu1 %v1170_v23, %s6427_s21  ;;  %v448_v23 = vld [vmem:[%s6705_s23 + $0xb8] sm:$0xff] }
 0x1ce   : > { %607 = vrot.lane.b32.xlu0 %v517_v24, %s6425_s20  ;;  %485 = vst.msk [vmem:[#allocation2 + $0xb8] sm:$0xff] %vm461_vm0, %v448_v23  ;;  %v1174_v24 = vld [vmem:[%s6705_s23 + $0xbb] sm:$0xff] }
 0x1cf   : > { %v1028_v29 = vpop.permute.xlu1 %1027 }
 0x1d0   : > { %v812_v30 = vpop.permute.xlu0 %811  ;;  %1126 = vst.msk [vmem:[#allocation2 + $0x50] sm:$0xff] %vm1115_vm4, %v1028_v29  ;;  %v2044_v29 = vld [vmem:[%s6705_s23 + $0xbe] sm:$0xff] }
 0x1d1   : > { %909 = vst.msk [vmem:[#allocation2 + $0x58] sm:$0xff] %vm897_vm3, %v812_v30  ;;  %2127 = vrot.lane.b32.xlu1 %v2040_v28, %s6431_s13 }
 0x1d2   : > { %1475 = vrot.lane.b32.xlu0 %v7051_v1, %s6428_s22 }
 0x1d3   : > { %v1896_v32 = vpop.permute.xlu1 %1895 }
 0x1d4   : > { %v1680_v33 = vpop.permute.xlu0 %1679  ;;  %1996 = vst.msk [vmem:[#allocation2 + $0x40] sm:$0xff] %vm1987_vm8, %v1896_v32  ;;  %v522_v32 = vld [vmem:[%s6705_s23 + $0xb9] sm:$0xff] }
 0x1d5   : > { %1779 = vst.msk [vmem:[#allocation2 + $0x48] sm:$0xff] %vm1769_vm7, %v1680_v33  ;;  %825 = vrot.lane.b32.xlu1 %v7059_v4, %s6424_s10 }
 0x1d6   : > { %609 = vrot.lane.b32.xlu0 %v518_v31, %s6425_s20 }
 0x1d7   : > { %v1246_v35 = vpop.permute.xlu1 %1245 }
 0x1d8   : > { %v1030_v36 = vpop.permute.xlu0 %1029  ;;  %1344 = vst.msk [vmem:[#allocation2 + $0x50] sm:$0xff] %vm1333_vm5, %v1246_v35  ;;  %v1609_v35 = vld [vmem:[%s6705_s23 + $0xc4] sm:$0xff] }
 0x1d9   : > { %1127 = vst.msk [vmem:[#allocation2 + $0x58] sm:$0xff] %vm1115_vm4, %v1030_v36  ;;  %1693 = vrot.lane.b32.xlu1 %v7126_v34, %s6429_s18 }
 0x1da   : > { %1477 = vrot.lane.b32.xlu0 %v7068_v8, %s6428_s22  ;;  %v1825_v8 = vld [vmem:[%s6705_s23 + $0xb5] sm:$0xff] }
 0x1db   : > { %v2114_v38 = vpop.permute.xlu1 %2113 }
 0x1dc   : > { %v1898_v39 = vpop.permute.xlu0 %1897  ;;  %2214 = vst.msk [vmem:[#allocation2 + $0x40] sm:$0xff] %vm2205_vm9, %v2114_v38  ;;  %v957_v38 = vld [vmem:[%s6705_s23 + $0xc2] sm:$0xff] }
 0x1dd   : > { %1997 = vst.msk [vmem:[#allocation2 + $0x48] sm:$0xff] %vm1987_vm8, %v1898_v39  ;;  %1043 = vrot.lane.b32.xlu1 %v7135_v37, %s6426_s26 }
 0x1de   : > { %827 = vrot.lane.b32.xlu0 %v7079_v13, %s6424_s10  ;;  %v1173_v13 = vld [vmem:[%s6705_s23 + $0xb3] sm:$0xff] }
 0x1df   : > { %v1248_v42 = vpop.permute.xlu1 %1247 }
 0x1e0   : > { %v596_v43 = vpop.permute.xlu0 %595  ;;  %1345 = vst.msk [vmem:[#allocation2 + $0x58] sm:$0xff] %vm1333_vm5, %v1248_v42  ;;  %v1610_v42 = vld [vmem:[%s6705_s23 + $0xcc] sm:$0xff] }
 0x1e1   : > { %692 = vst.msk [vmem:[#allocation2 + $0x60] sm:$0xff] %vm679_vm2, %v596_v43  ;;  %1911 = vrot.lane.b32.xlu1 %v1823_v40, %s6430_s27 }
 0x1e2   : > { %1695 = vrot.lane.b32.xlu0 %v7145_v41, %s6429_s18 }
 0x1e3   : > { %v2116_v47 = vpop.permute.xlu1 %2115  ;;  %v2251_v49 = vld [vmem:[#allocation2 + $0x40] sm:$0xff] }
 0x1e4   : > { %v1464_v48 = vpop.permute.xlu0 %1463  ;;  %2215 = vst.msk [vmem:[#allocation2 + $0x48] sm:$0xff] %vm2205_vm9, %v2116_v47  ;;  %5581 = vmatprep.mubr.msk.f32.mxu0 %vm2291_vm10, %v2251_v49  ;;  %v958_v47 = vld [vmem:[%s6705_s23 + $0xca] sm:$0xff] }
 0x1e5   : > { %1562 = vst.msk [vmem:[#allocation2 + $0x50] sm:$0xff] %vm1551_vm6, %v1464_v48  ;;  %1261 = vrot.lane.b32.xlu1 %v1171_v45, %s6427_s21  ;;  %v449_v45 = vld [vmem:[%s6705_s23 + $0xc0] sm:$0xff] }
 0x1e6   : > { %1045 = vrot.lane.b32.xlu0 %v7156_v46, %s6426_s26  ;;  %486 = vst.msk [vmem:[#allocation2 + $0xc0] sm:$0xff] %vm461_vm0, %v449_v45 }
 0x1e7   : > { %v814_v52 = vpop.permute.xlu1 %813 }
 0x1e8   : > { %v598_v53 = vpop.permute.xlu0 %597  ;;  %910 = vst.msk [vmem:[#allocation2 + $0x60] sm:$0xff] %vm897_vm3, %v814_v52  ;;  %v1828_v52 = vld [vmem:[%s6705_s23 + $0xcd] sm:$0xff] }
 0x1e9   : > { %693 = vst.msk [vmem:[#allocation2 + $0x68] sm:$0xff] %vm679_vm2, %v598_v53  ;;  %2129 = vrot.lane.b32.xlu1 %v2041_v50, %s6431_s13 }
 0x1ea   : > { %1913 = vrot.lane.b32.xlu0 %v1824_v51, %s6430_s27  ;;  %v2045_v51 = vld [vmem:[%s6705_s23 + $0xc6] sm:$0xff] }
 0x1eb   : > { %v1682_v57 = vpop.permute.xlu1 %1681  ;;  %v2252_v59 = vld [vmem:[#allocation2 + $0x48] sm:$0xff] }
 0x1ec   : > { %v1466_v58 = vpop.permute.xlu0 %1465  ;;  %1780 = vst.msk [vmem:[#allocation2 + $0x50] sm:$0xff] %vm1769_vm7, %v1682_v57  ;;  %5582 = vmatmul.mubr.msk.f32.gmra.mrb[8].mxu0 %vm2291_vm10, %v2252_v59  ;;  %v523_v57 = vld [vmem:[%s6705_s23 + $0xc1] sm:$0xff] }
 0x1ed   : > { %1563 = vst.msk [vmem:[#allocation2 + $0x58] sm:$0xff] %vm1551_vm6, %v1466_v58  ;;  %1263 = vrot.lane.b32.xlu1 %v1172_v55, %s6427_s21  ;;  %v450_v55 = vld [vmem:[%s6705_s23 + $0xc8] sm:$0xff] }
 0x1ee   : > { %611 = vrot.lane.b32.xlu0 %v519_v56, %s6425_s20  ;;  %487 = vst.msk [vmem:[#allocation2 + $0xc8] sm:$0xff] %vm461_vm0, %v450_v55  ;;  %v1176_v56 = vld [vmem:[%s6705_s23 + $0xcb] sm:$0xff] }
 0x1ef   : > { %v1032_v61 = vpop.permute.xlu1 %1031  ;;  %v1831_v55 = vld [vmem:[%s6705_s23 + $0xe5] sm:$0xff] }
 0x1f0   : > { %v816_v62 = vpop.permute.xlu0 %815  ;;  %1128 = vst.msk [vmem:[#allocation2 + $0x60] sm:$0xff] %vm1115_vm4, %v1032_v61  ;;  %v2046_v61 = vld [vmem:[%s6705_s23 + $0xce] sm:$0xff] }
 0x1f1   : > { %911 = vst.msk [vmem:[#allocation2 + $0x68] sm:$0xff] %vm897_vm3, %v816_v62  ;;  %2131 = vrot.lane.b32.xlu1 %v2042_v60, %s6431_s13 }
 0x1f2   : > { %1479 = vrot.lane.b32.xlu0 %v7126_v34, %s6428_s22 }
 0x1f3   : > { %v1900_v0 = vpop.permute.xlu1 %1899 }
 0x1f4   : > { %v1684_v1 = vpop.permute.xlu0 %1683  ;;  %1998 = vst.msk [vmem:[#allocation2 + $0x50] sm:$0xff] %vm1987_vm8, %v1900_v0  ;;  %v524_v0 = vld [vmem:[%s6705_s23 + $0xc9] sm:$0xff] }
 0x1f5   : > { %1781 = vst.msk [vmem:[#allocation2 + $0x58] sm:$0xff] %vm1769_vm7, %v1684_v1  ;;  %829 = vrot.lane.b32.xlu1 %v7135_v37, %s6424_s10 }
 0x1f6   : > { %613 = vrot.lane.b32.xlu0 %v520_v63, %s6425_s20 }
 0x1f7   : > { %v1250_v3 = vpop.permute.xlu1 %1249 }
 0x1f8   : > { %v1034_v4 = vpop.permute.xlu0 %1033  ;;  %1346 = vst.msk [vmem:[#allocation2 + $0x60] sm:$0xff] %vm1333_vm5, %v1250_v3  ;;  %v7310_v3 = vld [vmem:[%s6705_s23 + $0xd4] sm:$0xff] }
 0x1f9   : > { %1129 = vst.msk [vmem:[#allocation2 + $0x68] sm:$0xff] %vm1115_vm4, %v1034_v4  ;;  %1697 = vrot.lane.b32.xlu1 %v1607_v2, %s6429_s18 }
 0x1fa   : > { %1481 = vrot.lane.b32.xlu0 %v7145_v41, %s6428_s22  ;;  %v1827_v41 = vld [vmem:[%s6705_s23 + $0xc5] sm:$0xff] }
 0x1fb   : > { %v2118_v6 = vpop.permute.xlu1 %2117 }
 0x1fc   : > { %v1902_v7 = vpop.permute.xlu0 %1901  ;;  %2216 = vst.msk [vmem:[#allocation2 + $0x50] sm:$0xff] %vm2205_vm9, %v2118_v6  ;;  %v7318_v6 = vld [vmem:[%s6705_s23 + $0xd2] sm:$0xff] }
 0x1fd   : > { %1999 = vst.msk [vmem:[#allocation2 + $0x58] sm:$0xff] %vm1987_vm8, %v1902_v7  ;;  %1047 = vrot.lane.b32.xlu1 %v955_v5, %s6426_s26 }
 0x1fe   : > { %831 = vrot.lane.b32.xlu0 %v7156_v46, %s6424_s10  ;;  %v1175_v46 = vld [vmem:[%s6705_s23 + $0xc3] sm:$0xff] }
 0x1ff   : > { %v1252_v10 = vpop.permute.xlu1 %1251 }
 0x200   : > { %v600_v11 = vpop.permute.xlu0 %599  ;;  %1347 = vst.msk [vmem:[#allocation2 + $0x68] sm:$0xff] %vm1333_vm5, %v1252_v10  ;;  %v1829_v10 = vld [vmem:[%s6705_s23 + $0xd5] sm:$0xff] }
 0x201   : > { %694 = vst.msk [vmem:[#allocation2 + $0x70] sm:$0xff] %vm679_vm2, %v600_v11  ;;  %1915 = vrot.lane.b32.xlu1 %v1825_v8, %s6430_s27  ;;  %v7329_v11 = vld [vmem:[%s6705_s23 + $0xdc] sm:$0xff] }
 0x202   : > { %1699 = vrot.lane.b32.xlu0 %v1608_v9, %s6429_s18 }
 0x203   : > { %v2120_v15 = vpop.permute.xlu1 %2119  ;;  %v2253_v17 = vld [vmem:[#allocation2 + $0x50] sm:$0xff] }
 0x204   : > { %v1468_v16 = vpop.permute.xlu0 %1467  ;;  %2217 = vst.msk [vmem:[#allocation2 + $0x58] sm:$0xff] %vm2205_vm9, %v2120_v15  ;;  %5584 = vmatprep.mubr.msk.f32.mxu0 %vm2291_vm10, %v2253_v17  ;;  %v451_v15 = vld [vmem:[%s6705_s23 + $0xd0] sm:$0xff] }
 0x205   : > { %1564 = vst.msk [vmem:[#allocation2 + $0x60] sm:$0xff] %vm1551_vm6, %v1468_v16  ;;  %1265 = vrot.lane.b32.xlu1 %v1173_v13, %s6427_s21 }
 0x206   : > { %1049 = vrot.lane.b32.xlu0 %v956_v14, %s6426_s26  ;;  %488 = vst.msk [vmem:[#allocation2 + $0xd0] sm:$0xff] %vm461_vm0, %v451_v15 }
 0x207   : > { %v818_v21 = vpop.permute.xlu1 %817 }
 0x208   : > { %v602_v22 = vpop.permute.xlu0 %601  ;;  %912 = vst.msk [vmem:[#allocation2 + $0x70] sm:$0xff] %vm897_vm3, %v818_v21  ;;  %v7342_v21 = vld [vmem:[%s6705_s23 + $0xda] sm:$0xff] }
 0x209   : > { %695 = vst.msk [vmem:[#allocation2 + $0x78] sm:$0xff] %vm679_vm2, %v602_v22  ;;  %2133 = vrot.lane.b32.xlu1 %v2043_v18, %s6431_s13 }
 0x20a   : > { %1917 = vrot.lane.b32.xlu0 %v1826_v20, %s6430_s27  ;;  %v1177_v20 = vld [vmem:[%s6705_s23 + $0xd3] sm:$0xff] }
 0x20b   : > { %v1686_v26 = vpop.permute.xlu1 %1685  ;;  %v2254_v28 = vld [vmem:[#allocation2 + $0x58] sm:$0xff] }
 0x20c   : > { %v1470_v27 = vpop.permute.xlu0 %1469  ;;  %1782 = vst.msk [vmem:[#allocation2 + $0x60] sm:$0xff] %vm1769_vm7, %v1686_v26  ;;  %5585 = vmatmul.mubr.msk.f32.gmra.mrb[10].mxu0 %vm2291_vm10, %v2254_v28  ;;  %v1830_v28 = vld [vmem:[%s6705_s23 + $0xdd] sm:$0xff] }
 0x20d   : > { %1565 = vst.msk [vmem:[#allocation2 + $0x68] sm:$0xff] %vm1551_vm6, %v1470_v27  ;;  %1267 = vrot.lane.b32.xlu1 %v1174_v24, %s6427_s21  ;;  %v2047_v27 = vld [vmem:[%s6705_s23 + $0xd6] sm:$0xff] }
 0x20e   : > { %615 = vrot.lane.b32.xlu0 %v521_v25, %s6425_s20 }
 0x20f   : > { %v1036_v30 = vpop.permute.xlu1 %1035 }
 0x210   : > { %v820_v31 = vpop.permute.xlu0 %819  ;;  %1130 = vst.msk [vmem:[#allocation2 + $0x70] sm:$0xff] %vm1115_vm4, %v1036_v30 }
 0x211   : > { %913 = vst.msk [vmem:[#allocation2 + $0x78] sm:$0xff] %vm897_vm3, %v820_v31  ;;  %2135 = vrot.lane.b32.xlu1 %v2044_v29, %s6431_s13  ;;  %v452_v31 = vld [vmem:[%s6705_s23 + $0xd8] sm:$0xff] }
 0x212   : > { %1483 = vrot.lane.b32.xlu0 %v1607_v2, %s6428_s22  ;;  %489 = vst.msk [vmem:[#allocation2 + $0xd8] sm:$0xff] %vm461_vm0, %v452_v31  ;;  %v528_v31 = vld [vmem:[%s6705_s23 + $0xe9] sm:$0xff] }
 0x213   : > { %v1904_v33 = vpop.permute.xlu1 %1903 }
 0x214   : > { %v1688_v34 = vpop.permute.xlu0 %1687  ;;  %2000 = vst.msk [vmem:[#allocation2 + $0x60] sm:$0xff] %vm1987_vm8, %v1904_v33  ;;  %v525_v33 = vld [vmem:[%s6705_s23 + $0xd1] sm:$0xff] }
 0x215   : > { %1783 = vst.msk [vmem:[#allocation2 + $0x68] sm:$0xff] %vm1769_vm7, %v1688_v34  ;;  %833 = vrot.lane.b32.xlu1 %v955_v5, %s6424_s10 }
 0x216   : > { %617 = vrot.lane.b32.xlu0 %v522_v32, %s6425_s20  ;;  %v1178_v32 = vld [vmem:[%s6705_s23 + $0xdb] sm:$0xff] }
 0x217   : > { %v1254_v36 = vpop.permute.xlu1 %1253 }
 0x218   : > { %v1038_v37 = vpop.permute.xlu0 %1037  ;;  %1348 = vst.msk [vmem:[#allocation2 + $0x70] sm:$0xff] %vm1333_vm5, %v1254_v36 }
 0x219   : > { %1131 = vst.msk [vmem:[#allocation2 + $0x78] sm:$0xff] %vm1115_vm4, %v1038_v37  ;;  %1701 = vrot.lane.b32.xlu1 %v1609_v35, %s6429_s18 }
 0x21a   : > { %1485 = vrot.lane.b32.xlu0 %v1608_v9, %s6428_s22  ;;  %v7325_v9 = vld [vmem:[#allocation13] ss:$0 sm:$0xff] }
 0x21b   : > { %v2122_v39 = vpop.permute.xlu1 %2121 }
 0x21c   : > { %v1906_v40 = vpop.permute.xlu0 %1905  ;;  %2218 = vst.msk [vmem:[#allocation2 + $0x60] sm:$0xff] %vm2205_vm9, %v2122_v39  ;;  %v2048_v39 = vld [vmem:[%s6705_s23 + $0xde] sm:$0xff] }
 0x21d   : > { %2001 = vst.msk [vmem:[#allocation2 + $0x68] sm:$0xff] %vm1987_vm8, %v1906_v40  ;;  %1051 = vrot.lane.b32.xlu1 %v957_v38, %s6426_s26 }
 0x21e   : > { %835 = vrot.lane.b32.xlu0 %v956_v14, %s6424_s10 }
 0x21f   : > { %v1256_v43 = vpop.permute.xlu1 %1255 }
 0x220   : > { %v604_v44 = vpop.permute.xlu0 %603  ;;  %1349 = vst.msk [vmem:[#allocation2 + $0x78] sm:$0xff] %vm1333_vm5, %v1256_v43 }
 0x221   : > { %696 = vst.msk [vmem:[#allocation2 + $0x80] sm:$0xff] %vm679_vm2, %v604_v44  ;;  %1919 = vrot.lane.b32.xlu1 %v1827_v41, %s6430_s27 }
 0x222   : > { %1703 = vrot.lane.b32.xlu0 %v1610_v42, %s6429_s18 }
 0x223   : > { %v2124_v48 = vpop.permute.xlu1 %2123  ;;  %v2255_v50 = vld [vmem:[#allocation2 + $0x60] sm:$0xff] }
 0x224   : > { %v1472_v49 = vpop.permute.xlu0 %1471  ;;  %2219 = vst.msk [vmem:[#allocation2 + $0x68] sm:$0xff] %vm2205_vm9, %v2124_v48  ;;  %5587 = vmatprep.mubr.msk.f32.mxu0 %vm2291_vm10, %v2255_v50 }
 0x225   : > { %1566 = vst.msk [vmem:[#allocation2 + $0x70] sm:$0xff] %vm1551_vm6, %v1472_v49  ;;  %1269 = vrot.lane.b32.xlu1 %v1175_v46, %s6427_s21  ;;  %v526_v46 = vld [vmem:[%s6705_s23 + $0xd9] sm:$0xff]  ;;  %v7383_v49 = vld [vmem:[%s6705_s23 + $0xe4] sm:$0xff] }
 0x226   : > { %1053 = vrot.lane.b32.xlu0 %v958_v47, %s6426_s26 }
 0x227   : > { %v822_v53 = vpop.permute.xlu1 %821 }
 0x228   : > { %v606_v54 = vpop.permute.xlu0 %605  ;;  %914 = vst.msk [vmem:[#allocation2 + $0x80] sm:$0xff] %vm897_vm3, %v822_v53 }
 0x229   : > { %697 = vst.msk [vmem:[#allocation2 + $0x88] sm:$0xff] %vm679_vm2, %v606_v54  ;;  %2137 = vrot.lane.b32.xlu1 %v2045_v51, %s6431_s13 }
 0x22a   : > { %1921 = vrot.lane.b32.xlu0 %v1828_v52, %s6430_s27  ;;  %v7392_v52 = vld [vmem:[%s6705_s23 + $0xe2] sm:$0xff] }
 0x22b   : > { %v1690_v58 = vpop.permute.xlu1 %1689  ;;  %v2256_v60 = vld [vmem:[#allocation2 + $0x68] sm:$0xff] }
 0x22c   : > { %v1474_v59 = vpop.permute.xlu0 %1473  ;;  %1784 = vst.msk [vmem:[#allocation2 + $0x70] sm:$0xff] %vm1769_vm7, %v1690_v58  ;;  %5588 = vmatmul.mubr.msk.f32.gmra.mrb[12].mxu0 %vm2291_vm10, %v2256_v60  ;;  %v453_v60 = vld [vmem:[%s6705_s23 + $0xe0] sm:$0xff] }
 0x22d   : > { %1567 = vst.msk [vmem:[#allocation2 + $0x78] sm:$0xff] %vm1551_vm6, %v1474_v59  ;;  %1271 = vrot.lane.b32.xlu1 %v1176_v56, %s6427_s21  ;;  %v7402_v56 = vld [vmem:[%s6705_s23 + $0xec] sm:$0xff] }
 0x22e   : > { %619 = vrot.lane.b32.xlu0 %v523_v57, %s6425_s20  ;;  %490 = vst.msk [vmem:[#allocation2 + $0xe0] sm:$0xff] %vm461_vm0, %v453_v60 }
 0x22f   : > { %v1040_v62 = vpop.permute.xlu1 %1039 }
 0x230   : > { %v824_v63 = vpop.permute.xlu0 %823  ;;  %1132 = vst.msk [vmem:[#allocation2 + $0x80] sm:$0xff] %vm1115_vm4, %v1040_v62 }
 0x231   : > { %915 = vst.msk [vmem:[#allocation2 + $0x88] sm:$0xff] %vm897_vm3, %v824_v63  ;;  %2139 = vrot.lane.b32.xlu1 %v2046_v61, %s6431_s13 }
 0x232   : > { %1487 = vrot.lane.b32.xlu0 %v1609_v35, %s6428_s22 }
 0x233   : > { %v1908_v1 = vpop.permute.xlu1 %1907 }
 0x234   : > { %v1692_v2 = vpop.permute.xlu0 %1691  ;;  %2002 = vst.msk [vmem:[#allocation2 + $0x70] sm:$0xff] %vm1987_vm8, %v1908_v1  ;;  %v7415_v1 = vld [vmem:[%s6705_s23 + $0xea] sm:$0xff] }
 0x235   : > { %1785 = vst.msk [vmem:[#allocation2 + $0x78] sm:$0xff] %vm1769_vm7, %v1692_v2  ;;  %837 = vrot.lane.b32.xlu1 %v957_v38, %s6424_s10 }
 0x236   : > { %621 = vrot.lane.b32.xlu0 %v524_v0, %s6425_s20  ;;  %v1179_v0 = vld [vmem:[%s6705_s23 + $0xe3] sm:$0xff] }
 0x237   : > { %v1258_v4 = vpop.permute.xlu1 %1257 }
 0x238   : > { %v1042_v5 = vpop.permute.xlu0 %1041  ;;  %1350 = vst.msk [vmem:[#allocation2 + $0x80] sm:$0xff] %vm1333_vm5, %v1258_v4 }
 0x239   : > { %1133 = vst.msk [vmem:[#allocation2 + $0x88] sm:$0xff] %vm1115_vm4, %v1042_v5  ;;  %1705 = vrot.lane.b32.xlu1 %v7310_v3, %s6429_s18 }
 0x23a   : > { %1489 = vrot.lane.b32.xlu0 %v1610_v42, %s6428_s22 }
 0x23b   : > { %v2126_v7 = vpop.permute.xlu1 %2125 }
 0x23c   : > { %v1910_v8 = vpop.permute.xlu0 %1909  ;;  %2220 = vst.msk [vmem:[#allocation2 + $0x70] sm:$0xff] %vm2205_vm9, %v2126_v7  ;;  %v2049_v7 = vld [vmem:[%s6705_s23 + $0xe6] sm:$0xff] }
 0x23d   : > { %2003 = vst.msk [vmem:[#allocation2 + $0x78] sm:$0xff] %vm1987_vm8, %v1910_v8  ;;  %1055 = vrot.lane.b32.xlu1 %v7318_v6, %s6426_s26  ;;  %v1832_v8 = vld [vmem:[%s6705_s23 + $0xed] sm:$0xff] }
 0x23e   : > { %839 = vrot.lane.b32.xlu0 %v958_v47, %s6424_s10 }
 0x23f   : > { %v1260_v12 = vpop.permute.xlu1 %1259  ;;  %v5571_v14 = vpop.f32.mrb[0].mxu0 }
 0x240   : > { %v608_v13 = vpop.permute.xlu0 %607  ;;  %1351 = vst.msk [vmem:[#allocation2 + $0x88] sm:$0xff] %vm1333_vm5, %v1260_v12  ;;  %v2476_v16 = vadd.f32 %v5571_v14, %v7325_v9  ;;  %v2470_v17 = vpop.f32.mrb[1].mxu0  ;;  %v454_v12 = vld [vmem:[%s6705_s23 + $0xe8] sm:$0xff] }
 0x241   : > { %698 = vst.msk [vmem:[#allocation2 + $0x90] sm:$0xff] %vm679_vm2, %v608_v13  ;;  %1923 = vrot.lane.b32.xlu1 %v1829_v10, %s6430_s27  ;;  %v2471_v18 = vadd.f32 %v7325_v9, %v2470_v17  ;;  %v1180_v13 = vld [vmem:[%s6705_s23 + $0xeb] sm:$0xff]  ;;  %v527_v14 = vld [vmem:[%s6705_s23 + $0xe1] sm:$0xff] }
 0x242   : > { %1707 = vrot.lane.b32.xlu0 %v7329_v11, %s6429_s18  ;;  %v2650_v22 = vmax.f32 %v2476_v16, 0.0  ;;  %491 = vst.msk [vmem:[#allocation2 + $0xe8] sm:$0xff] %vm461_vm0, %v454_v12 }
 0x243   : > { %v2128_v23 = vpop.permute.xlu1 %2127  ;;  %v2257_v25 = vld [vmem:[#allocation2 + $0x70] sm:$0xff]  ;;  %v2649_v26 = vmax.f32 %v2471_v18, 0.0 }
 0x244   : > { %v1476_v24 = vpop.permute.xlu0 %1475  ;;  %2221 = vst.msk [vmem:[#allocation2 + $0x78] sm:$0xff] %vm2205_vm9, %v2128_v23  ;;  %5590 = vmatprep.mubr.msk.f32.mxu0 %vm2291_vm10, %v2257_v25 }
 0x245   : > { %1568 = vst.msk [vmem:[#allocation2 + $0x80] sm:$0xff] %vm1551_vm6, %v1476_v24  ;;  %1273 = vrot.lane.b32.xlu1 %v1177_v20, %s6427_s21 }
 0x246   : > { %2690 = vst.msk [vmem:[#allocation3 + $0x9] sm:$0xff] %vm2688_vm11, %v2650_v22  ;;  %1057 = vrot.lane.b32.xlu0 %v7342_v21, %s6426_s26  ;;  %2689 = vst.msk [vmem:[#allocation3 + $0x1] sm:$0xff] %vm2688_vm11, %v2649_v26 }
 0x247   : > { %v826_v29 = vpop.permute.xlu1 %825 }
 0x248   : > { %v610_v30 = vpop.permute.xlu0 %609  ;;  %916 = vst.msk [vmem:[#allocation2 + $0x90] sm:$0xff] %vm897_vm3, %v826_v29 }
 0x249   : > { %699 = vst.msk [vmem:[#allocation2 + $0x98] sm:$0xff] %vm679_vm2, %v610_v30  ;;  %2141 = vrot.lane.b32.xlu1 %v2047_v27, %s6431_s13 }
 0x24a   : > { %1925 = vrot.lane.b32.xlu0 %v1830_v28, %s6430_s27 }
 0x24b   : > { %v1694_v34 = vpop.permute.xlu1 %1693  ;;  %v2258_v36 = vld [vmem:[#allocation2 + $0x78] sm:$0xff] }
 0x24c   : > { %v1478_v35 = vpop.permute.xlu0 %1477  ;;  %1786 = vst.msk [vmem:[#allocation2 + $0x80] sm:$0xff] %vm1769_vm7, %v1694_v34  ;;  %5591 = vmatmul.mubr.msk.f32.gmra.mrb[14].mxu0 %vm2291_vm10, %v2258_v36 }
 0x24d   : > { %1569 = vst.msk [vmem:[#allocation2 + $0x88] sm:$0xff] %vm1551_vm6, %v1478_v35  ;;  %v2742_v37 = vld [vmem:[#allocation3] sm:$0xff]  ;;  %1275 = vrot.lane.b32.xlu1 %v1178_v32, %s6427_s21  ;;  %v7373_v45 = vld [vmem:[#allocation3 + $0x8] sm:$0xff]  ;;  %v7460_v35 = vld [vmem:[%s6705_s23 + $0xf4] sm:$0xff] }
 0x24e   : > { %623 = vrot.lane.b32.xlu0 %v525_v33, %s6425_s20  ;;  %v2814_v38 = vld [vmem:[#allocation3 + $0x2] sm:$0xff] }
 0x24f   : > { %v2850_v40 = vmax.f32 %v2742_v37, %v2814_v38  ;;  %v1044_v41 = vpop.permute.xlu1 %1043  ;;  %v2778_v43 = vld [vmem:[#allocation3 + $0x1] sm:$0xff]  ;;  %v2779_v26 = vld [vmem:[#allocation3 + $0x9] sm:$0xff]  ;;  %v7469_v38 = vld [vmem:[%s6705_s23 + $0xf2] sm:$0xff] }
 0x250   : > { %v828_v42 = vpop.permute.xlu0 %827  ;;  %1134 = vst.msk [vmem:[#allocation2 + $0x90] sm:$0xff] %vm1115_vm4, %v1044_v41  ;;  %v1833_v41 = vld [vmem:[%s6705_s23 + $0xf5] sm:$0xff] }
 0x251   : > { %917 = vst.msk [vmem:[#allocation2 + $0x98] sm:$0xff] %vm897_vm3, %v828_v42  ;;  %v2886_v44 = vmax.f32 %v2850_v40, %v2778_v43  ;;  %2143 = vrot.lane.b32.xlu1 %v2048_v39, %s6431_s13  ;;  %v7479_v42 = vld [vmem:[%s6705_s23 + $0xfc] sm:$0xff] }
 0x252   : > { %1491 = vrot.lane.b32.xlu0 %v7310_v3, %s6428_s22 }
 0x253   : > { %2922 = vst.msk [vmem:[#allocation3 + $0x1] sm:$0xff] %vm2688_vm11, %v2886_v44  ;;  %v1912_v47 = vpop.permute.xlu1 %1911 }
 0x254   : > { %v1696_v48 = vpop.permute.xlu0 %1695  ;;  %2004 = vst.msk [vmem:[#allocation2 + $0x80] sm:$0xff] %vm1987_vm8, %v1912_v47 }
 0x255   : > { %1787 = vst.msk [vmem:[#allocation2 + $0x88] sm:$0xff] %vm1769_vm7, %v1696_v48  ;;  %841 = vrot.lane.b32.xlu1 %v7318_v6, %s6424_s10 }
 0x256   : > { %625 = vrot.lane.b32.xlu0 %v526_v46, %s6425_s20  ;;  %v455_v46 = vld [vmem:[%s6705_s23 + $0xf0] sm:$0xff] }
 0x257   : > { %v1262_v50 = vpop.permute.xlu1 %1261  ;;  %492 = vst.msk [vmem:[#allocation2 + $0xf0] sm:$0xff] %vm461_vm0, %v455_v46 }
 0x258   : > { %v1046_v51 = vpop.permute.xlu0 %1045  ;;  %1352 = vst.msk [vmem:[#allocation2 + $0x90] sm:$0xff] %vm1333_vm5, %v1262_v50  ;;  %v1181_v50 = vld [vmem:[%s6705_s23 + $0xf3] sm:$0xff] }
 0x259   : > { %1135 = vst.msk [vmem:[#allocation2 + $0x98] sm:$0xff] %vm1115_vm4, %v1046_v51  ;;  %1709 = vrot.lane.b32.xlu1 %v7383_v49, %s6429_s18  ;;  %v7492_v51 = vld [vmem:[%s6705_s23 + $0xfa] sm:$0xff] }
 0x25a   : > { %1493 = vrot.lane.b32.xlu0 %v7329_v11, %s6428_s22 }
 0x25b   : > { %v2130_v53 = vpop.permute.xlu1 %2129 }
 0x25c   : > { %v1914_v54 = vpop.permute.xlu0 %1913  ;;  %2222 = vst.msk [vmem:[#allocation2 + $0x80] sm:$0xff] %vm2205_vm9, %v2130_v53 }
 0x25d   : > { %2005 = vst.msk [vmem:[#allocation2 + $0x88] sm:$0xff] %vm1987_vm8, %v1914_v54  ;;  %1059 = vrot.lane.b32.xlu1 %v7392_v52, %s6426_s26 }
 0x25e   : > { %843 = vrot.lane.b32.xlu0 %v7342_v21, %s6424_s10  ;;  %v2050_v21 = vld [vmem:[%s6705_s23 + $0xee] sm:$0xff] }
 0x25f   : > { %v1264_v57 = vpop.permute.xlu1 %1263  ;;  %v5574_v59 = vpop.f32.mrb[2].mxu0 }
 0x260   : > { %v612_v58 = vpop.permute.xlu0 %611  ;;  %1353 = vst.msk [vmem:[#allocation2 + $0x98] sm:$0xff] %vm1333_vm5, %v1264_v57  ;;  %v2486_v61 = vadd.f32 %v5574_v59, %v7325_v9  ;;  %v2480_v62 = vpop.f32.mrb[3].mxu0  ;;  %v2051_v57 = vld [vmem:[%s6705_s23 + $0xf6] sm:$0xff] }
 0x261   : > { %700 = vst.msk [vmem:[#allocation2 + $0xa0] sm:$0xff] %vm679_vm2, %v612_v58  ;;  %1927 = vrot.lane.b32.xlu1 %v1831_v55, %s6430_s27  ;;  %v2481_v63 = vadd.f32 %v7325_v9, %v2480_v62  ;;  %v1834_v58 = vld [vmem:[%s6705_s23 + $0xfd] sm:$0xff] }
 0x262   : > { %1711 = vrot.lane.b32.xlu0 %v7402_v56, %s6429_s18  ;;  %v2652_v2 = vmax.f32 %v2486_v61, 0.0  ;;  %v456_v61 = vld [vmem:[%s6705_s23 + $0xf8] sm:$0xff] }
 0x263   : > { %v2132_v3 = vpop.permute.xlu1 %2131  ;;  %v2259_v5 = vld [vmem:[#allocation2 + $0x80] sm:$0xff]  ;;  %v2651_v6 = vmax.f32 %v2481_v63, 0.0  ;;  %493 = vst.msk [vmem:[#allocation2 + $0xf8] sm:$0xff] %vm461_vm0, %v456_v61  ;;  %v529_v63 = vld [vmem:[%s6705_s23 + $0xf1] sm:$0xff] }
 0x264   : > { %v1480_v4 = vpop.permute.xlu0 %1479  ;;  %2223 = vst.msk [vmem:[#allocation2 + $0x88] sm:$0xff] %vm2205_vm9, %v2132_v3  ;;  %5593 = vmatprep.mubr.msk.f32.mxu0 %vm2291_vm10, %v2259_v5  ;;  %v1182_v62 = vld [vmem:[%s6705_s23 + $0xfb] sm:$0xff] }
 0x265   : > { %1570 = vst.msk [vmem:[#allocation2 + $0x90] sm:$0xff] %vm1551_vm6, %v1480_v4  ;;  %1277 = vrot.lane.b32.xlu1 %v1179_v0, %s6427_s21 }
 0x266   : > { %2692 = vst.msk [vmem:[#allocation3 + $0x19] sm:$0xff] %vm2688_vm11, %v2652_v2  ;;  %1061 = vrot.lane.b32.xlu0 %v7415_v1, %s6426_s26  ;;  %2691 = vst.msk [vmem:[#allocation3 + $0x11] sm:$0xff] %vm2688_vm11, %v2651_v6 }
 0x267   : > { %2727 = vst.msk [vmem:[#allocation3 + $0x11] sm:$0x3] %vm2726_vm13, %v6432_v19  ;;  %v830_v10 = vpop.permute.xlu1 %829 }
 0x268   : > { %v614_v11 = vpop.permute.xlu0 %613  ;;  %918 = vst.msk [vmem:[#allocation2 + $0xa0] sm:$0xff] %vm897_vm3, %v830_v10 }
 0x269   : > { %701 = vst.msk [vmem:[#allocation2 + $0xa8] sm:$0xff] %vm679_vm2, %v614_v11  ;;  %2145 = vrot.lane.b32.xlu1 %v2049_v7, %s6431_s13  ;;  %v2052_v7 = vld [vmem:[%s6705_s23 + $0xfe] sm:$0xff] }
 0x26a   : > { %1929 = vrot.lane.b32.xlu0 %v1832_v8, %s6430_s27 }
 0x26b   : > { %v1698_v15 = vpop.permute.xlu1 %1697  ;;  %v2260_v17 = vld [vmem:[#allocation2 + $0x88] sm:$0xff] }
 0x26c   : > { %v1482_v16 = vpop.permute.xlu0 %1481  ;;  %1788 = vst.msk [vmem:[#allocation2 + $0x90] sm:$0xff] %vm1769_vm7, %v1698_v15  ;;  %5594 = vmatmul.mubr.msk.f32.gmra.mrb[16].mxu0 %vm2291_vm10, %v2260_v17  ;;  %v530_v17 = vld [vmem:[%s6705_s23 + $0xf9] sm:$0xff] }
 0x26d   : > { %1571 = vst.msk [vmem:[#allocation2 + $0x98] sm:$0xff] %vm1551_vm6, %v1482_v16  ;;  %1279 = vrot.lane.b32.xlu1 %v1180_v13, %s6427_s21  ;;  %v7450_v32 = vld [vmem:[#allocation3 + $0x18] sm:$0xff] }
 0x26e   : > { %627 = vrot.lane.b32.xlu0 %v527_v14, %s6425_s20  ;;  %v2744_v18 = vld [vmem:[#allocation3 + $0x10] sm:$0xff]  ;;  %v2781_v8 = vld [vmem:[#allocation3 + $0x19] sm:$0xff] }
 0x26f   : > { %v2815_v20 = vld [vmem:[#allocation3 + $0xa] sm:$0xff]  ;;  %v2816_v22 = vld [vmem:[#allocation3 + $0x12] sm:$0xff]  ;;  %v1048_v24 = vpop.permute.xlu1 %1047 }
 0x270   : > { %v2851_v23 = vmax.f32 %v7373_v45, %v2815_v20  ;;  %v832_v25 = vpop.permute.xlu0 %831  ;;  %v2852_v27 = vmax.f32 %v2744_v18, %v2816_v22  ;;  %1136 = vst.msk [vmem:[#allocation2 + $0xa0] sm:$0xff] %vm1115_vm4, %v1048_v24  ;;  %v2780_v28 = vld [vmem:[#allocation3 + $0x11] sm:$0xff]  ;;  %v7546_v24 = vld [vmem:[%s6705_s23 + $0x102] sm:$0xff] }
 0x271   : > { %919 = vst.msk [vmem:[#allocation2 + $0xa8] sm:$0xff] %vm897_vm3, %v832_v25  ;;  %2147 = vrot.lane.b32.xlu1 %v2050_v21, %s6431_s13  ;;  %v7537_v21 = vld [vmem:[%s6705_s23 + $0x104] sm:$0xff] }
 0x272   : > { %v2887_v29 = vmax.f32 %v2851_v23, %v2779_v26  ;;  %1495 = vrot.lane.b32.xlu0 %v7383_v49, %s6428_s22  ;;  %v2888_v30 = vmax.f32 %v2852_v27, %v2780_v28 }
 0x273   : > { %v1916_v33 = vpop.permute.xlu1 %1915 }
 0x274   : > { %2923 = vst.msk [vmem:[#allocation3 + $0x9] sm:$0xff] %vm2688_vm11, %v2887_v29  ;;  %v1700_v34 = vpop.permute.xlu0 %1699  ;;  %2924 = vst.msk [vmem:[#allocation3 + $0x11] sm:$0xff] %vm2688_vm11, %v2888_v30  ;;  %v1835_v30 = vld [vmem:[%s6705_s23 + $0x105] sm:$0xff] }
 0x275   : > { %2006 = vst.msk [vmem:[#allocation2 + $0x90] sm:$0xff] %vm1987_vm8, %v1916_v33  ;;  %845 = vrot.lane.b32.xlu1 %v7392_v52, %s6424_s10 }
 0x276   : > { %1789 = vst.msk [vmem:[#allocation2 + $0x98] sm:$0xff] %vm1769_vm7, %v1700_v34  ;;  %629 = vrot.lane.b32.xlu0 %v528_v31, %s6425_s20  ;;  %v7557_v31 = vld [vmem:[%s6705_s23 + $0x10c] sm:$0xff] }
 0x277   : > { %v1266_v36 = vpop.permute.xlu1 %1265 }
 0x278   : > { %v1050_v37 = vpop.permute.xlu0 %1049  ;;  %1354 = vst.msk [vmem:[#allocation2 + $0xa0] sm:$0xff] %vm1333_vm5, %v1266_v36 }
 0x279   : > { %1137 = vst.msk [vmem:[#allocation2 + $0xa8] sm:$0xff] %vm1115_vm4, %v1050_v37  ;;  %1713 = vrot.lane.b32.xlu1 %v7460_v35, %s6429_s18 }
 0x27a   : > { %1497 = vrot.lane.b32.xlu0 %v7402_v56, %s6428_s22 }
 0x27b   : > { %v2134_v39 = vpop.permute.xlu1 %2133  ;;  %v2959_v25 = vld [vmem:[#allocation3 + $0x1] ss:$2 sm:$0xff] }
 0x27c   : > { %v1918_v40 = vpop.permute.xlu0 %1917  ;;  %2224 = vst.msk [vmem:[#allocation2 + $0x90] sm:$0xff] %vm2205_vm9, %v2134_v39  ;;  %v1183_v39 = vld [vmem:[%s6705_s23 + $0x103] sm:$0xff] }
 0x27d   : > { %2007 = vst.msk [vmem:[#allocation2 + $0x98] sm:$0xff] %vm1987_vm8, %v1918_v40  ;;  %1063 = vrot.lane.b32.xlu1 %v7469_v38, %s6426_s26  ;;  %v7570_v40 = vld [vmem:[%s6705_s23 + $0x10a] sm:$0xff] }
 0x27e   : > { %847 = vrot.lane.b32.xlu0 %v7415_v1, %s6424_s10 }
 0x27f   : > { %v1268_v43 = vpop.permute.xlu1 %1267  ;;  %v5577_v45 = vpop.f32.mrb[4].mxu0 }
 0x280   : > { %v616_v44 = vpop.permute.xlu0 %615  ;;  %1355 = vst.msk [vmem:[#allocation2 + $0xa8] sm:$0xff] %vm1333_vm5, %v1268_v43  ;;  %v2496_v47 = vadd.f32 %v5577_v45, %v7325_v9  ;;  %v2490_v48 = vpop.f32.mrb[5].mxu0 }
 0x281   : > { %702 = vst.msk [vmem:[#allocation2 + $0xb0] sm:$0xff] %vm679_vm2, %v616_v44  ;;  %1931 = vrot.lane.b32.xlu1 %v1833_v41, %s6430_s27  ;;  %v2491_v49 = vadd.f32 %v7325_v9, %v2490_v48  ;;  %v2053_v48 = vld [vmem:[%s6705_s23 + $0x106] sm:$0xff] }
 0x282   : > { %1715 = vrot.lane.b32.xlu0 %v7479_v42, %s6429_s18  ;;  %v2654_v52 = vmax.f32 %v2496_v47, 0.0 }
 0x283   : > { %v2136_v53 = vpop.permute.xlu1 %2135  ;;  %v2261_v55 = vld [vmem:[#allocation2 + $0x90] sm:$0xff]  ;;  %v2653_v56 = vmax.f32 %v2491_v49, 0.0 }
 0x284   : > { %v1484_v54 = vpop.permute.xlu0 %1483  ;;  %2225 = vst.msk [vmem:[#allocation2 + $0x98] sm:$0xff] %vm2205_vm9, %v2136_v53  ;;  %5596 = vmatprep.mubr.msk.f32.mxu0 %vm2291_vm10, %v2261_v55  ;;  %v1836_v49 = vld [vmem:[%s6705_s23 + $0x10d] sm:$0xff] }
 0x285   : > { %1572 = vst.msk [vmem:[#allocation2 + $0xa0] sm:$0xff] %vm1551_vm6, %v1484_v54  ;;  %1281 = vrot.lane.b32.xlu1 %v1181_v50, %s6427_s21  ;;  %v1184_v53 = vld [vmem:[%s6705_s23 + $0x10b] sm:$0xff]  ;;  %v531_v54 = vld [vmem:[%s6705_s23 + $0x101] sm:$0xff] }
 0x286   : > { %2694 = vst.msk [vmem:[#allocation3 + $0x29] sm:$0xff] %vm2688_vm11, %v2654_v52  ;;  %1065 = vrot.lane.b32.xlu0 %v7492_v51, %s6426_s26  ;;  %2693 = vst.msk [vmem:[#allocation3 + $0x21] sm:$0xff] %vm2688_vm11, %v2653_v56  ;;  %v458_v52 = vld [vmem:[%s6705_s23 + $0x108] sm:$0xff] }
 0x287   : > { %2728 = vst.msk [vmem:[#allocation3 + $0x23] sm:$0x3] %vm2726_vm13, %v6432_v19  ;;  %v834_v59 = vpop.permute.xlu1 %833 }
 0x288   : > { %v618_v60 = vpop.permute.xlu0 %617  ;;  %920 = vst.msk [vmem:[#allocation2 + $0xb0] sm:$0xff] %vm897_vm3, %v834_v59 }
 0x289   : > { %703 = vst.msk [vmem:[#allocation2 + $0xb8] sm:$0xff] %vm679_vm2, %v618_v60  ;;  %2149 = vrot.lane.b32.xlu1 %v2051_v57, %s6431_s13 }
 0x28a   : > { %1933 = vrot.lane.b32.xlu0 %v1834_v58, %s6430_s27  ;;  %495 = vst.msk [vmem:[#allocation2 + $0x108] sm:$0xff] %vm461_vm0, %v458_v52 }
 0x28b   : > { %v1702_v0 = vpop.permute.xlu1 %1701  ;;  %v2262_v2 = vld [vmem:[#allocation2 + $0x98] sm:$0xff] }
 0x28c   : > { %v1486_v1 = vpop.permute.xlu0 %1485  ;;  %1790 = vst.msk [vmem:[#allocation2 + $0xa0] sm:$0xff] %vm1769_vm7, %v1702_v0  ;;  %5597 = vmatmul.mubr.msk.f32.gmra.mrb[18].mxu0 %vm2291_vm10, %v2262_v2 }
 0x28d   : > { %1573 = vst.msk [vmem:[#allocation2 + $0xa8] sm:$0xff] %vm1551_vm6, %v1486_v1  ;;  %v2817_v3 = vld [vmem:[#allocation3 + $0x1a] sm:$0xff]  ;;  %1283 = vrot.lane.b32.xlu1 %v1182_v62, %s6427_s21  ;;  %v7526_v16 = vld [vmem:[#allocation3 + $0x28] sm:$0xff] }
 0x28e   : > { %631 = vrot.lane.b32.xlu0 %v529_v63, %s6425_s20  ;;  %v2746_v4 = vld [vmem:[#allocation3 + $0x20] sm:$0xff]  ;;  %v2853_v6 = vmax.f32 %v7450_v32, %v2817_v3  ;;  %v2054_v62 = vld [vmem:[%s6705_s23 + $0x10e] sm:$0xff] }
 0x28f   : > { %v2818_v5 = vld [vmem:[#allocation3 + $0x22] sm:$0xff]  ;;  %v1052_v11 = vpop.permute.xlu1 %1051 }
 0x290   : > { %v2854_v10 = vmax.f32 %v2746_v4, %v2818_v5  ;;  %v836_v12 = vpop.permute.xlu0 %835  ;;  %v2782_v13 = vld [vmem:[#allocation3 + $0x21] sm:$0xff]  ;;  %v2889_v14 = vmax.f32 %v2853_v6, %v2781_v8  ;;  %1138 = vst.msk [vmem:[#allocation2 + $0xb0] sm:$0xff] %vm1115_vm4, %v1052_v11  ;;  %v2783_v63 = vld [vmem:[#allocation3 + $0x29] sm:$0xff]  ;;  %v7617_v11 = vld [vmem:[%s6705_s23 + $0x114] sm:$0xff] }
 0x291   : > { %921 = vst.msk [vmem:[#allocation2 + $0xb8] sm:$0xff] %vm897_vm3, %v836_v12  ;;  %2151 = vrot.lane.b32.xlu1 %v2052_v7, %s6431_s13  ;;  %v532_v7 = vld [vmem:[%s6705_s23 + $0x109] sm:$0xff] }
 0x292   : > { %v2890_v15 = vmax.f32 %v2854_v10, %v2782_v13  ;;  %1499 = vrot.lane.b32.xlu0 %v7460_v35, %s6428_s22  ;;  %2925 = vst.msk [vmem:[#allocation3 + $0x19] sm:$0xff] %vm2688_vm11, %v2889_v14  ;;  %v457_v35 = vld [vmem:[%s6705_s23 + $0x100] sm:$0xff]  ;;  %v7626_v14 = vld [vmem:[%s6705_s23 + $0x112] sm:$0xff] }
 0x293   : > { %v1920_v18 = vpop.permute.xlu1 %1919  ;;  %494 = vst.msk [vmem:[#allocation2 + $0x100] sm:$0xff] %vm461_vm0, %v457_v35  ;;  %v1838_v35 = vld [vmem:[%s6705_s23 + $0x11d] sm:$0xff] }
 0x294   : > { %2926 = vst.msk [vmem:[#allocation3 + $0x21] sm:$0xff] %vm2688_vm11, %v2890_v15  ;;  %v1704_v20 = vpop.permute.xlu0 %1703 }
 0x295   : > { %2008 = vst.msk [vmem:[#allocation2 + $0xa0] sm:$0xff] %vm1987_vm8, %v1920_v18  ;;  %849 = vrot.lane.b32.xlu1 %v7469_v38, %s6424_s10  ;;  %v7636_v18 = vld [vmem:[%s6705_s23 + $0x11c] sm:$0xff] }
 0x296   : > { %1791 = vst.msk [vmem:[#allocation2 + $0xa8] sm:$0xff] %vm1769_vm7, %v1704_v20  ;;  %633 = vrot.lane.b32.xlu0 %v530_v17, %s6425_s20  ;;  %v1837_v17 = vld [vmem:[%s6705_s23 + $0x115] sm:$0xff] }
 0x297   : > { %v1270_v22 = vpop.permute.xlu1 %1269 }
 0x298   : > { %v1054_v23 = vpop.permute.xlu0 %1053  ;;  %1356 = vst.msk [vmem:[#allocation2 + $0xb0] sm:$0xff] %vm1333_vm5, %v1270_v22 }
 0x299   : > { %1139 = vst.msk [vmem:[#allocation2 + $0xb8] sm:$0xff] %vm1115_vm4, %v1054_v23  ;;  %1717 = vrot.lane.b32.xlu1 %v7537_v21, %s6429_s18  ;;  %v459_v23 = vld [vmem:[%s6705_s23 + $0x110] sm:$0xff] }
 0x29a   : > { %1501 = vrot.lane.b32.xlu0 %v7479_v42, %s6428_s22  ;;  %496 = vst.msk [vmem:[#allocation2 + $0x110] sm:$0xff] %vm461_vm0, %v459_v23  ;;  %vm715_vm0 = vcmask 62496  }
 0x29b   : > { %v2961_v26 = vld [vmem:[#allocation3 + $0x13] ss:$2 sm:$0xff]  ;;  %v2138_v27 = vpop.permute.xlu1 %2137 }
 0x29c   : > { %v1922_v28 = vpop.permute.xlu0 %1921  ;;  %v2962_v29 = vmax.f32 %v2959_v25, %v2961_v26  ;;  %2226 = vst.msk [vmem:[#allocation2 + $0xa0] sm:$0xff] %vm2205_vm9, %v2138_v27  ;;  %v1185_v27 = vld [vmem:[%s6705_s23 + $0x113] sm:$0xff] }
 0x29d   : > { %2009 = vst.msk [vmem:[#allocation2 + $0xa8] sm:$0xff] %vm1987_vm8, %v1922_v28  ;;  %1067 = vrot.lane.b32.xlu1 %v7546_v24, %s6426_s26  ;;  %v968_v28 = vld [vmem:[%s6705_s23 + $0x11a] sm:$0xff] }
 0x29e   : > { %851 = vrot.lane.b32.xlu0 %v7492_v51, %s6424_s10  ;;  %2963 = vst.msk [vmem:[#allocation4 + $0xb] sm:$0xff] %vm2688_vm11, %v2962_v29 }
 0x29f   : > { %v1272_v32 = vpop.permute.xlu1 %1271  ;;  %v5580_v34 = vpop.f32.mrb[6].mxu0 }
 0x2a0   : > { %v620_v33 = vpop.permute.xlu0 %619  ;;  %1357 = vst.msk [vmem:[#allocation2 + $0xb8] sm:$0xff] %vm1333_vm5, %v1272_v32  ;;  %v2506_v36 = vadd.f32 %v5580_v34, %v7325_v9  ;;  %v2500_v37 = vpop.f32.mrb[7].mxu0  ;;  %v2055_v34 = vld [vmem:[%s6705_s23 + $0x116] sm:$0xff] }
 0x2a1   : > { %704 = vst.msk [vmem:[#allocation2 + $0xc0] sm:$0xff] %vm679_vm2, %v620_v33  ;;  %1935 = vrot.lane.b32.xlu1 %v1835_v30, %s6430_s27  ;;  %v2501_v38 = vadd.f32 %v7325_v9, %v2500_v37 }
 0x2a2   : > { %1719 = vrot.lane.b32.xlu0 %v7557_v31, %s6429_s18  ;;  %v2656_v41 = vmax.f32 %v2506_v36, 0.0 }
 0x2a3   : > { %v2140_v42 = vpop.permute.xlu1 %2139  ;;  %v2263_v44 = vld [vmem:[#allocation2 + $0xa0] sm:$0xff]  ;;  %v2655_v45 = vmax.f32 %v2501_v38, 0.0  ;;  %v460_v38 = vld [vmem:[%s6705_s23 + $0x118] sm:$0x3f] }
 0x2a4   : > { %v1488_v43 = vpop.permute.xlu0 %1487  ;;  %2227 = vst.msk [vmem:[#allocation2 + $0xa8] sm:$0xff] %vm2205_vm9, %v2140_v42  ;;  %5599 = vmatprep.mubr.msk.f32.mxu0 %vm2291_vm10, %v2263_v44 }
 0x2a5   : > { %1574 = vst.msk [vmem:[#allocation2 + $0xb0] sm:$0xff] %vm1551_vm6, %v1488_v43  ;;  %1285 = vrot.lane.b32.xlu1 %v1183_v39, %s6427_s21  ;;  %v3238_v46 = vld [vmem:[#allocation4 + $0xb] sm:$0xff]  ;;  %v1186_v39 = vld [vmem:[%s6705_s23 + $0x11b] sm:$0xff] }
 0x2a6   : > { %2696 = vst.msk [vmem:[#allocation3 + $0x39] sm:$0xff] %vm2688_vm11, %v2656_v41  ;;  %1069 = vrot.lane.b32.xlu0 %v7570_v40, %s6426_s26  ;;  %v3033_v47 = vld [vmem:[#allocation4 + $0x8] sm:$0xff]  ;;  %2695 = vst.msk [vmem:[#allocation3 + $0x31] sm:$0xff] %vm2688_vm11, %v2655_v45 }
 0x2a7   : > { %3248 = vst.msk [vmem:[#allocation5 + $0x8] sm:$0xff] %vm2688_vm11, %v3238_v46  ;;  %3043 = vst.msk [vmem:[#allocation5 + $0x18] sm:$0xff] %vm2688_vm11, %v3033_v47  ;;  %v838_v50 = vpop.permute.xlu1 %837  ;;  %v2056_v47 = vld [vmem:[%s6705_s23 + $0x11e] sm:$0xff] }
 0x2a8   : > { %2729 = vst.msk [vmem:[#allocation3 + $0x35] sm:$0x3] %vm2726_vm13, %v6432_v19  ;;  %v622_v51 = vpop.permute.xlu0 %621 }
 0x2a9   : > { %922 = vst.msk [vmem:[#allocation2 + $0xc0] sm:$0xff] %vm897_vm3, %v838_v50  ;;  %2153 = vrot.lane.b32.xlu1 %v2053_v48, %s6431_s13 }
 0x2aa   : > { %705 = vst.msk [vmem:[#allocation2 + $0xc8] sm:$0xff] %vm679_vm2, %v622_v51  ;;  %1937 = vrot.lane.b32.xlu0 %v1836_v49, %s6430_s27 }
 0x2ab   : > { %v1706_v55 = vpop.permute.xlu1 %1705  ;;  %v2264_v57 = vld [vmem:[#allocation2 + $0xa8] sm:$0xff]  ;;  %498 = vst.msk [vmem:[#allocation2 + $0x118] sm:$0x3f] %vm497_vm15, %v460_v38  ;;  %vm3236_vm15 = vcmask 1046272  }
 0x2ac   : > { %v1490_v56 = vpop.permute.xlu0 %1489  ;;  %1792 = vst.msk [vmem:[#allocation2 + $0xb0] sm:$0xff] %vm1769_vm7, %v1706_v55  ;;  %5600 = vmatmul.mubr.msk.f32.gmra.mrb[20].mxu0 %vm2291_vm10, %v2264_v57  ;;  %v3507_v38 = vld [vmem:[#allocation15 + $0x98] sm:$0xff] }
 0x2ad   : > { %1575 = vst.msk [vmem:[#allocation2 + $0xb8] sm:$0xff] %vm1551_vm6, %v1490_v56  ;;  %v2819_v58 = vld [vmem:[#allocation3 + $0x2a] sm:$0xff]  ;;  %1287 = vrot.lane.b32.xlu1 %v1184_v53, %s6427_s21  ;;  %v7606_v6 = vld [vmem:[#allocation3 + $0x38] sm:$0xff] }
 0x2ae   : > { %635 = vrot.lane.b32.xlu0 %v531_v54, %s6425_s20  ;;  %v2855_v61 = vmax.f32 %v7526_v16, %v2819_v58  ;;  %v2785_v48 = vld [vmem:[#allocation3 + $0x39] sm:$0xff] }
 0x2af   : > { %v2748_v59 = vld [vmem:[#allocation3 + $0x30] sm:$0xff]  ;;  %v1056_v1 = vpop.permute.xlu1 %1055  ;;  %v534_v56 = vld [vmem:[%s6705_s23 + $0x119] sm:$0x3f] }
 0x2b0   : > { %v2820_v60 = vld [vmem:[#allocation3 + $0x32] sm:$0xff]  ;;  %v840_v2 = vpop.permute.xlu0 %839  ;;  %v2891_v4 = vmax.f32 %v2855_v61, %v2783_v63  ;;  %1140 = vst.msk [vmem:[#allocation2 + $0xc0] sm:$0xff] %vm1115_vm4, %v1056_v1  ;;  %v969_v1 = vld [vmem:[%s6705_s23 + $0x122] sm:$0xff] }
 0x2b1   : > { %v2856_v0 = vmax.f32 %v2748_v59, %v2820_v60  ;;  %v2784_v3 = vld [vmem:[#allocation3 + $0x31] sm:$0xff]  ;;  %923 = vst.msk [vmem:[#allocation2 + $0xc8] sm:$0xff] %vm897_vm3, %v840_v2  ;;  %2155 = vrot.lane.b32.xlu1 %v2054_v62, %s6431_s13  ;;  %v7690_v60 = vld [vmem:[%s6705_s23 + $0x124] sm:$0xff]  ;;  %v752_v2 = vld [vmem:[%s6705_s23 + $0x11a] sm:$0x3f] }
 0x2b2   : > { %1503 = vrot.lane.b32.xlu0 %v7537_v21, %s6428_s22  ;;  %2927 = vst.msk [vmem:[#allocation3 + $0x29] sm:$0xff] %vm2688_vm11, %v2891_v4 }
 0x2b3   : > { %v2892_v5 = vmax.f32 %v2856_v0, %v2784_v3  ;;  %v1924_v8 = vpop.permute.xlu1 %1923  ;;  %v2964_v0 = vld [vmem:[#allocation3 + $0x13] ss:$2 sm:$0xff] }
 0x2b4   : > { %v1708_v10 = vpop.permute.xlu0 %1707  ;;  %2010 = vst.msk [vmem:[#allocation2 + $0xb0] sm:$0xff] %vm1987_vm8, %v1924_v8  ;;  %v1839_v8 = vld [vmem:[%s6705_s23 + $0x125] sm:$0xff] }
 0x2b5   : > { %2928 = vst.msk [vmem:[#allocation3 + $0x31] sm:$0xff] %vm2688_vm11, %v2892_v5  ;;  %853 = vrot.lane.b32.xlu1 %v7546_v24, %s6424_s10 }
 0x2b6   : > { %1793 = vst.msk [vmem:[#allocation2 + $0xb8] sm:$0xff] %vm1769_vm7, %v1708_v10  ;;  %637 = vrot.lane.b32.xlu0 %v532_v7, %s6425_s20  ;;  %v1622_v10 = vld [vmem:[%s6705_s23 + $0x12c] sm:$0xff] }
 0x2b7   : > { %v1274_v12 = vpop.permute.xlu1 %1273 }
 0x2b8   : > { %v1058_v13 = vpop.permute.xlu0 %1057  ;;  %1358 = vst.msk [vmem:[#allocation2 + $0xc0] sm:$0xff] %vm1333_vm5, %v1274_v12 }
 0x2b9   : > { %1141 = vst.msk [vmem:[#allocation2 + $0xc8] sm:$0xff] %vm1115_vm4, %v1058_v13  ;;  %1721 = vrot.lane.b32.xlu1 %v7617_v11, %s6429_s18 }
 0x2ba   : > { %1505 = vrot.lane.b32.xlu0 %v7557_v31, %s6428_s22 }
 0x2bb   : > { %v2142_v15 = vpop.permute.xlu1 %2141 }
 0x2bc   : > { %v1926_v16 = vpop.permute.xlu0 %1925  ;;  %2228 = vst.msk [vmem:[#allocation2 + $0xb0] sm:$0xff] %vm2205_vm9, %v2142_v15  ;;  %v2966_v63 = vld [vmem:[#allocation3 + $0x25] ss:$2 sm:$0xff] }
 0x2bd   : > { %2011 = vst.msk [vmem:[#allocation2 + $0xb8] sm:$0xff] %vm1987_vm8, %v1926_v16  ;;  %1071 = vrot.lane.b32.xlu1 %v7626_v14, %s6426_s26  ;;  %v2969_v3 = vmax.f32 %v2964_v0, %v2966_v63  ;;  %v3493_v0 = vld [vmem:[#allocation15 + $0x28] sm:$0xff] }
 0x2be   : > { %855 = vrot.lane.b32.xlu0 %v7570_v40, %s6424_s10  ;;  %v533_v40 = vld [vmem:[%s6705_s23 + $0x111] sm:$0xff] }
 0x2bf   : > { %v1276_v20 = vpop.permute.xlu1 %1275  ;;  %v5583_v22 = vpop.f32.mrb[8].mxu0 }
 0x2c0   : > { %v624_v21 = vpop.permute.xlu0 %623  ;;  %1359 = vst.msk [vmem:[#allocation2 + $0xc8] sm:$0xff] %vm1333_vm5, %v1276_v20  ;;  %v2516_v24 = vadd.f32 %v5583_v22, %v7325_v9  ;;  %v2510_v25 = vpop.f32.mrb[9].mxu0 }
 0x2c1   : > { %706 = vst.msk [vmem:[#allocation2 + $0xd0] sm:$0xff] %vm679_vm2, %v624_v21  ;;  %1939 = vrot.lane.b32.xlu1 %v1837_v17, %s6430_s27  ;;  %v2511_v26 = vadd.f32 %v7325_v9, %v2510_v25  ;;  %v1187_v17 = vld [vmem:[%s6705_s23 + $0x123] sm:$0xff]  ;;  %v1840_v25 = vld [vmem:[%s6705_s23 + $0x12d] sm:$0xff] }
 0x2c2   : > { %1723 = vrot.lane.b32.xlu0 %v7636_v18, %s6429_s18  ;;  %v2658_v29 = vmax.f32 %v2516_v24, 0.0 }
 0x2c3   : > { %v2144_v30 = vpop.permute.xlu1 %2143  ;;  %v2265_v32 = vld [vmem:[#allocation2 + $0xb0] sm:$0xff]  ;;  %v2657_v33 = vmax.f32 %v2511_v26, 0.0 }
 0x2c4   : > { %v1492_v31 = vpop.permute.xlu0 %1491  ;;  %2229 = vst.msk [vmem:[#allocation2 + $0xb8] sm:$0xff] %vm2205_vm9, %v2144_v30  ;;  %5602 = vmatprep.mubr.msk.f32.mxu0 %vm2291_vm10, %v2265_v32  ;;  %v3504_v26 = vld [vmem:[#allocation15 + $0x80] sm:$0xff]  ;;  %v3489_v32 = vld [vmem:[#allocation15 + $0x8] sm:$0xff] }
 0x2c5   : > { %1576 = vst.msk [vmem:[#allocation2 + $0xc0] sm:$0xff] %vm1551_vm6, %v1492_v31  ;;  %1289 = vrot.lane.b32.xlu1 %v1185_v27, %s6427_s21  ;;  %v3505_v27 = vld [vmem:[#allocation15 + $0x88] sm:$0xff]  ;;  %v3488_v31 = vld [vmem:[#allocation15] sm:$0xff] }
 0x2c6   : > { %2698 = vst.msk [vmem:[#allocation3 + $0x49] sm:$0xff] %vm2688_vm11, %v2658_v29  ;;  %1073 = vrot.lane.b32.xlu0 %v968_v28, %s6426_s26  ;;  %2697 = vst.msk [vmem:[#allocation3 + $0x41] sm:$0xff] %vm2688_vm11, %v2657_v33  ;;  %v5679_v30 = vpack.c.bf16 %v3505_v27, %v3504_v26  ;;  %v3515_v26 = vld [vmem:[#allocation15 + $0xd8] sm:$0xff]  ;;  %v3498_v27 = vld [vmem:[#allocation15 + $0x50] sm:$0xff] }
 0x2c7   : > { %2730 = vst.msk [vmem:[#allocation3 + $0x47] sm:$0x3] %vm2726_vm13, %v6432_v19  ;;  %v842_v36 = vpop.permute.xlu1 %841 }
 0x2c8   : > { %v626_v37 = vpop.permute.xlu0 %625  ;;  %924 = vst.msk [vmem:[#allocation2 + $0xd0] sm:$0xff] %vm897_vm3, %v842_v36  ;;  %5680 = vmatprep.subr.bf16.mxu1 %v5679_v30 }
 0x2c9   : > { %707 = vst.msk [vmem:[#allocation2 + $0xd8] sm:$0xff] %vm679_vm2, %v626_v37  ;;  %2157 = vrot.lane.b32.xlu1 %v2055_v34, %s6431_s13  ;;  %v5681_v34 = vpack.c.bf16 %v3489_v32, %v3488_v31  ;;  %v3506_v37 = vld [vmem:[#allocation15 + $0x90] sm:$0xff]  ;;  %v3499_v31 = vld [vmem:[#allocation15 + $0x58] sm:$0xff] }
 0x2ca   : > { %1941 = vrot.lane.b32.xlu0 %v1838_v35, %s6430_s27 }
 0x2cb   : > { %v1710_v41 = vpop.permute.xlu1 %1709  ;;  %v2266_v43 = vld [vmem:[#allocation2 + $0xb8] sm:$0xff]  ;;  %5682 = vmatpush3.bf16.msra.mxu1 %v5681_v34  ;;  %v5701_v34 = vpack.c.bf16 %v3499_v31, %v3498_v27 }
 0x2cc   : > { %v1494_v42 = vpop.permute.xlu0 %1493  ;;  %1794 = vst.msk [vmem:[#allocation2 + $0xc0] sm:$0xff] %vm1769_vm7, %v1710_v41  ;;  %5603 = vmatmul.mubr.msk.f32.gmra.mrb[22].mxu0 %vm2291_vm10, %v2266_v43  ;;  %v3490_v41 = vld [vmem:[#allocation15 + $0x10] sm:$0xff] }
 0x2cd   : > { %1577 = vst.msk [vmem:[#allocation2 + $0xc8] sm:$0xff] %vm1551_vm6, %v1494_v42  ;;  %v2821_v44 = vld [vmem:[#allocation3 + $0x3a] sm:$0xff]  ;;  %1291 = vrot.lane.b32.xlu1 %v1186_v39, %s6427_s21  ;;  %v1188_v39 = vld [vmem:[%s6705_s23 + $0x12b] sm:$0x3f]  ;;  %v3491_v42 = vld [vmem:[#allocation15 + $0x18] sm:$0xff] }
 0x2ce   : > { %639 = vrot.lane.b32.xlu0 %v533_v40, %s6425_s20  ;;  %v2750_v45 = vld [vmem:[#allocation3 + $0x40] sm:$0xff]  ;;  %v2857_v46 = vmax.f32 %v7606_v6, %v2821_v44  ;;  %v7681_v57 = vld [vmem:[#allocation3 + $0x48] sm:$0xff]  ;;  %v5683_v40 = vpack.c.bf16 %v3507_v38, %v3506_v37 }
 0x2cf   : > { %v2822_v49 = vld [vmem:[#allocation3 + $0x42] sm:$0xff]  ;;  %v1060_v50 = vpop.permute.xlu1 %1059  ;;  %v3500_v37 = vld [vmem:[#allocation15 + $0x60] sm:$0xff] }
 0x2d0   : > { %v844_v51 = vpop.permute.xlu0 %843  ;;  %v2858_v52 = vmax.f32 %v2750_v45, %v2822_v49  ;;  %v2893_v53 = vmax.f32 %v2857_v46, %v2785_v48  ;;  %1142 = vst.msk [vmem:[#allocation2 + $0xd0] sm:$0xff] %vm1115_vm4, %v1060_v50  ;;  %v2786_v54 = vld [vmem:[#allocation3 + $0x41] sm:$0xff]  ;;  %v5685_v46 = vpack.c.bf16 %v3491_v42, %v3490_v41  ;;  %5684 = vmatprep.subr.bf16.mxu1 %v5683_v40  ;;  %v1406_v48 = vld [vmem:[%s6705_s23 + $0x12c] sm:$0x3f] }
 0x2d1   : > { %925 = vst.msk [vmem:[#allocation2 + $0xd8] sm:$0xff] %vm897_vm3, %v844_v51  ;;  %2159 = vrot.lane.b32.xlu1 %v2056_v47, %s6431_s13  ;;  %v2058_v51 = vld [vmem:[%s6705_s23 + $0x12e] sm:$0xff]  ;;  %v3052_v40 = vld [vmem:[#allocation4 + $0x1] sm:$0xff] }
 0x2d2   : > { %1507 = vrot.lane.b32.xlu0 %v7617_v11, %s6428_s22  ;;  %v2894_v55 = vmax.f32 %v2858_v52, %v2786_v54  ;;  %2929 = vst.msk [vmem:[#allocation3 + $0x39] sm:$0xff] %vm2688_vm11, %v2893_v53  ;;  %5686 = vmatpush3.bf16.msra.mxu1 %v5685_v46  ;;  %v7772_v46 = vld [vmem:[#allocation13] ss:$0 sm:$0xff] }
 0x2d3   : > { %v1928_v58 = vpop.permute.xlu1 %1927 }
 0x2d4   : > { %v1712_v59 = vpop.permute.xlu0 %1711  ;;  %2930 = vst.msk [vmem:[#allocation3 + $0x41] sm:$0xff] %vm2688_vm11, %v2894_v55 }
 0x2d5   : > { %2012 = vst.msk [vmem:[#allocation2 + $0xc0] sm:$0xff] %vm1987_vm8, %v1928_v58  ;;  %857 = vrot.lane.b32.xlu1 %v7626_v14, %s6424_s10  ;;  %v3509_v58 = vld [vmem:[#allocation15 + $0xa8] sm:$0xff] }
 0x2d6   : > { %1795 = vst.msk [vmem:[#allocation2 + $0xc8] sm:$0xff] %vm1769_vm7, %v1712_v59  ;;  %641 = vrot.lane.b32.xlu0 %v534_v56, %s6425_s20  ;;  %v3508_v56 = vld [vmem:[#allocation15 + $0xa0] sm:$0xff]  ;;  %s5293_s20 = sshll.u32 %s8252_s12, 1 }
 0x2d7   : > { %v1278_v61 = vpop.permute.xlu1 %1277  ;;  %v3492_v59 = vld [vmem:[#allocation15 + $0x20] sm:$0xff]  ;;  %v5687_v63 = vpack.c.bf16 %v3509_v58, %v3508_v56 }
 0x2d8   : > { %v1062_v62 = vpop.permute.xlu0 %1061  ;;  %1360 = vst.msk [vmem:[#allocation2 + $0xd0] sm:$0xff] %vm1333_vm5, %v1278_v61  ;;  %v2787_v61 = vld [vmem:[#allocation3 + $0x49] sm:$0xff] }
 0x2d9   : > { %1143 = vst.msk [vmem:[#allocation2 + $0xd8] sm:$0xff] %vm1115_vm4, %v1062_v62  ;;  %1725 = vrot.lane.b32.xlu1 %v7690_v60, %s6429_s18  ;;  %5688 = vmatprep.subr.bf16.mxu1 %v5687_v63 }
 0x2da   : > { %1509 = vrot.lane.b32.xlu0 %v7636_v18, %s6428_s22  ;;  %v970_v18 = vld [vmem:[%s6705_s23 + $0x12a] sm:$0x3f] }
 0x2db   : > { %v2146_v4 = vpop.permute.xlu1 %2145  ;;  %v2968_v6 = vld [vmem:[#allocation3 + $0x37] ss:$2 sm:$0xff] }
 0x2dc   : > { %v1930_v5 = vpop.permute.xlu0 %1929  ;;  %2230 = vst.msk [vmem:[#allocation2 + $0xc0] sm:$0xff] %vm2205_vm9, %v2146_v4  ;;  %v2970_v7 = vmax.f32 %v2969_v3, %v2968_v6  ;;  %v5689_v3 = vpack.c.bf16 %v3493_v0, %v3492_v59  ;;  %v3510_v4 = vld [vmem:[#allocation15 + $0xb0] sm:$0xff] }
 0x2dd   : > { %2013 = vst.msk [vmem:[#allocation2 + $0xc8] sm:$0xff] %vm1987_vm8, %v1930_v5  ;;  %1075 = vrot.lane.b32.xlu1 %v969_v1, %s6426_s26  ;;  %v3511_v5 = vld [vmem:[#allocation15 + $0xb8] sm:$0xff]  ;;  %v3502_v59 = vld [vmem:[#allocation15 + $0x70] sm:$0xff] }
 0x2de   : > { %859 = vrot.lane.b32.xlu0 %v752_v2, %s6424_s10  ;;  %2971 = vst.msk [vmem:[#allocation4 + $0x15] sm:$0xff] %vm2688_vm11, %v2970_v7  ;;  %v5691_v7 = vpack.c.bf16 %v3511_v5, %v3510_v4  ;;  %5690 = vmatpush3.bf16.msra.mxu1 %v5689_v3  ;;  %s6434_s10 = smov 96  }
 0x2df   : > { %v1280_v11 = vpop.permute.xlu1 %1279  ;;  %v5586_v13 = vpop.f32.mrb[10].mxu0 }
 0x2e0   : > { %v628_v12 = vpop.permute.xlu0 %627  ;;  %1361 = vst.msk [vmem:[#allocation2 + $0xd8] sm:$0xff] %vm1333_vm5, %v1280_v11  ;;  %v2526_v14 = vadd.f32 %v5586_v13, %v7325_v9  ;;  %v2520_v15 = vpop.f32.mrb[11].mxu0  ;;  %5692 = vmatprep.subr.bf16.mxu1 %v5691_v7  ;;  %v3053_v7 = vld [vmem:[#allocation4 + $0x9] sm:$0xff] }
 0x2e1   : > { %708 = vst.msk [vmem:[#allocation2 + $0xe0] sm:$0xff] %vm679_vm2, %v628_v12  ;;  %1943 = vrot.lane.b32.xlu1 %v1839_v8, %s6430_s27  ;;  %v2521_v16 = vadd.f32 %v7325_v9, %v2520_v15  ;;  %v2057_v9 = vld [vmem:[%s6705_s23 + $0x126] sm:$0xff]  ;;  %v3494_v8 = vld [vmem:[#allocation15 + $0x30] sm:$0xff] }
 0x2e2   : > { %1727 = vrot.lane.b32.xlu0 %v1622_v10, %s6429_s18  ;;  %v2660_v20 = vmax.f32 %v2526_v14, 0.0  ;;  %v3495_v10 = vld [vmem:[#allocation15 + $0x38] sm:$0xff]  ;;  %v3512_v15 = vld [vmem:[#allocation15 + $0xc0] sm:$0xff] }
 0x2e3   : > { %v2148_v21 = vpop.permute.xlu1 %2147  ;;  %v2267_v23 = vld [vmem:[#allocation2 + $0xc0] sm:$0xff]  ;;  %v2659_v24 = vmax.f32 %v2521_v16, 0.0  ;;  %v5693_v13 = vpack.c.bf16 %v3495_v10, %v3494_v8  ;;  %v3513_v16 = vld [vmem:[#allocation15 + $0xc8] sm:$0xff] }
 0x2e4   : > { %v1496_v22 = vpop.permute.xlu0 %1495  ;;  %2231 = vst.msk [vmem:[#allocation2 + $0xc8] sm:$0xff] %vm2205_vm9, %v2148_v21  ;;  %5605 = vmatprep.mubr.msk.f32.mxu0 %vm2291_vm10, %v2267_v23  ;;  %v3032_v14 = vld [vmem:[#allocation4] sm:$0xff] }
 0x2e5   : > { %1578 = vst.msk [vmem:[#allocation2 + $0xd0] sm:$0xff] %vm1551_vm6, %v1496_v22  ;;  %1293 = vrot.lane.b32.xlu1 %v1187_v17, %s6427_s21  ;;  %v3239_v33 = vld [vmem:[#allocation4 + $0x13] sm:$0xff]  ;;  %v3496_v17 = vld [vmem:[#allocation15 + $0x40] sm:$0xff]  ;;  %v1842_v21 = vld [vmem:[%s6705_s23 + $0x13d] sm:$0x3f]  ;;  %5694 = vmatpush3.bf16.msra.mxu1 %v5693_v13 }
 0x2e6   : > { %2700 = vst.msk [vmem:[#allocation3 + $0x59] sm:$0xff] %vm2688_vm11, %v2660_v20  ;;  %1077 = vrot.lane.b32.xlu0 %v970_v18, %s6426_s26  ;;  %2699 = vst.msk [vmem:[#allocation3 + $0x51] sm:$0xff] %vm2688_vm11, %v2659_v24  ;;  %v3034_v35 = vld [vmem:[#allocation4 + $0x10] sm:$0xff]  ;;  %v5695_v18 = vpack.c.bf16 %v3513_v16, %v3512_v15 }
 0x2e7   : > { %2731 = vst.msk [vmem:[#allocation3 + $0x59] sm:$0x3] %vm2726_vm13, %v6432_v19  ;;  %v846_v28 = vpop.permute.xlu1 %845  ;;  %v3438_v36 = vld [vmem:[#allocation4 + $0x16] sm:$0xff] }
 0x2e8   : > { %v630_v29 = vpop.permute.xlu0 %629  ;;  %926 = vst.msk [vmem:[#allocation2 + $0xe0] sm:$0xff] %vm897_vm3, %v846_v28  ;;  %v3497_v20 = vld [vmem:[#allocation15 + $0x48] sm:$0xff]  ;;  %5696 = vmatprep.subr.bf16.mxu1 %v5695_v18  ;;  %v2060_v28 = vld [vmem:[%s6705_s23 + $0x13e] sm:$0x3f] }
 0x2e9   : > { %709 = vst.msk [vmem:[#allocation2 + $0xe8] sm:$0xff] %vm679_vm2, %v630_v29  ;;  %2161 = vrot.lane.b32.xlu1 %v2057_v9, %s6431_s13  ;;  %v1841_v22 = vld [vmem:[%s6705_s23 + $0x135] sm:$0xff]  ;;  %v5697_v9 = vpack.c.bf16 %v3497_v20, %v3496_v17 }
 0x2ea   : > { %3249 = vst.msk [vmem:[#allocation5 + $0x20] sm:$0xff] %vm2688_vm11, %v3239_v33  ;;  %1945 = vrot.lane.b32.xlu0 %v1840_v25, %s6430_s27  ;;  %3044 = vst.msk [vmem:[#allocation5 + $0x30] sm:$0xff] %vm2688_vm11, %v3034_v35  ;;  %v3514_v25 = vld [vmem:[#allocation15 + $0xd0] sm:$0xff]  ;;  %v3516_v35 = vld [vmem:[#allocation15 + $0xe0] sm:$0xff] }
 0x2eb   : > { %3448 = vst.msk [vmem:[#allocation5 + $0x10] sm:$0xff] %vm2688_vm11, %v3438_v36  ;;  %v1714_v43 = vpop.permute.xlu1 %1713  ;;  %v2268_v45 = vld [vmem:[#allocation2 + $0xc8] sm:$0xff]  ;;  %3042 = vst.msk [vmem:[#allocation5] sm:$0xff] %vm2688_vm11, %v3032_v14  ;;  %v2059_v29 = vld [vmem:[%s6705_s23 + $0x136] sm:$0xff]  ;;  %v5699_v30 = vpack.c.bf16 %v3515_v26, %v3514_v25  ;;  %5698 = vmatpush3.bf16.msra.mxu1 %v5697_v9 }
 0x2ec   : > { %v1498_v44 = vpop.permute.xlu0 %1497  ;;  %1796 = vst.msk [vmem:[#allocation2 + $0xd0] sm:$0xff] %vm1769_vm7, %v1714_v43  ;;  %5606 = vmatmul.mubr.msk.f32.gmra.mrb[24].mxu0 %vm2291_vm10, %v2268_v45  ;;  %v3517_v36 = vld [vmem:[#allocation15 + $0xe8] sm:$0xff] }
 0x2ed   : > { %1579 = vst.msk [vmem:[#allocation2 + $0xd8] sm:$0xff] %vm1551_vm6, %v1498_v44  ;;  %v2752_v47 = vld [vmem:[#allocation3 + $0x50] sm:$0xff]  ;;  %1511 = vrot.lane.b32.xlu1 %v7690_v60, %s6428_s22  ;;  %v1624_v60 = vld [vmem:[%s6705_s23 + $0x13c] sm:$0x3f]  ;;  %5700 = vmatprep.subr.bf16.mxu1 %v5699_v30  ;;  %v5703_v38 = vpack.c.bf16 %v3517_v36, %v3516_v35 }
 0x2ee   : > { %1295 = vrot.lane.b32.xlu0 %v1188_v39, %s6427_s21  ;;  %v2823_v49 = vld [vmem:[#allocation3 + $0x4a] sm:$0xff]  ;;  %v2824_v50 = vld [vmem:[#allocation3 + $0x52] sm:$0xff] }
 0x2ef   : > { %v2859_v52 = vmax.f32 %v7681_v57, %v2823_v49  ;;  %v2860_v53 = vmax.f32 %v2752_v47, %v2824_v50  ;;  %v1064_v54 = vpop.permute.xlu1 %1063  ;;  %v2788_v62 = vld [vmem:[#allocation3 + $0x51] sm:$0xff]  ;;  %5702 = vmatpush3.bf16.msra.mxu1 %v5701_v34  ;;  %v3114_v50 = vld [vmem:[#allocation4 + $0x2] sm:$0xff]  ;;  %v2789_v16 = vld [vmem:[#allocation3 + $0x59] sm:$0xff] }
 0x2f0   : > { %v848_v55 = vpop.permute.xlu0 %847  ;;  %1144 = vst.msk [vmem:[#allocation2 + $0xe0] sm:$0xff] %vm1115_vm4, %v1064_v54  ;;  %v1623_v57 = vld [vmem:[%s6705_s23 + $0x134] sm:$0xff]  ;;  %v3258_v45 = vld [vmem:[#allocation4 + $0xc] sm:$0xff]  ;;  %5704 = vmatprep.subr.bf16.mxu1 %v5703_v38  ;;  %s6433_s23 = smov 64  }
 0x2f1   : > { %927 = vst.msk [vmem:[#allocation2 + $0xe8] sm:$0xff] %vm897_vm3, %v848_v55  ;;  %v2895_v1 = vmax.f32 %v2859_v52, %v2787_v61  ;;  %v2896_v2 = vmax.f32 %v2860_v53, %v2788_v62  ;;  %1513 = vrot.lane.b32.xlu1 %v1406_v48, %s6428_s22  ;;  %v7749_v6 = vld [vmem:[#allocation3 + $0x58] sm:$0xff]  ;;  %v3519_v52 = vld [vmem:[#allocation15 + $0xf8] sm:$0xff]  ;;  %s424_s22 = scalar_lea.vmem %s8234_s9, %s5293_s20 }
 0x2f2   : > { %2163 = vrot.lane.b32.xlu0 %v2058_v51, %s6431_s13  ;;  %v3501_v39 = vld [vmem:[#allocation15 + $0x68] sm:$0xff]  ;;  %v3518_v51 = vld [vmem:[#allocation15 + $0xf0] sm:$0xff]  ;;  %v3503_v61 = vld [vmem:[#allocation15 + $0x78] sm:$0xff] }
 0x2f3   : > { %2931 = vst.msk [vmem:[#allocation3 + $0x49] sm:$0xff] %vm2688_vm11, %v2895_v1  ;;  %2932 = vst.msk [vmem:[#allocation3 + $0x51] sm:$0xff] %vm2688_vm11, %v2896_v2  ;;  %v1932_v11 = vpop.permute.xlu1 %1931  ;;  %v5705_v43 = vpack.c.bf16 %v3501_v39, %v3500_v37  ;;  %v5707_v58 = vpack.c.bf16 %v3519_v52, %v3518_v51  ;;  %v5709_v63 = vpack.c.bf16 %v3503_v61, %v3502_v59  ;;  %v3378_v2 = vld [vmem:[#allocation4 + $0x15] sm:$0xff] }
 0x2f4   : > { %v1716_v12 = vpop.permute.xlu0 %1715  ;;  %2014 = vst.msk [vmem:[#allocation2 + $0xd0] sm:$0xff] %vm1987_vm8, %v1932_v11  ;;  %v3054_v25 = vld [vmem:[#allocation4 + $0x11] sm:$0xff] }
 0x2f5   : > { %1797 = vst.msk [vmem:[#allocation2 + $0xd8] sm:$0xff] %vm1769_vm7, %v1716_v12  ;;  %1731 = vrot.lane.b32.xlu1 %v1624_v60, %s6429_s18  ;;  %5706 = vmatpush3.bf16.msra.mxu1 %v5705_v43  ;;  %v3318_v60 = vld [vmem:[#allocation4 + $0x14] sm:$0xff] }
 0x2f6   : > { %1729 = vrot.lane.b32.xlu0 %v1623_v57, %s6429_s18  ;;  %5708 = vmatprep.subr.bf16.mxu1 %v5707_v58  ;;  %v3176_v57 = vld [vmem:[#allocation4 + $0xa] sm:$0xff] }
 0x2f7   : > { %v1282_v23 = vpop.permute.xlu1 %1281 }
 0x2f8   : > { %v1066_v24 = vpop.permute.xlu0 %1065  ;;  %1362 = vst.msk [vmem:[#allocation2 + $0xe0] sm:$0xff] %vm1333_vm5, %v1282_v23  ;;  %v3177_v23 = vld [vmem:[#allocation4 + $0x12] sm:$0xff] }
 0x2f9   : > { %1145 = vst.msk [vmem:[#allocation2 + $0xe8] sm:$0xff] %vm1115_vm4, %v1066_v24  ;;  %1949 = vrot.lane.b32.xlu1 %v1842_v21, %s6430_s27  ;;  %5710 = vmatpush3.bf16.msra.mxu1 %v5709_v63  ;;  %v2972_v63 = vld [vmem:[#allocation3 + $0x37] ss:$2 sm:$0xff] }
 0x2fa   : > { %1947 = vrot.lane.b32.xlu0 %v1841_v22, %s6430_s27  ;;  %v2974_v61 = vld [vmem:[#allocation3 + $0x49] ss:$2 sm:$0xff] }
 0x2fb   : > { %v2150_v32 = vpop.permute.xlu1 %2149 }
 0x2fc   : > { %v1934_v33 = vpop.permute.xlu0 %1933  ;;  %2232 = vst.msk [vmem:[#allocation2 + $0xd0] sm:$0xff] %vm2205_vm9, %v2150_v32 }
 0x2fd   : > { %2015 = vst.msk [vmem:[#allocation2 + $0xd8] sm:$0xff] %vm1987_vm8, %v1934_v33  ;;  %2167 = vrot.lane.b32.xlu1 %v2060_v28, %s6431_s13 }
 0x2fe   : > { %2165 = vrot.lane.b32.xlu0 %v2059_v29, %s6431_s13 }
 0x2ff   : > { %v1284_v41 = vpop.permute.xlu1 %1283  ;;  %v5589_v44 = vpop.f32.mrb[12].mxu0 }
 0x300   : > { %v632_v42 = vpop.permute.xlu0 %631  ;;  %1363 = vst.msk [vmem:[#allocation2 + $0xe8] sm:$0xff] %vm1333_vm5, %v1284_v41  ;;  %v2536_v47 = vadd.f32 %v7772_v46, %v5589_v44  ;;  %v2530_v48 = vpop.f32.mrb[13].mxu0 }
 0x301   : > { %710 = vst.msk [vmem:[#allocation2 + $0xf0] sm:$0xff] %vm679_vm2, %v632_v42  ;;  %3072 = vrot.lane.b32.xlu1 %v3052_v40, %s6431_s13  ;;  %v2531_v49 = vadd.f32 %v7772_v46, %v2530_v48 }
 0x302   : > { %3278 = vrot.lane.b32.xlu0 %v3258_v45, %s6431_s13  ;;  %v2662_v53 = vmax.f32 %v2536_v47, 0.0 }
 0x303   : > { %v2152_v54 = vpop.permute.xlu1 %2151  ;;  %v2269_v56 = vld [vmem:[#allocation2 + $0xd0] sm:$0xff]  ;;  %v2661_v62 = vmax.f32 %v2531_v49, 0.0 }
 0x304   : > { %v1500_v55 = vpop.permute.xlu0 %1499  ;;  %2233 = vst.msk [vmem:[#allocation2 + $0xd8] sm:$0xff] %vm2205_vm9, %v2152_v54  ;;  %5608 = vmatprep.mubr.msk.f32.mxu0 %vm2291_vm10, %v2269_v56 }
 0x305   : > { %1580 = vst.msk [vmem:[#allocation2 + $0xe0] sm:$0xff] %vm1551_vm6, %v1500_v55  ;;  %3134 = vrot.lane.b32.xlu1 %v3114_v50, %s6433_s23 }
 0x306   : > { %2702 = vst.msk [vmem:[#allocation3 + $0x69] sm:$0xff] %vm2688_vm11, %v2662_v53  ;;  %3338 = vrot.lane.b32.xlu0 %v3318_v60, %s6433_s23  ;;  %2701 = vst.msk [vmem:[#allocation3 + $0x61] sm:$0xff] %vm2688_vm11, %v2661_v62 }
 0x307   : > { %2732 = vst.msk [vmem:[#allocation3 + $0x6b] sm:$0x3] %vm2726_vm13, %v6432_v19  ;;  %v850_v0 = vpop.permute.xlu1 %849 }
 0x308   : > { %v634_v1 = vpop.permute.xlu0 %633  ;;  %928 = vst.msk [vmem:[#allocation2 + $0xf0] sm:$0xff] %vm897_vm3, %v850_v0  ;;  %v2977_v0 = vmax.f32 %v2972_v63, %v2974_v61 }
 0x309   : > { %711 = vst.msk [vmem:[#allocation2 + $0xf8] sm:$0xff] %vm679_vm2, %v634_v1  ;;  %3196 = vrot.lane.b32.xlu1 %v3176_v57, %s6434_s10 }
 0x30a   : > { %3398 = vrot.lane.b32.xlu0 %v3378_v2, %s6434_s10 }
 0x30b   : > { %v1718_v3 = vpop.permute.xlu1 %1717  ;;  %v2270_v5 = vld [vmem:[#allocation2 + $0xd8] sm:$0xff] }
 0x30c   : > { %v1502_v4 = vpop.permute.xlu0 %1501  ;;  %1798 = vst.msk [vmem:[#allocation2 + $0xe0] sm:$0xff] %vm1769_vm7, %v1718_v3  ;;  %5609 = vmatmul.mubr.msk.f32.gmra.mrb[26].mxu0 %vm2291_vm10, %v2270_v5 }
 0x30d   : > { %1581 = vst.msk [vmem:[#allocation2 + $0xe8] sm:$0xff] %vm1551_vm6, %v1502_v4  ;;  %v2754_v8 = vld [vmem:[#allocation3 + $0x60] sm:$0xff]  ;;  %3074 = vrot.lane.b32.xlu1 %v3053_v7, %s6431_s13 }
 0x30e   : > { %3280 = vrot.lane.b32.xlu0 %v3318_v60, %s6431_s13  ;;  %v2825_v10 = vld [vmem:[#allocation3 + $0x5a] sm:$0xff]  ;;  %v2826_v11 = vld [vmem:[#allocation3 + $0x62] sm:$0xff] }
 0x30f   : > { %v2861_v12 = vmax.f32 %v7749_v6, %v2825_v10  ;;  %v2862_v13 = vmax.f32 %v2754_v8, %v2826_v11  ;;  %v1068_v14 = vpop.permute.xlu1 %1067  ;;  %v2790_v17 = vld [vmem:[#allocation3 + $0x61] sm:$0xff]  ;;  %v2791_v52 = vld [vmem:[#allocation3 + $0x69] sm:$0xff] }
 0x310   : > { %v852_v15 = vpop.permute.xlu0 %851  ;;  %1146 = vst.msk [vmem:[#allocation2 + $0xf0] sm:$0xff] %vm1115_vm4, %v1068_v14  ;;  %v2755_v21 = vld [vmem:[#allocation3 + $0x68] sm:$0xff] }
 0x311   : > { %929 = vst.msk [vmem:[#allocation2 + $0xf8] sm:$0xff] %vm897_vm3, %v852_v15  ;;  %v2897_v18 = vmax.f32 %v2861_v12, %v2789_v16  ;;  %v2898_v20 = vmax.f32 %v2862_v13, %v2790_v17  ;;  %3136 = vrot.lane.b32.xlu1 %v3176_v57, %s6433_s23 }
 0x313   : > { %2933 = vst.msk [vmem:[#allocation3 + $0x59] sm:$0xff] %vm2688_vm11, %v2897_v18  ;;  %2934 = vst.msk [vmem:[#allocation3 + $0x61] sm:$0xff] %vm2688_vm11, %v2898_v20  ;;  %v1936_v22 = vpop.permute.xlu1 %1935 }
 0x314   : > { %v1720_v6 = vpop.permute.xlu0 %1719  ;;  %2016 = vst.msk [vmem:[#allocation2 + $0xe0] sm:$0xff] %vm1987_vm8, %v1936_v22 }
 0x315   : > { %1799 = vst.msk [vmem:[#allocation2 + $0xe8] sm:$0xff] %vm1769_vm7, %v1720_v6  ;;  %3198 = vrot.lane.b32.xlu1 %v3177_v23, %s6434_s10 }
 0x317   : > { %v1286_v24 = vpop.permute.xlu1 %1285 }
 0x318   : > { %v1070_v9 = vpop.permute.xlu0 %1069  ;;  %1364 = vst.msk [vmem:[#allocation2 + $0xf0] sm:$0xff] %vm1333_vm5, %v1286_v24 }
 0x319   : > { %1147 = vst.msk [vmem:[#allocation2 + $0xf8] sm:$0xff] %vm1115_vm4, %v1070_v9  ;;  %3076 = vrot.lane.b32.xlu1 %v3054_v25, %s6431_s13 }
 0x31b   : > { %v2154_v26 = vpop.permute.xlu1 %2153 }
 0x31c   : > { %v1938_v27 = vpop.permute.xlu0 %1937  ;;  %2234 = vst.msk [vmem:[#allocation2 + $0xe0] sm:$0xff] %vm2205_vm9, %v2154_v26 }
 0x31d   : > { %2017 = vst.msk [vmem:[#allocation2 + $0xe8] sm:$0xff] %vm1987_vm8, %v1938_v27  ;;  %3138 = vrot.lane.b32.xlu1 %v3177_v23, %s6433_s23 }
 0x31f   : > { %v1288_v28 = vpop.permute.xlu1 %1287  ;;  %v5592_v30 = vpop.f32.mrb[14].mxu0 }
 0x320   : > { %v636_v29 = vpop.permute.xlu0 %635  ;;  %1365 = vst.msk [vmem:[#allocation2 + $0xf8] sm:$0xff] %vm1333_vm5, %v1288_v28  ;;  %v2546_v31 = vadd.f32 %v7772_v46, %v5592_v30  ;;  %v2540_v32 = vpop.f32.mrb[15].mxu0 }
 0x321   : > { %712 = vst.msk [vmem:[#allocation2 + $0x100] sm:$0xff] %vm679_vm2, %v636_v29  ;;  %v2541_v33 = vadd.f32 %v7772_v46, %v2540_v32 }
 0x322   : > { %v2664_v34 = vmax.f32 %v2546_v31, 0.0 }
 0x323   : > { %v2156_v35 = vpop.permute.xlu1 %2155  ;;  %v2271_v37 = vld [vmem:[#allocation2 + $0xe0] sm:$0xff]  ;;  %v2663_v38 = vmax.f32 %v2541_v33, 0.0 }
 0x324   : > { %v1504_v36 = vpop.permute.xlu0 %1503  ;;  %2235 = vst.msk [vmem:[#allocation2 + $0xe8] sm:$0xff] %vm2205_vm9, %v2156_v35  ;;  %5611 = vmatprep.mubr.msk.f32.mxu0 %vm2291_vm10, %v2271_v37 }
 0x325   : > { %1582 = vst.msk [vmem:[#allocation2 + $0xf0] sm:$0xff] %vm1551_vm6, %v1504_v36 }
 0x326   : > { %2704 = vst.msk [vmem:[#allocation3 + $0x79] sm:$0xff] %vm2688_vm11, %v2664_v34  ;;  %2703 = vst.msk [vmem:[#allocation3 + $0x71] sm:$0xff] %vm2688_vm11, %v2663_v38 }
 0x327   : > { %2733 = vst.msk [vmem:[#allocation3 + $0x7d] sm:$0x3] %vm2726_vm13, %v6432_v19  ;;  %v854_v39 = vpop.permute.xlu1 %853 }
 0x328   : > { %v638_v40 = vpop.permute.xlu0 %637  ;;  %930 = vst.msk [vmem:[#allocation2 + $0x100] sm:$0xff] %vm897_vm3, %v854_v39 }
 0x329   : > { %713 = vst.msk [vmem:[#allocation2 + $0x108] sm:$0xff] %vm679_vm2, %v638_v40 }
 0x32b   : > { %v1722_v41 = vpop.permute.xlu1 %1721  ;;  %v2272_v43 = vld [vmem:[#allocation2 + $0xe8] sm:$0xff] }
 0x32c   : > { %v1506_v42 = vpop.permute.xlu0 %1505  ;;  %1800 = vst.msk [vmem:[#allocation2 + $0xf0] sm:$0xff] %vm1769_vm7, %v1722_v41  ;;  %5612 = vmatmul.mubr.msk.f32.gmra.mrb[28].mxu0 %vm2291_vm10, %v2272_v43 }
 0x32d   : > { %1583 = vst.msk [vmem:[#allocation2 + $0xf8] sm:$0xff] %vm1551_vm6, %v1506_v42  ;;  %v2756_v44 = vld [vmem:[#allocation3 + $0x70] sm:$0xff] }
 0x32e   : > { %v2827_v45 = vld [vmem:[#allocation3 + $0x6a] sm:$0xff]  ;;  %v2828_v47 = vld [vmem:[#allocation3 + $0x72] sm:$0xff] }
 0x32f   : > { %v2863_v48 = vmax.f32 %v2755_v21, %v2827_v45  ;;  %v2864_v49 = vmax.f32 %v2756_v44, %v2828_v47  ;;  %v1072_v50 = vpop.permute.xlu1 %1071  ;;  %v2792_v53 = vld [vmem:[#allocation3 + $0x71] sm:$0xff]  ;;  %v2793_v36 = vld [vmem:[#allocation3 + $0x79] sm:$0xff] }
 0x330   : > { %v856_v51 = vpop.permute.xlu0 %855  ;;  %1148 = vst.msk [vmem:[#allocation2 + $0x100] sm:$0xff] %vm1115_vm4, %v1072_v50  ;;  %v7829_v56 = vld [vmem:[#allocation3 + $0x78] sm:$0xff] }
 0x331   : > { %931 = vst.msk [vmem:[#allocation2 + $0x108] sm:$0xff] %vm897_vm3, %v856_v51  ;;  %v2899_v54 = vmax.f32 %v2863_v48, %v2791_v52  ;;  %v2900_v55 = vmax.f32 %v2864_v49, %v2792_v53 }
 0x333   : > { %2935 = vst.msk [vmem:[#allocation3 + $0x69] sm:$0xff] %vm2688_vm11, %v2899_v54  ;;  %2936 = vst.msk [vmem:[#allocation3 + $0x71] sm:$0xff] %vm2688_vm11, %v2900_v55  ;;  %v1940_v58 = vpop.permute.xlu1 %1939 }
 0x334   : > { %v1724_v59 = vpop.permute.xlu0 %1723  ;;  %2018 = vst.msk [vmem:[#allocation2 + $0xf0] sm:$0xff] %vm1987_vm8, %v1940_v58 }
 0x335   : > { %1801 = vst.msk [vmem:[#allocation2 + $0xf8] sm:$0xff] %vm1769_vm7, %v1724_v59 }
 0x337   : > { %v1290_v62 = vpop.permute.xlu1 %1289 }
 0x338   : > { %v1074_v60 = vpop.permute.xlu0 %1073  ;;  %1366 = vst.msk [vmem:[#allocation2 + $0x100] sm:$0xff] %vm1333_vm5, %v1290_v62 }
 0x339   : > { %1149 = vst.msk [vmem:[#allocation2 + $0x108] sm:$0xff] %vm1115_vm4, %v1074_v60 }
 0x33a   : > { %v2976_v1 = vld [vmem:[#allocation3 + $0x5b] ss:$2 sm:$0xff] }
 0x33b   : > { %v2158_v2 = vpop.permute.xlu1 %2157  ;;  %v2978_v3 = vmax.f32 %v2977_v0, %v2976_v1 }
 0x33c   : > { %v1942_v57 = vpop.permute.xlu0 %1941  ;;  %2236 = vst.msk [vmem:[#allocation2 + $0xf0] sm:$0xff] %vm2205_vm9, %v2158_v2 }
 0x33d   : > { %2019 = vst.msk [vmem:[#allocation2 + $0xf8] sm:$0xff] %vm1987_vm8, %v1942_v57 }
 0x33e   : > { %2979 = vst.msk [vmem:[#allocation4 + $0x1f] sm:$0xff] %vm2688_vm11, %v2978_v3 }
 0x33f   : > { %v1292_v4 = vpop.permute.xlu1 %1291  ;;  %v5595_v7 = vpop.f32.mrb[16].mxu0 }
 0x340   : > { %v640_v5 = vpop.permute.xlu0 %639  ;;  %1367 = vst.msk [vmem:[#allocation2 + $0x108] sm:$0xff] %vm1333_vm5, %v1292_v4  ;;  %v2556_v8 = vadd.f32 %v7772_v46, %v5595_v7  ;;  %v2550_v10 = vpop.f32.mrb[17].mxu0 }
 0x341   : > { %714 = vst.msk [vmem:[#allocation2 + $0x110] sm:$0xff] %vm679_vm2, %v640_v5  ;;  %v2551_v11 = vadd.f32 %v7772_v46, %v2550_v10  ;;  %vm1151_vm2 = vcmask 128096  }
 0x342   : > { %v2666_v12 = vmax.f32 %v2556_v8, 0.0 }
 0x343   : > { %v2160_v13 = vpop.permute.xlu1 %2159  ;;  %v2273_v15 = vld [vmem:[#allocation2 + $0xf0] sm:$0xff]  ;;  %v2665_v16 = vmax.f32 %v2551_v11, 0.0 }
 0x344   : > { %v1508_v14 = vpop.permute.xlu0 %1507  ;;  %2237 = vst.msk [vmem:[#allocation2 + $0xf8] sm:$0xff] %vm2205_vm9, %v2160_v13  ;;  %5614 = vmatprep.mubr.msk.f32.mxu0 %vm2291_vm10, %v2273_v15 }
 0x345   : > { %1584 = vst.msk [vmem:[#allocation2 + $0x100] sm:$0xff] %vm1551_vm6, %v1508_v14  ;;  %v3319_v17 = vld [vmem:[#allocation4 + $0x1c] sm:$0xff] }
 0x346   : > { %v3178_v18 = vld [vmem:[#allocation4 + $0x1a] sm:$0xff]  ;;  %2706 = vst.msk [vmem:[#allocation3 + $0x89] sm:$0xff] %vm2688_vm11, %v2666_v12  ;;  %3340 = vrot.lane.b32.xlu0 %v3319_v17, %s6433_s23  ;;  %2705 = vst.msk [vmem:[#allocation3 + $0x81] sm:$0xff] %vm2688_vm11, %v2665_v16 }
 0x347   : > { %3200 = vrot.lane.b32.xlu1 %v3178_v18, %s6434_s10  ;;  %v3035_v20 = vld [vmem:[#allocation4 + $0x18] sm:$0xff]  ;;  %2734 = vst.msk [vmem:[#allocation3 + $0x8f] sm:$0x3] %vm2726_vm13, %v6432_v19  ;;  %v3036_v22 = vld [vmem:[#allocation4 + $0x20] sm:$0xff]  ;;  %v858_v23 = vpop.permute.xlu1 %857 }
 0x348   : > { %3045 = vst.msk [vmem:[#allocation5 + $0x48] sm:$0xff] %vm2688_vm11, %v3035_v20  ;;  %v3240_v21 = vld [vmem:[#allocation4 + $0x1b] sm:$0xff]  ;;  %v642_v24 = vpop.permute.xlu0 %641  ;;  %3046 = vst.msk [vmem:[#allocation5 + $0x60] sm:$0xff] %vm2688_vm11, %v3036_v22 }
 0x349   : > { %v3439_v6 = vld [vmem:[#allocation4 + $0x1e] sm:$0xff]  ;;  %3250 = vst.msk [vmem:[#allocation5 + $0x38] sm:$0xff] %vm2688_vm11, %v3240_v21 }
 0x34a   : > { %3449 = vst.msk [vmem:[#allocation5 + $0x28] sm:$0xff] %vm2688_vm11, %v3439_v6  ;;  %v3379_v9 = vld [vmem:[#allocation4 + $0x1d] sm:$0xff] }
 0x34b   : > { %932 = vst.msk [vmem:[#allocation2 + $0x110] sm:$0xff] %vm897_vm3, %v858_v23  ;;  %v3055_v25 = vld [vmem:[#allocation4 + $0x19] sm:$0xff]  ;;  %3400 = vrot.lane.b32.xlu0 %v3379_v9, %s6434_s10  ;;  %v1726_v26 = vpop.permute.xlu1 %1725  ;;  %vm1369_vm3 = vcmask 160896  }
 0x34c   : > { %716 = vst.msk [vmem:[#allocation2 + $0x118] sm:$0x3f] %vm715_vm0, %v642_v24  ;;  %3078 = vrot.lane.b32.xlu1 %v3055_v25, %s6431_s13  ;;  %v1510_v27 = vpop.permute.xlu0 %1509  ;;  %v2274_v28 = vld [vmem:[#allocation2 + $0xf8] sm:$0xff]  ;;  %vm3816_vm0 = vcmask 517120  }
 0x34d   : > { %1802 = vst.msk [vmem:[#allocation2 + $0x100] sm:$0xff] %vm1769_vm7, %v1726_v26  ;;  %5615 = vmatmul.mubr.msk.f32.gmra.mrb[30].mxu0 %vm2291_vm10, %v2274_v28  ;;  %v2758_v29 = vld [vmem:[#allocation3 + $0x80] sm:$0xff] }
 0x34e   : > { %1585 = vst.msk [vmem:[#allocation2 + $0x108] sm:$0xff] %vm1551_vm6, %v1510_v27  ;;  %v2829_v30 = vld [vmem:[#allocation3 + $0x7a] sm:$0xff]  ;;  %v2830_v31 = vld [vmem:[#allocation3 + $0x82] sm:$0xff] }
 0x34f   : > { %3282 = vrot.lane.b32.xlu0 %v3319_v17, %s6431_s13  ;;  %v2865_v32 = vmax.f32 %v7829_v56, %v2829_v30  ;;  %v2866_v33 = vmax.f32 %v2758_v29, %v2830_v31  ;;  %v1076_v34 = vpop.permute.xlu1 %1075  ;;  %v2794_v37 = vld [vmem:[#allocation3 + $0x81] sm:$0xff]  ;;  %v2795_v8 = vld [vmem:[#allocation3 + $0x89] sm:$0xff]  ;;  %3917 = vst.msk [vmem:[#allocation7 + $0xb] sm:$0x3] %vm3816_vm0, %v6432_v19  ;;  %3918 = vst.msk [vmem:[#allocation7 + $0x11] sm:$0x3] %vm3816_vm0, %v6432_v19 }
 0x350   : > { %3140 = vrot.lane.b32.xlu1 %v3178_v18, %s6433_s23  ;;  %v860_v35 = vpop.permute.xlu0 %859  ;;  %1150 = vst.msk [vmem:[#allocation2 + $0x110] sm:$0xff] %vm1115_vm4, %v1076_v34  ;;  %v2759_v40 = vld [vmem:[#allocation3 + $0x88] sm:$0xff]  ;;  %vm1587_vm4 = vcmask 193696  }
 0x351   : > { %934 = vst.msk [vmem:[#allocation2 + $0x118] sm:$0x3f] %vm933_vm1, %v860_v35  ;;  %v2901_v38 = vmax.f32 %v2865_v32, %v2793_v36  ;;  %v2902_v39 = vmax.f32 %v2866_v33, %v2794_v37  ;;  %v2980_v22 = vld [vmem:[#allocation3 + $0x5b] ss:$2 sm:$0xff]  ;;  %vm3801_vm1 = vcmask 516096  }
 0x352   : > { %3919 = vst.msk [vmem:[#allocation7 + $0x17] sm:$0x3] %vm3816_vm0, %v6432_v19 }
 0x353   : > { %2937 = vst.msk [vmem:[#allocation3 + $0x79] sm:$0xff] %vm2688_vm11, %v2901_v38  ;;  %2938 = vst.msk [vmem:[#allocation3 + $0x81] sm:$0xff] %vm2688_vm11, %v2902_v39  ;;  %v1944_v41 = vpop.permute.xlu1 %1943 }
 0x354   : > { %v1728_v42 = vpop.permute.xlu0 %1727  ;;  %2020 = vst.msk [vmem:[#allocation2 + $0x100] sm:$0xff] %vm1987_vm8, %v1944_v41 }
 0x355   : > { %1803 = vst.msk [vmem:[#allocation2 + $0x108] sm:$0xff] %vm1769_vm7, %v1728_v42 }
 0x356   : > { %3802 = vst.msk [vmem:[#allocation6] sm:$0x1] %vm3801_vm1, %v6432_v19  ;;  %3803 = vst.msk [vmem:[#allocation6 + $0x4f] sm:$0x1] %vm3801_vm1, %v6432_v19 }
 0x357   : > { %v1294_v43 = vpop.permute.xlu1 %1293 }
 0x358   : > { %v1078_v44 = vpop.permute.xlu0 %1077  ;;  %1368 = vst.msk [vmem:[#allocation2 + $0x110] sm:$0xff] %vm1333_vm5, %v1294_v43  ;;  %vm1805_vm5 = vcmask 226496  }
 0x359   : > { %1152 = vst.msk [vmem:[#allocation2 + $0x118] sm:$0x3f] %vm1151_vm2, %v1078_v44  ;;  %v3056_v44 = vld [vmem:[#allocation4 + $0x21] sm:$0xff]  ;;  %vm3814_vm2 = vcmask 521216  }
 0x35a   : > { %v2982_v16 = vld [vmem:[#allocation3 + $0x6d] ss:$2 sm:$0xff] }
 0x35b   : > { %v2162_v45 = vpop.permute.xlu1 %2161  ;;  %v2985_v6 = vmax.f32 %v2980_v22, %v2982_v16 }
 0x35c   : > { %v1946_v47 = vpop.permute.xlu0 %1945  ;;  %2238 = vst.msk [vmem:[#allocation2 + $0x100] sm:$0xff] %vm2205_vm9, %v2162_v45 }
 0x35d   : > { %2021 = vst.msk [vmem:[#allocation2 + $0x108] sm:$0xff] %vm1987_vm8, %v1946_v47 }
 0x35f   : > { %v1512_v48 = vpop.permute.xlu1 %1511  ;;  %v5598_v50 = vpop.f32.mrb[18].mxu0 }
 0x360   : > { %v1296_v49 = vpop.permute.xlu0 %1295  ;;  %1586 = vst.msk [vmem:[#allocation2 + $0x110] sm:$0xff] %vm1551_vm6, %v1512_v48  ;;  %v2566_v51 = vadd.f32 %v7772_v46, %v5598_v50  ;;  %v2560_v52 = vpop.f32.mrb[19].mxu0  ;;  %vm2023_vm6 = vcmask 259296  }
 0x361   : > { %1370 = vst.msk [vmem:[#allocation2 + $0x118] sm:$0x3f] %vm1369_vm3, %v1296_v49  ;;  %v2561_v53 = vadd.f32 %v7772_v46, %v2560_v52  ;;  %vm3804_vm3 = vcmask 523264  }
 0x362   : > { %v2668_v54 = vmax.f32 %v2566_v51, 0.0 }
 0x363   : > { %v1514_v55 = vpop.permute.xlu1 %1513  ;;  %v2275_v58 = vld [vmem:[#allocation2 + $0x100] sm:$0xff]  ;;  %v2667_v59 = vmax.f32 %v2561_v53, 0.0 }
 0x364   : > { %v2164_v56 = vpop.permute.xlu0 %2163  ;;  %1588 = vst.msk [vmem:[#allocation2 + $0x118] sm:$0x3f] %vm1587_vm4, %v1514_v55  ;;  %5617 = vmatprep.mubr.msk.f32.mxu0 %vm2291_vm10, %v2275_v58  ;;  %vm3889_vm4 = vcmask 519168  }
 0x365   : > { %2239 = vst.msk [vmem:[#allocation2 + $0x108] sm:$0xff] %vm2205_vm9, %v2164_v56 }
 0x366   : > { %2708 = vst.msk [vmem:[#allocation3 + $0x99] sm:$0xff] %vm2688_vm11, %v2668_v54  ;;  %2707 = vst.msk [vmem:[#allocation3 + $0x91] sm:$0xff] %vm2688_vm11, %v2667_v59 }
 0x367   : > { %v1732_v61 = vpop.permute.xlu1 %1731 }
 0x368   : > { %v1730_v62 = vpop.permute.xlu0 %1729  ;;  %1806 = vst.msk [vmem:[#allocation2 + $0x118] sm:$0x3f] %vm1805_vm5, %v1732_v61  ;;  %vm3942_vm5 = vcmask 1048064  }
 0x369   : > { %1804 = vst.msk [vmem:[#allocation2 + $0x110] sm:$0xff] %vm1769_vm7, %v1730_v62  ;;  %vm3102_vm7 = vcmask 523520  }
 0x36b   : > { %v1950_v60 = vpop.permute.xlu1 %1949 }
 0x36c   : > { %v1948_v63 = vpop.permute.xlu0 %1947  ;;  %v2276_v0 = vld [vmem:[#allocation2 + $0x108] sm:$0xff]  ;;  %2024 = vst.msk [vmem:[#allocation2 + $0x118] sm:$0x3f] %vm2023_vm6, %v1950_v60  ;;  %vm3945_vm6 = vcmask 1046016  }
 0x36d   : > { %2022 = vst.msk [vmem:[#allocation2 + $0x110] sm:$0xff] %vm1987_vm8, %v1948_v63  ;;  %5618 = vmatmul.mubr.msk.f32.gmra.mrb[32].mxu0 %vm2291_vm10, %v2276_v0  ;;  %v2760_v1 = vld [vmem:[#allocation3 + $0x90] sm:$0xff]  ;;  %v7885_v13 = vld [vmem:[#allocation3 + $0x98] sm:$0xff]  ;;  %vm3164_vm8 = vcmask 785920  }
 0x36e   : > { %v2831_v2 = vld [vmem:[#allocation3 + $0x8a] sm:$0xff]  ;;  %v2832_v57 = vld [vmem:[#allocation3 + $0x92] sm:$0xff] }
 0x36f   : > { %v2867_v3 = vmax.f32 %v2759_v40, %v2831_v2  ;;  %v2868_v4 = vmax.f32 %v2760_v1, %v2832_v57  ;;  %v2168_v5 = vpop.permute.xlu1 %2167  ;;  %v2796_v10 = vld [vmem:[#allocation3 + $0x91] sm:$0xff]  ;;  %v2797_v52 = vld [vmem:[#allocation3 + $0x99] sm:$0xff] }
 0x370   : > { %v2166_v7 = vpop.permute.xlu0 %2165  ;;  %2242 = vst.msk [vmem:[#allocation2 + $0x118] sm:$0x3f] %vm2241_vm12, %v2168_v5  ;;  %vm6436_vm12 = vmmov 0  }
 0x371   : > { %2240 = vst.msk [vmem:[#allocation2 + $0x110] sm:$0xff] %vm2205_vm9, %v2166_v7  ;;  %v2903_v11 = vmax.f32 %v2867_v3, %v2795_v8  ;;  %v2904_v12 = vmax.f32 %v2868_v4, %v2796_v10  ;;  %vm3226_vm9 = vcmask 1048320  }
 0x373   : > { %2939 = vst.msk [vmem:[#allocation3 + $0x89] sm:$0xff] %vm2688_vm11, %v2903_v11  ;;  %2940 = vst.msk [vmem:[#allocation3 + $0x91] sm:$0xff] %vm2688_vm11, %v2904_v12  ;;  %v3073_v14 = vpop.permute.xlu1 %3072 }
 0x374   : > { %v3279_v15 = vpop.permute.xlu0 %3278  ;;  %3103 = vst.msk [vmem:[#allocation5] sm:$0xff] %vm3102_vm7, %v3073_v14 }
 0x375   : > { %3308 = vst.msk [vmem:[#allocation5 + $0x8] sm:$0xff] %vm3102_vm7, %v3279_v15 }
 0x377   : > { %v3135_v17 = vpop.permute.xlu1 %3134  ;;  %v2278_v21 = vld [vmem:[#allocation2 + $0x118] sm:$0x3f] }
 0x378   : > { %v3339_v18 = vpop.permute.xlu0 %3338  ;;  %v2277_v20 = vld [vmem:[#allocation2 + $0x110] sm:$0xff]  ;;  %3165 = vst.msk [vmem:[#allocation5] sm:$0xff] %vm3164_vm8, %v3135_v17 }
 0x379   : > { %3368 = vst.msk [vmem:[#allocation5 + $0x8] sm:$0xff] %vm3164_vm8, %v3339_v18  ;;  %5620 = vmatprep.mubr.msk.f32.mxu0 %vm2291_vm10, %v2277_v20 }
 0x37a   : > { %5621 = vmatmul.mubr.msk.f32.gmra.mrb[34].mxu0 %vm2291_vm10, %v2278_v21  ;;  %v2984_v23 = vld [vmem:[#allocation3 + $0x7f] ss:$2 sm:$0xff]  ;;  %vm2724_vm10 = vcmask 259072  }
 0x37b   : > { %v3197_v9 = vpop.permute.xlu1 %3196  ;;  %v2986_v25 = vmax.f32 %v2985_v6, %v2984_v23  ;;  %v2988_v18 = vld [vmem:[#allocation3 + $0x7f] ss:$2 sm:$0xff] }
 0x37c   : > { %v3399_v24 = vpop.permute.xlu0 %3398  ;;  %3227 = vst.msk [vmem:[#allocation5] sm:$0xff] %vm3226_vm9, %v3197_v9 }
 0x37d   : > { %3428 = vst.msk [vmem:[#allocation5 + $0x8] sm:$0xff] %vm3226_vm9, %v3399_v24 }
 0x37e   : > { %2987 = vst.msk [vmem:[#allocation4 + $0x29] sm:$0xff] %vm2688_vm11, %v2986_v25 }
 0x37f   : > { %v5601_v26 = vpop.f32.mrb[20].mxu0  ;;  %v3075_v29 = vpop.permute.xlu1 %3074 }
 0x380   : > { %v3281_v27 = vpop.permute.xlu0 %3280  ;;  %v2576_v28 = vadd.f32 %v7772_v46, %v5601_v26  ;;  %v2570_v30 = vpop.f32.mrb[21].mxu0  ;;  %3104 = vst.msk [vmem:[#allocation5 + $0x18] sm:$0xff] %vm3102_vm7, %v3075_v29 }
 0x381   : > { %3309 = vst.msk [vmem:[#allocation5 + $0x20] sm:$0xff] %vm3102_vm7, %v3281_v27  ;;  %v2571_v31 = vadd.f32 %v7772_v46, %v2570_v30 }
 0x382   : > { %v2670_v32 = vmax.f32 %v2576_v28, 0.0 }
 0x383   : > { %v2669_v33 = vmax.f32 %v2571_v31, 0.0  ;;  %v3458_v35 = vld [vmem:[#allocation5] sm:$0xff]  ;;  %v3137_v38 = vpop.permute.xlu1 %3136 }
 0x384   : > { %v3459_v34 = vld [vmem:[#allocation5 + $0x8] sm:$0xff]  ;;  %2710 = vst.msk [vmem:[#allocation3 + $0xa9] sm:$0xff] %vm2688_vm11, %v2670_v32 }
 0x385   : > { %v3320_v36 = vld [vmem:[#allocation4 + $0x24] sm:$0xff]  ;;  %3625 = vmatprep.mubr.f32.mxu1 %v3459_v34  ;;  %2709 = vst.msk [vmem:[#allocation3 + $0xa1] sm:$0xff] %vm2688_vm11, %v2669_v33 }
 0x386   : > { %v3179_v37 = vld [vmem:[#allocation4 + $0x22] sm:$0xff]  ;;  %3342 = vrot.lane.b32.xlu0 %v3320_v36, %s6433_s23  ;;  %3166 = vst.msk [vmem:[#allocation5 + $0x18] sm:$0xff] %vm3164_vm8, %v3137_v38  ;;  %3626 = vmatmul.mubr.f32.vlgmr.msra.gmra.mrb[0].mxu1 %v3458_v35  ;;  %v3242_v41 = vld [vmem:[#allocation4 + $0x2b] sm:$0xff] }
 0x387   : > { %3202 = vrot.lane.b32.xlu1 %v3179_v37, %s6434_s10  ;;  %v3241_v39 = vld [vmem:[#allocation4 + $0x23] sm:$0xff]  ;;  %2735 = vst.msk [vmem:[#allocation3 + $0xa1] sm:$0x3] %vm2726_vm13, %v6432_v19  ;;  %v3199_v45 = vpop.permute.xlu1 %3198 }
 0x388   : > { %3251 = vst.msk [vmem:[#allocation5 + $0x50] sm:$0xff] %vm2688_vm11, %v3241_v39  ;;  %v3037_v40 = vld [vmem:[#allocation4 + $0x28] sm:$0xff]  ;;  %3252 = vst.msk [vmem:[#allocation5 + $0x68] sm:$0xff] %vm2688_vm11, %v3242_v41 }
 0x389   : > { %v3440_v42 = vld [vmem:[#allocation4 + $0x26] sm:$0xff]  ;;  %3047 = vst.msk [vmem:[#allocation5 + $0x78] sm:$0xff] %vm2688_vm11, %v3037_v40 }
 0x38a   : > { %3450 = vst.msk [vmem:[#allocation5 + $0x40] sm:$0xff] %vm2688_vm11, %v3440_v42  ;;  %v3380_v43 = vld [vmem:[#allocation4 + $0x25] sm:$0xff] }
 0x38b   : > { %3402 = vrot.lane.b32.xlu0 %v3380_v43, %s6434_s10  ;;  %3080 = vrot.lane.b32.xlu1 %v3056_v44, %s6431_s13  ;;  %3228 = vst.msk [vmem:[#allocation5 + $0x18] sm:$0xff] %vm3226_vm9, %v3199_v45  ;;  %v3077_v47 = vpop.permute.xlu1 %3076  ;;  %v3180_v56 = vld [vmem:[#allocation4 + $0x2a] sm:$0xff] }
 0x38c   : > { %3105 = vst.msk [vmem:[#allocation5 + $0x30] sm:$0xff] %vm3102_vm7, %v3077_v47  ;;  %v2763_v61 = vld [vmem:[#allocation3 + $0xa8] sm:$0xff] }
 0x38d   : > { %v3057_v62 = vld [vmem:[#allocation4 + $0x29] sm:$0xff] }
 0x38e   : > { %v2762_v48 = vld [vmem:[#allocation3 + $0xa0] sm:$0xff]  ;;  %v2799_v8 = vld [vmem:[#allocation3 + $0xa9] sm:$0xff] }
 0x38f   : > { %v2833_v49 = vld [vmem:[#allocation3 + $0x9a] sm:$0xff]  ;;  %3284 = vrot.lane.b32.xlu0 %v3320_v36, %s6431_s13  ;;  %3142 = vrot.lane.b32.xlu1 %v3179_v37, %s6433_s23  ;;  %v2834_v50 = vld [vmem:[#allocation3 + $0xa2] sm:$0xff]  ;;  %v3139_v58 = vpop.permute.xlu1 %3138 }
 0x390   : > { %v2869_v51 = vmax.f32 %v7885_v13, %v2833_v49  ;;  %v2870_v53 = vmax.f32 %v2762_v48, %v2834_v50  ;;  %v2798_v54 = vld [vmem:[#allocation3 + $0xa1] sm:$0xff]  ;;  %3167 = vst.msk [vmem:[#allocation5 + $0x30] sm:$0xff] %vm3164_vm8, %v3139_v58 }
 0x392   : > { %v2905_v55 = vmax.f32 %v2869_v51, %v2797_v52  ;;  %v2906_v59 = vmax.f32 %v2870_v53, %v2798_v54  ;;  %v3461_v34 = vld [vmem:[#allocation5 + $0x18] sm:$0xff] }
 0x393   : > { %3204 = vrot.lane.b32.xlu1 %v3180_v56, %s6434_s10  ;;  %v3447_v53 = vld [vmem:[#allocation4 + $0x5e] sm:$0x3f] }
 0x394   : > { %2941 = vst.msk [vmem:[#allocation3 + $0x99] sm:$0xff] %vm2688_vm11, %v2905_v55  ;;  %2942 = vst.msk [vmem:[#allocation3 + $0xa1] sm:$0xff] %vm2688_vm11, %v2906_v59 }
 0x395   : > { %3457 = vst.msk [vmem:[#allocation5 + $0xe8] sm:$0x3f] %vm2724_vm10, %v3447_v53 }
 0x397   : > { %3082 = vrot.lane.b32.xlu1 %v3057_v62, %s6431_s13 }
 0x39b   : > { %3144 = vrot.lane.b32.xlu1 %v3180_v56, %s6433_s23  ;;  %v2990_v15 = vld [vmem:[#allocation3 + $0x91] ss:$2 sm:$0xff] }
 0x39c   : > { %v2993_v20 = vmax.f32 %v2988_v18, %v2990_v15 }
 0x39f   : > { %v5604_v60 = vpop.f32.mrb[22].mxu0 }
 0x3a0   : > { %v2586_v63 = vadd.f32 %v7772_v46, %v5604_v60  ;;  %v2580_v0 = vpop.f32.mrb[23].mxu0 }
 0x3a1   : > { %v2581_v1 = vadd.f32 %v7772_v46, %v2580_v0 }
 0x3a2   : > { %v2672_v2 = vmax.f32 %v2586_v63, 0.0 }
 0x3a3   : > { %v2671_v57 = vmax.f32 %v2581_v1, 0.0 }
 0x3a4   : > { %2712 = vst.msk [vmem:[#allocation3 + $0xb9] sm:$0xff] %vm2688_vm11, %v2672_v2 }
 0x3a5   : > { %2711 = vst.msk [vmem:[#allocation3 + $0xb1] sm:$0xff] %vm2688_vm11, %v2671_v57 }
 0x3a6   : > { %2736 = vst.msk [vmem:[#allocation3 + $0xb3] sm:$0x3] %vm2726_vm13, %v6432_v19 }
 0x3ab   : > { %v2801_v44 = vld [vmem:[#allocation3 + $0xb9] sm:$0xff] }
 0x3ac   : > { %v2835_v3 = vld [vmem:[#allocation3 + $0xaa] sm:$0xff]  ;;  %v2765_v14 = vld [vmem:[#allocation3 + $0xb8] sm:$0xff] }
 0x3ad   : > { %v2764_v4 = vld [vmem:[#allocation3 + $0xb0] sm:$0xff]  ;;  %v2871_v7 = vmax.f32 %v2763_v61, %v2835_v3 }
 0x3ae   : > { %v2836_v5 = vld [vmem:[#allocation3 + $0xb2] sm:$0xff] }
 0x3af   : > { %v2872_v10 = vmax.f32 %v2764_v4, %v2836_v5  ;;  %v2800_v11 = vld [vmem:[#allocation3 + $0xb1] sm:$0xff]  ;;  %v2907_v12 = vmax.f32 %v2871_v7, %v2799_v8 }
 0x3b1   : > { %v2908_v13 = vmax.f32 %v2872_v10, %v2800_v11  ;;  %2943 = vst.msk [vmem:[#allocation3 + $0xa9] sm:$0xff] %vm2688_vm11, %v2907_v12 }
 0x3b3   : > { %2944 = vst.msk [vmem:[#allocation3 + $0xb1] sm:$0xff] %vm2688_vm11, %v2908_v13 }
 0x3b8   : > { %v3341_v16 = vpop.permute.xlu0 %3340 }
 0x3b9   : > { %v3201_v17 = vpop.permute.xlu1 %3200  ;;  %3369 = vst.msk [vmem:[#allocation5 + $0x20] sm:$0xff] %vm3164_vm8, %v3341_v16 }
 0x3ba   : > { %3229 = vst.msk [vmem:[#allocation5 + $0x30] sm:$0xff] %vm3226_vm9, %v3201_v17  ;;  %v2992_v21 = vld [vmem:[#allocation3 + $0xa3] ss:$2 sm:$0xff] }
 0x3bb   : > { %v2994_v22 = vmax.f32 %v2993_v20, %v2992_v21  ;;  %v2996_v11 = vld [vmem:[#allocation3 + $0xa3] ss:$2 sm:$0xff] }
 0x3bd   : > { %v3401_v6 = vpop.permute.xlu0 %3400  ;;  %2995 = vst.msk [vmem:[#allocation4 + $0x33] sm:$0xff] %vm2688_vm11, %v2994_v22 }
 0x3be   : > { %v3079_v23 = vpop.permute.xlu1 %3078  ;;  %3429 = vst.msk [vmem:[#allocation5 + $0x20] sm:$0xff] %vm3226_vm9, %v3401_v6 }
 0x3bf   : > { %3106 = vst.msk [vmem:[#allocation5 + $0x48] sm:$0xff] %vm3102_vm7, %v3079_v23  ;;  %v5607_v25 = vpop.f32.mrb[24].mxu0 }
 0x3c0   : > { %v2596_v26 = vadd.f32 %v7772_v46, %v5607_v25  ;;  %v2590_v27 = vpop.f32.mrb[25].mxu0 }
 0x3c1   : > { %v3283_v24 = vpop.permute.xlu0 %3282  ;;  %v2591_v28 = vadd.f32 %v7772_v46, %v2590_v27 }
 0x3c2   : > { %v3141_v9 = vpop.permute.xlu1 %3140  ;;  %3310 = vst.msk [vmem:[#allocation5 + $0x38] sm:$0xff] %vm3102_vm7, %v3283_v24  ;;  %v2674_v29 = vmax.f32 %v2596_v26, 0.0  ;;  %v3464_v26 = vld [vmem:[#allocation5 + $0x30] sm:$0xff] }
 0x3c3   : > { %3168 = vst.msk [vmem:[#allocation5 + $0x48] sm:$0xff] %vm3164_vm8, %v3141_v9  ;;  %v2673_v33 = vmax.f32 %v2591_v28, 0.0 }
 0x3c4   : > { %v3321_v31 = vld [vmem:[#allocation4 + $0x2c] sm:$0xff]  ;;  %2714 = vst.msk [vmem:[#allocation3 + $0xc9] sm:$0xff] %vm2688_vm11, %v2674_v29  ;;  %v3322_v47 = vld [vmem:[#allocation4 + $0x34] sm:$0xff] }
 0x3c5   : > { %v3462_v30 = vld [vmem:[#allocation5 + $0x20] sm:$0xff]  ;;  %v3181_v32 = vld [vmem:[#allocation4 + $0x32] sm:$0xff]  ;;  %3344 = vrot.lane.b32.xlu0 %v3321_v31, %s6433_s23  ;;  %2713 = vst.msk [vmem:[#allocation3 + $0xc1] sm:$0xff] %vm2688_vm11, %v2673_v33 }
 0x3c6   : > { %3630 = vmatprep.mubr.f32.mxu1 %v3462_v30  ;;  %3206 = vrot.lane.b32.xlu1 %v3181_v32, %s6434_s10  ;;  %v3038_v35 = vld [vmem:[#allocation4 + $0x30] sm:$0xff]  ;;  %2737 = vst.msk [vmem:[#allocation3 + $0xc5] sm:$0x3] %vm2726_vm13, %v6432_v19 }
 0x3c7   : > { %3631 = vmatmul.mubr.f32.gmra.mrb[2].mxu1 %v3461_v34  ;;  %v3243_v36 = vld [vmem:[#allocation4 + $0x33] sm:$0xff]  ;;  %3048 = vst.msk [vmem:[#allocation5 + $0x90] sm:$0xff] %vm2688_vm11, %v3038_v35 }
 0x3c8   : > { %3253 = vst.msk [vmem:[#allocation5 + $0x80] sm:$0xff] %vm2688_vm11, %v3243_v36  ;;  %v3441_v37 = vld [vmem:[#allocation4 + $0x2e] sm:$0xff] }
 0x3c9   : > { %v3381_v38 = vld [vmem:[#allocation4 + $0x2d] sm:$0xff]  ;;  %3451 = vst.msk [vmem:[#allocation5 + $0x58] sm:$0xff] %vm2688_vm11, %v3441_v37  ;;  %v3382_v52 = vld [vmem:[#allocation4 + $0x35] sm:$0xff] }
 0x3ca   : > { %3404 = vrot.lane.b32.xlu0 %v3381_v38, %s6434_s10  ;;  %v3058_v39 = vld [vmem:[#allocation4 + $0x31] sm:$0xff] }
 0x3cb   : > { %3084 = vrot.lane.b32.xlu1 %v3058_v39, %s6431_s13  ;;  %v2803_v0 = vld [vmem:[#allocation3 + $0xc9] sm:$0xff] }
 0x3cc   : > { %v2837_v40 = vld [vmem:[#allocation3 + $0xba] sm:$0xff]  ;;  %v2767_v51 = vld [vmem:[#allocation3 + $0xc8] sm:$0xff] }
 0x3cd   : > { %v2766_v41 = vld [vmem:[#allocation3 + $0xc0] sm:$0xff]  ;;  %v2873_v43 = vmax.f32 %v2765_v14, %v2837_v40 }
 0x3ce   : > { %3286 = vrot.lane.b32.xlu0 %v3321_v31, %s6431_s13  ;;  %v2838_v42 = vld [vmem:[#allocation3 + $0xc2] sm:$0xff] }
 0x3cf   : > { %3146 = vrot.lane.b32.xlu1 %v3181_v32, %s6433_s23  ;;  %v2874_v45 = vmax.f32 %v2766_v41, %v2838_v42  ;;  %v2802_v48 = vld [vmem:[#allocation3 + $0xc1] sm:$0xff]  ;;  %v2909_v49 = vmax.f32 %v2873_v43, %v2801_v44 }
 0x3d1   : > { %v2910_v50 = vmax.f32 %v2874_v45, %v2802_v48  ;;  %2945 = vst.msk [vmem:[#allocation3 + $0xb9] sm:$0xff] %vm2688_vm11, %v2909_v49  ;;  %v6192_v48 = vld [vmem:[#allocation13] ss:$0 sm:$0xff] }
 0x3d2   : > { %3346 = vrot.lane.b32.xlu0 %v3322_v47, %s6433_s23 }
 0x3d3   : > { %2946 = vst.msk [vmem:[#allocation3 + $0xc1] sm:$0xff] %vm2688_vm11, %v2910_v50 }
 0x3d6   : > { %3406 = vrot.lane.b32.xlu0 %v3382_v52, %s6434_s10 }
 0x3da   : > { %3288 = vrot.lane.b32.xlu0 %v3322_v47, %s6431_s13  ;;  %v2998_v7 = vld [vmem:[#allocation3 + $0xb5] ss:$2 sm:$0xff] }
 0x3db   : > { %v3001_v12 = vmax.f32 %v2996_v11, %v2998_v7 }
 0x3df   : > { %v5610_v54 = vpop.f32.mrb[26].mxu0 }
 0x3e0   : > { %v2606_v55 = vadd.f32 %v7772_v46, %v5610_v54  ;;  %v2600_v56 = vpop.f32.mrb[27].mxu0 }
 0x3e1   : > { %v2601_v58 = vadd.f32 %v7772_v46, %v2600_v56 }
 0x3e2   : > { %v2676_v59 = vmax.f32 %v2606_v55, 0.0 }
 0x3e3   : > { %v2675_v61 = vmax.f32 %v2601_v58, 0.0 }
 0x3e4   : > { %2716 = vst.msk [vmem:[#allocation3 + $0xd9] sm:$0xff] %vm2688_vm11, %v2676_v59 }
 0x3e5   : > { %2715 = vst.msk [vmem:[#allocation3 + $0xd1] sm:$0xff] %vm2688_vm11, %v2675_v61 }
 0x3e6   : > { %2738 = vst.msk [vmem:[#allocation3 + $0xd7] sm:$0x3] %vm2726_vm13, %v6432_v19 }
 0x3eb   : > { %v2805_v41 = vld [vmem:[#allocation3 + $0xd9] sm:$0xff] }
 0x3ec   : > { %v2839_v62 = vld [vmem:[#allocation3 + $0xca] sm:$0xff] }
 0x3ed   : > { %v2768_v60 = vld [vmem:[#allocation3 + $0xd0] sm:$0xff]  ;;  %v2875_v63 = vmax.f32 %v2767_v51, %v2839_v62  ;;  %v7969_v5 = vld [vmem:[#allocation3 + $0xd8] sm:$0xff] }
 0x3ee   : > { %v2840_v1 = vld [vmem:[#allocation3 + $0xd2] sm:$0xff] }
 0x3ef   : > { %v2876_v2 = vmax.f32 %v2768_v60, %v2840_v1  ;;  %v2911_v57 = vmax.f32 %v2875_v63, %v2803_v0  ;;  %v2804_v3 = vld [vmem:[#allocation3 + $0xd1] sm:$0xff] }
 0x3f1   : > { %v2912_v4 = vmax.f32 %v2876_v2, %v2804_v3  ;;  %2947 = vst.msk [vmem:[#allocation3 + $0xc9] sm:$0xff] %vm2688_vm11, %v2911_v57 }
 0x3f3   : > { %2948 = vst.msk [vmem:[#allocation3 + $0xd1] sm:$0xff] %vm2688_vm11, %v2912_v4 }
 0x3f8   : > { %v3343_v8 = vpop.permute.xlu0 %3342 }
 0x3f9   : > { %v3203_v10 = vpop.permute.xlu1 %3202  ;;  %3370 = vst.msk [vmem:[#allocation5 + $0x38] sm:$0xff] %vm3164_vm8, %v3343_v8 }
 0x3fa   : > { %3230 = vst.msk [vmem:[#allocation5 + $0x48] sm:$0xff] %vm3226_vm9, %v3203_v10  ;;  %v3000_v13 = vld [vmem:[#allocation3 + $0xc7] ss:$2 sm:$0xff] }
 0x3fb   : > { %v3002_v16 = vmax.f32 %v3001_v12, %v3000_v13 }
 0x3fd   : > { %v3403_v14 = vpop.permute.xlu0 %3402  ;;  %v3081_v15 = vpop.permute.xlu1 %3080  ;;  %3003 = vst.msk [vmem:[#allocation4 + $0x3d] sm:$0xff] %vm2688_vm11, %v3002_v16 }
 0x3fe   : > { %3430 = vst.msk [vmem:[#allocation5 + $0x38] sm:$0xff] %vm3226_vm9, %v3403_v14 }
 0x3ff   : > { %3107 = vst.msk [vmem:[#allocation5 + $0x60] sm:$0xff] %vm3102_vm7, %v3081_v15  ;;  %v5613_v20 = vpop.f32.mrb[28].mxu0 }
 0x400   : > { %v2616_v21 = vadd.f32 %v7772_v46, %v5613_v20  ;;  %v2610_v22 = vpop.f32.mrb[29].mxu0 }
 0x401   : > { %v3285_v17 = vpop.permute.xlu0 %3284  ;;  %v3143_v18 = vpop.permute.xlu1 %3142  ;;  %v2611_v6 = vadd.f32 %v7772_v46, %v2610_v22  ;;  %v3467_v16 = vld [vmem:[#allocation5 + $0x48] sm:$0xff] }
 0x402   : > { %3311 = vst.msk [vmem:[#allocation5 + $0x50] sm:$0xff] %vm3102_vm7, %v3285_v17  ;;  %v2678_v23 = vmax.f32 %v2616_v21, 0.0 }
 0x403   : > { %3169 = vst.msk [vmem:[#allocation5 + $0x60] sm:$0xff] %vm3164_vm8, %v3143_v18  ;;  %v2677_v25 = vmax.f32 %v2611_v6, 0.0 }
 0x404   : > { %v3323_v27 = vld [vmem:[#allocation4 + $0x3c] sm:$0xff]  ;;  %2718 = vst.msk [vmem:[#allocation3 + $0xe9] sm:$0xff] %vm2688_vm11, %v2678_v23 }
 0x405   : > { %v3205_v24 = vpop.permute.xlu1 %3204  ;;  %v3465_v9 = vld [vmem:[#allocation5 + $0x38] sm:$0xff]  ;;  %3348 = vrot.lane.b32.xlu0 %v3323_v27, %s6433_s23  ;;  %v3039_v29 = vld [vmem:[#allocation4 + $0x38] sm:$0xff]  ;;  %2739 = vst.msk [vmem:[#allocation3 + $0xe9] sm:$0x3] %vm2726_vm13, %v6432_v19 }
 0x406   : > { %3231 = vst.msk [vmem:[#allocation5 + $0x60] sm:$0xff] %vm3226_vm9, %v3205_v24  ;;  %3635 = vmatprep.mubr.f32.mxu1 %v3465_v9  ;;  %v3182_v28 = vld [vmem:[#allocation4 + $0x3a] sm:$0xff] }
 0x407   : > { %3636 = vmatmul.mubr.f32.gmra.mrb[4].mxu1 %v3464_v26  ;;  %v3244_v30 = vld [vmem:[#allocation4 + $0x3b] sm:$0xff]  ;;  %2717 = vst.msk [vmem:[#allocation3 + $0xe1] sm:$0xff] %vm2688_vm11, %v2677_v25  ;;  %3208 = vrot.lane.b32.xlu1 %v3182_v28, %s6434_s10  ;;  %3049 = vst.msk [vmem:[#allocation5 + $0xa8] sm:$0xff] %vm2688_vm11, %v3039_v29 }
 0x408   : > { %3254 = vst.msk [vmem:[#allocation5 + $0x98] sm:$0xff] %vm2688_vm11, %v3244_v30  ;;  %v3442_v46 = vld [vmem:[#allocation4 + $0x36] sm:$0xff]  ;;  %v3443_v31 = vld [vmem:[#allocation4 + $0x3e] sm:$0xff] }
 0x409   : > { %v3083_v32 = vpop.permute.xlu1 %3082  ;;  %3452 = vst.msk [vmem:[#allocation5 + $0x70] sm:$0xff] %vm2688_vm11, %v3442_v46  ;;  %3453 = vst.msk [vmem:[#allocation5 + $0x88] sm:$0xff] %vm2688_vm11, %v3443_v31  ;;  %v3383_v33 = vld [vmem:[#allocation4 + $0x3d] sm:$0xff] }
 0x40a   : > { %3108 = vst.msk [vmem:[#allocation5 + $0x78] sm:$0xff] %vm3102_vm7, %v3083_v32  ;;  %3408 = vrot.lane.b32.xlu0 %v3383_v33, %s6434_s10  ;;  %v3059_v34 = vld [vmem:[#allocation4 + $0x39] sm:$0xff] }
 0x40b   : > { %3086 = vrot.lane.b32.xlu1 %v3059_v34, %s6431_s13 }
 0x40c   : > { %v2807_v61 = vld [vmem:[#allocation3 + $0xe9] sm:$0xff] }
 0x40d   : > { %v3145_v35 = vpop.permute.xlu1 %3144  ;;  %v3470_v46 = vld [vmem:[#allocation5 + $0x60] sm:$0xff] }
 0x40e   : > { %3170 = vst.msk [vmem:[#allocation5 + $0x78] sm:$0xff] %vm3164_vm8, %v3145_v35  ;;  %v2770_v36 = vld [vmem:[#allocation3 + $0xe0] sm:$0xff]  ;;  %3290 = vrot.lane.b32.xlu0 %v3323_v27, %s6431_s13  ;;  %v2771_v45 = vld [vmem:[#allocation3 + $0xe8] sm:$0xff] }
 0x40f   : > { %v2841_v37 = vld [vmem:[#allocation3 + $0xda] sm:$0xff]  ;;  %v2842_v38 = vld [vmem:[#allocation3 + $0xe2] sm:$0xff]  ;;  %3148 = vrot.lane.b32.xlu1 %v3182_v28, %s6433_s23 }
 0x410   : > { %v2877_v39 = vmax.f32 %v7969_v5, %v2841_v37  ;;  %v2878_v40 = vmax.f32 %v2770_v36, %v2842_v38  ;;  %v2806_v42 = vld [vmem:[#allocation3 + $0xe1] sm:$0xff] }
 0x411   : > { %v3004_v37 = vld [vmem:[#allocation3 + $0xc7] ss:$2 sm:$0xff] }
 0x412   : > { %v2913_v43 = vmax.f32 %v2877_v39, %v2805_v41  ;;  %v2914_v44 = vmax.f32 %v2878_v40, %v2806_v42 }
 0x414   : > { %2949 = vst.msk [vmem:[#allocation3 + $0xd9] sm:$0xff] %vm2688_vm11, %v2913_v43  ;;  %2950 = vst.msk [vmem:[#allocation3 + $0xe1] sm:$0xff] %vm2688_vm11, %v2914_v44 }
 0x41b   : > { %v3006_v35 = vld [vmem:[#allocation3 + $0xd9] ss:$2 sm:$0xff] }
 0x41c   : > { %v3009_v41 = vmax.f32 %v3004_v37, %v3006_v35  ;;  %v3387_v35 = vld [vmem:[#allocation4 + $0x5d] sm:$0x3f] }
 0x420   : > { %v5616_v47 = vpop.f32.mrb[30].mxu0 }
 0x421   : > { %v2626_v49 = vadd.f32 %v6192_v48, %v5616_v47  ;;  %v2620_v50 = vpop.f32.mrb[31].mxu0 }
 0x422   : > { %v2621_v51 = vadd.f32 %v6192_v48, %v2620_v50 }
 0x423   : > { %v2680_v52 = vmax.f32 %v2626_v49, 0.0 }
 0x424   : > { %v2679_v53 = vmax.f32 %v2621_v51, 0.0 }
 0x425   : > { %2720 = vst.msk [vmem:[#allocation3 + $0xf9] sm:$0xff] %vm2688_vm11, %v2680_v52 }
 0x426   : > { %2740 = vst.msk [vmem:[#allocation3 + $0xfb] sm:$0x3] %vm2726_vm13, %v6432_v19 }
 0x427   : > { %2719 = vst.msk [vmem:[#allocation3 + $0xf1] sm:$0xff] %vm2688_vm11, %v2679_v53 }
 0x42d   : > { %v2809_v28 = vld [vmem:[#allocation3 + $0xf9] sm:$0xff] }
 0x42e   : > { %v2772_v54 = vld [vmem:[#allocation3 + $0xf0] sm:$0xff]  ;;  %v2773_v0 = vld [vmem:[#allocation3 + $0xf8] sm:$0xff] }
 0x42f   : > { %v2843_v55 = vld [vmem:[#allocation3 + $0xea] sm:$0xff]  ;;  %v2844_v56 = vld [vmem:[#allocation3 + $0xf2] sm:$0xff] }
 0x430   : > { %v2879_v58 = vmax.f32 %v2771_v45, %v2843_v55  ;;  %v2880_v59 = vmax.f32 %v2772_v54, %v2844_v56  ;;  %v2808_v62 = vld [vmem:[#allocation3 + $0xf1] sm:$0xff] }
 0x432   : > { %v2915_v60 = vmax.f32 %v2879_v58, %v2807_v61  ;;  %v2916_v63 = vmax.f32 %v2880_v59, %v2808_v62 }
 0x434   : > { %2951 = vst.msk [vmem:[#allocation3 + $0xe9] sm:$0xff] %vm2688_vm11, %v2915_v60  ;;  %2952 = vst.msk [vmem:[#allocation3 + $0xf1] sm:$0xff] %vm2688_vm11, %v2916_v63 }
 0x437   : > { %v3345_v1 = vpop.permute.xlu0 %3344 }
 0x438   : > { %3371 = vst.msk [vmem:[#allocation5 + $0x50] sm:$0xff] %vm3164_vm8, %v3345_v1  ;;  %v3207_v2 = vpop.permute.xlu1 %3206 }
 0x439   : > { %3232 = vst.msk [vmem:[#allocation5 + $0x78] sm:$0xff] %vm3226_vm9, %v3207_v2 }
 0x43c   : > { %v3405_v57 = vpop.permute.xlu0 %3404 }
 0x43d   : > { %3431 = vst.msk [vmem:[#allocation5 + $0x50] sm:$0xff] %vm3226_vm9, %v3405_v57  ;;  %v3085_v3 = vpop.permute.xlu1 %3084 }
 0x43e   : > { %3109 = vst.msk [vmem:[#allocation5 + $0x90] sm:$0xff] %vm3102_vm7, %v3085_v3  ;;  %v3520_v3 = vld [vmem:[#allocation15 + $0x100] sm:$0xff] }
 0x440   : > { %v3287_v4 = vpop.permute.xlu0 %3286  ;;  %v5619_v7 = vpop.f32.mrb[32].mxu0 }
 0x441   : > { %3312 = vst.msk [vmem:[#allocation5 + $0x68] sm:$0xff] %vm3102_vm7, %v3287_v4  ;;  %v3147_v5 = vpop.permute.xlu1 %3146  ;;  %v2636_v8 = vadd.f32 %v6192_v48, %v5619_v7  ;;  %v2630_v10 = vpop.f32.mrb[33].mxu0  ;;  %v3521_v4 = vld [vmem:[#allocation15 + $0x108] sm:$0xff] }
 0x442   : > { %3171 = vst.msk [vmem:[#allocation5 + $0x90] sm:$0xff] %vm3164_vm8, %v3147_v5  ;;  %v2631_v11 = vadd.f32 %v6192_v48, %v2630_v10  ;;  %v5711_v7 = vpack.c.bf16 %v3521_v4, %v3520_v3 }
 0x443   : > { %v2682_v12 = vmax.f32 %v2636_v8, 0.0 }
 0x444   : > { %v3347_v13 = vpop.permute.xlu0 %3346  ;;  %v3468_v14 = vld [vmem:[#allocation5 + $0x50] sm:$0xff]  ;;  %v2681_v15 = vmax.f32 %v2631_v11, 0.0  ;;  %5712 = vmatprep.subr.bf16.mxu1 %v5711_v7 }
 0x445   : > { %3372 = vst.msk [vmem:[#allocation5 + $0x68] sm:$0xff] %vm3164_vm8, %v3347_v13  ;;  %3640 = vmatprep.mubr.f32.mxu1 %v3468_v14  ;;  %5714 = vmatpush3.bf16.msra.mxu1 %v5711_v7  ;;  %v3460_v7 = vld [vmem:[#allocation5 + $0x10] sm:$0xff] }
 0x446   : > { %2722 = vst.msk [vmem:[#allocation3 + $0x109] sm:$0xff] %vm2688_vm11, %v2682_v12  ;;  %3641 = vmatmul.mubr.f32.gmra.mrb[6].mxu1 %v3467_v16  ;;  %2721 = vst.msk [vmem:[#allocation3 + $0x101] sm:$0xff] %vm2688_vm11, %v2681_v15 }
 0x447   : > { %2741 = vst.msk [vmem:[#allocation3 + $0x10d] sm:$0x3] %vm2726_vm13, %v6432_v19  ;;  %vm3112_vm13 = vcmask 521472  }
 0x448   : > { %v3407_v17 = vpop.permute.xlu0 %3406 }
 0x449   : > { %3432 = vst.msk [vmem:[#allocation5 + $0x68] sm:$0xff] %vm3226_vm9, %v3407_v17 }
 0x44c   : > { %v3289_v18 = vpop.permute.xlu0 %3288 }
 0x44d   : > { %3313 = vst.msk [vmem:[#allocation5 + $0x80] sm:$0xff] %vm3102_vm7, %v3289_v18  ;;  %v2774_v20 = vld [vmem:[#allocation3 + $0x100] sm:$0xff]  ;;  %v5622_v21 = vpop.f32.mrb[34].mxu0 }
 0x44e   : > { %v2845_v22 = vld [vmem:[#allocation3 + $0xfa] sm:$0xff]  ;;  %v2846_v6 = vld [vmem:[#allocation3 + $0x102] sm:$0xff]  ;;  %v2646_v23 = vadd.f32 %v6192_v48, %v5622_v21  ;;  %v2640_v24 = vpop.f32.mrb[35].mxu0 }
 0x44f   : > { %v2881_v9 = vmax.f32 %v2773_v0, %v2845_v22  ;;  %v2882_v25 = vmax.f32 %v2774_v20, %v2846_v6  ;;  %v2641_v26 = vadd.f32 %v6192_v48, %v2640_v24  ;;  %v2810_v29 = vld [vmem:[#allocation3 + $0x101] sm:$0xff]  ;;  %v2811_v53 = vld [vmem:[#allocation3 + $0x109] sm:$0xff] }
 0x450   : > { %v3471_v27 = vld [vmem:[#allocation5 + $0x68] sm:$0xff]  ;;  %v2684_v30 = vmax.f32 %v2646_v23, 0.0  ;;  %v2775_v34 = vld [vmem:[#allocation3 + $0x108] sm:$0xff]  ;;  %v3522_v23 = vld [vmem:[#allocation15 + $0x110] sm:$0xff] }
 0x451   : > { %3645 = vmatprep.mubr.f32.mxu1 %v3471_v27  ;;  %v2917_v31 = vmax.f32 %v2881_v9, %v2809_v28  ;;  %v2918_v32 = vmax.f32 %v2882_v25, %v2810_v29  ;;  %v2683_v33 = vmax.f32 %v2641_v26, 0.0  ;;  %v3523_v24 = vld [vmem:[#allocation15 + $0x118] sm:$0xff] }
 0x452   : > { %3646 = vmatmul.mubr.f32.gmra.mrb[8].mxu1 %v3470_v46  ;;  %2725 = vst.msk [vmem:[#allocation3 + $0x119] sm:$0x3f] %vm2724_vm10, %v2684_v30  ;;  %v5715_v25 = vpack.c.bf16 %v3523_v24, %v3522_v23 }
 0x453   : > { %2953 = vst.msk [vmem:[#allocation3 + $0xf9] sm:$0xff] %vm2688_vm11, %v2917_v31  ;;  %2954 = vst.msk [vmem:[#allocation3 + $0x101] sm:$0xff] %vm2688_vm11, %v2918_v32  ;;  %v3473_v32 = vld [vmem:[#allocation5 + $0x78] sm:$0xff] }
 0x454   : > { %2723 = vst.msk [vmem:[#allocation3 + $0x111] sm:$0xff] %vm2688_vm11, %v2683_v33  ;;  %5716 = vmatprep.subr.bf16.mxu1 %v5715_v25 }
 0x455   : > { %5718 = vmatpush3.bf16.msra.mxu1 %v5715_v25 }
 0x459   : > { %v2849_v36 = vld [vmem:[#allocation3 + $0x11a] sm:$0x3f]  ;;  %v5422_v40 = vpop.f32.mrb[0].mxu1 }
 0x45a   : > { %v5423_v45 = vpop.f32.mrb[1].mxu1  ;;  %v3008_v47 = vld [vmem:[#allocation3 + $0xeb] ss:$2 sm:$0xff] }
 0x45b   : > { %v2776_v38 = vld [vmem:[#allocation3 + $0x110] sm:$0xff]  ;;  %v2777_v39 = vld [vmem:[#allocation3 + $0x118] sm:$0x3f]  ;;  %v8024_v51 = vadd.f32 %v5423_v45, %v5422_v40  ;;  %v3010_v52 = vmax.f32 %v3009_v41, %v3008_v47 }
 0x45c   : > { %v2847_v42 = vld [vmem:[#allocation3 + $0x10a] sm:$0xff]  ;;  %v2848_v43 = vld [vmem:[#allocation3 + $0x112] sm:$0xff]  ;;  %v2885_v44 = vmax.f32 %v2777_v39, %v2849_v36 }
 0x45d   : > { %v2813_v48 = vld [vmem:[#allocation3 + $0x119] sm:$0x3f]  ;;  %v2883_v49 = vmax.f32 %v2775_v34, %v2847_v42  ;;  %v2884_v50 = vmax.f32 %v2776_v38, %v2848_v43  ;;  %v2812_v54 = vld [vmem:[#allocation3 + $0x111] sm:$0xff]  ;;  %3011 = vst.msk [vmem:[#allocation4 + $0x47] sm:$0xff] %vm2688_vm11, %v3010_v52 }
 0x45e   : > { %v2921_v55 = vmax.f32 %v2885_v44, %v2813_v48  ;;  %v3012_v62 = vld [vmem:[#allocation3 + $0xeb] ss:$2 sm:$0xff]  ;;  %v3327_v34 = vld [vmem:[#allocation4 + $0x5c] sm:$0x3f] }
 0x45f   : > { %v2919_v56 = vmax.f32 %v2883_v49, %v2811_v53  ;;  %v2920_v58 = vmax.f32 %v2884_v50, %v2812_v54 }
 0x460   : > { %2957 = vst.msk [vmem:[#allocation3 + $0x119] sm:$0x3f] %vm2724_vm10, %v2921_v55 }
 0x461   : > { %2955 = vst.msk [vmem:[#allocation3 + $0x109] sm:$0xff] %vm2688_vm11, %v2919_v56  ;;  %2956 = vst.msk [vmem:[#allocation3 + $0x111] sm:$0xff] %vm2688_vm11, %v2920_v58 }
 0x464   : > { %v3324_v59 = vld [vmem:[#allocation4 + $0x44] sm:$0xff] }
 0x465   : > { %v3183_v61 = vld [vmem:[#allocation4 + $0x42] sm:$0xff]  ;;  %3350 = vrot.lane.b32.xlu0 %v3324_v59, %s6433_s23  ;;  %v3123_v6 = vld [vmem:[#allocation4 + $0x4a] sm:$0x3f] }
 0x466   : > { %3210 = vrot.lane.b32.xlu1 %v3183_v61, %s6434_s10  ;;  %v3384_v60 = vld [vmem:[#allocation4 + $0x45] sm:$0xff] }
 0x467   : > { %v3060_v63 = vld [vmem:[#allocation4 + $0x41] sm:$0xff]  ;;  %v3061_v20 = vld [vmem:[#allocation4 + $0x49] sm:$0x3f] }
 0x468   : > { %v3014_v0 = vld [vmem:[#allocation3 + $0xfd] ss:$2 sm:$0xff] }
 0x469   : > { %v3040_v1 = vld [vmem:[#allocation4 + $0x40] sm:$0xff]  ;;  %v3017_v2 = vmax.f32 %v3012_v62, %v3014_v0  ;;  %v3016_v5 = vld [vmem:[#allocation3 + $0x10f] ss:$2 sm:$0xff]  ;;  %v3041_v8 = vld [vmem:[#allocation4 + $0x48] sm:$0x3f]  ;;  %3410 = vrot.lane.b32.xlu0 %v3384_v60, %s6434_s10 }
 0x46a   : > { %3050 = vst.msk [vmem:[#allocation5 + $0xc0] sm:$0xff] %vm2688_vm11, %v3040_v1  ;;  %v3245_v57 = vld [vmem:[#allocation4 + $0x43] sm:$0xff]  ;;  %3088 = vrot.lane.b32.xlu1 %v3060_v63, %s6431_s13 }
 0x46b   : > { %3255 = vst.msk [vmem:[#allocation5 + $0xb0] sm:$0xff] %vm2688_vm11, %v3245_v57  ;;  %v3444_v10 = vld [vmem:[#allocation4 + $0x46] sm:$0xff]  ;;  %v3018_v11 = vmax.f32 %v3017_v2, %v3016_v5 }
 0x46c   : > { %3051 = vst.msk [vmem:[#allocation5 + $0xd8] sm:$0x3f] %vm2724_vm10, %v3041_v8  ;;  %v3463_v8 = vld [vmem:[#allocation5 + $0x28] sm:$0xff] }
 0x46d   : > { %3454 = vst.msk [vmem:[#allocation5 + $0xa0] sm:$0xff] %vm2688_vm11, %v3444_v10  ;;  %3019 = vst.msk [vmem:[#allocation4 + $0x51] sm:$0xff] %vm2688_vm11, %v3018_v11  ;;  %3292 = vrot.lane.b32.xlu0 %v3324_v59, %s6431_s13  ;;  %v3466_v10 = vld [vmem:[#allocation5 + $0x40] sm:$0xff]  ;;  %v3469_v11 = vld [vmem:[#allocation5 + $0x58] sm:$0xff] }
 0x46e   : > { %3150 = vrot.lane.b32.xlu1 %v3183_v61, %s6433_s23 }
 0x474   : > { %v3325_v12 = vld [vmem:[#allocation4 + $0x4c] sm:$0xff]  ;;  %v3446_v17 = vld [vmem:[#allocation4 + $0x56] sm:$0xff] }
 0x475   : > { %v3184_v13 = vld [vmem:[#allocation4 + $0x4a] sm:$0xff]  ;;  %3352 = vrot.lane.b32.xlu0 %v3325_v12, %s6433_s23  ;;  %v3247_v15 = vld [vmem:[#allocation4 + $0x53] sm:$0x3f]  ;;  %3456 = vst.msk [vmem:[#allocation5 + $0xd0] sm:$0xff] %vm2688_vm11, %v3446_v17 }
 0x476   : > { %3212 = vrot.lane.b32.xlu1 %v3184_v13, %s6434_s10  ;;  %v3246_v14 = vld [vmem:[#allocation4 + $0x4b] sm:$0xff]  ;;  %3257 = vst.msk [vmem:[#allocation5 + $0xe0] sm:$0x3f] %vm2724_vm10, %v3247_v15  ;;  %v3326_v27 = vld [vmem:[#allocation4 + $0x54] sm:$0xff] }
 0x477   : > { %3256 = vst.msk [vmem:[#allocation5 + $0xc8] sm:$0xff] %vm2688_vm11, %v3246_v14  ;;  %v3445_v16 = vld [vmem:[#allocation4 + $0x4e] sm:$0xff]  ;;  %v3349_v21 = vpop.permute.xlu0 %3348 }
 0x478   : > { %v3385_v18 = vld [vmem:[#allocation4 + $0x4d] sm:$0xff]  ;;  %3455 = vst.msk [vmem:[#allocation5 + $0xb8] sm:$0xff] %vm2688_vm11, %v3445_v16  ;;  %v3386_v46 = vld [vmem:[#allocation4 + $0x55] sm:$0xff] }
 0x479   : > { %3412 = vrot.lane.b32.xlu0 %v3385_v18, %s6434_s10  ;;  %3373 = vst.msk [vmem:[#allocation5 + $0x80] sm:$0xff] %vm3164_vm8, %v3349_v21  ;;  %v3209_v22 = vpop.permute.xlu1 %3208  ;;  %v3185_v28 = vld [vmem:[#allocation4 + $0x52] sm:$0x3f]  ;;  %v3478_v15 = vld [vmem:[#allocation5 + $0xa0] sm:$0xff] }
 0x47a   : > { %3090 = vrot.lane.b32.xlu1 %v3061_v20, %s6431_s13  ;;  %3233 = vst.msk [vmem:[#allocation5 + $0x90] sm:$0xff] %vm3226_vm9, %v3209_v22  ;;  %v3267_v33 = vld [vmem:[#allocation4 + $0x54] sm:$0x3f] }
 0x47b   : > { %v3475_v13 = vld [vmem:[#allocation5 + $0x88] sm:$0xff] }
 0x47c   : > { %v3409_v9 = vpop.permute.xlu0 %3408  ;;  %v3484_v20 = vld [vmem:[#allocation5 + $0xd0] sm:$0xff]  ;;  %v3487_v21 = vld [vmem:[#allocation5 + $0xe8] sm:$0x3f] }
 0x47d   : > { %3294 = vrot.lane.b32.xlu0 %v3325_v12, %s6431_s13  ;;  %3433 = vst.msk [vmem:[#allocation5 + $0x80] sm:$0xff] %vm3226_vm9, %v3409_v9  ;;  %v3087_v26 = vpop.permute.xlu1 %3086  ;;  %v3472_v12 = vld [vmem:[#allocation5 + $0x70] sm:$0xff] }
 0x47e   : > { %3152 = vrot.lane.b32.xlu1 %v3123_v6, %s6433_s23  ;;  %3110 = vst.msk [vmem:[#allocation5 + $0xa8] sm:$0xff] %vm3102_vm7, %v3087_v26 }
 0x47f   : > { %v3481_v18 = vld [vmem:[#allocation5 + $0xb8] sm:$0xff] }
 0x480   : > { %v3291_v29 = vpop.permute.xlu0 %3290 }
 0x481   : > { %3354 = vrot.lane.b32.xlu0 %v3326_v27, %s6433_s23  ;;  %3314 = vst.msk [vmem:[#allocation5 + $0x98] sm:$0xff] %vm3102_vm7, %v3291_v29  ;;  %v3149_v30 = vpop.permute.xlu1 %3148  ;;  %v3476_v50 = vld [vmem:[#allocation5 + $0x90] sm:$0xff]  ;;  %v4056_v27 = vld [vmem:[#allocation18 + $0x80] sm:$0xff] }
 0x482   : > { %3214 = vrot.lane.b32.xlu1 %v3185_v28, %s6434_s10  ;;  %3172 = vst.msk [vmem:[#allocation5 + $0xa8] sm:$0xff] %vm3164_vm8, %v3149_v30  ;;  %v4057_v28 = vld [vmem:[#allocation18 + $0x88] sm:$0xff]  ;;  %v4040_v29 = vld [vmem:[#allocation18] sm:$0xff] }
 0x483   : > { %v5719_v30 = vpack.c.bf16 %v4057_v28, %v4056_v27 }
 0x484   : > { %v3474_v31 = vld [vmem:[#allocation5 + $0x80] sm:$0xff] }
 0x485   : > { %3414 = vrot.lane.b32.xlu0 %v3386_v46, %s6434_s10  ;;  %3650 = vmatprep.mubr.f32.mxu1 %v3474_v31  ;;  %v4041_v46 = vld [vmem:[#allocation18 + $0x8] sm:$0xff]  ;;  %v4058_v31 = vld [vmem:[#allocation18 + $0x90] sm:$0xff] }
 0x486   : > { %3651 = vmatmul.mubr.f32.gmra.mrb[10].mxu1 %v3473_v32  ;;  %v4059_v32 = vld [vmem:[#allocation18 + $0x98] sm:$0xff]  ;;  %5720 = vmatprep.subr.bf16.mxu0 %v5719_v30 }
 0x489   : > { %3296 = vrot.lane.b32.xlu0 %v3267_v33, %s6431_s13  ;;  %v5721_v33 = vpack.c.bf16 %v4041_v46, %v4040_v29  ;;  %v5332_v29 = vld [vmem:[#allocation17] ss:$0 sm:$0xff] }
 0x48b   : > { %5722 = vmatpush3.bf16.msra.mxu0 %v5721_v33 }
 0x48d   : > { %3356 = vrot.lane.b32.xlu0 %v3327_v34, %s6433_s23  ;;  %v5723_v34 = vpack.c.bf16 %v4059_v32, %v4058_v31  ;;  %v3628_v32 = vadd.f32 %v8024_v51, %v5332_v29 }
 0x48f   : > { %5724 = vmatprep.subr.bf16.mxu0 %v5723_v34 }
 0x491   : > { %3416 = vrot.lane.b32.xlu0 %v3387_v35, %s6434_s10  ;;  %v4042_v35 = vld [vmem:[#allocation18 + $0x10] sm:$0xff] }
 0x49a   : > { %v5425_v36 = vpop.f32.mrb[2].mxu1 }
 0x49b   : > { %v5426_v37 = vpop.f32.mrb[3].mxu1 }
 0x49c   : > { %v8063_v38 = vadd.f32 %v5426_v37, %v5425_v36  ;;  %v4043_v36 = vld [vmem:[#allocation18 + $0x18] sm:$0xff]  ;;  %v4060_v37 = vld [vmem:[#allocation18 + $0xa0] sm:$0xff] }
 0x49e   : > { %v3633_v46 = vadd.f32 %v8063_v38, %v5332_v29 }
 0x4d7   : > { %v3351_v39 = vpop.permute.xlu0 %3350 }
 0x4d8   : > { %v3211_v40 = vpop.permute.xlu1 %3210  ;;  %3374 = vst.msk [vmem:[#allocation5 + $0x98] sm:$0xff] %vm3164_vm8, %v3351_v39  ;;  %v4061_v39 = vld [vmem:[#allocation18 + $0xa8] sm:$0xff] }
 0x4d9   : > { %3234 = vst.msk [vmem:[#allocation5 + $0xa8] sm:$0xff] %vm3226_vm9, %v3211_v40  ;;  %v5725_v40 = vpack.c.bf16 %v4043_v36, %v4042_v35 }
 0x4da   : > { %v5428_v41 = vpop.f32.mrb[4].mxu1 }
 0x4db   : > { %v5429_v42 = vpop.f32.mrb[5].mxu1  ;;  %v3411_v44 = vpop.permute.xlu0 %3410  ;;  %5726 = vmatpush3.bf16.msra.mxu0 %v5725_v40 }
 0x4dc   : > { %v8067_v43 = vadd.f32 %v5429_v42, %v5428_v41  ;;  %v3089_v45 = vpop.permute.xlu1 %3088  ;;  %3434 = vst.msk [vmem:[#allocation5 + $0x98] sm:$0xff] %vm3226_vm9, %v3411_v44  ;;  %v4044_v41 = vld [vmem:[#allocation18 + $0x20] sm:$0xff]  ;;  %v4045_v42 = vld [vmem:[#allocation18 + $0x28] sm:$0xff]  ;;  %v4062_v44 = vld [vmem:[#allocation18 + $0xb0] sm:$0xff] }
 0x4dd   : > { %3111 = vst.msk [vmem:[#allocation5 + $0xc0] sm:$0xff] %vm3102_vm7, %v3089_v45  ;;  %v5727_v45 = vpack.c.bf16 %v4061_v39, %v4060_v37 }
 0x4df   : > { %v3293_v47 = vpop.permute.xlu0 %3292  ;;  %5728 = vmatprep.subr.bf16.mxu0 %v5727_v45 }
 0x4e0   : > { %v3151_v48 = vpop.permute.xlu1 %3150  ;;  %3315 = vst.msk [vmem:[#allocation5 + $0xb0] sm:$0xff] %vm3102_vm7, %v3293_v47  ;;  %v3479_v60 = vld [vmem:[#allocation5 + $0xa8] sm:$0xff]  ;;  %v4063_v47 = vld [vmem:[#allocation18 + $0xb8] sm:$0xff] }
 0x4e1   : > { %3173 = vst.msk [vmem:[#allocation5 + $0xc0] sm:$0xff] %vm3164_vm8, %v3151_v48  ;;  %v4088_v48 = vld [vmem:[#allocation18 + $0x180] sm:$0xff] }
 0x4e3   : > { %v3477_v49 = vld [vmem:[#allocation5 + $0x98] sm:$0xff] }
 0x4e4   : > { %3655 = vmatprep.mubr.f32.mxu1 %v3477_v49  ;;  %v4089_v49 = vld [vmem:[#allocation18 + $0x188] sm:$0xff] }
 0x4e5   : > { %3656 = vmatmul.mubr.f32.gmra.mrb[12].mxu1 %v3476_v50  ;;  %v5751_v50 = vpack.c.bf16 %v4089_v49, %v4088_v48 }
 0x4e7   : > { %v3353_v52 = vpop.permute.xlu0 %3352  ;;  %5752 = vmatprep.subr.bf16.mxu1 %v5751_v50 }
 0x4e8   : > { %v3213_v53 = vpop.permute.xlu1 %3212  ;;  %3375 = vst.msk [vmem:[#allocation5 + $0xb0] sm:$0xff] %vm3164_vm8, %v3353_v52  ;;  %v4072_v52 = vld [vmem:[#allocation18 + $0x100] sm:$0xff] }
 0x4e9   : > { %3235 = vst.msk [vmem:[#allocation5 + $0xc0] sm:$0xff] %vm3226_vm9, %v3213_v53  ;;  %v4073_v53 = vld [vmem:[#allocation18 + $0x108] sm:$0xff] }
 0x4eb   : > { %v3413_v54 = vpop.permute.xlu0 %3412 }
 0x4ec   : > { %v3091_v55 = vpop.permute.xlu1 %3090  ;;  %3435 = vst.msk [vmem:[#allocation5 + $0xb0] sm:$0xff] %vm3226_vm9, %v3413_v54  ;;  %v4090_v54 = vld [vmem:[#allocation18 + $0x190] sm:$0xff] }
 0x4ed   : > { %3113 = vst.msk [vmem:[#allocation5 + $0xd8] sm:$0x3f] %vm3112_vm13, %v3091_v55  ;;  %v5753_v55 = vpack.c.bf16 %v4073_v53, %v4072_v52 }
 0x4ef   : > { %v3295_v56 = vpop.permute.xlu0 %3294 }
 0x4f0   : > { %v3153_v58 = vpop.permute.xlu1 %3152  ;;  %3316 = vst.msk [vmem:[#allocation5 + $0xc8] sm:$0xff] %vm3102_vm7, %v3295_v56  ;;  %v3482_v57 = vld [vmem:[#allocation5 + $0xc0] sm:$0xff] }
 0x4f1   : > { %3175 = vst.msk [vmem:[#allocation5 + $0xd8] sm:$0x3f] %vm3174_vm14, %v3153_v58  ;;  %v4091_v56 = vld [vmem:[#allocation18 + $0x198] sm:$0xff]  ;;  %v4074_v58 = vld [vmem:[#allocation18 + $0x110] sm:$0xff] }
 0x4f3   : > { %v3355_v59 = vpop.permute.xlu0 %3354  ;;  %v3480_v62 = vld [vmem:[#allocation5 + $0xb0] sm:$0xff] }
 0x4f4   : > { %v3215_v61 = vpop.permute.xlu1 %3214  ;;  %3376 = vst.msk [vmem:[#allocation5 + $0xc8] sm:$0xff] %vm3164_vm8, %v3355_v59  ;;  %3660 = vmatprep.mubr.f32.mxu1 %v3480_v62  ;;  %v4075_v59 = vld [vmem:[#allocation18 + $0x118] sm:$0xff]  ;;  %v4046_v62 = vld [vmem:[#allocation18 + $0x30] sm:$0xff] }
 0x4f5   : > { %3237 = vst.msk [vmem:[#allocation5 + $0xd8] sm:$0x3f] %vm3236_vm15, %v3215_v61  ;;  %3661 = vmatmul.mubr.f32.gmra.mrb[14].mxu1 %v3479_v60  ;;  %v5729_v61 = vpack.c.bf16 %v4045_v42, %v4044_v41  ;;  %v4047_v60 = vld [vmem:[#allocation18 + $0x38] sm:$0xff]  ;;  %v3638_v41 = vadd.f32 %v8067_v43, %v5332_v29 }
 0x4f7   : > { %v3415_v63 = vpop.permute.xlu0 %3414  ;;  %5730 = vmatpush3.bf16.msra.mxu0 %v5729_v61 }
 0x4f8   : > { %3436 = vst.msk [vmem:[#allocation5 + $0xc8] sm:$0xff] %vm3226_vm9, %v3415_v63  ;;  %v5755_v63 = vpack.c.bf16 %v4091_v56, %v4090_v54 }
 0x4fb   : > { %v3297_v0 = vpop.permute.xlu0 %3296 }
 0x4fc   : > { %3317 = vst.msk [vmem:[#allocation5 + $0xe0] sm:$0x3f] %vm3112_vm13, %v3297_v0  ;;  %v3485_v5 = vld [vmem:[#allocation5 + $0xd8] sm:$0x3f]  ;;  %v5731_v0 = vpack.c.bf16 %v4063_v47, %v4062_v44 }
 0x4fe   : > { %5732 = vmatprep.subr.bf16.mxu0 %v5731_v0 }
 0x4ff   : > { %v3357_v1 = vpop.permute.xlu0 %3356  ;;  %v3483_v2 = vld [vmem:[#allocation5 + $0xc8] sm:$0xff] }
 0x500   : > { %3377 = vst.msk [vmem:[#allocation5 + $0xe0] sm:$0x3f] %vm3174_vm14, %v3357_v1  ;;  %3665 = vmatprep.mubr.f32.mxu1 %v3483_v2  ;;  %v5757_v1 = vpack.c.bf16 %v4075_v59, %v4074_v58  ;;  %v4064_v2 = vld [vmem:[#allocation18 + $0xc0] sm:$0xff] }
 0x501   : > { %3666 = vmatmul.mubr.f32.gmra.mrb[16].mxu1 %v3482_v57  ;;  %v4092_v57 = vld [vmem:[#allocation18 + $0x1a0] sm:$0xff] }
 0x503   : > { %v3417_v3 = vpop.permute.xlu0 %3416 }
 0x504   : > { %3437 = vst.msk [vmem:[#allocation5 + $0xe0] sm:$0x3f] %vm3236_vm15, %v3417_v3  ;;  %v4093_v3 = vld [vmem:[#allocation18 + $0x1a8] sm:$0xff] }
 0x50b   : > { %v3486_v4 = vld [vmem:[#allocation5 + $0xe0] sm:$0x3f] }
 0x50c   : > { %3670 = vmatprep.mubr.f32.mxu1 %v3486_v4  ;;  %v4065_v4 = vld [vmem:[#allocation18 + $0xc8] sm:$0xff] }
 0x50d   : > { %3671 = vmatmul.mubr.f32.gmra.mrb[18].mxu1 %v3485_v5  ;;  %v5759_v5 = vpack.c.bf16 %v4093_v3, %v4092_v57 }
 0x50e   : > { %5631 = vmatprep.mubr.msk.f32.mxu1 %vm2688_vm11, %v3460_v7  ;;  %v4076_v7 = vld [vmem:[#allocation18 + $0x120] sm:$0xff] }
 0x511   : > { %5632 = vmatmul.mubr.msk.f32.vlgmr.msra.gmra.mrb[20].mxu1 %vm2688_vm11, %v3463_v8  ;;  %v4077_v8 = vld [vmem:[#allocation18 + $0x128] sm:$0xff] }
 0x512   : > { %5634 = vmatprep.mubr.msk.f32.mxu1 %vm2688_vm11, %v3466_v10  ;;  %5754 = vmatpush3.bf16.msra.mxu1 %v5753_v55  ;;  %v5733_v10 = vpack.c.bf16 %v4047_v60, %v4046_v62 }
 0x513   : > { %5756 = vmatprep.subr.bf16.mxu1 %v5755_v63 }
 0x514   : > { %5734 = vmatpush3.bf16.msra.mxu0 %v5733_v10 }
 0x515   : > { %5635 = vmatmul.mubr.msk.f32.gmra.mrb[22].mxu1 %vm2688_vm11, %v3469_v11  ;;  %v5735_v11 = vpack.c.bf16 %v4065_v4, %v4064_v2 }
 0x516   : > { %5637 = vmatprep.mubr.msk.f32.mxu1 %vm2688_vm11, %v3472_v12  ;;  %5758 = vmatpush3.bf16.msra.mxu1 %v5757_v1  ;;  %v4048_v12 = vld [vmem:[#allocation18 + $0x40] sm:$0xff] }
 0x517   : > { %5760 = vmatprep.subr.bf16.mxu1 %v5759_v5  ;;  %5736 = vmatprep.subr.bf16.mxu0 %v5735_v11 }
 0x519   : > { %5638 = vmatmul.mubr.msk.f32.gmra.mrb[24].mxu1 %vm2688_vm11, %v3475_v13  ;;  %v5431_v14 = vpop.f32.mrb[6].mxu1  ;;  %v4049_v13 = vld [vmem:[#allocation18 + $0x48] sm:$0xff] }
 0x51a   : > { %5640 = vmatprep.mubr.msk.f32.mxu1 %vm2688_vm11, %v3478_v15  ;;  %v5432_v16 = vpop.f32.mrb[7].mxu1 }
 0x51b   : > { %v8092_v17 = vadd.f32 %v5432_v16, %v5431_v14  ;;  %v5761_v14 = vpack.c.bf16 %v4077_v8, %v4076_v7 }
 0x51d   : > { %5641 = vmatmul.mubr.msk.f32.gmra.mrb[26].mxu1 %vm2688_vm11, %v3481_v18  ;;  %v3643_v37 = vadd.f32 %v8092_v17, %v5332_v29 }
 0x51e   : > { %5643 = vmatprep.mubr.msk.f32.mxu1 %vm2688_vm11, %v3484_v20  ;;  %v5737_v20 = vpack.c.bf16 %v4049_v13, %v4048_v12  ;;  %5762 = vmatpush3.bf16.msra.mxu1 %v5761_v14 }
 0x520   : > { %5738 = vmatpush3.bf16.msra.mxu0 %v5737_v20 }
 0x521   : > { %5644 = vmatmul.mubr.msk.f32.gmra.mrb[28].mxu1 %vm2688_vm11, %v3487_v21  ;;  %vm3915_vm11 = vcmask 522240  }
 0x522   : > { %3920 = vst.msk [vmem:[#allocation7 + $0x1d] sm:$0x7f] %vm3915_vm11, %v6432_v19  ;;  %3916 = vst.msk [vmem:[#allocation7] sm:$0x7f] %vm3915_vm11, %v6432_v19 }
 0x525   : > { %v5434_v22 = vpop.f32.mrb[8].mxu1 }
 0x526   : > { %v5435_v6 = vpop.f32.mrb[9].mxu1 }
 0x527   : > { %v8097_v23 = vadd.f32 %v5435_v6, %v5434_v22 }
 0x529   : > { %v4021_v26 = vld [vmem:[#allocation7 + $0x1e] sm:$0x3f]  ;;  %v3648_v17 = vadd.f32 %v8097_v23, %v5332_v29 }
 0x52a   : > { %4024 = vst.msk [vmem:[#allocation8 + $0x70] sm:$0x3f] %vm3814_vm2, %v4021_v26 }
 0x559   : > { %v5437_v24 = vpop.f32.mrb[10].mxu1 }
 0x55a   : > { %v5438_v9 = vpop.f32.mrb[11].mxu1 }
 0x55b   : > { %v8099_v25 = vadd.f32 %v5438_v9, %v5437_v24 }
 0x55d   : > { %v3653_v45 = vadd.f32 %v8099_v25, %v5332_v29 }
 0x5b8   : > { %v5440_v15 = vpop.f32.mrb[12].mxu1 }
 0x5b9   : > { %v5441_v16 = vpop.f32.mrb[13].mxu1 }
 0x5ba   : > { %v5442_v18 = vadd.f32 %v5441_v16, %v5440_v15 }
 0x5bc   : > { %v3658_v55 = vadd.f32 %v5442_v18, %v5332_v29 }
 0x5c8   : > { %v5443_v21 = vpop.f32.mrb[14].mxu1 }
 0x5c9   : > { %v5444_v22 = vpop.f32.mrb[15].mxu1 }
 0x5ca   : > { %v5445_v6 = vadd.f32 %v5444_v22, %v5443_v21 }
 0x5cc   : > { %v3663_v53 = vadd.f32 %v5445_v6, %v5332_v29 }
 0x5d4   : > { %v5446_v24 = vpop.f32.mrb[16].mxu1 }
 0x5d5   : > { %v5447_v9 = vpop.f32.mrb[17].mxu1 }
 0x5d6   : > { %v5448_v26 = vadd.f32 %v5447_v9, %v5446_v24 }
 0x5d8   : > { %v3668_v57 = vadd.f32 %v5448_v26, %v5332_v29 }
 0x5e0   : > { %v5449_v27 = vpop.f32.mrb[18].mxu1 }
 0x5e1   : > { %v5450_v28 = vpop.f32.mrb[19].mxu1 }
 0x5e2   : > { %v5451_v30 = vadd.f32 %v5450_v28, %v5449_v27 }
 0x5e4   : > { %v5633_v31 = vpop.f32.mrb[20].mxu1  ;;  %v3673_v63 = vadd.f32 %v5451_v30, %v5332_v29 }
 0x5e5   : > { %v3748_v33 = vadd.f32 %v5633_v31, %v3633_v46  ;;  %v3742_v34 = vpop.f32.mrb[21].mxu1 }
 0x5e6   : > { %v3743_v35 = vadd.f32 %v3742_v34, %v3628_v32 }
 0x5e7   : > { %v3792_v36 = vmax.f32 %v3748_v33, 0.0 }
 0x5e8   : > { %v3791_v39 = vmax.f32 %v3743_v35, 0.0  ;;  %v5636_v40 = vpop.f32.mrb[22].mxu1 }
 0x5e9   : > { %3806 = vst.msk [vmem:[#allocation6 + $0x9] sm:$0xff] %vm3804_vm3, %v3792_v36  ;;  %v3758_v42 = vadd.f32 %v5636_v40, %v3643_v37  ;;  %v3752_v44 = vpop.f32.mrb[23].mxu1 }
 0x5ea   : > { %3817 = vst.msk [vmem:[#allocation6 + $0x9] sm:$0x3] %vm3816_vm0, %v6432_v19  ;;  %v3753_v51 = vadd.f32 %v3752_v44, %v3638_v41 }
 0x5eb   : > { %3805 = vst.msk [vmem:[#allocation6 + $0x1] sm:$0xff] %vm3804_vm3, %v3791_v39  ;;  %v3794_v38 = vmax.f32 %v3758_v42, 0.0 }
 0x5ec   : > { %v3793_v47 = vmax.f32 %v3753_v51, 0.0  ;;  %v5639_v48 = vpop.f32.mrb[24].mxu1 }
 0x5ed   : > { %3808 = vst.msk [vmem:[#allocation6 + $0x19] sm:$0xff] %vm3804_vm3, %v3794_v38  ;;  %v3768_v43 = vadd.f32 %v5639_v48, %v3653_v45  ;;  %v3762_v49 = vpop.f32.mrb[25].mxu1 }
 0x5ee   : > { %3819 = vst.msk [vmem:[#allocation6 + $0x1d] sm:$0x3] %vm3816_vm0, %v6432_v19  ;;  %v3763_v50 = vadd.f32 %v3762_v49, %v3648_v17  ;;  %v4094_v17 = vld [vmem:[#allocation18 + $0x1b0] sm:$0xff] }
 0x5ef   : > { %3807 = vst.msk [vmem:[#allocation6 + $0x11] sm:$0xff] %vm3804_vm3, %v3793_v47  ;;  %v3796_v52 = vmax.f32 %v3768_v43, 0.0 }
 0x5f0   : > { %3818 = vst.msk [vmem:[#allocation6 + $0x13] sm:$0x3] %vm3816_vm0, %v6432_v19  ;;  %v3795_v25 = vmax.f32 %v3763_v50, 0.0  ;;  %v5642_v54 = vpop.f32.mrb[26].mxu1 }
 0x5f1   : > { %3810 = vst.msk [vmem:[#allocation6 + $0x29] sm:$0xff] %vm3804_vm3, %v3796_v52  ;;  %v3778_v23 = vadd.f32 %v5642_v54, %v3663_v53  ;;  %v3772_v58 = vpop.f32.mrb[27].mxu1  ;;  %v3835_v14 = vld [vmem:[#allocation6 + $0x9] sm:$0xff] }
 0x5f2   : > { %v3824_v56 = vld [vmem:[#allocation6] sm:$0xff]  ;;  %3809 = vst.msk [vmem:[#allocation6 + $0x21] sm:$0xff] %vm3804_vm3, %v3795_v25  ;;  %v3773_v61 = vadd.f32 %v3772_v58, %v3658_v55  ;;  %v3825_v3 = vld [vmem:[#allocation6 + $0x8] sm:$0xff] }
 0x5f3   : > { %v3844_v59 = vld [vmem:[#allocation6 + $0x2] sm:$0xff]  ;;  %3820 = vst.msk [vmem:[#allocation6 + $0x27] sm:$0x3] %vm3816_vm0, %v6432_v19  ;;  %v3798_v60 = vmax.f32 %v3778_v23, 0.0 }
 0x5f4   : > { %v3854_v62 = vmax.f32 %v3824_v56, %v3844_v59  ;;  %v3834_v0 = vld [vmem:[#allocation6 + $0x1] sm:$0xff]  ;;  %v3797_v1 = vmax.f32 %v3773_v61, 0.0  ;;  %v5645_v2 = vpop.f32.mrb[28].mxu1  ;;  %v4095_v61 = vld [vmem:[#allocation18 + $0x1b8] sm:$0xff] }
 0x5f5   : > { %3812 = vst.msk [vmem:[#allocation6 + $0x39] sm:$0xff] %vm3804_vm3, %v3798_v60  ;;  %v3788_v7 = vadd.f32 %v5645_v2, %v3673_v63  ;;  %v3782_v8 = vpop.f32.mrb[29].mxu1  ;;  %v3837_v27 = vld [vmem:[#allocation6 + $0x19] sm:$0xff]  ;;  %v4079_v60 = vld [vmem:[#allocation18 + $0x138] sm:$0xff] }
 0x5f6   : > { %v3864_v4 = vmax.f32 %v3854_v62, %v3834_v0  ;;  %v3845_v5 = vld [vmem:[#allocation6 + $0xa] sm:$0xff]  ;;  %3822 = vst.msk [vmem:[#allocation6 + $0x3b] sm:$0x3] %vm3816_vm0, %v6432_v19  ;;  %v3783_v13 = vadd.f32 %v3782_v8, %v3668_v57  ;;  %v3827_v22 = vld [vmem:[#allocation6 + $0x18] sm:$0xff] }
 0x5f7   : > { %v3826_v10 = vld [vmem:[#allocation6 + $0x10] sm:$0xff]  ;;  %v3855_v12 = vmax.f32 %v3825_v3, %v3845_v5  ;;  %3811 = vst.msk [vmem:[#allocation6 + $0x31] sm:$0xff] %vm3804_vm3, %v3797_v1  ;;  %v3800_v16 = vmax.f32 %v3788_v7, 0.0  ;;  %v4078_v62 = vld [vmem:[#allocation18 + $0x130] sm:$0xff]  ;;  %v5763_v1 = vpack.c.bf16 %v4095_v61, %v4094_v17  ;;  %v4097_v8 = vld [vmem:[#allocation18 + $0x1c8] sm:$0xff] }
 0x5f8   : > { %v3846_v11 = vld [vmem:[#allocation6 + $0x12] sm:$0xff]  ;;  %3874 = vst.msk [vmem:[#allocation6 + $0x1] sm:$0xff] %vm3804_vm3, %v3864_v4  ;;  %v3799_v21 = vmax.f32 %v3783_v13, 0.0  ;;  %v3839_v35 = vld [vmem:[#allocation6 + $0x29] sm:$0xff]  ;;  %v5765_v2 = vpack.c.bf16 %v4079_v60, %v4078_v62  ;;  %v4085_v17 = vld [vmem:[#allocation18 + $0x168] sm:$0xff] }
 0x5f9   : > { %v3856_v15 = vmax.f32 %v3826_v10, %v3846_v11  ;;  %3821 = vst.msk [vmem:[#allocation6 + $0x31] sm:$0x3] %vm3816_vm0, %v6432_v19  ;;  %v3836_v18 = vld [vmem:[#allocation6 + $0x11] sm:$0xff]  ;;  %v3865_v20 = vmax.f32 %v3855_v12, %v3835_v14  ;;  %v3847_v24 = vld [vmem:[#allocation6 + $0x1a] sm:$0xff]  ;;  %v4066_v57 = vld [vmem:[#allocation18 + $0xd0] sm:$0xff]  ;;  %5764 = vmatprep.subr.bf16.mxu1 %v5763_v1 }
 0x5fa   : > { %3815 = vst.msk [vmem:[#allocation6 + $0x49] sm:$0x3f] %vm3814_vm2, %v3800_v16  ;;  %v3828_v9 = vld [vmem:[#allocation6 + $0x20] sm:$0xff]  ;;  %v3857_v26 = vmax.f32 %v3827_v22, %v3847_v24  ;;  %v3829_v31 = vld [vmem:[#allocation6 + $0x28] sm:$0xff]  ;;  %v4096_v7 = vld [vmem:[#allocation18 + $0x1c0] sm:$0xff]  ;;  %5766 = vmatpush3.bf16.msra.mxu1 %v5765_v2 }
 0x5fb   : > { %v3866_v6 = vmax.f32 %v3856_v15, %v3836_v18  ;;  %3875 = vst.msk [vmem:[#allocation6 + $0x9] sm:$0xff] %vm3804_vm3, %v3865_v20  ;;  %3813 = vst.msk [vmem:[#allocation6 + $0x41] sm:$0xff] %vm3804_vm3, %v3799_v21  ;;  %v3848_v28 = vld [vmem:[#allocation6 + $0x22] sm:$0xff]  ;;  %v4067_v3 = vld [vmem:[#allocation18 + $0xd8] sm:$0xff]  ;;  %v5767_v12 = vpack.c.bf16 %v4097_v8, %v4096_v7  ;;  %v6435_v7 = vmov 0.0|0.0  }
 0x5fc   : > { %3823 = vst.msk [vmem:[#allocation6 + $0x45] sm:$0x3] %vm3816_vm0, %v6432_v19  ;;  %v3858_v29 = vmax.f32 %v3828_v9, %v3848_v28  ;;  %v3867_v30 = vmax.f32 %v3857_v26, %v3837_v27  ;;  %v3838_v46 = vld [vmem:[#allocation6 + $0x21] sm:$0xff]  ;;  %v5739_v5 = vpack.c.bf16 %v4067_v3, %v4066_v57  ;;  %v4051_v15 = vld [vmem:[#allocation18 + $0x58] sm:$0xff]  ;;  %v4080_v16 = vld [vmem:[#allocation18 + $0x140] sm:$0xff] }
 0x5fd   : > { %3876 = vst.msk [vmem:[#allocation6 + $0x11] sm:$0xff] %vm3804_vm3, %v3866_v6  ;;  %v3841_v44 = vld [vmem:[#allocation6 + $0x39] sm:$0xff]  ;;  %v4050_v10 = vld [vmem:[#allocation18 + $0x50] sm:$0xff]  ;;  %5768 = vmatprep.subr.bf16.mxu1 %v5767_v12  ;;  %v4099_v6 = vld [vmem:[#allocation18 + $0x1d8] sm:$0xff] }
 0x5fe   : > { %v3868_v32 = vmax.f32 %v3858_v29, %v3838_v46  ;;  %3877 = vst.msk [vmem:[#allocation6 + $0x19] sm:$0xff] %vm3804_vm3, %v3867_v30  ;;  %v3831_v39 = vld [vmem:[#allocation6 + $0x38] sm:$0xff]  ;;  %5740 = vmatprep.subr.bf16.mxu0 %v5739_v5  ;;  %v5741_v20 = vpack.c.bf16 %v4051_v15, %v4050_v10  ;;  %v4098_v22 = vld [vmem:[#allocation18 + $0x1d0] sm:$0xff]  ;;  %v4083_v27 = vld [vmem:[#allocation18 + $0x158] sm:$0xff] }
 0x5ff   : > { %v3885_v48 = vld [vmem:[#allocation6 + $0x1] ss:$2 sm:$0xf]  ;;  %v5771_v26 = vpack.c.bf16 %v4099_v6, %v4098_v22  ;;  %v4068_v28 = vld [vmem:[#allocation18 + $0xe0] sm:$0xff] }
 0x600   : > { %v3830_v33 = vld [vmem:[#allocation6 + $0x30] sm:$0xff]  ;;  %3878 = vst.msk [vmem:[#allocation6 + $0x21] sm:$0xff] %vm3804_vm3, %v3868_v32  ;;  %v4081_v18 = vld [vmem:[#allocation18 + $0x148] sm:$0xff]  ;;  %v4082_v24 = vld [vmem:[#allocation18 + $0x150] sm:$0xff]  ;;  %5742 = vmatpush3.bf16.msra.mxu0 %v5741_v20 }
 0x601   : > { %v3849_v34 = vld [vmem:[#allocation6 + $0x2a] sm:$0xff]  ;;  %v3850_v36 = vld [vmem:[#allocation6 + $0x32] sm:$0xff]  ;;  %v5769_v21 = vpack.c.bf16 %v4081_v18, %v4080_v16  ;;  %v4069_v30 = vld [vmem:[#allocation18 + $0xe8] sm:$0xff]  ;;  %v5773_v32 = vpack.c.bf16 %v4083_v27, %v4082_v24 }
 0x602   : > { %v3859_v37 = vmax.f32 %v3829_v31, %v3849_v34  ;;  %v3840_v40 = vld [vmem:[#allocation6 + $0x31] sm:$0xff]  ;;  %v3860_v41 = vmax.f32 %v3830_v33, %v3850_v36  ;;  %v3853_v42 = vld [vmem:[#allocation6 + $0x4a] sm:$0x3f]  ;;  %v3851_v47 = vld [vmem:[#allocation6 + $0x3a] sm:$0xff]  ;;  %v5743_v33 = vpack.c.bf16 %v4069_v30, %v4068_v28 }
 0x603   : > { %v3843_v38 = vld [vmem:[#allocation6 + $0x49] sm:$0x3f]  ;;  %v3832_v49 = vld [vmem:[#allocation6 + $0x40] sm:$0xff]  ;;  %v3861_v53 = vmax.f32 %v3831_v39, %v3851_v47  ;;  %v4052_v46 = vld [vmem:[#allocation18 + $0x60] sm:$0xff]  ;;  %5770 = vmatpush3.bf16.msra.mxu1 %v5769_v21 }
 0x604   : > { %v3869_v51 = vmax.f32 %v3859_v37, %v3839_v35  ;;  %v3833_v45 = vld [vmem:[#allocation6 + $0x48] sm:$0x3f]  ;;  %v3870_v43 = vmax.f32 %v3860_v41, %v3840_v40  ;;  %v4053_v31 = vld [vmem:[#allocation18 + $0x68] sm:$0xff]  ;;  %v4100_v35 = vld [vmem:[#allocation18 + $0x1e0] sm:$0xff]  ;;  %5772 = vmatprep.subr.bf16.mxu1 %v5771_v26  ;;  %5744 = vmatprep.subr.bf16.mxu0 %v5743_v33 }
 0x605   : > { %v3842_v50 = vld [vmem:[#allocation6 + $0x41] sm:$0xff]  ;;  %v3863_v25 = vmax.f32 %v3833_v45, %v3853_v42  ;;  %v3887_v55 = vld [vmem:[#allocation6 + $0xb] ss:$2 sm:$0xf]  ;;  %v3871_v23 = vmax.f32 %v3861_v53, %v3841_v44  ;;  %v5745_v34 = vpack.c.bf16 %v4053_v31, %v4052_v46 }
 0x606   : > { %v3852_v52 = vld [vmem:[#allocation6 + $0x42] sm:$0xff]  ;;  %3879 = vst.msk [vmem:[#allocation6 + $0x29] sm:$0xff] %vm3804_vm3, %v3869_v51  ;;  %v3891_v56 = vld [vmem:[#allocation6 + $0xb] ss:$2 sm:$0xf]  ;;  %3880 = vst.msk [vmem:[#allocation6 + $0x31] sm:$0xff] %vm3804_vm3, %v3870_v43  ;;  %v3888_v59 = vmax.f32 %v3885_v48, %v3887_v55 }
 0x607   : > { %v3862_v54 = vmax.f32 %v3832_v49, %v3852_v52  ;;  %v3873_v58 = vmax.f32 %v3863_v25, %v3843_v38  ;;  %v3893_v0 = vld [vmem:[#allocation6 + $0x15] ss:$2 sm:$0xf]  ;;  %3881 = vst.msk [vmem:[#allocation6 + $0x39] sm:$0xff] %vm3804_vm3, %v3871_v23  ;;  %v4101_v36 = vld [vmem:[#allocation18 + $0x1e8] sm:$0xff]  ;;  %5746 = vmatpush3.bf16.msra.mxu0 %v5745_v34  ;;  %5774 = vmatpush3.bf16.msra.mxu1 %v5773_v32  ;;  %v4070_v43 = vld [vmem:[#allocation18 + $0xf0] sm:$0xff] }
 0x608   : > { %3890 = vst.msk [vmem:[#allocation7 + $0x7] sm:$0xf] %vm3889_vm4, %v3888_v59  ;;  %v3896_v4 = vmax.f32 %v3891_v56, %v3893_v0  ;;  %v3895_v11 = vld [vmem:[#allocation6 + $0x1f] ss:$2 sm:$0xf]  ;;  %v5775_v41 = vpack.c.bf16 %v4101_v36, %v4100_v35  ;;  %v4084_v48 = vld [vmem:[#allocation18 + $0x160] sm:$0xff] }
 0x609   : > { %v3872_v63 = vmax.f32 %v3862_v54, %v3842_v50  ;;  %3883 = vst.msk [vmem:[#allocation6 + $0x49] sm:$0x3f] %vm3814_vm2, %v3873_v58  ;;  %v3899_v14 = vld [vmem:[#allocation6 + $0x1f] ss:$2 sm:$0xf]  ;;  %v4071_v49 = vld [vmem:[#allocation18 + $0xf8] sm:$0xff]  ;;  %v5777_v53 = vpack.c.bf16 %v4085_v17, %v4084_v48 }
 0x60a   : > { %v3897_v13 = vmax.f32 %v3896_v4, %v3895_v11  ;;  %5776 = vmatprep.subr.bf16.mxu1 %v5775_v41  ;;  %v5747_v25 = vpack.c.bf16 %v4071_v49, %v4070_v43  ;;  %v4054_v56 = vld [vmem:[#allocation18 + $0x70] sm:$0xff]  ;;  %v4055_v23 = vld [vmem:[#allocation18 + $0x78] sm:$0xff]  ;;  %v4105_v30 = vld [vmem:[#allocation18 + $0x208] sm:$0xff] }
 0x60b   : > { %3882 = vst.msk [vmem:[#allocation6 + $0x41] sm:$0xff] %vm3804_vm3, %v3872_v63  ;;  %v4102_v58 = vld [vmem:[#allocation18 + $0x1f0] sm:$0xff]  ;;  %v4103_v59 = vld [vmem:[#allocation18 + $0x1f8] sm:$0xff]  ;;  %5778 = vmatpush3.bf16.msra.mxu1 %v5777_v53  ;;  %v5749_v61 = vpack.c.bf16 %v4055_v23, %v4054_v56 }
 0x60c   : > { %3898 = vst.msk [vmem:[#allocation7 + $0xd] sm:$0xf] %vm3889_vm4, %v3897_v13  ;;  %5748 = vmatprep.subr.bf16.mxu0 %v5747_v25  ;;  %v5779_v62 = vpack.c.bf16 %v4103_v59, %v4102_v58  ;;  %v4086_v60 = vld [vmem:[#allocation18 + $0x170] sm:$0xff]  ;;  %v4087_v63 = vld [vmem:[#allocation18 + $0x178] sm:$0xff] }
 0x60d   : > { %v3901_v9 = vld [vmem:[#allocation6 + $0x29] ss:$2 sm:$0xf]  ;;  %v5781_v1 = vpack.c.bf16 %v4087_v63, %v4086_v60  ;;  %5750 = vmatpush3.bf16.msra.mxu0 %v5749_v61  ;;  %v4442_v61 = vld [vmem:[#allocation21 + $0x8] sm:$0xff]  ;;  %v4441_v60 = vld [vmem:[#allocation21] sm:$0xff] }
 0x60e   : > { %v3904_v29 = vmax.f32 %v3899_v14, %v3901_v9  ;;  %v3903_v39 = vld [vmem:[#allocation6 + $0x33] ss:$2 sm:$0xf]  ;;  %5780 = vmatprep.subr.bf16.mxu1 %v5779_v62  ;;  %v4003_v20 = vld [vmem:[#allocation7 + $0x1d] sm:$0x3f]  ;;  %v4106_v36 = vld [vmem:[#allocation18 + $0x210] sm:$0xff] }
 0x60f   : > { %v3927_v37 = vld [vmem:[#allocation7 + $0x1] sm:$0xff]  ;;  %5782 = vmatpush3.bf16.msra.mxu1 %v5781_v1  ;;  %v4110_v43 = vld [vmem:[#allocation18 + $0x230] sm:$0xff] }
 0x610   : > { %v3921_v40 = vld [vmem:[#allocation7] sm:$0xff]  ;;  %3933 = vrot.lane.b32.xlu1 %v3927_v37, %s6433_s23  ;;  %v3905_v42 = vmax.f32 %v3904_v29, %v3903_v39  ;;  %5783 = vmatprep.subr.bf16.mxu1 %v6435_v7  ;;  %v4039_v59 = vld [vmem:[#allocation8 + $0x70] sm:$0x3f]  ;;  %v4570_v1 = vld [vmem:[#allocation21 + $0x408] sm:$0xff] }
 0x611   : > { %v3907_v44 = vld [vmem:[#allocation6 + $0x33] ss:$2 sm:$0xf]  ;;  %3924 = vst.msk [vmem:[#allocation8] sm:$0xff] %vm3804_vm3, %v3921_v40 }
 0x612   : > { %v3909_v51 = vld [vmem:[#allocation6 + $0x3d] ss:$2 sm:$0xf]  ;;  %v3911_v38 = vld [vmem:[#allocation6 + $0x47] ss:$2 sm:$0xf] }
 0x613   : > { %v3912_v45 = vmax.f32 %v3907_v44, %v3909_v51  ;;  %v3947_v47 = vld [vmem:[#allocation7 + $0x2] sm:$0xff]  ;;  %3906 = vst.msk [vmem:[#allocation7 + $0x13] sm:$0xf] %vm3889_vm4, %v3905_v42  ;;  %v3948_v55 = vld [vmem:[#allocation7 + $0xa] sm:$0xff] }
 0x614   : > { %3950 = vst.msk [vmem:[#allocation8 + $0x8] sm:$0xff] %vm3804_vm3, %v3947_v47  ;;  %v3977_v50 = vld [vmem:[#allocation7 + $0x8] sm:$0xff]  ;;  %3951 = vst.msk [vmem:[#allocation8 + $0x30] sm:$0xff] %vm3804_vm3, %v3948_v55  ;;  %v4107_v37 = vld [vmem:[#allocation18 + $0x218] sm:$0xff] }
 0x615   : > { %v3913_v52 = vmax.f32 %v3912_v45, %v3911_v38  ;;  %3983 = vrot.lane.b32.xlu1 %v3977_v50, %s6433_s23  ;;  %v3971_v54 = vld [vmem:[#allocation7 + $0x7] sm:$0xff]  ;;  %3925 = vst.msk [vmem:[#allocation8 + $0x28] sm:$0xff] %vm3804_vm3, %v3977_v50  ;;  %v5787_v42 = vpack.c.bf16 %v4107_v37, %v4106_v36  ;;  %v4111_v49 = vld [vmem:[#allocation18 + $0x238] sm:$0xff] }
 0x616   : > { %3974 = vst.msk [vmem:[#allocation8 + $0x10] sm:$0xff] %vm3804_vm3, %v3971_v54  ;;  %v3953_v0 = vld [vmem:[#allocation7 + $0x6] sm:$0xff]  ;;  %v4444_v62 = vld [vmem:[#allocation21 + $0x18] sm:$0xff] }
 0x617   : > { %3914 = vst.msk [vmem:[#allocation7 + $0x19] sm:$0xf] %vm3889_vm4, %v3913_v52  ;;  %v3928_v14 = vld [vmem:[#allocation7 + $0x9] sm:$0xff]  ;;  %v5793_v52 = vpack.c.bf16 %v4111_v49, %v4110_v43  ;;  %v5795_v63 = vpack.c.bf16 %v4444_v62, %v4442_v61  ;;  %v4459_v49 = vld [vmem:[#allocation21 + $0x90] sm:$0xff] }
 0x618   : > { %v4104_v29 = vld [vmem:[#allocation18 + $0x200] sm:$0xff]  ;;  %v4109_v38 = vld [vmem:[#allocation18 + $0x228] sm:$0xff]  ;;  %v4463_v62 = vld [vmem:[#allocation21 + $0xb0] sm:$0xff] }
 0x619   : > { %3959 = vrot.lane.b32.xlu1 %v3953_v0, %s6433_s23  ;;  %v5784_v33 = vpack.c.bf16 %v4105_v30, %v4104_v29  ;;  %v4108_v51 = vld [vmem:[#allocation18 + $0x220] sm:$0xff]  ;;  %v4443_v0 = vld [vmem:[#allocation21 + $0x10] sm:$0xff] }
 0x61a   : > { %v4001_v2 = vld [vmem:[#allocation7 + $0xd] sm:$0xff]  ;;  %v5790_v47 = vpack.c.bf16 %v4109_v38, %v4108_v51  ;;  %v4580_v30 = vld [vmem:[#allocation21 + $0x458] sm:$0xff]  ;;  %v4583_v38 = vld [vmem:[#allocation21 + $0x470] sm:$0xff] }
 0x61b   : > { %v3954_v57 = vld [vmem:[#allocation7 + $0xe] sm:$0xff]  ;;  %4007 = vrot.lane.b32.xlu0 %v4001_v2, %s6433_s23  ;;  %v4572_v2 = vld [vmem:[#allocation21 + $0x418] sm:$0xff]  ;;  %v4453_v37 = vld [vmem:[#allocation21 + $0x60] sm:$0xff] }
 0x61c   : > { %v3995_v3 = vld [vmem:[#allocation7 + $0xc] sm:$0xff]  ;;  %4022 = vst.msk [vmem:[#allocation8 + $0x20] sm:$0xff] %vm3804_vm3, %v3954_v57 }
 0x61d   : > { %v3972_v4 = vld [vmem:[#allocation7 + $0xf] sm:$0xff]  ;;  %3998 = vst.msk [vmem:[#allocation8 + $0x18] sm:$0xff] %vm3804_vm3, %v3995_v3  ;;  %3961 = vrot.lane.b32.xlu1 %v3954_v57, %s6433_s23  ;;  %v5797_v57 = vpack.c.bf16 %v4443_v0, %v4441_v60  ;;  %v5923_v3 = vpack.c.bf16 %v4572_v2, %v4570_v1  ;;  %v4581_v51 = vld [vmem:[#allocation21 + $0x460] sm:$0xff]  ;;  %v4592_v0 = vld [vmem:[#allocation21 + $0x4b8] sm:$0xff] }
 0x61e   : > { %3975 = vst.msk [vmem:[#allocation8 + $0x38] sm:$0xff] %vm3804_vm3, %v3972_v4  ;;  %v3923_v5 = vld [vmem:[#allocation7 + $0x10] sm:$0x3f]  ;;  %v3997_v11 = vld [vmem:[#allocation7 + $0x1c] sm:$0x3f]  ;;  %v4569_v4 = vld [vmem:[#allocation21 + $0x400] sm:$0xff] }
 0x61f   : > { %v3978_v8 = vld [vmem:[#allocation7 + $0x10] sm:$0xff]  ;;  %3926 = vst.msk [vmem:[#allocation8 + $0x50] sm:$0x3f] %vm3814_vm2, %v3923_v5  ;;  %4000 = vst.msk [vmem:[#allocation8 + $0x68] sm:$0x3f] %vm3814_vm2, %v3997_v11  ;;  %v4445_v11 = vld [vmem:[#allocation21 + $0x20] sm:$0xff]  ;;  %5924 = vmatprep.subr.bf16.mxu0 %v5923_v3 }
 0x620   : > { %v3996_v10 = vld [vmem:[#allocation7 + $0x14] sm:$0xff]  ;;  %3985 = vrot.lane.b32.xlu0 %v3978_v8, %s6433_s23  ;;  %v4457_v43 = vld [vmem:[#allocation21 + $0x80] sm:$0xff] }
 0x621   : > { %v3973_v12 = vld [vmem:[#allocation7 + $0x17] sm:$0x3f]  ;;  %3999 = vst.msk [vmem:[#allocation8 + $0x40] sm:$0xff] %vm3804_vm3, %v3996_v10  ;;  %3935 = vrot.lane.b32.xlu1 %v3928_v14, %s6433_s23  ;;  %v3929_v18 = vld [vmem:[#allocation7 + $0x11] sm:$0x3f]  ;;  %v4448_v10 = vld [vmem:[#allocation21 + $0x38] sm:$0xff] }
 0x622   : > { %3976 = vst.msk [vmem:[#allocation8 + $0x60] sm:$0x3f] %vm3814_vm2, %v3973_v12  ;;  %v3949_v13 = vld [vmem:[#allocation7 + $0x12] sm:$0x3f]  ;;  %v3979_v21 = vld [vmem:[#allocation7 + $0x18] sm:$0x3f] }
 0x623   : > { %3952 = vst.msk [vmem:[#allocation8 + $0x58] sm:$0x3f] %vm3814_vm2, %v3949_v13  ;;  %v4020_v15 = vld [vmem:[#allocation7 + $0x16] sm:$0xff]  ;;  %v4029_v56 = vld [vmem:[#allocation8 + $0x20] sm:$0xff] }
 0x624   : > { %4023 = vst.msk [vmem:[#allocation8 + $0x48] sm:$0xff] %vm3804_vm3, %v4020_v15  ;;  %v4002_v16 = vld [vmem:[#allocation7 + $0x15] sm:$0xff]  ;;  %v4461_v61 = vld [vmem:[#allocation21 + $0xa0] sm:$0xff] }
 0x625   : > { %4009 = vrot.lane.b32.xlu0 %v4002_v16, %s6433_s23  ;;  %3937 = vrot.lane.b32.xlu1 %v3929_v18, %s6433_s23  ;;  %v3955_v22 = vld [vmem:[#allocation7 + $0x16] sm:$0x3f]  ;;  %v4574_v15 = vld [vmem:[#allocation21 + $0x428] sm:$0xff]  ;;  %v4576_v16 = vld [vmem:[#allocation21 + $0x438] sm:$0xff]  ;;  %v5817_v60 = vpack.c.bf16 %v4463_v62, %v4461_v61 }
 0x626   : > { %v4571_v5 = vld [vmem:[#allocation21 + $0x410] sm:$0xff]  ;;  %v4573_v18 = vld [vmem:[#allocation21 + $0x420] sm:$0xff]  ;;  %v4610_v61 = vld [vmem:[#allocation21 + $0x548] sm:$0xff] }
 0x627   : > { %v5925_v8 = vpack.c.bf16 %v4571_v5, %v4569_v4  ;;  %v4447_v12 = vld [vmem:[#allocation21 + $0x30] sm:$0xff]  ;;  %v4589_v2 = vld [vmem:[#allocation21 + $0x4a0] sm:$0xff]  ;;  %v4466_v4 = vld [vmem:[#allocation21 + $0xc8] sm:$0xff] }
 0x628   : > { %v5801_v14 = vpack.c.bf16 %v4447_v12, %v4445_v11  ;;  %v4468_v5 = vld [vmem:[#allocation21 + $0xd8] sm:$0xff]  ;;  %v4594_v12 = vld [vmem:[#allocation21 + $0x4c8] sm:$0xff] }
 0x629   : > { %4011 = vrot.lane.b32.xlu0 %v4003_v20, %s6433_s23  ;;  %v5927_v20 = vpack.c.bf16 %v4576_v16, %v4574_v15  ;;  %v4593_v15 = vld [vmem:[#allocation21 + $0x4c0] sm:$0xff]  ;;  %v4595_v16 = vld [vmem:[#allocation21 + $0x4d0] sm:$0xff]  ;;  %v4612_v62 = vld [vmem:[#allocation21 + $0x558] sm:$0xff] }
 0x62b   : > { %v4034_v58 = vld [vmem:[#allocation8 + $0x48] sm:$0xff] }
 0x62d   : > { %3987 = vrot.lane.b32.xlu0 %v3979_v21, %s6433_s23  ;;  %v4575_v21 = vld [vmem:[#allocation21 + $0x430] sm:$0xff] }
 0x631   : > { %3963 = vrot.lane.b32.xlu0 %v3955_v22, %s6433_s23  ;;  %v5929_v22 = vpack.c.bf16 %v4575_v21, %v4573_v18  ;;  %v5949_v18 = vpack.c.bf16 %v4595_v16, %v4593_v15  ;;  %v4472_v21 = vld [vmem:[#allocation21 + $0xf8] sm:$0xff]  ;;  %v4490_v15 = vld [vmem:[#allocation21 + $0x188] sm:$0xff] }
 0x632   : > { %v4492_v16 = vld [vmem:[#allocation21 + $0x198] sm:$0xff] }
 0x682   : > { %v3934_v6 = vpop.permute.xlu1 %3933 }
 0x683   : > { %3943 = vst.msk [vmem:[#allocation8] sm:$0xff] %vm3942_vm5, %v3934_v6  ;;  %v4450_v6 = vld [vmem:[#allocation21 + $0x48] sm:$0xff] }
 0x687   : > { %v3984_v24 = vpop.permute.xlu1 %3983 }
 0x688   : > { %3992 = vst.msk [vmem:[#allocation8 + $0x10] sm:$0xff] %vm3942_vm5, %v3984_v24  ;;  %v4452_v24 = vld [vmem:[#allocation21 + $0x58] sm:$0xff] }
 0x68a   : > { %v4025_v32 = vld [vmem:[#allocation8] sm:$0xff] }
 0x68b   : > { %v3960_v9 = vpop.permute.xlu1 %3959 }
 0x68c   : > { %3968 = vst.msk [vmem:[#allocation8 + $0x8] sm:$0xff] %vm3942_vm5, %v3960_v9  ;;  %v5803_v9 = vpack.c.bf16 %v4452_v24, %v4450_v6  ;;  %v4469_v6 = vld [vmem:[#allocation21 + $0xe0] sm:$0xff]  ;;  %v4471_v24 = vld [vmem:[#allocation21 + $0xf0] sm:$0xff] }
 0x68d   : > { %v4008_v26 = vpop.permute.xlu0 %4007 }
 0x68e   : > { %4016 = vst.msk [vmem:[#allocation8 + $0x18] sm:$0xff] %vm3942_vm5, %v4008_v26  ;;  %v4449_v26 = vld [vmem:[#allocation21 + $0x40] sm:$0xff] }
 0x68f   : > { %v3962_v27 = vpop.permute.xlu1 %3961  ;;  %v4027_v39 = vld [vmem:[#allocation8 + $0x10] sm:$0xff] }
 0x690   : > { %3969 = vst.msk [vmem:[#allocation8 + $0x30] sm:$0xff] %vm3942_vm5, %v3962_v27  ;;  %v4451_v27 = vld [vmem:[#allocation21 + $0x50] sm:$0xff] }
 0x691   : > { %v5805_v29 = vpack.c.bf16 %v4451_v27, %v4449_v26  ;;  %v4598_v26 = vld [vmem:[#allocation21 + $0x4e8] sm:$0xff]  ;;  %v4600_v27 = vld [vmem:[#allocation21 + $0x4f8] sm:$0xff] }
 0x692   : > { %v3986_v28 = vpop.permute.xlu0 %3985 }
 0x693   : > { %3993 = vst.msk [vmem:[#allocation8 + $0x38] sm:$0xff] %vm3942_vm5, %v3986_v28  ;;  %v3936_v46 = vpop.permute.xlu1 %3935  ;;  %v4026_v31 = vld [vmem:[#allocation8 + $0x8] sm:$0xff] }
 0x694   : > { %3944 = vst.msk [vmem:[#allocation8 + $0x28] sm:$0xff] %vm3942_vm5, %v3936_v46  ;;  %4192 = vmatprep.mubr.f32.mxu0 %v4026_v31  ;;  %v4578_v28 = vld [vmem:[#allocation21 + $0x448] sm:$0xff]  ;;  %v4577_v46 = vld [vmem:[#allocation21 + $0x440] sm:$0xff]  ;;  %v4579_v31 = vld [vmem:[#allocation21 + $0x450] sm:$0xff] }
 0x695   : > { %4193 = vmatmul.mubr.f32.vlgmr.msra.gmra.mrb[36].mxu0 %v4025_v32  ;;  %v4028_v35 = vld [vmem:[#allocation8 + $0x18] sm:$0xff]  ;;  %v5931_v32 = vpack.c.bf16 %v4580_v30, %v4578_v28  ;;  %v5951_v28 = vpack.c.bf16 %v4600_v27, %v4598_v26  ;;  %v4599_v30 = vld [vmem:[#allocation21 + $0x4f0] sm:$0xff] }
 0x696   : > { %4272 = vmatprep.mubr.f32.mxu1 %v4028_v35  ;;  %5926 = vmatpush1.bf16.msra.mxu0 %v5925_v8  ;;  %v4456_v35 = vld [vmem:[#allocation21 + $0x78] sm:$0xff]  ;;  %v4465_v8 = vld [vmem:[#allocation21 + $0xc0] sm:$0xff]  ;;  %v4619_v27 = vld [vmem:[#allocation21 + $0x590] sm:$0xff] }
 0x697   : > { %v4010_v34 = vpop.permute.xlu0 %4009  ;;  %4273 = vmatmul.mubr.f32.vlgmr.msra.gmra.mrb[30].mxu1 %v4027_v39  ;;  %v3938_v40 = vpop.permute.xlu1 %3937  ;;  %v4031_v41 = vld [vmem:[#allocation8 + $0x30] sm:$0xff]  ;;  %5928 = vmatprep.subr.bf16.mxu0 %v5927_v20  ;;  %v4470_v20 = vld [vmem:[#allocation21 + $0xe8] sm:$0xff]  ;;  %v4617_v26 = vld [vmem:[#allocation21 + $0x580] sm:$0xff] }
 0x698   : > { %4017 = vst.msk [vmem:[#allocation8 + $0x40] sm:$0xff] %vm3942_vm5, %v4010_v34  ;;  %4197 = vmatprep.mubr.f32.mxu0 %v4031_v41  ;;  %5785 = vmatpush3.bf16.msra.mxu1 %v5784_v33  ;;  %v5933_v33 = vpack.c.bf16 %v4579_v31, %v4577_v46  ;;  %v4454_v34 = vld [vmem:[#allocation21 + $0x68] sm:$0xff]  ;;  %v4455_v39 = vld [vmem:[#allocation21 + $0x70] sm:$0xff] }
 0x699   : > { %3946 = vst.msk [vmem:[#allocation8 + $0x50] sm:$0x3f] %vm3945_vm6, %v3938_v40  ;;  %5786 = vmatprep.subr.bf16.mxu1 %v6435_v7  ;;  %v5807_v36 = vpack.c.bf16 %v4456_v35, %v4454_v34  ;;  %v5809_v40 = vpack.c.bf16 %v4455_v39, %v4453_v37  ;;  %v4582_v41 = vld [vmem:[#allocation21 + $0x468] sm:$0xff]  ;;  %v4473_v34 = vld [vmem:[#allocation21 + $0x100] sm:$0xff]  ;;  %v4475_v35 = vld [vmem:[#allocation21 + $0x110] sm:$0xff] }
 0x69a   : > { %v4032_v50 = vld [vmem:[#allocation8 + $0x38] sm:$0xff]  ;;  %5930 = vmatpush1.bf16.msra.mxu0 %v5929_v22  ;;  %v5823_v22 = vpack.c.bf16 %v4472_v21, %v4470_v20  ;;  %v4474_v31 = vld [vmem:[#allocation21 + $0x108] sm:$0xff]  ;;  %v5843_v20 = vpack.c.bf16 %v4492_v16, %v4490_v15  ;;  %v4491_v21 = vld [vmem:[#allocation21 + $0x190] sm:$0xff] }
 0x69b   : > { %v4012_v44 = vpop.permute.xlu0 %4011  ;;  %v4030_v45 = vld [vmem:[#allocation8 + $0x28] sm:$0xff]  ;;  %5932 = vmatprep.subr.bf16.mxu0 %v5931_v32  ;;  %v4476_v32 = vld [vmem:[#allocation21 + $0x118] sm:$0xff] }
 0x69c   : > { %4018 = vst.msk [vmem:[#allocation8 + $0x68] sm:$0x3f] %vm3945_vm6, %v4012_v44  ;;  %4198 = vmatmul.mubr.f32.gmra.mrb[38].mxu0 %v4030_v45  ;;  %5788 = vmatpush3.bf16.msra.mxu1 %v5787_v42  ;;  %v4584_v42 = vld [vmem:[#allocation21 + $0x478] sm:$0xff]  ;;  %v5937_v45 = vpack.c.bf16 %v4583_v38, %v4581_v51  ;;  %v4602_v37 = vld [vmem:[#allocation21 + $0x508] sm:$0xff] }
 0x69d   : > { %5789 = vmatprep.subr.bf16.mxu1 %v6435_v7  ;;  %v5935_v44 = vpack.c.bf16 %v4584_v42, %v4582_v41  ;;  %v4604_v39 = vld [vmem:[#allocation21 + $0x518] sm:$0xff]  ;;  %v4601_v41 = vld [vmem:[#allocation21 + $0x500] sm:$0xff]  ;;  %v4603_v42 = vld [vmem:[#allocation21 + $0x510] sm:$0xff] }
 0x69e   : > { %5934 = vmatpush1.bf16.msra.mxu0 %v5933_v33  ;;  %v5827_v33 = vpack.c.bf16 %v4476_v32, %v4474_v31  ;;  %v4478_v51 = vld [vmem:[#allocation21 + $0x128] sm:$0xff]  ;;  %v4480_v38 = vld [vmem:[#allocation21 + $0x138] sm:$0xff]  ;;  %v4495_v31 = vld [vmem:[#allocation21 + $0x1b0] sm:$0xff] }
 0x69f   : > { %v3988_v48 = vpop.permute.xlu0 %3987  ;;  %v4033_v17 = vld [vmem:[#allocation8 + $0x40] sm:$0xff]  ;;  %5936 = vmatprep.subr.bf16.mxu0 %v5935_v44  ;;  %v5957_v44 = vpack.c.bf16 %v4603_v42, %v4601_v41  ;;  %v4500_v41 = vld [vmem:[#allocation21 + $0x1d8] sm:$0xff] }
 0x6a0   : > { %3994 = vst.msk [vmem:[#allocation8 + $0x60] sm:$0x3f] %vm3945_vm6, %v3988_v48  ;;  %4277 = vmatprep.mubr.f32.mxu1 %v4033_v17  ;;  %5791 = vmatpush3.bf16.msra.mxu1 %v5790_v47  ;;  %v4035_v23 = vld [vmem:[#allocation8 + $0x50] sm:$0x3f]  ;;  %v4458_v47 = vld [vmem:[#allocation21 + $0x88] sm:$0xff]  ;;  %v4460_v48 = vld [vmem:[#allocation21 + $0x98] sm:$0xff] }
 0x6a1   : > { %4278 = vmatmul.mubr.f32.gmra.mrb[32].mxu1 %v4032_v50  ;;  %5792 = vmatprep.subr.bf16.mxu1 %v6435_v7  ;;  %v4446_v7 = vld [vmem:[#allocation21 + $0x28] sm:$0xff]  ;;  %v5811_v17 = vpack.c.bf16 %v4460_v48, %v4458_v47  ;;  %v5813_v50 = vpack.c.bf16 %v4459_v49, %v4457_v43  ;;  %v4477_v47 = vld [vmem:[#allocation21 + $0x120] sm:$0xff]  ;;  %v4479_v48 = vld [vmem:[#allocation21 + $0x130] sm:$0xff] }
 0x6a2   : > { %v5799_v13 = vpack.c.bf16 %v4448_v10, %v4446_v7  ;;  %5938 = vmatpush1.bf16.msra.mxu0 %v5937_v45  ;;  %v5819_v7 = vpack.c.bf16 %v4468_v5, %v4466_v4  ;;  %v4467_v10 = vld [vmem:[#allocation21 + $0xd0] sm:$0xff]  ;;  %v5831_v45 = vpack.c.bf16 %v4480_v38, %v4478_v51  ;;  %v4606_v43 = vld [vmem:[#allocation21 + $0x528] sm:$0xff]  ;;  %v4608_v49 = vld [vmem:[#allocation21 + $0x538] sm:$0xff] }
 0x6a3   : > { %v3964_v53 = vpop.permute.xlu0 %3963  ;;  %v4038_v25 = vld [vmem:[#allocation8 + $0x68] sm:$0x3f]  ;;  %v5821_v11 = vpack.c.bf16 %v4467_v10, %v4465_v8  ;;  %v4485_v4 = vld [vmem:[#allocation21 + $0x160] sm:$0xff]  ;;  %v4487_v5 = vld [vmem:[#allocation21 + $0x170] sm:$0xff] }
 0x6a4   : > { %3970 = vst.msk [vmem:[#allocation8 + $0x58] sm:$0x3f] %vm3945_vm6, %v3964_v53  ;;  %4282 = vmatprep.mubr.f32.mxu1 %v4038_v25  ;;  %5794 = vmatpush3.bf16.msra.mxu1 %v5793_v52  ;;  %v4586_v52 = vld [vmem:[#allocation21 + $0x488] sm:$0xff]  ;;  %v4588_v53 = vld [vmem:[#allocation21 + $0x498] sm:$0xff]  ;;  %v4497_v51 = vld [vmem:[#allocation21 + $0x1c0] sm:$0xff] }
 0x6a5   : > { %5796 = vmatprep.subr.bf16.mxu1 %v5795_v63  ;;  %v5939_v25 = vpack.c.bf16 %v4588_v53, %v4586_v52  ;;  %v4590_v63 = vld [vmem:[#allocation21 + $0x4a8] sm:$0xff]  ;;  %v4605_v52 = vld [vmem:[#allocation21 + $0x520] sm:$0xff]  ;;  %v4607_v53 = vld [vmem:[#allocation21 + $0x530] sm:$0xff] }
 0x6a6   : > { %v5943_v1 = vpack.c.bf16 %v4592_v0, %v4590_v63  ;;  %v4609_v63 = vld [vmem:[#allocation21 + $0x540] sm:$0xff]  ;;  %v4611_v0 = vld [vmem:[#allocation21 + $0x550] sm:$0xff]  ;;  %v4614_v8 = vld [vmem:[#allocation21 + $0x568] sm:$0xff] }
 0x6a7   : > { %v4037_v54 = vld [vmem:[#allocation8 + $0x60] sm:$0x3f]  ;;  %5940 = vmatprep.subr.bf16.mxu0 %v5939_v25  ;;  %v5961_v25 = vpack.c.bf16 %v4607_v53, %v4605_v52  ;;  %v4616_v10 = vld [vmem:[#allocation21 + $0x578] sm:$0xff]  ;;  %v4499_v38 = vld [vmem:[#allocation21 + $0x1d0] sm:$0xff] }
 0x6a8   : > { %4283 = vmatmul.mubr.f32.gmra.mrb[34].mxu1 %v4037_v54  ;;  %v4585_v54 = vld [vmem:[#allocation21 + $0x480] sm:$0xff]  ;;  %v4504_v52 = vld [vmem:[#allocation21 + $0x1f8] sm:$0xff] }
 0x6a9   : > { %5662 = vmatprep.mubr.msk.f32.mxu1 %vm6436_vm12, %v6432_v19  ;;  %v4501_v53 = vld [vmem:[#allocation21 + $0x1e0] sm:$0xff] }
 0x6ab   : > { %v4036_v55 = vld [vmem:[#allocation8 + $0x58] sm:$0x3f] }
 0x6ac   : > { %4202 = vmatprep.mubr.f32.mxu0 %v4036_v55  ;;  %5663 = vmatmul.mubr.msk.f32.vlgmr.msra.gmra.mrb[36].mxu1 %vm3804_vm3, %v4029_v56  ;;  %v4587_v55 = vld [vmem:[#allocation21 + $0x490] sm:$0xff] }
 0x6ad   : > { %4203 = vmatmul.mubr.f32.gmra.mrb[40].mxu0 %v4035_v23  ;;  %5665 = vmatprep.mubr.msk.f32.mxu1 %vm6436_vm12, %v6432_v19  ;;  %v5941_v56 = vpack.c.bf16 %v4587_v55, %v4585_v54  ;;  %v4462_v23 = vld [vmem:[#allocation21 + $0xa8] sm:$0xff]  ;;  %v4484_v55 = vld [vmem:[#allocation21 + $0x158] sm:$0xff] }
 0x6ae   : > { %5798 = vmatpush1.bf16.msra.mxu1 %v5797_v57  ;;  %v4591_v57 = vld [vmem:[#allocation21 + $0x4b0] sm:$0xff]  ;;  %v4482_v54 = vld [vmem:[#allocation21 + $0x148] sm:$0xff] }
 0x6af   : > { %5800 = vmatprep.subr.bf16.mxu1 %v5799_v13  ;;  %5942 = vmatpush1.bf16.msra.mxu0 %v5941_v56  ;;  %v5945_v3 = vpack.c.bf16 %v4591_v57, %v4589_v2  ;;  %v4596_v13 = vld [vmem:[#allocation21 + $0x4d8] sm:$0xff]  ;;  %v5835_v56 = vpack.c.bf16 %v4484_v55, %v4482_v54  ;;  %v4486_v2 = vld [vmem:[#allocation21 + $0x168] sm:$0xff]  ;;  %v4503_v54 = vld [vmem:[#allocation21 + $0x1f0] sm:$0xff] }
 0x6b0   : > { %5666 = vmatmul.mubr.msk.f32.gmra.mrb[38].mxu1 %vm3804_vm3, %v4034_v58  ;;  %v4464_v58 = vld [vmem:[#allocation21 + $0xb8] sm:$0xff]  ;;  %5944 = vmatprep.subr.bf16.mxu0 %v5943_v1  ;;  %v5965_v1 = vpack.c.bf16 %v4611_v0, %v4609_v63  ;;  %v4630_v55 = vld [vmem:[#allocation21 + $0x5e8] sm:$0xff] }
 0x6b1   : > { %5668 = vmatprep.mubr.msk.f32.mxu1 %vm6436_vm12, %v6432_v19  ;;  %v4488_v57 = vld [vmem:[#allocation21 + $0x178] sm:$0xff]  ;;  %v4506_v63 = vld [vmem:[#allocation21 + $0x208] sm:$0xff] }
 0x6b2   : > { %5802 = vmatpush1.bf16.msra.mxu1 %v5801_v14  ;;  %v5947_v14 = vpack.c.bf16 %v4596_v13, %v4594_v12  ;;  %v4613_v12 = vld [vmem:[#allocation21 + $0x560] sm:$0xff]  ;;  %v4615_v13 = vld [vmem:[#allocation21 + $0x570] sm:$0xff]  ;;  %v4508_v0 = vld [vmem:[#allocation21 + $0x218] sm:$0xff] }
 0x6b3   : > { %5804 = vmatprep.subr.bf16.mxu1 %v5803_v9  ;;  %5946 = vmatpush1.bf16.msra.mxu0 %v5945_v3  ;;  %v5825_v9 = vpack.c.bf16 %v4471_v24, %v4469_v6  ;;  %v5839_v3 = vpack.c.bf16 %v4488_v57, %v4486_v2  ;;  %v4620_v6 = vld [vmem:[#allocation21 + $0x598] sm:$0xff]  ;;  %v4634_v2 = vld [vmem:[#allocation21 + $0x608] sm:$0xff] }
 0x6b4   : > { %5669 = vmatmul.mubr.msk.f32.gmra.mrb[40].mxu1 %vm3804_vm3, %v4039_v59  ;;  %v5815_v59 = vpack.c.bf16 %v4464_v58, %v4462_v23  ;;  %5948 = vmatprep.subr.bf16.mxu0 %v5947_v14  ;;  %v4481_v23 = vld [vmem:[#allocation21 + $0x140] sm:$0xff]  ;;  %v4483_v58 = vld [vmem:[#allocation21 + $0x150] sm:$0xff]  ;;  %v5969_v14 = vpack.c.bf16 %v4615_v13, %v4613_v12  ;;  %v4636_v57 = vld [vmem:[#allocation21 + $0x618] sm:$0xff] }
 0x6b6   : > { %5806 = vmatpush1.bf16.msra.mxu1 %v5805_v29  ;;  %v4597_v29 = vld [vmem:[#allocation21 + $0x4e0] sm:$0xff] }
 0x6b7   : > { %5808 = vmatprep.subr.bf16.mxu1 %v5807_v36  ;;  %5950 = vmatpush1.bf16.msra.mxu0 %v5949_v18  ;;  %v5953_v46 = vpack.c.bf16 %v4599_v30, %v4597_v29  ;;  %v5829_v36 = vpack.c.bf16 %v4475_v35, %v4473_v34  ;;  %v4489_v18 = vld [vmem:[#allocation21 + $0x180] sm:$0xff]  ;;  %v5973_v29 = vpack.c.bf16 %v4619_v27, %v4617_v26  ;;  %v4496_v30 = vld [vmem:[#allocation21 + $0x1b8] sm:$0xff]  ;;  %v4622_v34 = vld [vmem:[#allocation21 + $0x5a8] sm:$0xff] }
 0x6b8   : > { %5952 = vmatprep.subr.bf16.mxu0 %v5951_v28  ;;  %v5845_v24 = vpack.c.bf16 %v4491_v21, %v4489_v18  ;;  %v4494_v28 = vld [vmem:[#allocation21 + $0x1a8] sm:$0xff]  ;;  %v4624_v35 = vld [vmem:[#allocation21 + $0x5b8] sm:$0xff] }
 0x6b9   : > { %v5847_v32 = vpack.c.bf16 %v4496_v30, %v4494_v28 }
 0x6ba   : > { %5810 = vmatpush1.bf16.msra.mxu1 %v5809_v40  ;;  %v5955_v40 = vpack.c.bf16 %v4604_v39, %v4602_v37  ;;  %v5975_v37 = vpack.c.bf16 %v4624_v35, %v4622_v34  ;;  %v4623_v39 = vld [vmem:[#allocation21 + $0x5b0] sm:$0xff] }
 0x6bb   : > { %5812 = vmatprep.subr.bf16.mxu1 %v5811_v17  ;;  %5954 = vmatpush1.bf16.msra.mxu0 %v5953_v46  ;;  %v5833_v17 = vpack.c.bf16 %v4479_v48, %v4477_v47  ;;  %v4493_v46 = vld [vmem:[#allocation21 + $0x1a0] sm:$0xff]  ;;  %v4628_v47 = vld [vmem:[#allocation21 + $0x5d8] sm:$0xff] }
 0x6bc   : > { %5956 = vmatprep.subr.bf16.mxu0 %v5955_v40  ;;  %v4498_v40 = vld [vmem:[#allocation21 + $0x1c8] sm:$0xff]  ;;  %v4625_v48 = vld [vmem:[#allocation21 + $0x5c0] sm:$0xff] }
 0x6be   : > { %5814 = vmatpush1.bf16.msra.mxu1 %v5813_v50  ;;  %v5959_v50 = vpack.c.bf16 %v4608_v49, %v4606_v43  ;;  %v5853_v43 = vpack.c.bf16 %v4499_v38, %v4497_v51 }
 0x6bf   : > { %5816 = vmatprep.subr.bf16.mxu1 %v5815_v59  ;;  %5958 = vmatpush1.bf16.msra.mxu0 %v5957_v44  ;;  %v5837_v59 = vpack.c.bf16 %v4483_v58, %v4481_v23  ;;  %v5851_v44 = vpack.c.bf16 %v4500_v41, %v4498_v40 }
 0x6c0   : > { %5960 = vmatprep.subr.bf16.mxu0 %v5959_v50  ;;  %v4502_v50 = vld [vmem:[#allocation21 + $0x1e8] sm:$0xff] }
 0x6c2   : > { %5818 = vmatpush1.bf16.msra.mxu1 %v5817_v60  ;;  %v5963_v60 = vpack.c.bf16 %v4612_v62, %v4610_v61  ;;  %v4631_v61 = vld [vmem:[#allocation21 + $0x5f0] sm:$0xff]  ;;  %v5857_v62 = vpack.c.bf16 %v4503_v54, %v4501_v53 }
 0x6c3   : > { %5820 = vmatprep.subr.bf16.mxu1 %v5819_v7  ;;  %5962 = vmatpush1.bf16.msra.mxu0 %v5961_v25  ;;  %v5841_v7 = vpack.c.bf16 %v4487_v5, %v4485_v4  ;;  %v5855_v25 = vpack.c.bf16 %v4504_v52, %v4502_v50  ;;  %v5343_v5 = vld [vmem:[#allocation20] ss:$0 sm:$0xff] }
 0x6c4   : > { %5964 = vmatprep.subr.bf16.mxu0 %v5963_v60 }
 0x6c6   : > { %5822 = vmatpush1.bf16.msra.mxu1 %v5821_v11  ;;  %v5967_v11 = vpack.c.bf16 %v4616_v10, %v4614_v8 }
 0x6c7   : > { %5824 = vmatprep.subr.bf16.mxu1 %v5823_v22  ;;  %5966 = vmatpush1.bf16.msra.mxu0 %v5965_v1  ;;  %v4618_v22 = vld [vmem:[#allocation21 + $0x588] sm:$0xff]  ;;  %v5859_v1 = vpack.c.bf16 %v4508_v0, %v4506_v63 }
 0x6c8   : > { %5968 = vmatprep.subr.bf16.mxu0 %v5967_v11 }
 0x6ca   : > { %5826 = vmatpush1.bf16.msra.mxu1 %v5825_v9  ;;  %v5971_v9 = vpack.c.bf16 %v4620_v6, %v4618_v22 }
 0x6cb   : > { %5828 = vmatprep.subr.bf16.mxu1 %v5827_v33  ;;  %5970 = vmatpush1.bf16.msra.mxu0 %v5969_v14  ;;  %v5849_v33 = vpack.c.bf16 %v4495_v31, %v4493_v46 }
 0x6cc   : > { %5972 = vmatprep.subr.bf16.mxu0 %v5971_v9 }
 0x6ce   : > { %5830 = vmatpush1.bf16.msra.mxu1 %v5829_v36  ;;  %v4621_v36 = vld [vmem:[#allocation21 + $0x5a0] sm:$0xff] }
 0x6cf   : > { %5832 = vmatprep.subr.bf16.mxu1 %v5831_v45  ;;  %5974 = vmatpush1.bf16.msra.mxu0 %v5973_v29  ;;  %v5977_v42 = vpack.c.bf16 %v4623_v39, %v4621_v36  ;;  %v4626_v45 = vld [vmem:[#allocation21 + $0x5c8] sm:$0xff] }
 0x6d0   : > { %5976 = vmatprep.subr.bf16.mxu0 %v5975_v37  ;;  %v5979_v49 = vpack.c.bf16 %v4628_v47, %v4626_v45 }
 0x6d2   : > { %5834 = vmatpush1.bf16.msra.mxu1 %v5833_v17  ;;  %v4627_v17 = vld [vmem:[#allocation21 + $0x5d0] sm:$0xff] }
 0x6d3   : > { %5836 = vmatprep.subr.bf16.mxu1 %v5835_v56  ;;  %v4632_v56 = vld [vmem:[#allocation21 + $0x5f8] sm:$0xff]  ;;  %5978 = vmatpush1.bf16.msra.mxu0 %v5977_v42  ;;  %v5981_v23 = vpack.c.bf16 %v4627_v17, %v4625_v48 }
 0x6d4   : > { %5980 = vmatprep.subr.bf16.mxu0 %v5979_v49  ;;  %v5983_v58 = vpack.c.bf16 %v4632_v56, %v4630_v55 }
 0x6d6   : > { %5838 = vmatpush1.bf16.msra.mxu1 %v5837_v59  ;;  %v4629_v59 = vld [vmem:[#allocation21 + $0x5e0] sm:$0xff] }
 0x6d7   : > { %5840 = vmatprep.subr.bf16.mxu1 %v5839_v3  ;;  %5982 = vmatpush1.bf16.msra.mxu0 %v5981_v23  ;;  %v5985_v60 = vpack.c.bf16 %v4631_v61, %v4629_v59  ;;  %v5987_v3 = vpack.c.bf16 %v4636_v57, %v4634_v2 }
 0x6d8   : > { %5984 = vmatprep.subr.bf16.mxu0 %v5983_v58 }
 0x6da   : > { %5842 = vmatpush1.bf16.msra.mxu1 %v5841_v7 }
 0x6db   : > { %5844 = vmatprep.subr.bf16.mxu1 %v5843_v20  ;;  %5986 = vmatpush1.bf16.msra.mxu0 %v5985_v60 }
 0x6dc   : > { %5988 = vmatprep.subr.bf16.mxu0 %v5987_v3 }
 0x6de   : > { %5846 = vmatpush1.bf16.msra.mxu1 %v5845_v24 }
 0x6df   : > { %5848 = vmatprep.subr.bf16.mxu1 %v5847_v32 }
 0x6e2   : > { %5850 = vmatpush1.bf16.msra.mxu1 %v5849_v33 }
 0x6e3   : > { %5852 = vmatprep.subr.bf16.mxu1 %v5851_v44 }
 0x6e6   : > { %5854 = vmatpush1.bf16.msra.mxu1 %v5853_v43 }
 0x6e7   : > { %5856 = vmatprep.subr.bf16.mxu1 %v5855_v25 }
 0x6ea   : > { %5858 = vmatpush1.bf16.msra.mxu1 %v5857_v62 }
 0x6eb   : > { %5860 = vmatprep.subr.bf16.mxu1 %v5859_v1 }
 0x768   : > { %v5498_v4 = vpop.f32.mrb[36].mxu0 }
 0x769   : > { %v5499_v7 = vpop.f32.mrb[37].mxu0 }
 0x76a   : > { %v5500_v8 = vadd.f32 %v5499_v7, %v5498_v4  ;;  %v5539_v10 = vpop.f32.mrb[30].mxu1 }
 0x76b   : > { %v5540_v11 = vpop.f32.mrb[31].mxu1 }
 0x76c   : > { %v4195_v12 = vadd.f32 %v5500_v8, %v5343_v5  ;;  %v5541_v13 = vadd.f32 %v5540_v11, %v5539_v10 }
 0x76e   : > { %v4275_v14 = vadd.f32 %v5541_v13, %v4195_v12  ;;  %v4505_v12 = vld [vmem:[#allocation21 + $0x200] sm:$0xff]  ;;  %v4507_v13 = vld [vmem:[#allocation21 + $0x210] sm:$0xff] }
 0x76f   : > { %v5501_v15 = vpop.f32.mrb[38].mxu0 }
 0x770   : > { %v5502_v16 = vpop.f32.mrb[39].mxu0 }
 0x771   : > { %v5503_v18 = vadd.f32 %v5502_v16, %v5501_v15  ;;  %v4510_v15 = vld [vmem:[#allocation21 + $0x228] sm:$0xff]  ;;  %v4512_v16 = vld [vmem:[#allocation21 + $0x238] sm:$0xff] }
 0x773   : > { %v4200_v21 = vadd.f32 %v5503_v18, %v5343_v5  ;;  %v4635_v18 = vld [vmem:[#allocation21 + $0x610] sm:$0xff] }
 0x774   : > { %v5542_v20 = vpop.f32.mrb[32].mxu1 }
 0x775   : > { %v5543_v22 = vpop.f32.mrb[33].mxu1 }
 0x776   : > { %v5544_v6 = vadd.f32 %v5543_v22, %v5542_v20  ;;  %v4509_v20 = vld [vmem:[#allocation21 + $0x220] sm:$0xff]  ;;  %v5861_v22 = vpack.c.bf16 %v4507_v13, %v4505_v12 }
 0x777   : > { %v4525_v13 = vld [vmem:[#allocation21 + $0x2a0] sm:$0xff] }
 0x778   : > { %v4280_v24 = vadd.f32 %v5544_v6, %v4200_v21  ;;  %v4511_v21 = vld [vmem:[#allocation21 + $0x230] sm:$0xff]  ;;  %v4638_v6 = vld [vmem:[#allocation21 + $0x628] sm:$0xff] }
 0x77b   : > { %v5545_v9 = vpop.f32.mrb[34].mxu1 }
 0x77c   : > { %v5546_v26 = vpop.f32.mrb[35].mxu1 }
 0x77d   : > { %v5547_v27 = vadd.f32 %v5546_v26, %v5545_v9  ;;  %v4514_v9 = vld [vmem:[#allocation21 + $0x248] sm:$0xff] }
 0x77f   : > { %v4354_v28 = vpop.f32.mrb[36].mxu1 }
 0x780   : > { %v4355_v29 = vadd.f32 %v4354_v28, %v4275_v14  ;;  %v5504_v30 = vpop.f32.mrb[40].mxu0  ;;  %v5664_v46 = vpop.f32.mrb[37].mxu1  ;;  %v4633_v14 = vld [vmem:[#allocation21 + $0x600] sm:$0xff]  ;;  %v5863_v28 = vpack.c.bf16 %v4512_v16, %v4510_v15  ;;  %v4530_v16 = vld [vmem:[#allocation21 + $0x2c8] sm:$0xff] }
 0x781   : > { %v5505_v31 = vpop.f32.mrb[41].mxu0 }
 0x782   : > { %v4368_v32 = vmax.f32 %v4355_v29, 0.0  ;;  %v5506_v33 = vadd.f32 %v5505_v31, %v5504_v30  ;;  %v4516_v29 = vld [vmem:[#allocation21 + $0x258] sm:$0xff] }
 0x783   : > { %v4359_v34 = vpop.f32.mrb[38].mxu1 }
 0x784   : > { %4373 = vst [vmem:[#allocation9 + $0x1] sm:$0xff] %v4368_v32  ;;  %v4205_v35 = vadd.f32 %v5506_v33, %v5343_v5  ;;  %v4360_v36 = vadd.f32 %v4359_v34, %v4280_v24  ;;  %v5667_v37 = vpop.f32.mrb[39].mxu1  ;;  %v4640_v24 = vld [vmem:[#allocation21 + $0x638] sm:$0xff]  ;;  %v5989_v32 = vpack.c.bf16 %v4635_v18, %v4633_v14  ;;  %v4637_v34 = vld [vmem:[#allocation21 + $0x620] sm:$0xff]  ;;  %v4527_v14 = vld [vmem:[#allocation21 + $0x2b0] sm:$0xff] }
 0x785   : > { %4376 = vst [vmem:[#allocation9 + $0x5] sm:$0x3] %v6432_v19  ;;  %v5991_v33 = vpack.c.bf16 %v4640_v24, %v4638_v6  ;;  %v4642_v37 = vld [vmem:[#allocation21 + $0x648] sm:$0xff]  ;;  %v4532_v18 = vld [vmem:[#allocation21 + $0x2d8] sm:$0xff]  ;;  %v5881_v6 = vpack.c.bf16 %v4527_v14, %v4525_v13 }
 0x786   : > { %v4369_v39 = vmax.f32 %v4360_v36, 0.0  ;;  %v4285_v40 = vadd.f32 %v5547_v27, %v4205_v35  ;;  %v4639_v35 = vld [vmem:[#allocation21 + $0x630] sm:$0xff]  ;;  %v5865_v36 = vpack.c.bf16 %v4511_v21, %v4509_v20  ;;  %v4653_v21 = vld [vmem:[#allocation21 + $0x6a0] sm:$0xff]  ;;  %v4658_v24 = vld [vmem:[#allocation21 + $0x6c8] sm:$0xff] }
 0x787   : > { %v4364_v41 = vpop.f32.mrb[40].mxu1  ;;  %v4550_v13 = vld [vmem:[#allocation21 + $0x368] sm:$0xff]  ;;  %v4552_v14 = vld [vmem:[#allocation21 + $0x378] sm:$0xff] }
 0x788   : > { %4374 = vst [vmem:[#allocation9 + $0x9] sm:$0xff] %v4369_v39  ;;  %v4365_v42 = vadd.f32 %v4364_v41, %v4285_v40  ;;  %v5670_v44 = vpop.f32.mrb[41].mxu1  ;;  %v4644_v39 = vld [vmem:[#allocation21 + $0x658] sm:$0xff]  ;;  %v5867_v41 = vpack.c.bf16 %v4516_v29, %v4514_v9 }
 0x789   : > { %4377 = vst [vmem:[#allocation9 + $0xb] sm:$0x3] %v6432_v19  ;;  %v4515_v44 = vld [vmem:[#allocation21 + $0x250] sm:$0xff]  ;;  %v4660_v9 = vld [vmem:[#allocation21 + $0x6d8] sm:$0xff] }
 0x78a   : > { %v4370_v51 = vmax.f32 %v4365_v42, 0.0  ;;  %v4513_v42 = vld [vmem:[#allocation21 + $0x240] sm:$0xff] }
 0x78c   : > { %4375 = vst [vmem:[#allocation9 + $0x11] sm:$0x3f] %v4370_v51  ;;  %v4379_v38 = vld [vmem:[#allocation9] sm:$0xff]  ;;  %v5993_v51 = vpack.c.bf16 %v4639_v35, %v4637_v34  ;;  %v4662_v35 = vld [vmem:[#allocation21 + $0x6e8] sm:$0xff] }
 0x78d   : > { %4378 = vst [vmem:[#allocation9 + $0x11] sm:$0x3] %v6432_v19  ;;  %v4382_v48 = vld [vmem:[#allocation9 + $0x1] sm:$0xff] }
 0x78f   : > { %v4385_v45 = vld [vmem:[#allocation9 + $0x2] sm:$0xff] }
 0x790   : > { %v4388_v47 = vmax.f32 %v4379_v38, %v4385_v45  ;;  %v4380_v43 = vld [vmem:[#allocation9 + $0x8] sm:$0xff]  ;;  %v4520_v45 = vld [vmem:[#allocation21 + $0x278] sm:$0xff] }
 0x791   : > { %v4383_v25 = vld [vmem:[#allocation9 + $0x9] sm:$0xff] }
 0x792   : > { %v4391_v17 = vmax.f32 %v4388_v47, %v4382_v48  ;;  %v4518_v38 = vld [vmem:[#allocation21 + $0x268] sm:$0xff]  ;;  %v5995_v47 = vpack.c.bf16 %v4644_v39, %v4642_v37  ;;  %v4641_v48 = vld [vmem:[#allocation21 + $0x640] sm:$0xff] }
 0x793   : > { %v4533_v39 = vld [vmem:[#allocation21 + $0x2e0] sm:$0xff] }
 0x794   : > { %4394 = vst [vmem:[#allocation9 + $0x1] sm:$0xff] %v4391_v17  ;;  %v4381_v49 = vld [vmem:[#allocation9 + $0x10] sm:$0x3f]  ;;  %v4643_v17 = vld [vmem:[#allocation21 + $0x650] sm:$0xff] }
 0x795   : > { %v4386_v50 = vld [vmem:[#allocation9 + $0xa] sm:$0xff]  ;;  %v4387_v52 = vld [vmem:[#allocation9 + $0x12] sm:$0x3f] }
 0x796   : > { %v4389_v53 = vmax.f32 %v4380_v43, %v4386_v50  ;;  %v4390_v54 = vmax.f32 %v4381_v49, %v4387_v52  ;;  %v4384_v55 = vld [vmem:[#allocation9 + $0x11] sm:$0x3f]  ;;  %v5869_v43 = vpack.c.bf16 %v4515_v44, %v4513_v42  ;;  %v4648_v50 = vld [vmem:[#allocation21 + $0x678] sm:$0xff]  ;;  %v5871_v52 = vpack.c.bf16 %v4520_v45, %v4518_v38  ;;  %v4661_v38 = vld [vmem:[#allocation21 + $0x6e0] sm:$0xff] }
 0x797   : > { %v4646_v49 = vld [vmem:[#allocation21 + $0x668] sm:$0xff]  ;;  %v4540_v44 = vld [vmem:[#allocation21 + $0x318] sm:$0xff]  ;;  %v4663_v45 = vld [vmem:[#allocation21 + $0x6f0] sm:$0xff] }
 0x798   : > { %v4392_v56 = vmax.f32 %v4389_v53, %v4383_v25  ;;  %v4393_v23 = vmax.f32 %v4390_v54, %v4384_v55  ;;  %v4517_v53 = vld [vmem:[#allocation21 + $0x260] sm:$0xff]  ;;  %v4519_v25 = vld [vmem:[#allocation21 + $0x270] sm:$0xff]  ;;  %v5997_v54 = vpack.c.bf16 %v4643_v17, %v4641_v48  ;;  %v4522_v55 = vld [vmem:[#allocation21 + $0x288] sm:$0xff] }
 0x799   : > { %v4538_v42 = vld [vmem:[#allocation21 + $0x308] sm:$0xff]  ;;  %v4668_v17 = vld [vmem:[#allocation21 + $0x718] sm:$0xff] }
 0x79a   : > { %4395 = vst [vmem:[#allocation9 + $0x9] sm:$0xff] %v4392_v56  ;;  %4396 = vst [vmem:[#allocation9 + $0x11] sm:$0x3f] %v4393_v23  ;;  %v4524_v56 = vld [vmem:[#allocation21 + $0x298] sm:$0xff]  ;;  %v5999_v23 = vpack.c.bf16 %v4648_v50, %v4646_v49  ;;  %v4666_v48 = vld [vmem:[#allocation21 + $0x708] sm:$0xff] }
 0x79b   : > { %v4398_v62 = vld [vmem:[#allocation9 + $0x1] ss:$2 sm:$0x3]  ;;  %v4537_v49 = vld [vmem:[#allocation21 + $0x300] sm:$0xff]  ;;  %v4539_v50 = vld [vmem:[#allocation21 + $0x310] sm:$0xff] }
 0x7a1   : > { %v4403_v58 = vld [vmem:[#allocation9 + $0x7] ss:$2 sm:$0x3]  ;;  %v4405_v59 = vld [vmem:[#allocation9 + $0xd] ss:$2 sm:$0x3] }
 0x7a2   : > { %v4408_v61 = vmax.f32 %v4403_v58, %v4405_v59  ;;  %v4400_v60 = vld [vmem:[#allocation9 + $0x7] ss:$2 sm:$0x3]  ;;  %v4407_v63 = vld [vmem:[#allocation9 + $0x13] ss:$2 sm:$0x3] }
 0x7a3   : > { %v4401_v0 = vmax.f32 %v4398_v62, %v4400_v60  ;;  %v4645_v58 = vld [vmem:[#allocation21 + $0x660] sm:$0xff]  ;;  %v4647_v59 = vld [vmem:[#allocation21 + $0x670] sm:$0xff]  ;;  %v4650_v62 = vld [vmem:[#allocation21 + $0x688] sm:$0xff] }
 0x7a4   : > { %v4409_v1 = vmax.f32 %v4408_v61, %v4407_v63  ;;  %v5873_v61 = vpack.c.bf16 %v4519_v25, %v4517_v53  ;;  %v4652_v60 = vld [vmem:[#allocation21 + $0x698] sm:$0xff]  ;;  %v5875_v63 = vpack.c.bf16 %v4524_v56, %v4522_v55  ;;  %v4542_v53 = vld [vmem:[#allocation21 + $0x328] sm:$0xff]  ;;  %v4665_v55 = vld [vmem:[#allocation21 + $0x700] sm:$0xff] }
 0x7a5   : > { %4402 = vst [vmem:[#allocation10 + $0x5] sm:$0x3] %v4401_v0  ;;  %v4521_v0 = vld [vmem:[#allocation21 + $0x280] sm:$0xff]  ;;  %v4544_v25 = vld [vmem:[#allocation21 + $0x338] sm:$0xff]  ;;  %v4667_v56 = vld [vmem:[#allocation21 + $0x710] sm:$0xff] }
 0x7a6   : > { %4410 = vst [vmem:[#allocation10 + $0x9] sm:$0x3] %v4409_v1  ;;  %v4523_v1 = vld [vmem:[#allocation21 + $0x290] sm:$0xff] }
 0x7ac   : > { %v4416_v2 = vld [vmem:[#allocation10 + $0x1] sm:$0x3f] }
 0x7ad   : > { %v4414_v57 = vld [vmem:[#allocation10] sm:$0x3f]  ;;  %4417 = vst [vmem:[#allocation11 + $0x8] sm:$0x3f] %v4416_v2  ;;  %v4424_v5 = vld [vmem:[#allocation10 + $0x6] sm:$0x3f]  ;;  %v6001_v2 = vpack.c.bf16 %v4647_v59, %v4645_v58 }
 0x7ae   : > { %v4418_v3 = vld [vmem:[#allocation10 + $0x2] sm:$0x3f]  ;;  %4415 = vst [vmem:[#allocation11] sm:$0x3f] %v4414_v57  ;;  %4425 = vst [vmem:[#allocation11 + $0x28] sm:$0x3f] %v4424_v5 }
 0x7af   : > { %v4420_v4 = vld [vmem:[#allocation10 + $0x4] sm:$0x3f]  ;;  %4419 = vst [vmem:[#allocation11 + $0x10] sm:$0x3f] %v4418_v3  ;;  %v4430_v11 = vld [vmem:[#allocation10 + $0xa] sm:$0x3f] }
 0x7b0   : > { %v4422_v7 = vld [vmem:[#allocation10 + $0x5] sm:$0x3f]  ;;  %4421 = vst [vmem:[#allocation11 + $0x18] sm:$0x3f] %v4420_v4  ;;  %4431 = vst [vmem:[#allocation11 + $0x40] sm:$0x3f] %v4430_v11  ;;  %v6003_v4 = vpack.c.bf16 %v4652_v60, %v4650_v62 }
 0x7b1   : > { %4423 = vst [vmem:[#allocation11 + $0x20] sm:$0x3f] %v4422_v7  ;;  %v4428_v8 = vld [vmem:[#allocation10 + $0x9] sm:$0x3f]  ;;  %v4526_v57 = vld [vmem:[#allocation21 + $0x2a8] sm:$0xff]  ;;  %v4651_v7 = vld [vmem:[#allocation21 + $0x690] sm:$0xff] }
 0x7b2   : > { %v4426_v10 = vld [vmem:[#allocation10 + $0x8] sm:$0x3f]  ;;  %4429 = vst [vmem:[#allocation11 + $0x38] sm:$0x3f] %v4428_v8  ;;  %v4649_v5 = vld [vmem:[#allocation21 + $0x680] sm:$0xff]  ;;  %v5877_v8 = vpack.c.bf16 %v4523_v1, %v4521_v0  ;;  %v4670_v58 = vld [vmem:[#allocation21 + $0x728] sm:$0xff] }
 0x7b3   : > { %4427 = vst [vmem:[#allocation11 + $0x30] sm:$0x3f] %v4426_v10  ;;  %v4528_v3 = vld [vmem:[#allocation21 + $0x2b8] sm:$0xff]  ;;  %v4654_v10 = vld [vmem:[#allocation21 + $0x6a8] sm:$0xff]  ;;  %v6005_v15 = vpack.c.bf16 %v4651_v7, %v4649_v5  ;;  %v4541_v62 = vld [vmem:[#allocation21 + $0x320] sm:$0xff] }
 0x7b4   : > { %v4433_v26 = vld [vmem:[#allocation11 + $0x8] sm:$0x3f]  ;;  %v4656_v11 = vld [vmem:[#allocation21 + $0x6b8] sm:$0xff]  ;;  %v5879_v12 = vpack.c.bf16 %v4528_v3, %v4526_v57  ;;  %v4543_v60 = vld [vmem:[#allocation21 + $0x330] sm:$0xff] }
 0x7b5   : > { %v4432_v27 = vld [vmem:[#allocation11] sm:$0x3f]  ;;  %4805 = vmatprep.mubr.f32.mxu1 %v4433_v26  ;;  %v4437_v46 = vld [vmem:[#allocation11 + $0x28] sm:$0x3f]  ;;  %v6007_v20 = vpack.c.bf16 %v4656_v11, %v4654_v10  ;;  %v5883_v26 = vpack.c.bf16 %v4532_v18, %v4530_v16  ;;  %v4672_v59 = vld [vmem:[#allocation21 + $0x738] sm:$0xff] }
 0x7b6   : > { %4806 = vmatmul.mubr.f32.vlgmr.msra.gmra.mrb[42].mxu1 %v4432_v27  ;;  %4947 = vmatprep.mubr.f32.mxu0 %v4437_v46  ;;  %v4529_v27 = vld [vmem:[#allocation21 + $0x2c0] sm:$0xff]  ;;  %v4536_v46 = vld [vmem:[#allocation21 + $0x2f8] sm:$0xff]  ;;  %v4546_v0 = vld [vmem:[#allocation21 + $0x348] sm:$0xff] }
 0x7b7   : > { %v4435_v30 = vld [vmem:[#allocation11 + $0x18] sm:$0x3f]  ;;  %5862 = vmatpush1.bf16.msra.mxu1 %v5861_v22  ;;  %v4655_v22 = vld [vmem:[#allocation21 + $0x6b0] sm:$0xff]  ;;  %v4669_v57 = vld [vmem:[#allocation21 + $0x720] sm:$0xff] }
 0x7b8   : > { %v4436_v31 = vld [vmem:[#allocation11 + $0x20] sm:$0x3f]  ;;  %4876 = vmatprep.mubr.f32.mxu1 %v4435_v30  ;;  %5864 = vmatprep.subr.bf16.mxu1 %v5863_v28  ;;  %v4531_v28 = vld [vmem:[#allocation21 + $0x2d0] sm:$0xff]  ;;  %v6009_v29 = vpack.c.bf16 %v4655_v22, %v4653_v21  ;;  %v4534_v30 = vld [vmem:[#allocation21 + $0x2e8] sm:$0xff] }
 0x7b9   : > { %4948 = vmatmul.mubr.f32.vlgmr.msra.gmra.mrb[42].mxu0 %v4436_v31  ;;  %v4439_v40 = vld [vmem:[#allocation11 + $0x38] sm:$0x3f]  ;;  %v6011_v31 = vpack.c.bf16 %v4660_v9, %v4658_v24  ;;  %v5885_v34 = vpack.c.bf16 %v4531_v28, %v4529_v27  ;;  %v5887_v37 = vpack.c.bf16 %v4536_v46, %v4534_v30  ;;  %v4671_v3 = vld [vmem:[#allocation21 + $0x730] sm:$0xff]  ;;  %v4674_v5 = vld [vmem:[#allocation21 + $0x748] sm:$0xff] }
 0x7ba   : > { %5990 = vmatpush1.bf16.msra.mxu0 %v5989_v32  ;;  %5018 = vmatprep.mubr.f32.mxu0 %v4439_v40  ;;  %v4657_v32 = vld [vmem:[#allocation21 + $0x6c0] sm:$0xff]  ;;  %v4535_v40 = vld [vmem:[#allocation21 + $0x2f0] sm:$0xff]  ;;  %v4548_v1 = vld [vmem:[#allocation21 + $0x358] sm:$0xff] }
 0x7bb   : > { %5992 = vmatprep.subr.bf16.mxu0 %v5991_v33  ;;  %5866 = vmatpush1.bf16.msra.mxu1 %v5865_v36  ;;  %v4659_v33 = vld [vmem:[#allocation21 + $0x6d0] sm:$0xff]  ;;  %v4664_v36 = vld [vmem:[#allocation21 + $0x6f8] sm:$0xff]  ;;  %v4545_v10 = vld [vmem:[#allocation21 + $0x340] sm:$0xff] }
 0x7bc   : > { %5868 = vmatprep.subr.bf16.mxu1 %v5867_v41  ;;  %v6013_v41 = vpack.c.bf16 %v4659_v33, %v4657_v32  ;;  %v4676_v7 = vld [vmem:[#allocation21 + $0x758] sm:$0xff]  ;;  %v4547_v11 = vld [vmem:[#allocation21 + $0x350] sm:$0xff]  ;;  %v4673_v16 = vld [vmem:[#allocation21 + $0x740] sm:$0xff] }
 0x7bd   : > { %v4675_v18 = vld [vmem:[#allocation21 + $0x750] sm:$0xff]  ;;  %v4678_v21 = vld [vmem:[#allocation21 + $0x768] sm:$0xff]  ;;  %v4680_v22 = vld [vmem:[#allocation21 + $0x778] sm:$0xff] }
 0x7be   : > { %5994 = vmatpush1.bf16.msra.mxu0 %v5993_v51  ;;  %v6015_v51 = vpack.c.bf16 %v4664_v36, %v4662_v35  ;;  %v4549_v24 = vld [vmem:[#allocation21 + $0x360] sm:$0xff]  ;;  %v4551_v9 = vld [vmem:[#allocation21 + $0x370] sm:$0xff]  ;;  %v4554_v27 = vld [vmem:[#allocation21 + $0x388] sm:$0xff] }
 0x7bf   : > { %5996 = vmatprep.subr.bf16.mxu0 %v5995_v47  ;;  %5870 = vmatpush1.bf16.msra.mxu1 %v5869_v43  ;;  %v5889_v47 = vpack.c.bf16 %v4535_v40, %v4533_v39  ;;  %v5891_v43 = vpack.c.bf16 %v4540_v44, %v4538_v42  ;;  %v4556_v28 = vld [vmem:[#allocation21 + $0x398] sm:$0xff]  ;;  %v4677_v30 = vld [vmem:[#allocation21 + $0x760] sm:$0xff]  ;;  %v4679_v46 = vld [vmem:[#allocation21 + $0x770] sm:$0xff] }
 0x7c0   : > { %5872 = vmatprep.subr.bf16.mxu1 %v5871_v52  ;;  %v6017_v52 = vpack.c.bf16 %v4663_v45, %v4661_v38  ;;  %v4682_v32 = vld [vmem:[#allocation21 + $0x788] sm:$0xff]  ;;  %v4684_v33 = vld [vmem:[#allocation21 + $0x798] sm:$0xff]  ;;  %v4553_v35 = vld [vmem:[#allocation21 + $0x380] sm:$0xff] }
 0x7c1   : > { %v4555_v36 = vld [vmem:[#allocation21 + $0x390] sm:$0xff]  ;;  %v4558_v39 = vld [vmem:[#allocation21 + $0x3a8] sm:$0xff]  ;;  %v4560_v40 = vld [vmem:[#allocation21 + $0x3b8] sm:$0xff] }
 0x7c2   : > { %5998 = vmatpush1.bf16.msra.mxu0 %v5997_v54  ;;  %v6019_v54 = vpack.c.bf16 %v4668_v17, %v4666_v48  ;;  %v4681_v42 = vld [vmem:[#allocation21 + $0x780] sm:$0xff]  ;;  %v4683_v44 = vld [vmem:[#allocation21 + $0x790] sm:$0xff]  ;;  %v4686_v38 = vld [vmem:[#allocation21 + $0x7a8] sm:$0xff] }
 0x7c3   : > { %6000 = vmatprep.subr.bf16.mxu0 %v5999_v23  ;;  %5874 = vmatpush1.bf16.msra.mxu1 %v5873_v61  ;;  %v5893_v23 = vpack.c.bf16 %v4539_v50, %v4537_v49  ;;  %v5895_v61 = vpack.c.bf16 %v4544_v25, %v4542_v53  ;;  %v4688_v45 = vld [vmem:[#allocation21 + $0x7b8] sm:$0xff]  ;;  %v4557_v48 = vld [vmem:[#allocation21 + $0x3a0] sm:$0xff]  ;;  %v4559_v17 = vld [vmem:[#allocation21 + $0x3b0] sm:$0xff] }
 0x7c4   : > { %5876 = vmatprep.subr.bf16.mxu1 %v5875_v63  ;;  %v6021_v63 = vpack.c.bf16 %v4667_v56, %v4665_v55  ;;  %v4562_v49 = vld [vmem:[#allocation21 + $0x3c8] sm:$0xff]  ;;  %v4564_v50 = vld [vmem:[#allocation21 + $0x3d8] sm:$0xff]  ;;  %v4685_v53 = vld [vmem:[#allocation21 + $0x7a0] sm:$0xff] }
 0x7c5   : > { %v4687_v25 = vld [vmem:[#allocation21 + $0x7b0] sm:$0xff]  ;;  %v4690_v55 = vld [vmem:[#allocation21 + $0x7c8] sm:$0xff]  ;;  %v4692_v56 = vld [vmem:[#allocation21 + $0x7d8] sm:$0xff] }
 0x7c6   : > { %6002 = vmatpush1.bf16.msra.mxu0 %v6001_v2  ;;  %v6023_v2 = vpack.c.bf16 %v4672_v59, %v4670_v58  ;;  %v4561_v58 = vld [vmem:[#allocation21 + $0x3c0] sm:$0xff]  ;;  %v4563_v59 = vld [vmem:[#allocation21 + $0x3d0] sm:$0xff] }
 0x7c7   : > { %6004 = vmatprep.subr.bf16.mxu0 %v6003_v4  ;;  %5878 = vmatpush1.bf16.msra.mxu1 %v5877_v8  ;;  %v5897_v4 = vpack.c.bf16 %v4543_v60, %v4541_v62  ;;  %v5899_v8 = vpack.c.bf16 %v4548_v1, %v4546_v0  ;;  %v4566_v62 = vld [vmem:[#allocation21 + $0x3e8] sm:$0xff]  ;;  %v4568_v60 = vld [vmem:[#allocation21 + $0x3f8] sm:$0xff]  ;;  %v4689_v0 = vld [vmem:[#allocation21 + $0x7c0] sm:$0xff] }
 0x7c8   : > { %5880 = vmatprep.subr.bf16.mxu1 %v5879_v12  ;;  %v6025_v12 = vpack.c.bf16 %v4671_v3, %v4669_v57  ;;  %v4691_v1 = vld [vmem:[#allocation21 + $0x7d0] sm:$0xff]  ;;  %v4694_v57 = vld [vmem:[#allocation21 + $0x7e8] sm:$0xff]  ;;  %v4696_v3 = vld [vmem:[#allocation21 + $0x7f8] sm:$0xff] }
 0x7ca   : > { %6006 = vmatpush1.bf16.msra.mxu0 %v6005_v15  ;;  %v6027_v15 = vpack.c.bf16 %v4676_v7, %v4674_v5  ;;  %v4565_v5 = vld [vmem:[#allocation21 + $0x3e0] sm:$0xff]  ;;  %v4567_v7 = vld [vmem:[#allocation21 + $0x3f0] sm:$0xff] }
 0x7cb   : > { %6008 = vmatprep.subr.bf16.mxu0 %v6007_v20  ;;  %5882 = vmatpush1.bf16.msra.mxu1 %v5881_v6  ;;  %v5901_v20 = vpack.c.bf16 %v4547_v11, %v4545_v10  ;;  %v5903_v6 = vpack.c.bf16 %v4552_v14, %v4550_v13  ;;  %v6047_v10 = vpack.c.bf16 %v4696_v3, %v4694_v57  ;;  %v4693_v11 = vld [vmem:[#allocation21 + $0x7e0] sm:$0xff]  ;;  %v4698_v14 = vld [vmem:[#allocation21 + $0x808] sm:$0xff]  ;;  %v6437_v57 = vmov -inf  }
 0x7cc   : > { %5884 = vmatprep.subr.bf16.mxu1 %v5883_v26  ;;  %v6029_v26 = vpack.c.bf16 %v4675_v18, %v4673_v16  ;;  %v5921_v13 = vpack.c.bf16 %v4567_v7, %v4565_v5 }
 0x7ce   : > { %6010 = vmatpush1.bf16.msra.mxu0 %v6009_v29  ;;  %v6031_v29 = vpack.c.bf16 %v4680_v22, %v4678_v21  ;;  %v4699_v21 = vld [vmem:[#allocation21 + $0x810] sm:$0xff]  ;;  %v4702_v22 = vld [vmem:[#allocation21 + $0x828] sm:$0xff] }
 0x7cf   : > { %6012 = vmatprep.subr.bf16.mxu0 %v6011_v31  ;;  %5886 = vmatpush1.bf16.msra.mxu1 %v5885_v34  ;;  %v5905_v31 = vpack.c.bf16 %v4551_v9, %v4549_v24  ;;  %v5907_v34 = vpack.c.bf16 %v4556_v28, %v4554_v27  ;;  %v4434_v24 = vld [vmem:[#allocation11 + $0x10] sm:$0x3f]  ;;  %v4701_v27 = vld [vmem:[#allocation21 + $0x820] sm:$0xff] }
 0x7d0   : > { %5888 = vmatprep.subr.bf16.mxu1 %v5887_v37  ;;  %v6033_v37 = vpack.c.bf16 %v4679_v46, %v4677_v30  ;;  %v4703_v28 = vld [vmem:[#allocation21 + $0x830] sm:$0xff]  ;;  %v4706_v30 = vld [vmem:[#allocation21 + $0x848] sm:$0xff]  ;;  %v4708_v46 = vld [vmem:[#allocation21 + $0x858] sm:$0xff] }
 0x7d2   : > { %6014 = vmatpush1.bf16.msra.mxu0 %v6013_v41  ;;  %v6035_v41 = vpack.c.bf16 %v4684_v33, %v4682_v32  ;;  %v6059_v32 = vpack.c.bf16 %v4708_v46, %v4706_v30  ;;  %v4705_v33 = vld [vmem:[#allocation21 + $0x840] sm:$0xff] }
 0x7d3   : > { %6016 = vmatprep.subr.bf16.mxu0 %v6015_v51  ;;  %5890 = vmatpush1.bf16.msra.mxu1 %v5889_v47  ;;  %v5909_v51 = vpack.c.bf16 %v4555_v36, %v4553_v35  ;;  %v5911_v47 = vpack.c.bf16 %v4560_v40, %v4558_v39  ;;  %v4710_v35 = vld [vmem:[#allocation21 + $0x868] sm:$0xff]  ;;  %v4712_v36 = vld [vmem:[#allocation21 + $0x878] sm:$0xff]  ;;  %v4709_v40 = vld [vmem:[#allocation21 + $0x860] sm:$0xff] }
 0x7d4   : > { %5892 = vmatprep.subr.bf16.mxu1 %v5891_v43  ;;  %v6037_v43 = vpack.c.bf16 %v4683_v44, %v4681_v42  ;;  %v6063_v39 = vpack.c.bf16 %v4712_v36, %v4710_v35  ;;  %v4714_v42 = vld [vmem:[#allocation21 + $0x888] sm:$0xff]  ;;  %v4716_v44 = vld [vmem:[#allocation21 + $0x898] sm:$0xff] }
 0x7d6   : > { %6018 = vmatpush1.bf16.msra.mxu0 %v6017_v52  ;;  %v6039_v52 = vpack.c.bf16 %v4688_v45, %v4686_v38  ;;  %v6067_v38 = vpack.c.bf16 %v4716_v44, %v4714_v42  ;;  %v4713_v45 = vld [vmem:[#allocation21 + $0x880] sm:$0xff] }
 0x7d7   : > { %6020 = vmatprep.subr.bf16.mxu0 %v6019_v54  ;;  %5894 = vmatpush1.bf16.msra.mxu1 %v5893_v23  ;;  %v5913_v54 = vpack.c.bf16 %v4559_v17, %v4557_v48  ;;  %v5915_v23 = vpack.c.bf16 %v4564_v50, %v4562_v49  ;;  %v4720_v48 = vld [vmem:[#allocation21 + $0x8b8] sm:$0xff]  ;;  %v4717_v49 = vld [vmem:[#allocation21 + $0x8a0] sm:$0xff]  ;;  %v4719_v50 = vld [vmem:[#allocation21 + $0x8b0] sm:$0xff] }
 0x7d8   : > { %5896 = vmatprep.subr.bf16.mxu1 %v5895_v61  ;;  %v6041_v61 = vpack.c.bf16 %v4687_v25, %v4685_v53  ;;  %v4724_v53 = vld [vmem:[#allocation21 + $0x8d8] sm:$0xff]  ;;  %v6073_v25 = vpack.c.bf16 %v4719_v50, %v4717_v49 }
 0x7da   : > { %6022 = vmatpush1.bf16.msra.mxu0 %v6021_v63  ;;  %v6043_v63 = vpack.c.bf16 %v4692_v56, %v4690_v55  ;;  %v4721_v55 = vld [vmem:[#allocation21 + $0x8c0] sm:$0xff]  ;;  %v4723_v56 = vld [vmem:[#allocation21 + $0x8d0] sm:$0xff] }
 0x7db   : > { %6024 = vmatprep.subr.bf16.mxu0 %v6023_v2  ;;  %5898 = vmatpush1.bf16.msra.mxu1 %v5897_v4  ;;  %v5917_v2 = vpack.c.bf16 %v4563_v59, %v4561_v58  ;;  %v5919_v4 = vpack.c.bf16 %v4568_v60, %v4566_v62  ;;  %v4728_v58 = vld [vmem:[#allocation21 + $0x8f8] sm:$0xff]  ;;  %v6077_v59 = vpack.c.bf16 %v4723_v56, %v4721_v55  ;;  %v4725_v62 = vld [vmem:[#allocation21 + $0x8e0] sm:$0xff]  ;;  %v4727_v60 = vld [vmem:[#allocation21 + $0x8f0] sm:$0xff] }
 0x7dc   : > { %5900 = vmatprep.subr.bf16.mxu1 %v5899_v8  ;;  %v6045_v8 = vpack.c.bf16 %v4691_v1, %v4689_v0  ;;  %v4440_v0 = vld [vmem:[#allocation11 + $0x40] sm:$0x3f]  ;;  %v4731_v1 = vlaneseq }
 0x7de   : > { %6026 = vmatpush1.bf16.msra.mxu0 %v6025_v12  ;;  %v4695_v12 = vld [vmem:[#allocation21 + $0x7f0] sm:$0xff]  ;;  %vm8208_vm7 = vcmp.lt.s32.totalorder %v4731_v1, 256  ;;  %v4732_v5 = vshrl.u32 %v4731_v1, 7 }
 0x7df   : > { %6028 = vmatprep.subr.bf16.mxu0 %v6027_v15  ;;  %5902 = vmatpush1.bf16.msra.mxu1 %v5901_v20  ;;  %v4700_v15 = vld [vmem:[#allocation21 + $0x818] sm:$0xff]  ;;  %v6049_v16 = vpack.c.bf16 %v4695_v12, %v4693_v11  ;;  %v4697_v20 = vld [vmem:[#allocation21 + $0x800] sm:$0xff]  ;;  %5100 = vst.msk [vmem:[#allocation12] ss:$8 sm:$0x3] %vm8208_vm7, %v6437_v57 }
 0x7e0   : > { %5904 = vmatprep.subr.bf16.mxu1 %v5903_v6  ;;  %v6051_v18 = vpack.c.bf16 %v4700_v15, %v4698_v14  ;;  %v4704_v6 = vld [vmem:[#allocation21 + $0x838] sm:$0xff]  ;;  %v6053_v9 = vpack.c.bf16 %v4699_v21, %v4697_v20  ;;  %5103 = vst.msk [vmem:[#allocation12 + $0x7] ss:$8 sm:$0x3] %vm8208_vm7, %v6437_v57  ;;  %v4733_v7 = vsub.s32 0, %v4732_v5 }
 0x7e2   : > { %6030 = vmatpush1.bf16.msra.mxu0 %v6029_v26  ;;  %v6055_v26 = vpack.c.bf16 %v4704_v6, %v4702_v22 }
 0x7e3   : > { %6032 = vmatprep.subr.bf16.mxu0 %v6031_v29  ;;  %5906 = vmatpush1.bf16.msra.mxu1 %v5905_v31  ;;  %v4438_v29 = vld [vmem:[#allocation11 + $0x30] sm:$0x3f]  ;;  %v6057_v31 = vpack.c.bf16 %v4703_v28, %v4701_v27 }
 0x7e4   : > { %5908 = vmatprep.subr.bf16.mxu1 %v5907_v34  ;;  %v4707_v34 = vld [vmem:[#allocation21 + $0x850] sm:$0xff] }
 0x7e6   : > { %6034 = vmatpush1.bf16.msra.mxu0 %v6033_v37  ;;  %v6061_v37 = vpack.c.bf16 %v4707_v34, %v4705_v33 }
 0x7e7   : > { %6036 = vmatprep.subr.bf16.mxu0 %v6035_v41  ;;  %5910 = vmatpush1.bf16.msra.mxu1 %v5909_v51  ;;  %v4711_v41 = vld [vmem:[#allocation21 + $0x870] sm:$0xff] }
 0x7e8   : > { %5912 = vmatprep.subr.bf16.mxu1 %v5911_v47  ;;  %v6065_v51 = vpack.c.bf16 %v4711_v41, %v4709_v40  ;;  %v4718_v47 = vld [vmem:[#allocation21 + $0x8a8] sm:$0xff] }
 0x7ea   : > { %6038 = vmatpush1.bf16.msra.mxu0 %v6037_v43  ;;  %v6071_v43 = vpack.c.bf16 %v4720_v48, %v4718_v47 }
 0x7eb   : > { %6040 = vmatprep.subr.bf16.mxu0 %v6039_v52  ;;  %5914 = vmatpush1.bf16.msra.mxu1 %v5913_v54  ;;  %v4722_v52 = vld [vmem:[#allocation21 + $0x8c8] sm:$0xff] }
 0x7ec   : > { %5916 = vmatprep.subr.bf16.mxu1 %v5915_v23  ;;  %v6075_v54 = vpack.c.bf16 %v4724_v53, %v4722_v52  ;;  %v4726_v23 = vld [vmem:[#allocation21 + $0x8e8] sm:$0xff] }
 0x7ee   : > { %6042 = vmatpush1.bf16.msra.mxu0 %v6041_v61  ;;  %v6079_v61 = vpack.c.bf16 %v4728_v58, %v4726_v23 }
 0x7ef   : > { %6044 = vmatprep.subr.bf16.mxu0 %v6043_v63  ;;  %5918 = vmatpush1.bf16.msra.mxu1 %v5917_v2  ;;  %v6081_v63 = vpack.c.bf16 %v4727_v60, %v4725_v62 }
 0x7f0   : > { %5920 = vmatprep.subr.bf16.mxu1 %v5919_v4 }
 0x7f2   : > { %6046 = vmatpush1.bf16.msra.mxu0 %v6045_v8  ;;  %v4729_v8 = vld [vmem:[#allocation23] sm:$0x3] }
 0x7f3   : > { %6048 = vmatprep.subr.bf16.mxu0 %v6047_v10  ;;  %5922 = vmatpush1.bf16.msra.mxu1 %v5921_v13  ;;  %v4737_v10 = vsub.s32 1, %v4732_v5  ;;  %v4734_v11 = vrot.slane %v4729_v8, %v4733_v7 }
 0x7f5   : > { %v4738_v12 = vrot.slane %v4729_v8, %v4737_v10 }
 0x7f6   : > { %6050 = vmatpush1.bf16.msra.mxu0 %v6049_v16  ;;  %4877 = vmatmul.mubr.f32.vlgmr.msra.gmra.mrb[42].mxu1 %v4434_v24 }
 0x7f7   : > { %6052 = vmatprep.subr.bf16.mxu0 %v6051_v18 }
 0x7f9   : > { %5019 = vmatmul.mubr.f32.vlgmr.msra.gmra.mrb[42].mxu0 %v4438_v29 }
 0x7fa   : > { %6054 = vmatpush1.bf16.msra.mxu0 %v6053_v9  ;;  %5089 = vmatprep.mubr.f32.mxu0 %v6432_v19  ;;  %v4715_v19 = vld [vmem:[#allocation21 + $0x890] sm:$0xff] }
 0x7fb   : > { %6056 = vmatprep.subr.bf16.mxu0 %v6055_v26  ;;  %v6069_v17 = vpack.c.bf16 %v4715_v19, %v4713_v45 }
 0x7fe   : > { %6058 = vmatpush1.bf16.msra.mxu0 %v6057_v31 }
 0x7ff   : > { %6060 = vmatprep.subr.bf16.mxu0 %v6059_v32 }
 0x802   : > { %6062 = vmatpush1.bf16.msra.mxu0 %v6061_v37 }
 0x803   : > { %6064 = vmatprep.subr.bf16.mxu0 %v6063_v39 }
 0x806   : > { %6066 = vmatpush1.bf16.msra.mxu0 %v6065_v51 }
 0x807   : > { %6068 = vmatprep.subr.bf16.mxu0 %v6067_v38 }
 0x80a   : > { %6070 = vmatpush1.bf16.msra.mxu0 %v6069_v17 }
 0x80b   : > { %6072 = vmatprep.subr.bf16.mxu0 %v6071_v43 }
 0x80e   : > { %6074 = vmatpush1.bf16.msra.mxu0 %v6073_v25 }
 0x80f   : > { %6076 = vmatprep.subr.bf16.mxu0 %v6075_v54 }
 0x812   : > { %6078 = vmatpush1.bf16.msra.mxu0 %v6077_v59 }
 0x813   : > { %6080 = vmatprep.subr.bf16.mxu0 %v6079_v61 }
 0x816   : > { %6082 = vmatpush1.bf16.msra.mxu0 %v6081_v63 }
 0x819   : > { %5090 = vmatmul.mubr.f32.vlgmr.msra.gmra.mrb[42].mxu0 %v4440_v0 }
 0x8c9   : > { %v4878_v3 = vpop.f32.mrb[42].mxu1 }
 0x8ca   : > { %v4880_v4 = vpop.f32.mrb[43].mxu1  ;;  %v6083_v13 = vadd.f32 %v4878_v3, %v4734_v11 }
 0x8cb   : > { %v6085_v14 = vadd.f32 %v4880_v4, %v4738_v12 }
 0x8ec   : > { %v5091_v15 = vpop.f32.mrb[42].mxu0 }
 0x8ed   : > { %v6084_v16 = vadd.f32 %v6083_v13, %v5091_v15  ;;  %v5093_v18 = vpop.f32.mrb[43].mxu0 }
 0x8ee   : > { %v6086_v20 = vadd.f32 %v6085_v14, %v5093_v18 }
 0x8ef   : > { %v5107_v21 = vrot.slane %v6084_v16, 7 }
 0x8f0   : > { %v5108_v22 = vrot.slane %v6086_v20, 7 }
 0x8f1   : > { %5111 = vst [vmem:[#allocation12] sm:$0x7e] %v5107_v21 }
 0x8f2   : > { %5113 = vst [vmem:[#allocation12] sm:$0x18] %v6437_v57  ;;  %5112 = vst [vmem:[#allocation12 + $0x8] sm:$0x7e] %v5108_v22 }
 0x8f3   : > { %5114 = vst [vmem:[#allocation12 + $0x8] sm:$0x18] %v6437_v57 }
 0x8f9   : > { %v5117_v6 = vld [vmem:[#allocation12] sm:$0x7e] }
 0x8fa   : > { %v5119_v24 = vld [vmem:[#allocation12] sm:$0xfc]  ;;  %v5118_v27 = vld [vmem:[#allocation12 + $0x8] sm:$0x7e]  ;;  %v5131_v30 = vrot.slane %v5117_v6, 1 }
 0x8fb   : > { %v5123_v9 = vrot.slane %v5119_v24, 2  ;;  %v5115_v26 = vld [vmem:[#allocation12] sm:$0x3f]  ;;  %v5120_v28 = vld [vmem:[#allocation12 + $0x8] sm:$0xfc]  ;;  %v5132_v34 = vrot.slane %v5118_v27, 1 }
 0x8fc   : > { %v5124_v46 = vrot.slane %v5120_v28, 2  ;;  %v5116_v31 = vld [vmem:[#allocation12 + $0x8] sm:$0x3f] }
 0x8fd   : > { %v5127_v29 = vmax.f32 %v5115_v26, %v5123_v9 }
 0x8fe   : > { %v5128_v33 = vmax.f32 %v5116_v31, %v5124_v46 }
 0x8ff   : > { %v5135_v32 = vmax.f32 %v5127_v29, %v5131_v30 }
 0x900   : > { %v5136_v36 = vmax.f32 %v5128_v33, %v5132_v34 }
 0x901   : > { %v5139_v35 = vrot.slane %v5135_v32, 7 }
 0x902   : > { %v5140_v37 = vrot.slane %v5136_v36, 7 }
 0x903   : > { %5143 = vst [vmem:[#allocation12] sm:$0x7e] %v5139_v35 }
 0x904   : > { %5144 = vst [vmem:[#allocation12 + $0x8] sm:$0x7e] %v5140_v37 }
 0x90b   : > { %v5146_v39 = vld [vmem:[#allocation12 + $0x1] ss:$8 sm:$0x3]  ;;  %v5148_v40 = vld [vmem:[#allocation12 + $0x5] ss:$8 sm:$0x3] }
 0x90c   : > { %v5149_v41 = vmax.f32 %v5146_v39, %v5148_v40 }
 0x90e   : > { %5150 = vst.msk [vmem:[%s424_s22] sm:$0x3] %vm8208_vm7, %v5149_v41 }
 0x90f PF: > { %s23_s30 = sadd.s32 1, %s6411_s30  }
 0x910   : > { %p20_p9 = scmp.ge.s32.totalorder %s23_s30, 4  }
 0x912   :  { %22 = sbr.rel (!%p20_p9) target bundleno = 4 (0x4), region = 146 }
 0x919   :  { %5170 = vsyncpa [#allocation14], 1 }
 0x91a   :  { %5172 = vsyncpa [#allocation14 + $0x1], 1 }
 0x91b   :  { %5173 = vsyncpa [#allocation16], 1 }
 0x91c   :  { %5174 = vsyncpa [#allocation19], 1 }
 0x91d   :  { %5175 = vsyncpa [#allocation22], 1 }

</bundles_post_ra>
